<compile_context>
chip_gen: v7x
topology: tpu7x:2x2x1
jax: 0.10.0
libtpu: 0.0.40
codegen_flags: <defaults>
</compile_context>

<pallas_src>
import functools

import jax
import jax.numpy as jnp
from jax import lax
from jax.experimental import pallas as pl
from jax.experimental.pallas import tpu as pltpu


def basic_block_kernel(x_ref, w1_ref, w2_ref,
                       s1_ref, b1_ref, s2_ref, b2_ref,
                       o_ref, xpad1_ref, xpad2_ref):
    """One batch element per grid step.

    x_ref   : (H, W, Cin)        input (also the residual identity)   VMEM
    w1_ref  : (3, 3, Cin, Cout)  conv1 weight (HWIO, bf16)
    w2_ref  : (3, 3, Cout, Cout) conv2 weight (HWIO, bf16)
    s*/b*   : (1, C)             folded BN scale / bias (f32)
    o_ref   : (H, W, Cout)       output (f32)
    xpad1/2 : ((H+2)*(W+2)+8, C) flat row-major zero-padded images (bf16 scratch)
    """
    H, W, Cout = o_ref.shape
    Cin = x_ref.shape[-1]
    Wp = W + 2                      # padded width
    Mp = H * Wp                     # rows of the width-padded output grid
    head = Wp + 1                   # leading all-zero border rows of the padded image
    total = xpad1_ref.shape[0]      # (H+2)*Wp + slack
    tail = total - head - Mp

    x = x_ref[...]                  # (H, W, Cin) f32 — residual identity
    xb = x.astype(jnp.bfloat16)

    # ---- build the zero-padded conv1 input in a flat VMEM scratch -----------
    # Padded pixel (py, px) lives at flat row py*Wp + px.  Image pixel (y, x)
    # maps to row head + y*Wp + x; the two zero columns appended to each image
    # row land exactly on the remaining left/right border rows.
    xw = jnp.concatenate([xb, jnp.zeros((H, 2, Cin), jnp.bfloat16)], axis=1)
    xpad1_ref[pl.ds(0, head), :] = jnp.zeros((head, Cin), jnp.bfloat16)
    xpad1_ref[pl.ds(head, Mp), :] = xw.reshape(Mp, Cin)
    xpad1_ref[pl.ds(head + Mp, tail), :] = jnp.zeros((tail, Cin), jnp.bfloat16)

    # ---- conv1: nine contiguous-row bf16 matmuls, f32 accumulation ----------
    acc1 = jnp.zeros((Mp, Cout), jnp.float32)
    for dy in range(3):
        for dx in range(3):
            off = dy * Wp + dx
            acc1 += jnp.dot(xpad1_ref[pl.ds(off, Mp), :], w1_ref[dy, dx],
                            preferred_element_type=jnp.float32)

    # ---- bn1 (folded) + relu; zero the two dummy columns, re-pad in VMEM ----
    col = lax.broadcasted_iota(jnp.int32, (Mp, Cout), 0) % Wp
    valid = col < W
    out1 = jnp.maximum(acc1 * s1_ref[...] + b1_ref[...], 0.0)
    out1 = jnp.where(valid, out1, 0.0).astype(jnp.bfloat16)

    xpad2_ref[pl.ds(0, head), :] = jnp.zeros((head, Cout), jnp.bfloat16)
    xpad2_ref[pl.ds(head, Mp), :] = out1
    xpad2_ref[pl.ds(head + Mp, tail), :] = jnp.zeros((tail, Cout), jnp.bfloat16)

    # ---- conv2 ---------------------------------------------------------------
    acc2 = jnp.zeros((Mp, Cout), jnp.float32)
    for dy in range(3):
        for dx in range(3):
            off = dy * Wp + dx
            acc2 += jnp.dot(xpad2_ref[pl.ds(off, Mp), :], w2_ref[dy, dx],
                            preferred_element_type=jnp.float32)

    # ---- bn2 (folded) + residual add + relu; drop the dummy columns ---------
    out2 = acc2 * s2_ref[...] + b2_ref[...]
    out2 = out2.reshape(H, Wp, Cout)[:, :W, :] + x
    o_ref[...] = jnp.maximum(out2, 0.0).astype(o_ref.dtype)


@jax.jit
def basic_block_pallas(x_nhwc, w1, w2, scale1, bias1, scale2, bias2):
    N, H, W, Cin = x_nhwc.shape
    Cout = w1.shape[-1]
    assert Cin == Cout, "BasicBlock with downsample=None requires inplanes == planes"
    Wp = W + 2
    # +8 slack rows so taps with (dy, dx) = (2, >0) never read past the scratch.
    total_rows = (H + 2) * Wp + 8

    w1 = w1.astype(jnp.bfloat16)
    w2 = w2.astype(jnp.bfloat16)

    grid_spec = pltpu.PrefetchScalarGridSpec(
        num_scalar_prefetch=0,
        grid=(N,),
        in_specs=[
            pl.BlockSpec((None, H, W, Cin), lambda n: (n, 0, 0, 0)),
            pl.BlockSpec((3, 3, Cin, Cout), lambda n: (0, 0, 0, 0)),
            pl.BlockSpec((3, 3, Cout, Cout), lambda n: (0, 0, 0, 0)),
            pl.BlockSpec((1, Cout), lambda n: (0, 0)),
            pl.BlockSpec((1, Cout), lambda n: (0, 0)),
            pl.BlockSpec((1, Cout), lambda n: (0, 0)),
            pl.BlockSpec((1, Cout), lambda n: (0, 0)),
        ],
        out_specs=pl.BlockSpec((None, H, W, Cout), lambda n: (n, 0, 0, 0)),
        scratch_shapes=[
            pltpu.VMEM((total_rows, Cin), jnp.bfloat16),
            pltpu.VMEM((total_rows, Cout), jnp.bfloat16),
        ],
    )

    return pl.pallas_call(
        basic_block_kernel,
        out_shape=jax.ShapeDtypeStruct((N, H, W, Cout), jnp.float32),
        grid_spec=grid_spec,
        compiler_params=pltpu.CompilerParams(
            dimension_semantics=("parallel",)),
    )(x_nhwc, w1, w2, scale1, bias1, scale2, bias2)


def fold_bn(gamma, beta, mean, var, eps=1e-5):
    scale = gamma / jnp.sqrt(var + eps)
    bias = beta - mean * scale
    return scale.reshape(1, -1), bias.reshape(1, -1)


def reference_block(x_nhwc, w1, w2, scale1, bias1, scale2, bias2):
    """Plain-JAX reference (NHWC, folded BN, same bf16 matmul precision)."""
    dn = ('NHWC', 'HWIO', 'NHWC')
    out = lax.conv_general_dilated(
        x_nhwc.astype(jnp.bfloat16), w1.astype(jnp.bfloat16), (1, 1), 'SAME',
        dimension_numbers=dn, preferred_element_type=jnp.float32)
    out = jnp.maximum(out * scale1[0] + bias1[0], 0.0)
    out = lax.conv_general_dilated(
        out.astype(jnp.bfloat16), w2.astype(jnp.bfloat16), (1, 1), 'SAME',
        dimension_numbers=dn, preferred_element_type=jnp.float32)
    out = out * scale2[0] + bias2[0] + x_nhwc
    return jnp.maximum(out, 0.0)


if __name__ == "__main__":
    # Small-but-realistic shapes: batch=2, inplanes=planes=64 (ResNet minimum,
    # keeps the channel/lane axis reasonably dense), spatial=16x16, stride=1.
    N, C, H, W = 2, 64, 16, 16

    key = jax.random.PRNGKey(0)
    k = jax.random.split(key, 9)

    # Input in PyTorch NCHW convention, transposed to NHWC for the kernel.
    x_nchw = jax.random.normal(k[0], (N, C, H, W), jnp.float32)
    x_nhwc = jnp.transpose(x_nchw, (0, 2, 3, 1))

    # conv weights: PyTorch OIHW -> HWIO.
    w1_oihw = jax.random.normal(k[1], (C, C, 3, 3), jnp.float32) * 0.1
    w2_oihw = jax.random.normal(k[2], (C, C, 3, 3), jnp.float32) * 0.1
    w1 = jnp.transpose(w1_oihw, (2, 3, 1, 0))  # (3,3,Cin,Cout)
    w2 = jnp.transpose(w2_oihw, (2, 3, 1, 0))

    # BatchNorm params (eval mode: running stats), deterministic.
    gamma1 = 1.0 + 0.1 * jax.random.normal(k[3], (C,), jnp.float32)
    beta1 = 0.1 * jax.random.normal(k[4], (C,), jnp.float32)
    mean1 = 0.1 * jax.random.normal(k[5], (C,), jnp.float32)
    var1 = jnp.abs(jax.random.normal(k[6], (C,), jnp.float32)) + 0.5
    gamma2 = 1.0 + 0.1 * jax.random.normal(k[7], (C,), jnp.float32)
    beta2 = 0.1 * jax.random.normal(k[8], (C,), jnp.float32)
    mean2 = jnp.zeros((C,), jnp.float32)
    var2 = jnp.ones((C,), jnp.float32)

    s1, b1 = fold_bn(gamma1, beta1, mean1, var1)
    s2, b2 = fold_bn(gamma2, beta2, mean2, var2)

    out = basic_block_pallas(x_nhwc, w1, w2, s1, b1, s2, b2)
    out = jax.block_until_ready(out)

    ref = reference_block(x_nhwc, w1, w2, s1, b1, s2, b2)
    assert out.shape == (N, H, W, C)
    assert jnp.allclose(out, ref, rtol=1e-3, atol=1e-3), "mismatch vs JAX reference"

    print("KERNEL_OK")
</pallas_src>

<mosaic_0001>
module attributes {stable_mosaic.version = 11 : i64} {
  func.func @basic_block_kernel(%arg0: i32, %arg1: memref<1x16x16x64xf32, #tpu.memory_space<vmem>>, %arg2: memref<3x3x64x64xbf16, #tpu.memory_space<vmem>>, %arg3: memref<3x3x64x64xbf16, #tpu.memory_space<vmem>>, %arg4: memref<1x64xf32, #tpu.memory_space<vmem>>, %arg5: memref<1x64xf32, #tpu.memory_space<vmem>>, %arg6: memref<1x64xf32, #tpu.memory_space<vmem>>, %arg7: memref<1x64xf32, #tpu.memory_space<vmem>>, %arg8: memref<1x16x16x64xf32, #tpu.memory_space<vmem>>, %arg9: memref<332x64xbf16, #tpu.memory_space<vmem>>, %arg10: memref<332x64xbf16, #tpu.memory_space<vmem>>) attributes {dimension_semantics = [#tpu.dimension_semantics<parallel>], iteration_bounds = array<i64: 2>, scalar_prefetch = 0 : i64, scratch_operands = 2 : i64, tpu.core_type = #tpu.core_type<tc>, window_params = [{transform_indices = @transform_0, window_bounds = array<i64: 1, 16, 16, 64>}, {pipeline_mode = #tpu.pipeline_mode<synchronous>, transform_indices = @transform_1, window_bounds = array<i64: 3, 3, 64, 64>}, {pipeline_mode = #tpu.pipeline_mode<synchronous>, transform_indices = @transform_2, window_bounds = array<i64: 3, 3, 64, 64>}, {pipeline_mode = #tpu.pipeline_mode<synchronous>, transform_indices = @transform_3, window_bounds = array<i64: 1, 64>}, {pipeline_mode = #tpu.pipeline_mode<synchronous>, transform_indices = @transform_4, window_bounds = array<i64: 1, 64>}, {pipeline_mode = #tpu.pipeline_mode<synchronous>, transform_indices = @transform_5, window_bounds = array<i64: 1, 64>}, {pipeline_mode = #tpu.pipeline_mode<synchronous>, transform_indices = @transform_6, window_bounds = array<i64: 1, 64>}, {transform_indices = @transform_7, window_bounds = array<i64: 1, 16, 16, 64>}]} {
    %c0 = arith.constant 0 : index
    %c0_0 = arith.constant 0 : index
    %c0_1 = arith.constant 0 : index
    %c0_2 = arith.constant 0 : index
    %0 = vector.load %arg1[%c0, %c0_0, %c0_1, %c0_2] : memref<1x16x16x64xf32, #tpu.memory_space<vmem>>, vector<1x16x16x64xf32>
    %1 = vector.shape_cast %0 : vector<1x16x16x64xf32> to vector<16x16x64xf32>
    %2 = arith.truncf %1 : vector<16x16x64xf32> to vector<16x16x64xbf16>
    %cst = arith.constant 0.000000e+00 : bf16
    %3 = vector.broadcast %cst : bf16 to vector<16x2x64xbf16>
    %4 = tpu.concatenate %2, %3 in 1 : vector<16x16x64xbf16>, vector<16x2x64xbf16> -> vector<16x18x64xbf16>
    %cst_3 = arith.constant 0.000000e+00 : bf16
    %5 = vector.broadcast %cst_3 : bf16 to vector<19x64xbf16>
    %c0_4 = arith.constant 0 : index
    %c0_5 = arith.constant 0 : index
    %6 = vector.load %arg9[%c0_4, %c0_5] : memref<332x64xbf16, #tpu.memory_space<vmem>>, vector<19x64xbf16>
    tpu.vector_store %arg9[%c0_4, %c0_5], %5 {strides = array<i32>} : memref<332x64xbf16, #tpu.memory_space<vmem>>, vector<19x64xbf16>,
    %7 = vector.shape_cast %4 : vector<16x18x64xbf16> to vector<288x64xbf16>
    %c19 = arith.constant 19 : index
    %c0_6 = arith.constant 0 : index
    %8 = vector.load %arg9[%c19, %c0_6] : memref<332x64xbf16, #tpu.memory_space<vmem>>, vector<288x64xbf16>
    tpu.vector_store %arg9[%c19, %c0_6], %7 {strides = array<i32>} : memref<332x64xbf16, #tpu.memory_space<vmem>>, vector<288x64xbf16>,
    %cst_7 = arith.constant 0.000000e+00 : bf16
    %9 = vector.broadcast %cst_7 : bf16 to vector<25x64xbf16>
    %c307 = arith.constant 307 : index
    %c0_8 = arith.constant 0 : index
    %10 = vector.load %arg9[%c307, %c0_8] : memref<332x64xbf16, #tpu.memory_space<vmem>>, vector<25x64xbf16>
    tpu.vector_store %arg9[%c307, %c0_8], %9 {strides = array<i32>} : memref<332x64xbf16, #tpu.memory_space<vmem>>, vector<25x64xbf16>,
    %cst_9 = arith.constant 0.000000e+00 : f32
    %11 = vector.broadcast %cst_9 : f32 to vector<288x64xf32>
    %c0_10 = arith.constant 0 : index
    %c0_11 = arith.constant 0 : index
    %12 = vector.load %arg9[%c0_10, %c0_11] : memref<332x64xbf16, #tpu.memory_space<vmem>>, vector<288x64xbf16>
    %c0_12 = arith.constant 0 : index
    %c0_13 = arith.constant 0 : index
    %c0_14 = arith.constant 0 : index
    %c0_15 = arith.constant 0 : index
    %13 = vector.load %arg2[%c0_12, %c0_13, %c0_14, %c0_15] : memref<3x3x64x64xbf16, #tpu.memory_space<vmem>>, vector<1x1x64x64xbf16>
    %14 = vector.shape_cast %13 : vector<1x1x64x64xbf16> to vector<64x64xbf16>
    %cst_16 = arith.constant dense<0.000000e+00> : vector<288x64xf32>
    %15 = tpu.matmul %12, %14, %cst_16 {dimension_numbers = #tpu.dot_dimension_numbers<[1], [0], [0], [1], [0, 0, 1, 1], [], []>} : vector<288x64xbf16>, vector<64x64xbf16>, vector<288x64xf32> -> vector<288x64xf32>
    %16 = arith.addf %11, %15 : vector<288x64xf32>
    %c1 = arith.constant 1 : index
    %c0_17 = arith.constant 0 : index
    %17 = vector.load %arg9[%c1, %c0_17] : memref<332x64xbf16, #tpu.memory_space<vmem>>, vector<288x64xbf16>
    %c0_18 = arith.constant 0 : index
    %c1_19 = arith.constant 1 : index
    %c0_20 = arith.constant 0 : index
    %c0_21 = arith.constant 0 : index
    %18 = vector.load %arg2[%c0_18, %c1_19, %c0_20, %c0_21] : memref<3x3x64x64xbf16, #tpu.memory_space<vmem>>, vector<1x1x64x64xbf16>
    %19 = vector.shape_cast %18 : vector<1x1x64x64xbf16> to vector<64x64xbf16>
    %cst_22 = arith.constant dense<0.000000e+00> : vector<288x64xf32>
    %20 = tpu.matmul %17, %19, %cst_22 {dimension_numbers = #tpu.dot_dimension_numbers<[1], [0], [0], [1], [0, 0, 1, 1], [], []>} : vector<288x64xbf16>, vector<64x64xbf16>, vector<288x64xf32> -> vector<288x64xf32>
    %21 = arith.addf %16, %20 : vector<288x64xf32>
    %c2 = arith.constant 2 : index
    %c0_23 = arith.constant 0 : index
    %22 = vector.load %arg9[%c2, %c0_23] : memref<332x64xbf16, #tpu.memory_space<vmem>>, vector<288x64xbf16>
    %c0_24 = arith.constant 0 : index
    %c2_25 = arith.constant 2 : index
    %c0_26 = arith.constant 0 : index
    %c0_27 = arith.constant 0 : index
    %23 = vector.load %arg2[%c0_24, %c2_25, %c0_26, %c0_27] : memref<3x3x64x64xbf16, #tpu.memory_space<vmem>>, vector<1x1x64x64xbf16>
    %24 = vector.shape_cast %23 : vector<1x1x64x64xbf16> to vector<64x64xbf16>
    %cst_28 = arith.constant dense<0.000000e+00> : vector<288x64xf32>
    %25 = tpu.matmul %22, %24, %cst_28 {dimension_numbers = #tpu.dot_dimension_numbers<[1], [0], [0], [1], [0, 0, 1, 1], [], []>} : vector<288x64xbf16>, vector<64x64xbf16>, vector<288x64xf32> -> vector<288x64xf32>
    %26 = arith.addf %21, %25 : vector<288x64xf32>
    %c18 = arith.constant 18 : index
    %c0_29 = arith.constant 0 : index
    %27 = vector.load %arg9[%c18, %c0_29] : memref<332x64xbf16, #tpu.memory_space<vmem>>, vector<288x64xbf16>
    %c1_30 = arith.constant 1 : index
    %c0_31 = arith.constant 0 : index
    %c0_32 = arith.constant 0 : index
    %c0_33 = arith.constant 0 : index
    %28 = vector.load %arg2[%c1_30, %c0_31, %c0_32, %c0_33] : memref<3x3x64x64xbf16, #tpu.memory_space<vmem>>, vector<1x1x64x64xbf16>
    %29 = vector.shape_cast %28 : vector<1x1x64x64xbf16> to vector<64x64xbf16>
    %cst_34 = arith.constant dense<0.000000e+00> : vector<288x64xf32>
    %30 = tpu.matmul %27, %29, %cst_34 {dimension_numbers = #tpu.dot_dimension_numbers<[1], [0], [0], [1], [0, 0, 1, 1], [], []>} : vector<288x64xbf16>, vector<64x64xbf16>, vector<288x64xf32> -> vector<288x64xf32>
    %31 = arith.addf %26, %30 : vector<288x64xf32>
    %c19_35 = arith.constant 19 : index
    %c0_36 = arith.constant 0 : index
    %32 = vector.load %arg9[%c19_35, %c0_36] : memref<332x64xbf16, #tpu.memory_space<vmem>>, vector<288x64xbf16>
    %c1_37 = arith.constant 1 : index
    %c1_38 = arith.constant 1 : index
    %c0_39 = arith.constant 0 : index
    %c0_40 = arith.constant 0 : index
    %33 = vector.load %arg2[%c1_37, %c1_38, %c0_39, %c0_40] : memref<3x3x64x64xbf16, #tpu.memory_space<vmem>>, vector<1x1x64x64xbf16>
    %34 = vector.shape_cast %33 : vector<1x1x64x64xbf16> to vector<64x64xbf16>
    %cst_41 = arith.constant dense<0.000000e+00> : vector<288x64xf32>
    %35 = tpu.matmul %32, %34, %cst_41 {dimension_numbers = #tpu.dot_dimension_numbers<[1], [0], [0], [1], [0, 0, 1, 1], [], []>} : vector<288x64xbf16>, vector<64x64xbf16>, vector<288x64xf32> -> vector<288x64xf32>
    %36 = arith.addf %31, %35 : vector<288x64xf32>
    %c20 = arith.constant 20 : index
    %c0_42 = arith.constant 0 : index
    %37 = vector.load %arg9[%c20, %c0_42] : memref<332x64xbf16, #tpu.memory_space<vmem>>, vector<288x64xbf16>
    %c1_43 = arith.constant 1 : index
    %c2_44 = arith.constant 2 : index
    %c0_45 = arith.constant 0 : index
    %c0_46 = arith.constant 0 : index
    %38 = vector.load %arg2[%c1_43, %c2_44, %c0_45, %c0_46] : memref<3x3x64x64xbf16, #tpu.memory_space<vmem>>, vector<1x1x64x64xbf16>
    %39 = vector.shape_cast %38 : vector<1x1x64x64xbf16> to vector<64x64xbf16>
    %cst_47 = arith.constant dense<0.000000e+00> : vector<288x64xf32>
    %40 = tpu.matmul %37, %39, %cst_47 {dimension_numbers = #tpu.dot_dimension_numbers<[1], [0], [0], [1], [0, 0, 1, 1], [], []>} : vector<288x64xbf16>, vector<64x64xbf16>, vector<288x64xf32> -> vector<288x64xf32>
    %41 = arith.addf %36, %40 : vector<288x64xf32>
    %c36 = arith.constant 36 : index
    %c0_48 = arith.constant 0 : index
    %42 = vector.load %arg9[%c36, %c0_48] : memref<332x64xbf16, #tpu.memory_space<vmem>>, vector<288x64xbf16>
    %c2_49 = arith.constant 2 : index
    %c0_50 = arith.constant 0 : index
    %c0_51 = arith.constant 0 : index
    %c0_52 = arith.constant 0 : index
    %43 = vector.load %arg2[%c2_49, %c0_50, %c0_51, %c0_52] : memref<3x3x64x64xbf16, #tpu.memory_space<vmem>>, vector<1x1x64x64xbf16>
    %44 = vector.shape_cast %43 : vector<1x1x64x64xbf16> to vector<64x64xbf16>
    %cst_53 = arith.constant dense<0.000000e+00> : vector<288x64xf32>
    %45 = tpu.matmul %42, %44, %cst_53 {dimension_numbers = #tpu.dot_dimension_numbers<[1], [0], [0], [1], [0, 0, 1, 1], [], []>} : vector<288x64xbf16>, vector<64x64xbf16>, vector<288x64xf32> -> vector<288x64xf32>
    %46 = arith.addf %41, %45 : vector<288x64xf32>
    %c37 = arith.constant 37 : index
    %c0_54 = arith.constant 0 : index
    %47 = vector.load %arg9[%c37, %c0_54] : memref<332x64xbf16, #tpu.memory_space<vmem>>, vector<288x64xbf16>
    %c2_55 = arith.constant 2 : index
    %c1_56 = arith.constant 1 : index
    %c0_57 = arith.constant 0 : index
    %c0_58 = arith.constant 0 : index
    %48 = vector.load %arg2[%c2_55, %c1_56, %c0_57, %c0_58] : memref<3x3x64x64xbf16, #tpu.memory_space<vmem>>, vector<1x1x64x64xbf16>
    %49 = vector.shape_cast %48 : vector<1x1x64x64xbf16> to vector<64x64xbf16>
    %cst_59 = arith.constant dense<0.000000e+00> : vector<288x64xf32>
    %50 = tpu.matmul %47, %49, %cst_59 {dimension_numbers = #tpu.dot_dimension_numbers<[1], [0], [0], [1], [0, 0, 1, 1], [], []>} : vector<288x64xbf16>, vector<64x64xbf16>, vector<288x64xf32> -> vector<288x64xf32>
    %51 = arith.addf %46, %50 : vector<288x64xf32>
    %c38 = arith.constant 38 : index
    %c0_60 = arith.constant 0 : index
    %52 = vector.load %arg9[%c38, %c0_60] : memref<332x64xbf16, #tpu.memory_space<vmem>>, vector<288x64xbf16>
    %c2_61 = arith.constant 2 : index
    %c2_62 = arith.constant 2 : index
    %c0_63 = arith.constant 0 : index
    %c0_64 = arith.constant 0 : index
    %53 = vector.load %arg2[%c2_61, %c2_62, %c0_63, %c0_64] : memref<3x3x64x64xbf16, #tpu.memory_space<vmem>>, vector<1x1x64x64xbf16>
    %54 = vector.shape_cast %53 : vector<1x1x64x64xbf16> to vector<64x64xbf16>
    %cst_65 = arith.constant dense<0.000000e+00> : vector<288x64xf32>
    %55 = tpu.matmul %52, %54, %cst_65 {dimension_numbers = #tpu.dot_dimension_numbers<[1], [0], [0], [1], [0, 0, 1, 1], [], []>} : vector<288x64xbf16>, vector<64x64xbf16>, vector<288x64xf32> -> vector<288x64xf32>
    %56 = arith.addf %51, %55 : vector<288x64xf32>
    %57 = tpu.iota {dimensions = array<i32: 0>} : vector<288x64xi32>
    %c18_i32 = arith.constant 18 : i32
    %c0_i32 = arith.constant 0 : i32
    %58 = arith.cmpi eq, %c18_i32, %c0_i32 : i32
    %c1_i32 = arith.constant 1 : i32
    %59 = arith.select %58, %c1_i32, %c18_i32 : i32
    %60 = vector.broadcast %59 : i32 to vector<288x64xi32>
    %61 = arith.remsi %57, %60 : vector<288x64xi32>
    %c0_i32_66 = arith.constant 0 : i32
    %62 = vector.broadcast %c0_i32_66 : i32 to vector<288x64xi32>
    %63 = arith.cmpi ne, %61, %62 : vector<288x64xi32>
    %c0_i32_67 = arith.constant 0 : i32
    %64 = vector.broadcast %c0_i32_67 : i32 to vector<288x64xi32>
    %65 = arith.cmpi slt, %61, %64 : vector<288x64xi32>
    %c0_i32_68 = arith.constant 0 : i32
    %66 = arith.cmpi slt, %59, %c0_i32_68 : i32
    %67 = vector.broadcast %66 : i1 to vector<288x64xi1>
    %68 = vector.broadcast %67 : vector<288x64xi1> to vector<288x64xi1>
    %69 = arith.xori %65, %68 : vector<288x64xi1>
    %70 = arith.andi %69, %63 : vector<288x64xi1>
    %71 = vector.broadcast %59 : i32 to vector<288x64xi32>
    %72 = arith.addi %61, %71 : vector<288x64xi32>
    %73 = arith.select %70, %72, %61 : vector<288x64xi1>, vector<288x64xi32>
    %c16_i32 = arith.constant 16 : i32
    %74 = vector.broadcast %c16_i32 : i32 to vector<288x64xi32>
    %75 = arith.cmpi slt, %73, %74 : vector<288x64xi32>
    %c0_69 = arith.constant 0 : index
    %c0_70 = arith.constant 0 : index
    %76 = vector.load %arg4[%c0_69, %c0_70] : memref<1x64xf32, #tpu.memory_space<vmem>>, vector<1x64xf32>
    %77 = vector.broadcast %76 : vector<1x64xf32> to vector<288x64xf32>
    %78 = arith.mulf %56, %77 : vector<288x64xf32>
    %c0_71 = arith.constant 0 : index
    %c0_72 = arith.constant 0 : index
    %79 = vector.load %arg5[%c0_71, %c0_72] : memref<1x64xf32, #tpu.memory_space<vmem>>, vector<1x64xf32>
    %80 = vector.broadcast %79 : vector<1x64xf32> to vector<288x64xf32>
    %81 = arith.addf %78, %80 : vector<288x64xf32>
    %cst_73 = arith.constant 0.000000e+00 : f32
    %82 = vector.broadcast %cst_73 : f32 to vector<288x64xf32>
    %83 = arith.maximumf %81, %82 : vector<288x64xf32>
    %cst_74 = arith.constant 0.000000e+00 : f32
    %84 = vector.broadcast %cst_74 : f32 to vector<288x64xf32>
    %85 = arith.select %75, %83, %84 : vector<288x64xi1>, vector<288x64xf32>
    %86 = arith.truncf %85 : vector<288x64xf32> to vector<288x64xbf16>
    %cst_75 = arith.constant 0.000000e+00 : bf16
    %87 = vector.broadcast %cst_75 : bf16 to vector<19x64xbf16>
    %c0_76 = arith.constant 0 : index
    %c0_77 = arith.constant 0 : index
    %88 = vector.load %arg10[%c0_76, %c0_77] : memref<332x64xbf16, #tpu.memory_space<vmem>>, vector<19x64xbf16>
    tpu.vector_store %arg10[%c0_76, %c0_77], %87 {strides = array<i32>} : memref<332x64xbf16, #tpu.memory_space<vmem>>, vector<19x64xbf16>,
    %c19_78 = arith.constant 19 : index
    %c0_79 = arith.constant 0 : index
    %89 = vector.load %arg10[%c19_78, %c0_79] : memref<332x64xbf16, #tpu.memory_space<vmem>>, vector<288x64xbf16>
    tpu.vector_store %arg10[%c19_78, %c0_79], %86 {strides = array<i32>} : memref<332x64xbf16, #tpu.memory_space<vmem>>, vector<288x64xbf16>,
    %cst_80 = arith.constant 0.000000e+00 : bf16
    %90 = vector.broadcast %cst_80 : bf16 to vector<25x64xbf16>
    %c307_81 = arith.constant 307 : index
    %c0_82 = arith.constant 0 : index
    %91 = vector.load %arg10[%c307_81, %c0_82] : memref<332x64xbf16, #tpu.memory_space<vmem>>, vector<25x64xbf16>
    tpu.vector_store %arg10[%c307_81, %c0_82], %90 {strides = array<i32>} : memref<332x64xbf16, #tpu.memory_space<vmem>>, vector<25x64xbf16>,
    %cst_83 = arith.constant 0.000000e+00 : f32
    %92 = vector.broadcast %cst_83 : f32 to vector<288x64xf32>
    %c0_84 = arith.constant 0 : index
    %c0_85 = arith.constant 0 : index
    %93 = vector.load %arg10[%c0_84, %c0_85] : memref<332x64xbf16, #tpu.memory_space<vmem>>, vector<288x64xbf16>
    %c0_86 = arith.constant 0 : index
    %c0_87 = arith.constant 0 : index
    %c0_88 = arith.constant 0 : index
    %c0_89 = arith.constant 0 : index
    %94 = vector.load %arg3[%c0_86, %c0_87, %c0_88, %c0_89] : memref<3x3x64x64xbf16, #tpu.memory_space<vmem>>, vector<1x1x64x64xbf16>
    %95 = vector.shape_cast %94 : vector<1x1x64x64xbf16> to vector<64x64xbf16>
    %cst_90 = arith.constant dense<0.000000e+00> : vector<288x64xf32>
    %96 = tpu.matmul %93, %95, %cst_90 {dimension_numbers = #tpu.dot_dimension_numbers<[1], [0], [0], [1], [0, 0, 1, 1], [], []>} : vector<288x64xbf16>, vector<64x64xbf16>, vector<288x64xf32> -> vector<288x64xf32>
    %97 = arith.addf %92, %96 : vector<288x64xf32>
    %c1_91 = arith.constant 1 : index
    %c0_92 = arith.constant 0 : index
    %98 = vector.load %arg10[%c1_91, %c0_92] : memref<332x64xbf16, #tpu.memory_space<vmem>>, vector<288x64xbf16>
    %c0_93 = arith.constant 0 : index
    %c1_94 = arith.constant 1 : index
    %c0_95 = arith.constant 0 : index
    %c0_96 = arith.constant 0 : index
    %99 = vector.load %arg3[%c0_93, %c1_94, %c0_95, %c0_96] : memref<3x3x64x64xbf16, #tpu.memory_space<vmem>>, vector<1x1x64x64xbf16>
    %100 = vector.shape_cast %99 : vector<1x1x64x64xbf16> to vector<64x64xbf16>
    %cst_97 = arith.constant dense<0.000000e+00> : vector<288x64xf32>
    %101 = tpu.matmul %98, %100, %cst_97 {dimension_numbers = #tpu.dot_dimension_numbers<[1], [0], [0], [1], [0, 0, 1, 1], [], []>} : vector<288x64xbf16>, vector<64x64xbf16>, vector<288x64xf32> -> vector<288x64xf32>
    %102 = arith.addf %97, %101 : vector<288x64xf32>
    %c2_98 = arith.constant 2 : index
    %c0_99 = arith.constant 0 : index
    %103 = vector.load %arg10[%c2_98, %c0_99] : memref<332x64xbf16, #tpu.memory_space<vmem>>, vector<288x64xbf16>
    %c0_100 = arith.constant 0 : index
    %c2_101 = arith.constant 2 : index
    %c0_102 = arith.constant 0 : index
    %c0_103 = arith.constant 0 : index
    %104 = vector.load %arg3[%c0_100, %c2_101, %c0_102, %c0_103] : memref<3x3x64x64xbf16, #tpu.memory_space<vmem>>, vector<1x1x64x64xbf16>
    %105 = vector.shape_cast %104 : vector<1x1x64x64xbf16> to vector<64x64xbf16>
    %cst_104 = arith.constant dense<0.000000e+00> : vector<288x64xf32>
    %106 = tpu.matmul %103, %105, %cst_104 {dimension_numbers = #tpu.dot_dimension_numbers<[1], [0], [0], [1], [0, 0, 1, 1], [], []>} : vector<288x64xbf16>, vector<64x64xbf16>, vector<288x64xf32> -> vector<288x64xf32>
    %107 = arith.addf %102, %106 : vector<288x64xf32>
    %c18_105 = arith.constant 18 : index
    %c0_106 = arith.constant 0 : index
    %108 = vector.load %arg10[%c18_105, %c0_106] : memref<332x64xbf16, #tpu.memory_space<vmem>>, vector<288x64xbf16>
    %c1_107 = arith.constant 1 : index
    %c0_108 = arith.constant 0 : index
    %c0_109 = arith.constant 0 : index
    %c0_110 = arith.constant 0 : index
    %109 = vector.load %arg3[%c1_107, %c0_108, %c0_109, %c0_110] : memref<3x3x64x64xbf16, #tpu.memory_space<vmem>>, vector<1x1x64x64xbf16>
    %110 = vector.shape_cast %109 : vector<1x1x64x64xbf16> to vector<64x64xbf16>
    %cst_111 = arith.constant dense<0.000000e+00> : vector<288x64xf32>
    %111 = tpu.matmul %108, %110, %cst_111 {dimension_numbers = #tpu.dot_dimension_numbers<[1], [0], [0], [1], [0, 0, 1, 1], [], []>} : vector<288x64xbf16>, vector<64x64xbf16>, vector<288x64xf32> -> vector<288x64xf32>
    %112 = arith.addf %107, %111 : vector<288x64xf32>
    %c19_112 = arith.constant 19 : index
    %c0_113 = arith.constant 0 : index
    %113 = vector.load %arg10[%c19_112, %c0_113] : memref<332x64xbf16, #tpu.memory_space<vmem>>, vector<288x64xbf16>
    %c1_114 = arith.constant 1 : index
    %c1_115 = arith.constant 1 : index
    %c0_116 = arith.constant 0 : index
    %c0_117 = arith.constant 0 : index
    %114 = vector.load %arg3[%c1_114, %c1_115, %c0_116, %c0_117] : memref<3x3x64x64xbf16, #tpu.memory_space<vmem>>, vector<1x1x64x64xbf16>
    %115 = vector.shape_cast %114 : vector<1x1x64x64xbf16> to vector<64x64xbf16>
    %cst_118 = arith.constant dense<0.000000e+00> : vector<288x64xf32>
    %116 = tpu.matmul %113, %115, %cst_118 {dimension_numbers = #tpu.dot_dimension_numbers<[1], [0], [0], [1], [0, 0, 1, 1], [], []>} : vector<288x64xbf16>, vector<64x64xbf16>, vector<288x64xf32> -> vector<288x64xf32>
    %117 = arith.addf %112, %116 : vector<288x64xf32>
    %c20_119 = arith.constant 20 : index
    %c0_120 = arith.constant 0 : index
    %118 = vector.load %arg10[%c20_119, %c0_120] : memref<332x64xbf16, #tpu.memory_space<vmem>>, vector<288x64xbf16>
    %c1_121 = arith.constant 1 : index
    %c2_122 = arith.constant 2 : index
    %c0_123 = arith.constant 0 : index
    %c0_124 = arith.constant 0 : index
    %119 = vector.load %arg3[%c1_121, %c2_122, %c0_123, %c0_124] : memref<3x3x64x64xbf16, #tpu.memory_space<vmem>>, vector<1x1x64x64xbf16>
    %120 = vector.shape_cast %119 : vector<1x1x64x64xbf16> to vector<64x64xbf16>
    %cst_125 = arith.constant dense<0.000000e+00> : vector<288x64xf32>
    %121 = tpu.matmul %118, %120, %cst_125 {dimension_numbers = #tpu.dot_dimension_numbers<[1], [0], [0], [1], [0, 0, 1, 1], [], []>} : vector<288x64xbf16>, vector<64x64xbf16>, vector<288x64xf32> -> vector<288x64xf32>
    %122 = arith.addf %117, %121 : vector<288x64xf32>
    %c36_126 = arith.constant 36 : index
    %c0_127 = arith.constant 0 : index
    %123 = vector.load %arg10[%c36_126, %c0_127] : memref<332x64xbf16, #tpu.memory_space<vmem>>, vector<288x64xbf16>
    %c2_128 = arith.constant 2 : index
    %c0_129 = arith.constant 0 : index
    %c0_130 = arith.constant 0 : index
    %c0_131 = arith.constant 0 : index
    %124 = vector.load %arg3[%c2_128, %c0_129, %c0_130, %c0_131] : memref<3x3x64x64xbf16, #tpu.memory_space<vmem>>, vector<1x1x64x64xbf16>
    %125 = vector.shape_cast %124 : vector<1x1x64x64xbf16> to vector<64x64xbf16>
    %cst_132 = arith.constant dense<0.000000e+00> : vector<288x64xf32>
    %126 = tpu.matmul %123, %125, %cst_132 {dimension_numbers = #tpu.dot_dimension_numbers<[1], [0], [0], [1], [0, 0, 1, 1], [], []>} : vector<288x64xbf16>, vector<64x64xbf16>, vector<288x64xf32> -> vector<288x64xf32>
    %127 = arith.addf %122, %126 : vector<288x64xf32>
    %c37_133 = arith.constant 37 : index
    %c0_134 = arith.constant 0 : index
    %128 = vector.load %arg10[%c37_133, %c0_134] : memref<332x64xbf16, #tpu.memory_space<vmem>>, vector<288x64xbf16>
    %c2_135 = arith.constant 2 : index
    %c1_136 = arith.constant 1 : index
    %c0_137 = arith.constant 0 : index
    %c0_138 = arith.constant 0 : index
    %129 = vector.load %arg3[%c2_135, %c1_136, %c0_137, %c0_138] : memref<3x3x64x64xbf16, #tpu.memory_space<vmem>>, vector<1x1x64x64xbf16>
    %130 = vector.shape_cast %129 : vector<1x1x64x64xbf16> to vector<64x64xbf16>
    %cst_139 = arith.constant dense<0.000000e+00> : vector<288x64xf32>
    %131 = tpu.matmul %128, %130, %cst_139 {dimension_numbers = #tpu.dot_dimension_numbers<[1], [0], [0], [1], [0, 0, 1, 1], [], []>} : vector<288x64xbf16>, vector<64x64xbf16>, vector<288x64xf32> -> vector<288x64xf32>
    %132 = arith.addf %127, %131 : vector<288x64xf32>
    %c38_140 = arith.constant 38 : index
    %c0_141 = arith.constant 0 : index
    %133 = vector.load %arg10[%c38_140, %c0_141] : memref<332x64xbf16, #tpu.memory_space<vmem>>, vector<288x64xbf16>
    %c2_142 = arith.constant 2 : index
    %c2_143 = arith.constant 2 : index
    %c0_144 = arith.constant 0 : index
    %c0_145 = arith.constant 0 : index
    %134 = vector.load %arg3[%c2_142, %c2_143, %c0_144, %c0_145] : memref<3x3x64x64xbf16, #tpu.memory_space<vmem>>, vector<1x1x64x64xbf16>
    %135 = vector.shape_cast %134 : vector<1x1x64x64xbf16> to vector<64x64xbf16>
    %cst_146 = arith.constant dense<0.000000e+00> : vector<288x64xf32>
    %136 = tpu.matmul %133, %135, %cst_146 {dimension_numbers = #tpu.dot_dimension_numbers<[1], [0], [0], [1], [0, 0, 1, 1], [], []>} : vector<288x64xbf16>, vector<64x64xbf16>, vector<288x64xf32> -> vector<288x64xf32>
    %137 = arith.addf %132, %136 : vector<288x64xf32>
    %c0_147 = arith.constant 0 : index
    %c0_148 = arith.constant 0 : index
    %138 = vector.load %arg6[%c0_147, %c0_148] : memref<1x64xf32, #tpu.memory_space<vmem>>, vector<1x64xf32>
    %139 = vector.broadcast %138 : vector<1x64xf32> to vector<288x64xf32>
    %140 = arith.mulf %137, %139 : vector<288x64xf32>
    %c0_149 = arith.constant 0 : index
    %c0_150 = arith.constant 0 : index
    %141 = vector.load %arg7[%c0_149, %c0_150] : memref<1x64xf32, #tpu.memory_space<vmem>>, vector<1x64xf32>
    %142 = vector.broadcast %141 : vector<1x64xf32> to vector<288x64xf32>
    %143 = arith.addf %140, %142 : vector<288x64xf32>
    %144 = vector.shape_cast %143 : vector<288x64xf32> to vector<16x18x64xf32>
    %145 = vector.extract_strided_slice %144 {offsets = [0, 0, 0], sizes = [16, 16, 64], strides = [1, 1, 1]} : vector<16x18x64xf32> to vector<16x16x64xf32>
    %146 = arith.addf %145, %1 : vector<16x16x64xf32>
    %cst_151 = arith.constant 0.000000e+00 : f32
    %147 = vector.broadcast %cst_151 : f32 to vector<16x16x64xf32>
    %148 = arith.maximumf %146, %147 : vector<16x16x64xf32>
    %c0_152 = arith.constant 0 : index
    %c0_153 = arith.constant 0 : index
    %c0_154 = arith.constant 0 : index
    %c0_155 = arith.constant 0 : index
    %149 = vector.load %arg8[%c0_152, %c0_153, %c0_154, %c0_155] : memref<1x16x16x64xf32, #tpu.memory_space<vmem>>, vector<1x16x16x64xf32>
    %150 = vector.shape_cast %149 : vector<1x16x16x64xf32> to vector<16x16x64xf32>
    %151 = vector.shape_cast %148 : vector<16x16x64xf32> to vector<1x16x16x64xf32>
    tpu.vector_store %arg8[%c0_152, %c0_153, %c0_154, %c0_155], %151 {strides = array<i32>} : memref<1x16x16x64xf32, #tpu.memory_space<vmem>>, vector<1x16x16x64xf32>,
    return
  }
  func.func @transform_0(%arg0: i32) -> (i32, i32, i32, i32) {
    %c0_i32 = arith.constant 0 : i32
    %c0_i32_0 = arith.constant 0 : i32
    %c0_i32_1 = arith.constant 0 : i32
    %c0_i32_2 = arith.constant 0 : i32
    return %arg0, %c0_i32, %c0_i32_0, %c0_i32_1 : i32, i32, i32, i32
  }
  func.func @transform_1(%arg0: i32) -> (i32, i32, i32, i32) {
    %c0_i32 = arith.constant 0 : i32
    %c0_i32_0 = arith.constant 0 : i32
    %c0_i32_1 = arith.constant 0 : i32
    %c0_i32_2 = arith.constant 0 : i32
    %c0_i32_3 = arith.constant 0 : i32
    return %c0_i32, %c0_i32_0, %c0_i32_1, %c0_i32_2 : i32, i32, i32, i32
  }
  func.func @transform_2(%arg0: i32) -> (i32, i32, i32, i32) {
    %c0_i32 = arith.constant 0 : i32
    %c0_i32_0 = arith.constant 0 : i32
    %c0_i32_1 = arith.constant 0 : i32
    %c0_i32_2 = arith.constant 0 : i32
    %c0_i32_3 = arith.constant 0 : i32
    return %c0_i32, %c0_i32_0, %c0_i32_1, %c0_i32_2 : i32, i32, i32, i32
  }
  func.func @transform_3(%arg0: i32) -> (i32, i32) {
    %c0_i32 = arith.constant 0 : i32
    %c0_i32_0 = arith.constant 0 : i32
    %c0_i32_1 = arith.constant 0 : i32
    return %c0_i32, %c0_i32_0 : i32, i32
  }
  func.func @transform_4(%arg0: i32) -> (i32, i32) {
    %c0_i32 = arith.constant 0 : i32
    %c0_i32_0 = arith.constant 0 : i32
    %c0_i32_1 = arith.constant 0 : i32
    return %c0_i32, %c0_i32_0 : i32, i32
  }
  func.func @transform_5(%arg0: i32) -> (i32, i32) {
    %c0_i32 = arith.constant 0 : i32
    %c0_i32_0 = arith.constant 0 : i32
    %c0_i32_1 = arith.constant 0 : i32
    return %c0_i32, %c0_i32_0 : i32, i32
  }
  func.func @transform_6(%arg0: i32) -> (i32, i32) {
    %c0_i32 = arith.constant 0 : i32
    %c0_i32_0 = arith.constant 0 : i32
    %c0_i32_1 = arith.constant 0 : i32
    return %c0_i32, %c0_i32_0 : i32, i32
  }
  func.func @transform_7(%arg0: i32) -> (i32, i32, i32, i32) {
    %c0_i32 = arith.constant 0 : i32
    %c0_i32_0 = arith.constant 0 : i32
    %c0_i32_1 = arith.constant 0 : i32
    %c0_i32_2 = arith.constant 0 : i32
    return %arg0, %c0_i32, %c0_i32_0, %c0_i32_1 : i32, i32, i32, i32
  }
}

</mosaic_0001>

<bundles_post_ra>
// kernel: basic_block_pallas.1
= control target key start
LH: loop header
LB: loop body
LE: loop exit
PB: predicated region body
PF: predicated region fallthrough
CT: control target
= control target key end

     0   :  { %12 = vsyncpa [#allocation5], 0  ;;  %s21860_s0 = inlined_call_operand.vmem [shape: f32[2,16,16,64], index: 0, kind: input, shape index: {}]   ;;  %s21861_s1 = inlined_call_operand.vmem [shape: bf16[3,3,64,64], index: 1, kind: input, shape index: {}]   ;;  %s21862_s2 = inlined_call_operand.vmem [shape: bf16[3,3,64,64], index: 2, kind: input, shape index: {}]   ;;  %s21863_s3 = inlined_call_operand.vmem [shape: f32[1,64], index: 3, kind: input, shape index: {}]   ;;  %s21864_s4 = inlined_call_operand.vmem [shape: f32[1,64], index: 4, kind: input, shape index: {}]   ;;  %s21865_s5 = inlined_call_operand.vmem [shape: f32[1,64], index: 5, kind: input, shape index: {}]   ;;  %s21866_s6 = inlined_call_operand.vmem [shape: f32[1,64], index: 6, kind: input, shape index: {}]   ;;  %s21867_s7 = inlined_call_operand.hbm [shape: f32[2,16,16,64], index: 7, kind: output, shape index: {}]  }
   0x1   :  { %14 = vsyncpa [#allocation5 + $0x1], 0  ;;  %s16845_s24 = smov 0   ;;  %s16847_s25 = smov 0  }
   0x2   :  { %s16849_s26 = smov 0   ;;  %s16851_s27 = smov 0  }
   0x3 LB: > { %s16866_s28 = sadd.s32 4294967295, %s16796_s27   ;;  %s13843_s29 = sadd.s32 4294967294, %s16796_s27   ;;  %s16796_s27 = sphi %s16851_s27, %s22963_s27   ;;  %s16792_s26 = sphi %s16849_s26, %s22962_s26   ;;  %s16788_s25 = sphi %s16847_s25, %s22961_s25   ;;  %s16784_s24 = sphi %s16845_s24, %s22960_s24  }
   0x4   : > { %s16870_s30 = sadd.s32 1, %s16796_s27   ;;  %s179_s8 = sadd.s32 1, %s16792_s26 }
   0x5   : > { %s176_s9 = ssub.s32 %s16796_s27, %s16870_s30  ;;  %p189_p0 = scmp.ne.s32.totalorder %s16792_s26, %s16788_s25 }
   0x6   : > { %p177_p1 = scmp.eq.s32.totalorder %s176_s9, 0  ;;  %p190_p2 = scmp.eq.s32.totalorder %s16866_s28, 1 }
   0x7   : > { %p195_p3 = scmp.ne.s32.totalorder %s16788_s25, %s16784_s24  ;;  %p196_p4 = scmp.eq.s32.totalorder %s13843_s29, 1 }
   0x8   : > { %s16881_s10 = scalar_select %p177_p1, %s16792_s26, %s179_s8  }
   0x9   : > { %p16883_p5 = por %p190_p2, %p189_p0  ;;  %p16887_p6 = por %p196_p4, %p195_p3 }
   0xa   : > { %p13846_p7 = scmp.ge.s32.totalorder %s16796_s27, 1  ;;  %p240_p8 = scmp.lt.s32.totalorder %s16796_s27, 3 }
   0xc   : > { %p241_p9 = pnand %p13846_p7, %p240_p8 }
   0xe   : > { %244 = sbr.rel (%p241_p9) target bundleno = 2084 (0x824), region = 48 }
  0x15   : > { %v16478_v0 = vld [vmem:[%s21861_s1 + $0x20] sm:$0xff]   ;;  %p272_p10 = scmp.lt.s32.totalorder %s16866_s28, 1  ;;  %v16479_v1 = vld [vmem:[%s21861_s1 + $0x28] sm:$0xff]   ;;  %vm21875_vm0 = vcmask 519168   ;;  %v356_v2 = vlaneseq  ;;  %v16480_v3 = vld [vmem:[%s21861_s1 + $0x30] sm:$0xff]   ;;  %v16798_v4 = vmov 0  }
  0x16   : > { %14993 = vmatprep.subr.bf16.mxu0 %v16478_v0  ;;  %327 = vst.msk [vmem:[#allocation2] sm:$0xf] %vm21875_vm0, %v16798_v4  ;;  %328 = vst.msk [vmem:[#allocation2 + $0x4] sm:$0xf] %vm21875_vm0, %v16798_v4  ;;  %vm329_vm1 = vcmask 517120   ;;  %v22012_v6 = vmov 0 }
  0x17   : > { %s273_s17 = scalar_select %p272_p10, %s16866_s28, 1  ;;  %14994 = vmatpush3.bf16.msra.mxu0 %v16478_v0  ;;  %vm330_vm2 = vsmask.f32 1280  ;;  %v332_v5 = vld [vmem:[#allocation2 + $0x8] sm:$0x3]  ;;  %v16926_v12 = vshrl.u32 %v356_v2, 7 }
  0x18   : > { %14995 = vmatprep.subr.bf16.mxu0 %v16479_v1  ;;  %2459 = vst.msk [vmem:[#allocation2 + $0x9c] sm:$0xf] %vm21875_vm0, %v16798_v4  ;;  %2460 = vst.msk [vmem:[#allocation2 + $0xa0] sm:$0xf] %vm21875_vm0, %v16798_v4  ;;  %v16799_v10 = vmov 1966171168  }
  0x19   : > { %s14559_s20 = sshll.u32 %s273_s17, 8  ;;  %6987 = vst.msk [vmem:[#allocation3] sm:$0xf] %vm21875_vm0, %v16798_v4  ;;  %6988 = vst.msk [vmem:[#allocation3 + $0x4] sm:$0xf] %vm21875_vm0, %v16798_v4  ;;  %v354_v11 = vunpack.c.l.s4 %v16799_v10  ;;  %v16481_v15 = vld [vmem:[%s21861_s1 + $0x38] sm:$0xff]  }
  0x1a   : > { %7522 = vst.msk [vmem:[#allocation3 + $0x9c] sm:$0xf] %vm21875_vm0, %v16798_v4  ;;  %7523 = vst.msk [vmem:[#allocation3 + $0xa0] sm:$0xf] %vm21875_vm0, %v16798_v4  ;;  %s16915_s23 = scalar_lea.vmem %s21860_s0, %s14559_s20  ;;  %v16800_v13 = vmov 1935823168  }
  0x1b   : > { %vm16918_vm3 = vmand %vm329_vm1, %vm330_vm2  ;;  %v278_v7 = vld [vmem:[%s16915_s23] sm:$0xff]  ;;  %v279_v8 = vld [vmem:[%s16915_s23 + $0x8] sm:$0xff]  ;;  %22015 = vst [vmem:[#allocation8_spill] sm:$0xff] %v16926_v12  ;;  %v1153_v14 = vunpack.c.l.s4 %v16800_v13  ;;  %14996 = vmatpush3.bf16.msra.mxu0 %v16479_v1  ;;  %v355_v18 = vunpack.c.0.s8 %v354_v11  ;;  %vm2412_vm4 = vcmask 519169   ;;  %vm2413_vm5 = vsmask.f32 7942 }
  0x1c   : > { %v22013_v6 = vsel %vm16918_vm3, 4294967295, %v22012_v6  ;;  %v333_v9 = vsel %vm16918_vm3, 0, %v332_v5  ;;  %14997 = vmatprep.subr.bf16.mxu0 %v16480_v3  ;;  %v310_v16 = vpack.c.bf16 %v279_v8, %v278_v7  ;;  %v13850_v17 = vpack.c.bf16 %v279_v8, %v279_v8  ;;  %v280_v20 = vld [vmem:[%s16915_s23 + $0x10] sm:$0xff]  ;;  %v281_v21 = vld [vmem:[%s16915_s23 + $0x18] sm:$0xff]  ;;  %v282_v22 = vld [vmem:[%s16915_s23 + $0x20] sm:$0xff]  ;;  %s269_s21 = sand.u32 1, %s16788_s25  }
  0x1d   : > { %22014 = vst [vmem:[#allocation7_spill] sm:$0xff] %v22013_v6  ;;  %334 = vst [vmem:[#allocation2 + $0x8] sm:$0x3] %v333_v9  ;;  %v1154_v19 = vunpack.c.0.s8 %v1153_v14  ;;  %v283_v23 = vld [vmem:[%s16915_s23 + $0x28] sm:$0xff]  ;;  %v16936_v24 = vsub.s32 %v355_v18, %v16926_v12  ;;  %v311_v26 = vpack.c.bf16 %v281_v21, %v280_v20  ;;  %v13851_v27 = vpack.c.bf16 %v281_v21, %v281_v21  ;;  %v16942_v28 = vld [vmem:[%s16915_s23 + $0x30] sm:$0xff]  ;;  %s13847_s22 = sshll.u32 %s269_s21, 8 }
  0x1e   : > { %v16945_v29 = vld [vmem:[%s16915_s23 + $0x38] sm:$0xff]  ;;  %v2463_v30 = vld [vmem:[#allocation2] sm:$0xf]  ;;  %v2464_v31 = vld [vmem:[#allocation2 + $0x4] sm:$0xf]  ;;  %v312_v32 = vpack.c.bf16 %v283_v23, %v282_v22  ;;  %v13852_v33 = vpack.c.bf16 %v283_v23, %v283_v23  ;;  %vm21873_vm10 = vcmask 523264  }
  0x1f   : > { %v16939_v25 = vsub.s32 %v1154_v19, %v16926_v12  ;;  %14998 = vmatpush3.bf16.msra.mxu0 %v16480_v3  ;;  %v313_v34 = vpack.c.bf16 %v16945_v29, %v16942_v28  ;;  %v13853_v35 = vpack.c.bf16 %v16945_v29, %v16945_v29  ;;  %v359_v36 = vrot.slane %v310_v16, %v16936_v24  ;;  %v16959_v40 = vld [vmem:[%s21861_s1] sm:$0xff]   ;;  %vm17004_vm7 = vmand %vm2412_vm4, %vm2413_vm5  ;;  %s21212_s29 = scalar_lea.vmem [#allocation4], %s13847_s22  ;;  %s16802_s20 = smov [#allocation4]  }
  0x20   : > { %14999 = vmatprep.subr.bf16.mxu0 %v16481_v15  ;;  %v366_v37 = vrot.slane %v13850_v17, %v16936_v24  ;;  %v407_v38 = vrot.slane %v16798_v4, %v16936_v24  ;;  %v16954_v39 = vcombine.low %v2463_v30, %v2464_v31  ;;  %v422_v41 = vrot.slane %v311_v26, %v16936_v24  ;;  %s13781_s15 = sshll.u32 %s21212_s29, 4  ;;  %s16738_s22 = sshll.u32 %s16802_s20, 4  ;;  %s21811_s15 = int_to_ptr.vmem [resolvable:$true] %s13781_s15  ;;  %s16739_s22 = int_to_ptr.vmem [resolvable:$false] %s16738_s22 }
  0x21   : > { %v429_v42 = vrot.slane %v13851_v27, %v16936_v24  ;;  %v471_v43 = vrot.slane %v312_v32, %v16936_v24  ;;  %v478_v44 = vrot.slane %v13852_v33, %v16936_v24  ;;  %v367_v45 = vcombine.high %v359_v36, %v359_v36  ;;  %s16734_s19 = scalar_lea.vmem %s21811_s15, 4096  ;;  %s16740_s8 = scalar_lea.vmem %s16739_s22, 8192 }
  0x22   : > { %v368_v46 = vcombine.high %v366_v37, %v366_v37  ;;  %v375_v47 = vrot.slane %v359_v36, %v16936_v24  ;;  %v382_v48 = vrot.slane %v366_v37, %v16936_v24  ;;  %v16968_v49 = vrot.slane %v407_v38, %v16936_v24  ;;  %p16735_p11 = scmp.ne.s32.totalorder %s21811_s15, %s16734_s19  ;;  %p16741_p0 = scmp.lt.s32.totalorder %s21811_s15, %s16739_s22 }
  0x23   : > { %15000 = vmatpush3.bf16.msra.mxu0 %v16481_v15  ;;  %v2612_v50 = vshrl.u32 %v16954_v39, 16  ;;  %v2614_v51 = vshll.u32 %v16954_v39, 16  ;;  %v430_v52 = vcombine.high %v422_v41, %v422_v41  ;;  %v389_v53 = vrot.slane %v367_v45, %v16936_v24  ;;  %p16742_p1 = scmp.lt.s32.totalorder %s16740_s8, %s16734_s19 }
  0x24   : > { %v396_v54 = vrot.slane %v368_v46, %v16936_v24  ;;  %v397_v55 = vcombine.high %v375_v47, %v375_v47  ;;  %v398_v56 = vcombine.high %v382_v48, %v382_v48  ;;  %15037 = vmatprep.subr.bf16.mxu0 %v16959_v40  ;;  %v431_v58 = vcombine.high %v429_v42, %v429_v42  ;;  %p16736_p12 = pnand %p16735_p11, %p16883_p5 }
  0x25   : > { %v2616_v57 = vrot.slane %v2614_v51, 1  ;;  %v438_v59 = vrot.slane %v422_v41, %v16936_v24  ;;  %v445_v60 = vrot.slane %v429_v42, %v16936_v24  ;;  %v399_v61 = vcombine.high %v389_v53, %v389_v53  ;;  %p16743_p2 = por %p16742_p1, %p16741_p0 }
  0x26   : > { %v400_v62 = vcombine.high %v396_v54, %v396_v54  ;;  %v1150_v63 = vcombine.low %v375_v47, %v397_v55  ;;  %v1174_v0 = vcombine.low %v382_v48, %v398_v56  ;;  %v452_v2 = vrot.slane %v430_v52, %v16936_v24  ;;  %p16737_p13 = pneg %p16736_p12 }
  0x27   : > { %v16977_v1 = vor.u32 %v2616_v57, %v2612_v50  ;;  %v459_v3 = vrot.slane %v431_v58, %v16936_v24  ;;  %v460_v4 = vcombine.high %v438_v59, %v438_v59  ;;  %v1151_v5 = vcombine.low %v389_v53, %v399_v61 }
  0x28   : > { %v1158_v7 = vrot.slane %v1150_v63, %v16939_v25  ;;  %v1175_v8 = vcombine.low %v396_v54, %v400_v62  ;;  %v1182_v9 = vrot.slane %v1174_v0, %v16939_v25  ;;  %v461_v10 = vcombine.high %v445_v60, %v445_v60  ;;  %p16744_p3 = pnand %p16743_p2, %p16737_p13 }
  0x29   : > { %v462_v11 = vcombine.high %v452_v2, %v452_v2  ;;  %v1198_v13 = vcombine.low %v16968_v49, %v452_v2  ;;  %v1199_v14 = vcombine.low %v438_v59, %v460_v4  ;;  %v1165_v15 = vrot.slane %v1151_v5, %v16939_v25 }
  0x2a   : > { %v1189_v16 = vrot.slane %v1175_v8, %v16939_v25  ;;  %vm2014_vm6 = vsmask.f32 5392  ;;  %v463_v17 = vcombine.high %v459_v3, %v459_v3  ;;  %v479_v18 = vcombine.high %v471_v43, %v471_v43 }
  0x2b   : > { %v1206_v19 = vrot.slane %v1198_v13, %v16939_v25  ;;  %v1213_v20 = vrot.slane %v1199_v14, %v16939_v25  ;;  %v1222_v21 = vcombine.low %v462_v11, %v459_v3  ;;  %v1223_v22 = vcombine.low %v445_v60, %v461_v10  ;;  %vm17012_vm8 = vmor %vm330_vm2, %vm2014_vm6 }
  0x2c   : > { %v1166_v23 = vcombine.low %v1158_v7, %v1165_v15  ;;  %v1190_v26 = vcombine.low %v1182_v9, %v1189_v16  ;;  %v480_v27 = vcombine.high %v478_v44, %v478_v44  ;;  %v487_v30 = vrot.slane %v471_v43, %v16936_v24 }
  0x2d   : > { %v1214_v31 = vcombine.low %v1206_v19, %v1213_v20  ;;  %v1230_v32 = vrot.slane %v1222_v21, %v16939_v25  ;;  %v1237_v33 = vrot.slane %v1223_v22, %v16939_v25  ;;  %v16992_v36 = vrot.slane %v478_v44, %v16936_v24  ;;  %v2415_v44 = vld [vmem:[#allocation2 + $0x8] sm:$0xe]  ;;  %v17027_v20 = vld [vmem:[%s16915_s23 + $0x50] sm:$0xff] }
  0x2e   : > { %v1173_v37 = vrot.slane %v1166_v23, %v16939_v25  ;;  %v1197_v38 = vrot.slane %v1190_v26, %v16939_v25  ;;  %v501_v41 = vrot.slane %v479_v18, %v16936_v24  ;;  %v16998_v42 = vrot.slane %v480_v27, %v16936_v24  ;;  %v17021_v18 = vld [vmem:[%s16915_s23 + $0x40] sm:$0xff]  ;;  %v17024_v19 = vld [vmem:[%s16915_s23 + $0x48] sm:$0xff]  ;;  %v17032_v27 = vld [vmem:[%s16915_s23 + $0x58] sm:$0xff] }
  0x2f   : > { %v1221_v45 = vrot.slane %v1214_v31, %v16939_v25  ;;  %v1238_v43 = vcombine.low %v1230_v32, %v1237_v33  ;;  %v509_v46 = vcombine.high %v487_v30, %v487_v30  ;;  %v1246_v47 = vcombine.low %v463_v17, %v487_v30 }
  0x30   : > { %v2017_v48 = vshrl.u32 %v1173_v37, 16  ;;  %v2020_v50 = vshll.u32 %v1173_v37, 16  ;;  %v2026_v51 = vshrl.u32 %v1197_v38, 16  ;;  %v2029_v52 = vshll.u32 %v1197_v38, 16 }
  0x31   : > { %v1245_v53 = vrot.slane %v1238_v43, %v16939_v25  ;;  %v2036_v54 = vshrl.u32 %v1221_v45, 16  ;;  %v2039_v55 = vshll.u32 %v1221_v45, 16  ;;  %v511_v56 = vcombine.high %v501_v41, %v501_v41 }
  0x32   : > { %v2019_v57 = vrot.slane %v2017_v48, 6  ;;  %v2022_v58 = vrot.slane %v2020_v50, 7  ;;  %v2028_v59 = vrot.slane %v2026_v51, 6  ;;  %v2031_v60 = vrot.slane %v2029_v52, 7 }
  0x33   : > { %v22016_v61 = vmov 0  ;;  %v2038_v62 = vrot.slane %v2036_v54, 6  ;;  %v2041_v63 = vrot.slane %v2039_v55, 7  ;;  %v2046_v0 = vshrl.u32 %v1245_v53, 16 }
  0x34   : > { %v22017_v61 = vsel %vm17004_vm7, 4294967295, %v22016_v61  ;;  %v2049_v2 = vshll.u32 %v1245_v53, 16  ;;  %v2023_v3 = vor.u32 %v2022_v58, %v2019_v57  ;;  %v2032_v4 = vor.u32 %v2031_v60, %v2028_v59 }
  0x35   : > { %22018 = vst [vmem:[#allocation9_spill] sm:$0xff] %v22017_v61  ;;  %v1247_v5 = vcombine.low %v16968_v49, %v501_v41  ;;  %v1254_v7 = vrot.slane %v1246_v47, %v16939_v25  ;;  %v22019_v8 = vmov 0  ;;  %v2042_v9 = vor.u32 %v2041_v63, %v2038_v62 }
  0x36   : > { %v22020_v8 = vsel %vm17012_vm8, 4294967295, %v22019_v8  ;;  %v2048_v10 = vrot.slane %v2046_v0, 6  ;;  %v2051_v11 = vrot.slane %v2049_v2, 7  ;;  %v1270_v13 = vcombine.low %v509_v46, %v16992_v36 }
  0x37   : > { %22021 = vst [vmem:[#allocation10_spill] sm:$0xff] %v22020_v8  ;;  %v2024_v14 = vrot.slane %v2023_v3, 4  ;;  %v2034_v15 = vrot.slane %v2032_v4, 4  ;;  %v2416_v16 = vsel %vm17004_vm7, %v2023_v3, %v2415_v44  ;;  %v1261_v17 = vrot.slane %v1247_v5, %v16939_v25 }
  0x38   : > { %2417 = vst [vmem:[#allocation2 + $0x8] sm:$0xe] %v2416_v16  ;;  %v2044_v21 = vrot.slane %v2042_v9, 4  ;;  %v2052_v22 = vor.u32 %v2051_v11, %v2048_v10  ;;  %v1271_v23 = vcombine.low %v511_v56, %v16998_v42  ;;  %v1278_v26 = vrot.slane %v1270_v13, %v16939_v25 }
  0x39   : > { %v2033_v30 = vsel %vm17012_vm8, %v2024_v14, %v2032_v4  ;;  %v2043_v31 = vsel %vm17012_vm8, %v2034_v15, %v2042_v9  ;;  %v1262_v32 = vcombine.low %v1254_v7, %v1261_v17  ;;  %v510_v33 = vcombine.high %v16992_v36, %v16992_v36 }
  0x3a   : > { %2418 = vst.msk [vmem:[#allocation2 + $0xc] sm:$0xf] %vm21875_vm0, %v2033_v30  ;;  %v2053_v37 = vsel %vm17012_vm8, %v2044_v21, %v2052_v22  ;;  %2419 = vst.msk [vmem:[#allocation2 + $0x10] sm:$0xf] %vm21875_vm0, %v2043_v31  ;;  %v1285_v38 = vrot.slane %v1271_v23, %v16939_v25  ;;  %v2054_v41 = vrot.slane %v2052_v22, 4  ;;  %v512_v45 = vcombine.high %v16998_v42, %v16998_v42 }
  0x3b   : > { %2420 = vst.msk [vmem:[#allocation2 + $0x14] sm:$0xf] %vm21875_vm0, %v2053_v37  ;;  %v1269_v43 = vrot.slane %v1262_v32, %v16939_v25  ;;  %v520_v36 = vrot.slane %v313_v34, %v16936_v24  ;;  %v527_v46 = vrot.slane %v13853_v35, %v16936_v24  ;;  %v1294_v47 = vcombine.low %v510_v33, %v16968_v49 }
  0x3c   : > { %vm21874_vm9 = vsmask.f32 7424  ;;  %v1286_v48 = vcombine.low %v1278_v26, %v1285_v38  ;;  %v314_v42 = vpack.c.bf16 %v17024_v19, %v17021_v18  ;;  %v315_v50 = vpack.c.bf16 %v17032_v27, %v17027_v20 }
  0x3d   : > { %v13854_v51 = vpack.c.bf16 %v17024_v19, %v17024_v19  ;;  %v2056_v28 = vshrl.u32 %v1269_v43, 16  ;;  %v2059_v34 = vshll.u32 %v1269_v43, 16  ;;  %v528_v52 = vcombine.high %v520_v36, %v520_v36 }
  0x3e   : > { %v536_v29 = vrot.slane %v520_v36, %v16936_v24  ;;  %v1293_v35 = vrot.slane %v1286_v48, %v16939_v25  ;;  %v543_v44 = vrot.slane %v527_v46, %v16936_v24  ;;  %v1302_v53 = vrot.slane %v1294_v47, %v16939_v25 }
  0x3f   : > { %v529_v54 = vcombine.high %v527_v46, %v527_v46  ;;  %v2058_v55 = vrot.slane %v2056_v28, 6  ;;  %v2061_v56 = vrot.slane %v2059_v34, 7  ;;  %v550_v57 = vrot.slane %v528_v52, %v16936_v24 }
  0x40   : > { %v558_v58 = vcombine.high %v536_v29, %v536_v29  ;;  %v2066_v59 = vshrl.u32 %v1293_v35, 16  ;;  %v2069_v60 = vshll.u32 %v1293_v35, 16  ;;  %v1295_v62 = vcombine.low %v512_v45, %v536_v29  ;;  %v16490_v45 = vld [vmem:[%s21861_s1 + $0x8] sm:$0xff]  }
  0x41   : > { %v557_v63 = vrot.slane %v529_v54, %v16936_v24  ;;  %v16483_v0 = vld [vmem:[#allocation2 + $0x8] sm:$0xff]   ;;  %v2062_v2 = vor.u32 %v2061_v56, %v2058_v55  ;;  %v560_v3 = vcombine.high %v550_v57, %v550_v57  ;;  %v559_v5 = vcombine.high %v543_v44, %v543_v44  ;;  %v16495_v56 = vld [vmem:[%s21861_s1 + $0x10] sm:$0xff]  }
  0x42   : > { %v1319_v4 = vcombine.low %v558_v58, %v543_v44  ;;  %v16485_v7 = vld [vmem:[#allocation2 + $0x10] sm:$0xff]   ;;  %v2068_v9 = vrot.slane %v2066_v59, 6  ;;  %v2071_v10 = vrot.slane %v2069_v60, 7  ;;  %v1309_v11 = vrot.slane %v1295_v62, %v16939_v25 }
  0x43   : > { %v561_v13 = vcombine.high %v557_v63, %v557_v63  ;;  %v2619_v14 = vshll.u32 %v16483_v0, 16  ;;  %v2623_v15 = vshrl.u32 %v16483_v0, 16  ;;  %v2063_v16 = vsel %vm17012_vm8, %v2054_v41, %v2062_v2 }
  0x44   : > { %v2064_v17 = vrot.slane %v2062_v2, 4  ;;  %v2627_v18 = vshll.u32 %v16485_v7, 16  ;;  %v2072_v21 = vor.u32 %v2071_v10, %v2068_v9  ;;  %2421 = vst.msk [vmem:[#allocation2 + $0x18] sm:$0xf] %vm21875_vm0, %v2063_v16  ;;  %v2631_v22 = vshrl.u32 %v16485_v7, 16 }
  0x45   : > { %v1310_v23 = vcombine.low %v1302_v53, %v1309_v11  ;;  %v2621_v26 = vrot.slane %v2619_v14, 1  ;;  %v1318_v30 = vcombine.low %v550_v57, %v560_v3  ;;  %v1333_v31 = vrot.slane %v1319_v4, %v16939_v25  ;;  %v16500_v11 = vld [vmem:[%s21861_s1 + $0x18] sm:$0xff]  }
  0x46   : > { %v569_v32 = vrot.slane %v314_v42, %v16936_v24  ;;  %v2629_v33 = vrot.slane %v2627_v18, 1  ;;  %v2073_v37 = vsel %vm17012_vm8, %v2064_v17, %v2072_v21  ;;  %v2074_v41 = vrot.slane %v2072_v21, 4 }
  0x47   : > { %v1317_v38 = vrot.slane %v1310_v23, %v16939_v25  ;;  %v2622_v43 = vsel %vm21874_vm9, %v16977_v1, %v2621_v26  ;;  %v2625_v36 = vor.u32 %v2623_v15, %v2621_v26  ;;  %2422 = vst.msk [vmem:[#allocation2 + $0x1c] sm:$0xf] %vm21875_vm0, %v2073_v37  ;;  %v1326_v46 = vrot.slane %v1318_v30, %v16939_v25  ;;  %v290_v37 = vld [vmem:[%s16915_s23 + $0x60] sm:$0xff] }
  0x48   : > { %v577_v47 = vcombine.high %v569_v32, %v569_v32  ;;  %15001 = vmatprep.mubr.msk.bf16.mxu0 %vm21873_vm10, %v2622_v43  ;;  %v2633_v48 = vor.u32 %v2631_v22, %v2629_v33  ;;  %v585_v34 = vrot.slane %v569_v32, %v16936_v24  ;;  %v1342_v44 = vcombine.low %v557_v63, %v561_v13 }
  0x49   : > { %v2076_v42 = vshrl.u32 %v1317_v38, 16  ;;  %v2079_v28 = vshll.u32 %v1317_v38, 16  ;;  %v2630_v52 = vsel %vm21874_vm9, %v2625_v36, %v2629_v33  ;;  %v1334_v29 = vcombine.low %v1326_v46, %v1333_v31  ;;  %v17124_v36 = vld [vmem:[%s16915_s23 + $0x68] sm:$0xff] }
  0x4a   : > { %v599_v35 = vrot.slane %v577_v47, %v16936_v24  ;;  %15002 = vmatmul.mubr.msk.bf16.vlgmr.msra.gmra.mrb[0].mxu0 %vm21873_vm10, %v2630_v52  ;;  %v607_v54 = vcombine.high %v585_v34, %v585_v34  ;;  %v1343_v55 = vcombine.low %v559_v5, %v16968_v49  ;;  %v1350_v59 = vrot.slane %v1342_v44, %v16939_v25  ;;  %v17131_v44 = vld [vmem:[%s16915_s23 + $0x70] sm:$0xff] }
  0x4b   : > { %v2078_v1 = vrot.slane %v2076_v42, 6  ;;  %v2081_v53 = vrot.slane %v2079_v28, 7  ;;  %15038 = vmatpush3.bf16.msra.mxu0 %v16959_v40  ;;  %v1341_v57 = vrot.slane %v1334_v29, %v16939_v25  ;;  %v576_v60 = vrot.slane %v13854_v51, %v16936_v24 }
  0x4c   : > { %v609_v58 = vcombine.high %v599_v35, %v599_v35  ;;  %v1357_v63 = vrot.slane %v1343_v55, %v16939_v25  ;;  %v1366_v0 = vcombine.low %v585_v34, %v607_v54  ;;  %v618_v2 = vrot.slane %v315_v50, %v16936_v24  ;;  %15039 = vmatprep.subr.bf16.mxu0 %v16490_v45 }
  0x4d   : > { %v2082_v62 = vor.u32 %v2081_v53, %v2078_v1  ;;  %v2086_v40 = vshrl.u32 %v1341_v57, 16  ;;  %v2089_v3 = vshll.u32 %v1341_v57, 16  ;;  %v578_v5 = vcombine.high %v576_v60, %v576_v60  ;;  %v17134_v1 = vld [vmem:[%s16915_s23 + $0x78] sm:$0xff] }
  0x4e   : > { %v1367_v4 = vcombine.low %v599_v35, %v609_v58  ;;  %v16486_v7 = vld [vmem:[#allocation2 + $0x18] sm:$0xff]   ;;  %v1358_v51 = vcombine.low %v1350_v59, %v1357_v63  ;;  %v1374_v10 = vrot.slane %v1366_v0, %v16939_v25  ;;  %v592_v14 = vrot.slane %v576_v60, %v16936_v24 }
  0x4f   : > { %v2083_v9 = vsel %vm17012_vm8, %v2074_v41, %v2082_v62  ;;  %v2084_v19 = vrot.slane %v2082_v62, 4  ;;  %v2088_v13 = vrot.slane %v2086_v40, 6  ;;  %v2091_v20 = vrot.slane %v2089_v3, 7  ;;  %15040 = vmatpush3.bf16.msra.mxu0 %v16490_v45 }
  0x50   : > { %2423 = vst.msk [vmem:[#allocation2 + $0x20] sm:$0xf] %vm21875_vm0, %v2083_v9  ;;  %v1381_v50 = vrot.slane %v1367_v4, %v16939_v25  ;;  %v2635_v15 = vshll.u32 %v16486_v7, 16  ;;  %v2639_v16 = vshrl.u32 %v16486_v7, 16  ;;  %v1365_v17 = vrot.slane %v1358_v51, %v16939_v25  ;;  %15041 = vmatprep.subr.bf16.mxu0 %v16495_v56 }
  0x51   : > { %v606_v18 = vrot.slane %v578_v5, %v16936_v24  ;;  %v2092_v21 = vor.u32 %v2091_v20, %v2088_v13  ;;  %v608_v23 = vcombine.high %v592_v14, %v592_v14  ;;  %v626_v26 = vcombine.high %v618_v2, %v618_v2 }
  0x52   : > { %v1382_v22 = vcombine.low %v1374_v10, %v1381_v50  ;;  %v2637_v30 = vrot.slane %v2635_v15, 1  ;;  %v2096_v31 = vshrl.u32 %v1365_v17, 16  ;;  %v2099_v32 = vshll.u32 %v1365_v17, 16 }
  0x53   : > { %v610_v33 = vcombine.high %v606_v18, %v606_v18  ;;  %v2093_v38 = vsel %vm17012_vm8, %v2084_v19, %v2092_v21  ;;  %v2094_v45 = vrot.slane %v2092_v21, 4  ;;  %v634_v43 = vrot.slane %v618_v2, %v16936_v24  ;;  %15042 = vmatpush3.bf16.msra.mxu0 %v16495_v56 }
  0x54   : > { %v1389_v41 = vrot.slane %v1382_v22, %v16939_v25  ;;  %v2638_v46 = vsel %vm21874_vm9, %v2633_v48, %v2637_v30  ;;  %2424 = vst.msk [vmem:[#allocation2 + $0x24] sm:$0xf] %vm21875_vm0, %v2093_v38  ;;  %v2641_v47 = vor.u32 %v2639_v16, %v2637_v30  ;;  %v2098_v42 = vrot.slane %v2096_v31, 6  ;;  %15043 = vmatprep.subr.bf16.mxu0 %v16500_v11 }
  0x55   : > { %v2101_v28 = vrot.slane %v2099_v32, 7  ;;  %15005 = vmatprep.mubr.msk.bf16.mxu0 %vm21873_vm10, %v2638_v46  ;;  %v648_v29 = vrot.slane %v626_v26, %v16936_v24  ;;  %v656_v35 = vcombine.high %v634_v43, %v634_v43  ;;  %v1390_v54 = vcombine.low %v592_v14, %v608_v23 }
  0x56   : > { %v2106_v34 = vshrl.u32 %v1389_v41, 16  ;;  %v2109_v52 = vshll.u32 %v1389_v41, 16  ;;  %v1391_v48 = vcombine.low %v606_v18, %v610_v33  ;;  %v316_v55 = vpack.c.bf16 %v17124_v36, %v290_v37 }
  0x57   : > { %v2102_v53 = vor.u32 %v2101_v28, %v2098_v42  ;;  %v1414_v58 = vcombine.low %v16968_v49, %v648_v29  ;;  %v1415_v59 = vcombine.low %v634_v43, %v656_v35  ;;  %15044 = vmatpush3.bf16.msra.mxu0 %v16500_v11  ;;  %v1398_v63 = vrot.slane %v1390_v54, %v16939_v25 }
  0x58   : > { %v2108_v56 = vrot.slane %v2106_v34, 6  ;;  %v2111_v57 = vrot.slane %v2109_v52, 7  ;;  %v1405_v0 = vrot.slane %v1391_v48, %v16939_v25  ;;  %v13855_v4 = vpack.c.bf16 %v17032_v27, %v17032_v27 }
  0x59   : > { %v2103_v60 = vsel %vm17012_vm8, %v2094_v45, %v2102_v53  ;;  %v2104_v62 = vrot.slane %v2102_v53, 4  ;;  %v1422_v40 = vrot.slane %v1414_v58, %v16939_v25  ;;  %v1429_v3 = vrot.slane %v1415_v59, %v16939_v25 }
  0x5a   : > { %v2112_v2 = vor.u32 %v2111_v57, %v2108_v56  ;;  %2425 = vst.msk [vmem:[#allocation2 + $0x28] sm:$0xf] %vm21875_vm0, %v2103_v60  ;;  %v1406_v5 = vcombine.low %v1398_v63, %v1405_v0  ;;  %v658_v7 = vcombine.high %v648_v29, %v648_v29  ;;  %v667_v9 = vrot.slane %v316_v55, %v16936_v24 }
  0x5b   : > { %v317_v19 = vpack.c.bf16 %v17134_v1, %v17131_v44  ;;  %v16487_v51 = vld [vmem:[#allocation2 + $0x20] sm:$0xff]   ;;  %v1430_v11 = vcombine.low %v1422_v40, %v1429_v3  ;;  %v625_v20 = vrot.slane %v13855_v4, %v16936_v24  ;;  %v13856_v15 = vpack.c.bf16 %v17124_v36, %v17124_v36 }
  0x5c   : > { %v2113_v10 = vsel %vm17012_vm8, %v2104_v62, %v2112_v2  ;;  %v2114_v13 = vrot.slane %v2112_v2, 4  ;;  %v1413_v50 = vrot.slane %v1406_v5, %v16939_v25  ;;  %v675_v27 = vcombine.high %v667_v9, %v667_v9 }
  0x5d   : > { %2426 = vst.msk [vmem:[#allocation2 + $0x2c] sm:$0xf] %vm21875_vm0, %v2113_v10  ;;  %v683_v14 = vrot.slane %v667_v9, %v16936_v24  ;;  %v2643_v16 = vshll.u32 %v16487_v51, 16  ;;  %v2647_v17 = vshrl.u32 %v16487_v51, 16  ;;  %v1437_v18 = vrot.slane %v1430_v11, %v16939_v25 }
  0x5e   : > { %v627_v21 = vcombine.high %v625_v20, %v625_v20  ;;  %v2116_v22 = vshrl.u32 %v1413_v50, 16  ;;  %v2119_v23 = vshll.u32 %v1413_v50, 16  ;;  %v641_v26 = vrot.slane %v625_v20, %v16936_v24 }
  0x5f   : > { %v697_v30 = vrot.slane %v675_v27, %v16936_v24  ;;  %v2645_v31 = vrot.slane %v2643_v16, 1  ;;  %v2126_v32 = vshrl.u32 %v1437_v18, 16  ;;  %v2129_v33 = vshll.u32 %v1437_v18, 16 }
  0x60   : > { %v655_v37 = vrot.slane %v627_v21, %v16936_v24  ;;  %v2118_v38 = vrot.slane %v2116_v22, 6  ;;  %v2121_v41 = vrot.slane %v2119_v23, 7  ;;  %v657_v45 = vcombine.high %v641_v26, %v641_v26 }
  0x61   : > { %v1463_v43 = vcombine.low %v16968_v49, %v697_v30  ;;  %v2646_v36 = vsel %vm21874_vm9, %v2641_v47, %v2645_v31  ;;  %v2649_v46 = vor.u32 %v2647_v17, %v2645_v31  ;;  %v2128_v42 = vrot.slane %v2126_v32, 6 }
  0x62   : > { %v2131_v28 = vrot.slane %v2129_v33, 7  ;;  %15006 = vmatmul.mubr.msk.bf16.gmra.mrb[4].mxu0 %vm21873_vm10, %v2646_v36  ;;  %v2122_v34 = vor.u32 %v2121_v41, %v2118_v38  ;;  %v659_v52 = vcombine.high %v655_v37, %v655_v37  ;;  %v1438_v29 = vcombine.low %v658_v7, %v655_v37 }
  0x63   : > { %v1439_v35 = vcombine.low %v641_v26, %v657_v45  ;;  %v1477_v54 = vrot.slane %v1463_v43, %v16939_v25  ;;  %v674_v48 = vrot.slane %v13856_v15, %v16936_v24  ;;  %v705_v55 = vcombine.high %v683_v14, %v683_v14 }
  0x64   : > { %v16488_v44 = vld [vmem:[#allocation2 + $0x28] sm:$0xff]   ;;  %v2132_v53 = vor.u32 %v2131_v28, %v2128_v42  ;;  %v2123_v56 = vsel %vm17012_vm8, %v2114_v13, %v2122_v34  ;;  %v2124_v47 = vrot.slane %v2122_v34, 4  ;;  %v1446_v57 = vrot.slane %v1438_v29, %v16939_v25 }
  0x65   : > { %v1453_v58 = vrot.slane %v1439_v35, %v16939_v25  ;;  %v2651_v59 = vshll.u32 %v16488_v44, 16  ;;  %2427 = vst.msk [vmem:[#allocation2 + $0x30] sm:$0xf] %vm21875_vm0, %v2123_v56  ;;  %v2655_v60 = vshrl.u32 %v16488_v44, 16  ;;  %v1462_v62 = vcombine.low %v659_v52, %v683_v14 }
  0x66   : > { %v2134_v63 = vrot.slane %v2132_v53, 4  ;;  %v2133_v0 = vsel %vm17012_vm8, %v2124_v47, %v2132_v53  ;;  %v676_v40 = vcombine.high %v674_v48, %v674_v48  ;;  %v690_v3 = vrot.slane %v674_v48, %v16936_v24 }
  0x67   : > { %v1454_v2 = vcombine.low %v1446_v57, %v1453_v58  ;;  %v2653_v4 = vrot.slane %v2651_v59, 1  ;;  %2428 = vst.msk [vmem:[#allocation2 + $0x34] sm:$0xf] %vm21875_vm0, %v2133_v0  ;;  %v1470_v5 = vrot.slane %v1462_v62, %v16939_v25  ;;  %v707_v7 = vcombine.high %v697_v30, %v697_v30 }
  0x68   : > { %v716_v9 = vrot.slane %v317_v19, %v16936_v24  ;;  %v704_v10 = vrot.slane %v676_v40, %v16936_v24  ;;  %v706_v11 = vcombine.high %v690_v3, %v690_v3  ;;  %v1486_v13 = vcombine.low %v705_v55, %v690_v3 }
  0x69   : > { %v1461_v51 = vrot.slane %v1454_v2, %v16939_v25  ;;  %v2654_v20 = vsel %vm21874_vm9, %v2649_v46, %v2653_v4  ;;  %v1478_v50 = vcombine.low %v1470_v5, %v1477_v54  ;;  %v13857_v22 = vpack.c.bf16 %v17134_v1, %v17134_v1  ;;  %v295_v5 = vld [vmem:[%s16915_s23 + $0x88] sm:$0xff] }
  0x6a   : > { %v732_v27 = vrot.slane %v716_v9, %v16936_v24  ;;  %15009 = vmatprep.mubr.msk.bf16.mxu0 %vm21873_vm10, %v2654_v20  ;;  %v708_v16 = vcombine.high %v704_v10, %v704_v10  ;;  %v1487_v17 = vcombine.low %v707_v7, %v704_v10  ;;  %v1494_v19 = vrot.slane %v1486_v13, %v16939_v25 }
  0x6b   : > { %v2136_v14 = vshrl.u32 %v1461_v51, 16  ;;  %v2139_v15 = vshll.u32 %v1461_v51, 16  ;;  %v1485_v18 = vrot.slane %v1478_v50, %v16939_v25  ;;  %v1510_v21 = vcombine.low %v706_v11, %v16968_v49 }
  0x6c   : > { %v1501_v30 = vrot.slane %v1487_v17, %v16939_v25  ;;  %v1511_v31 = vcombine.low %v708_v16, %v732_v27  ;;  %v723_v38 = vrot.slane %v13857_v22, %v16936_v24  ;;  %v724_v46 = vcombine.high %v716_v9, %v716_v9  ;;  %v296_v17 = vld [vmem:[%s16915_s23 + $0x90] sm:$0xff] }
  0x6d   : > { %v2138_v23 = vrot.slane %v2136_v14, 6  ;;  %v2141_v26 = vrot.slane %v2139_v15, 7  ;;  %v2146_v32 = vshrl.u32 %v1485_v18, 16  ;;  %v2149_v33 = vshll.u32 %v1485_v18, 16  ;;  %v297_v18 = vld [vmem:[%s16915_s23 + $0x98] sm:$0xff] }
  0x6e   : > { %v1518_v37 = vrot.slane %v1510_v21, %v16939_v25  ;;  %v16489_v41 = vld [vmem:[#allocation2 + $0x30] sm:$0xff]   ;;  %v1502_v43 = vcombine.low %v1494_v19, %v1501_v30  ;;  %v1525_v36 = vrot.slane %v1511_v31, %v16939_v25  ;;  %v725_v1 = vcombine.high %v723_v38, %v723_v38  ;;  %v16505_v19 = vld [vmem:[%s21861_s1 + $0x40] sm:$0xff]  }
  0x6f   : > { %v2142_v45 = vor.u32 %v2141_v26, %v2138_v23  ;;  %v2148_v42 = vrot.slane %v2146_v32, 6  ;;  %v2151_v28 = vrot.slane %v2149_v33, 7  ;;  %v739_v34 = vrot.slane %v723_v38, %v16936_v24  ;;  %15081 = vmatprep.subr.bf16.mxu0 %v16505_v19 }
  0x70   : > { %v2657_v52 = vor.u32 %v2655_v60, %v2653_v4  ;;  %v2659_v29 = vshll.u32 %v16489_v41, 16  ;;  %v1509_v54 = vrot.slane %v1502_v43, %v16939_v25  ;;  %v1526_v48 = vcombine.low %v1518_v37, %v1525_v36  ;;  %v294_v4 = vld [vmem:[%s16915_s23 + $0x80] sm:$0xff] }
  0x71   : > { %v2143_v35 = vsel %vm17012_vm8, %v2134_v63, %v2142_v45  ;;  %v2144_v44 = vrot.slane %v2142_v45, 4  ;;  %v2152_v53 = vor.u32 %v2151_v28, %v2148_v42  ;;  %v746_v55 = vrot.slane %v724_v46, %v16936_v24 }
  0x72   : > { %2429 = vst.msk [vmem:[#allocation2 + $0x38] sm:$0xf] %vm21875_vm0, %v2143_v35  ;;  %v2661_v56 = vrot.slane %v2659_v29, 1  ;;  %v753_v47 = vrot.slane %v725_v1, %v16936_v24  ;;  %v754_v57 = vcombine.high %v732_v27, %v732_v27  ;;  %v755_v58 = vcombine.high %v739_v34, %v739_v34 }
  0x73   : > { %v2153_v59 = vsel %vm17012_vm8, %v2144_v44, %v2152_v53  ;;  %v2663_v60 = vshrl.u32 %v16489_v41, 16  ;;  %v1533_v62 = vrot.slane %v1526_v48, %v16939_v25  ;;  %v2156_v63 = vshrl.u32 %v1509_v54, 16 }
  0x74   : > { %v2662_v0 = vsel %vm21874_vm9, %v2657_v52, %v2661_v56  ;;  %2430 = vst.msk [vmem:[#allocation2 + $0x3c] sm:$0xf] %vm21875_vm0, %v2153_v59  ;;  %v2154_v2 = vrot.slane %v2152_v53, 4  ;;  %v2159_v40 = vshll.u32 %v1509_v54, 16  ;;  %v756_v3 = vcombine.high %v746_v55, %v746_v55 }
  0x75   : > { %15010 = vmatmul.mubr.msk.bf16.gmra.mrb[8].mxu0 %vm21873_vm10, %v2662_v0  ;;  %v2158_v7 = vrot.slane %v2156_v63, 6  ;;  %v2166_v9 = vshrl.u32 %v1533_v62, 16  ;;  %v2169_v51 = vshll.u32 %v1533_v62, 16  ;;  %v757_v10 = vcombine.high %v753_v47, %v753_v47 }
  0x76   : > { %v2161_v11 = vrot.slane %v2159_v40, 7  ;;  %v1534_v13 = vcombine.low %v746_v55, %v756_v3  ;;  %v1535_v20 = vcombine.low %v754_v57, %v739_v34  ;;  %v1559_v50 = vcombine.low %v755_v58, %v16968_v49 }
  0x77   : > { %v2168_v27 = vrot.slane %v2166_v9, 6  ;;  %v2171_v14 = vrot.slane %v2169_v51, 7  ;;  %v1558_v15 = vcombine.low %v753_v47, %v757_v10  ;;  %v318_v16 = vpack.c.bf16 %v295_v5, %v294_v4 }
  0x78   : > { %v2162_v21 = vor.u32 %v2161_v11, %v2158_v7  ;;  %v1542_v22 = vrot.slane %v1534_v13, %v16939_v25  ;;  %v1549_v23 = vrot.slane %v1535_v20, %v16939_v25  ;;  %v1573_v26 = vrot.slane %v1559_v50, %v16939_v25 }
  0x79   : > { %v2172_v30 = vor.u32 %v2171_v14, %v2168_v27  ;;  %v1566_v31 = vrot.slane %v1558_v15, %v16939_v25  ;;  %v13858_v32 = vpack.c.bf16 %v295_v5, %v295_v5  ;;  %v765_v33 = vrot.slane %v318_v16, %v16936_v24 }
  0x7a   : > { %v2665_v37 = vor.u32 %v2663_v60, %v2661_v56  ;;  %v2163_v38 = vsel %vm17012_vm8, %v2154_v2, %v2162_v21  ;;  %v2164_v41 = vrot.slane %v2162_v21, 4  ;;  %v1550_v45 = vcombine.low %v1542_v22, %v1549_v23 }
  0x7b   : > { %v16491_v43 = vld [vmem:[#allocation2 + $0x38] sm:$0xff]   ;;  %2431 = vst.msk [vmem:[#allocation2 + $0x40] sm:$0xf] %vm21875_vm0, %v2163_v38  ;;  %v1574_v36 = vcombine.low %v1566_v31, %v1573_v26  ;;  %v772_v46 = vrot.slane %v13858_v32, %v16936_v24  ;;  %v773_v42 = vcombine.high %v765_v33, %v765_v33  ;;  %v319_v28 = vpack.c.bf16 %v297_v18, %v296_v17  ;;  %v298_v32 = vld [vmem:[%s16915_s23 + $0xa0] sm:$0xff] }
  0x7c   : > { %v2173_v1 = vsel %vm17012_vm8, %v2164_v41, %v2172_v30  ;;  %v1557_v34 = vrot.slane %v1550_v45, %v16939_v25  ;;  %v2174_v52 = vrot.slane %v2172_v30, 4  ;;  %v781_v29 = vrot.slane %v765_v33, %v16936_v24  ;;  %v299_v33 = vld [vmem:[%s16915_s23 + $0xa8] sm:$0xff] }
  0x7d   : > { %v2667_v35 = vshll.u32 %v16491_v43, 16  ;;  %2432 = vst.msk [vmem:[#allocation2 + $0x44] sm:$0xf] %vm21875_vm0, %v2173_v1  ;;  %v1581_v44 = vrot.slane %v1574_v36, %v16939_v25  ;;  %v774_v53 = vcombine.high %v772_v46, %v772_v46  ;;  %v13859_v54 = vpack.c.bf16 %v297_v18, %v297_v18 }
  0x7e   : > { %v2176_v48 = vshrl.u32 %v1557_v34, 16  ;;  %v2179_v55 = vshll.u32 %v1557_v34, 16  ;;  %v788_v56 = vrot.slane %v772_v46, %v16936_v24  ;;  %v795_v47 = vrot.slane %v773_v42, %v16936_v24 }
  0x7f   : > { %v2669_v57 = vrot.slane %v2667_v35, 1  ;;  %v2186_v58 = vshrl.u32 %v1581_v44, 16  ;;  %v2189_v59 = vshll.u32 %v1581_v44, 16  ;;  %v802_v60 = vrot.slane %v774_v53, %v16936_v24 }
  0x80   : > { %v2178_v62 = vrot.slane %v2176_v48, 6  ;;  %v2181_v63 = vrot.slane %v2179_v55, 7  ;;  %v803_v0 = vcombine.high %v781_v29, %v781_v29  ;;  %v804_v2 = vcombine.high %v788_v56, %v788_v56 }
  0x81   : > { %v2670_v40 = vsel %vm21874_vm9, %v2665_v37, %v2669_v57  ;;  %v2671_v3 = vshrl.u32 %v16491_v43, 16  ;;  %v2188_v4 = vrot.slane %v2186_v58, 6  ;;  %v2191_v5 = vrot.slane %v2189_v59, 7 }
  0x82   : > { %15013 = vmatprep.mubr.msk.bf16.mxu0 %vm21873_vm10, %v2670_v40  ;;  %v2182_v7 = vor.u32 %v2181_v63, %v2178_v62  ;;  %v805_v9 = vcombine.high %v795_v47, %v795_v47  ;;  %v806_v51 = vcombine.high %v802_v60, %v802_v60  ;;  %v1582_v10 = vcombine.low %v781_v29, %v803_v0 }
  0x83   : > { %v17233_v11 = vor.u32 %v2191_v5, %v2188_v4  ;;  %v1606_v13 = vcombine.low %v788_v56, %v804_v2  ;;  %v814_v20 = vrot.slane %v319_v28, %v16936_v24  ;;  %v821_v50 = vrot.slane %v13859_v54, %v16936_v24 }
  0x84   : > { %v17237_v27 = vld [vmem:[#allocation2 + $0x40] sm:$0xff]   ;;  %v2183_v14 = vsel %vm17012_vm8, %v2174_v52, %v2182_v7  ;;  %v2184_v15 = vrot.slane %v2182_v7, 4  ;;  %v1583_v16 = vcombine.low %v795_v47, %v805_v9  ;;  %v1590_v17 = vrot.slane %v1582_v10, %v16939_v25 }
  0x85   : > { %v2673_v18 = vor.u32 %v2671_v3, %v2669_v57  ;;  %2433 = vst.msk [vmem:[#allocation2 + $0x48] sm:$0xf] %vm21875_vm0, %v2183_v14  ;;  %v1607_v19 = vcombine.low %v802_v60, %v806_v51  ;;  %v1614_v21 = vrot.slane %v1606_v13, %v16939_v25  ;;  %v822_v22 = vcombine.high %v814_v20, %v814_v20 }
  0x86   : > { %v2675_v23 = vshll.u32 %v17237_v27, 16  ;;  %v2193_v26 = vsel %vm17012_vm8, %v2184_v15, %v17233_v11  ;;  %v1597_v30 = vrot.slane %v1583_v16, %v16939_v25  ;;  %v2194_v31 = vrot.slane %v17233_v11, 4 }
  0x87   : > { %2434 = vst.msk [vmem:[#allocation2 + $0x4c] sm:$0xf] %vm21875_vm0, %v2193_v26  ;;  %v1621_v37 = vrot.slane %v1607_v19, %v16939_v25  ;;  %v823_v38 = vcombine.high %v821_v50, %v821_v50  ;;  %v830_v41 = vrot.slane %v814_v20, %v16936_v24  ;;  %v837_v45 = vrot.slane %v821_v50, %v16936_v24 }
  0x88   : > { %v2677_v43 = vrot.slane %v2675_v23, 1  ;;  %v2679_v36 = vshrl.u32 %v17237_v27, 16  ;;  %v1598_v46 = vcombine.low %v1590_v17, %v1597_v30  ;;  %v844_v42 = vrot.slane %v822_v22, %v16936_v24 }
  0x89   : > { %v1622_v28 = vcombine.low %v1614_v21, %v1621_v37  ;;  %v852_v1 = vcombine.high %v830_v41, %v830_v41  ;;  %v853_v34 = vcombine.high %v837_v45, %v837_v45  ;;  %v320_v52 = vpack.c.bf16 %v299_v33, %v298_v32 }
  0x8a   : > { %v2678_v29 = vsel %vm21874_vm9, %v2673_v18, %v2677_v43  ;;  %v1605_v35 = vrot.slane %v1598_v46, %v16939_v25  ;;  %v17261_v44 = vrot.slane %v823_v38, %v16936_v24  ;;  %v854_v53 = vcombine.high %v844_v42, %v844_v42 }
  0x8b   : > { %15014 = vmatmul.mubr.msk.bf16.gmra.mrb[12].mxu0 %vm21873_vm10, %v2678_v29  ;;  %v1629_v54 = vrot.slane %v1622_v28, %v16939_v25  ;;  %v1630_v48 = vcombine.low %v16968_v49, %v844_v42  ;;  %v1631_v55 = vcombine.low %v830_v41, %v852_v1  ;;  %v1655_v56 = vcombine.low %v837_v45, %v853_v34  ;;  %v300_v45 = vld [vmem:[%s16915_s23 + $0xb0] sm:$0xff] }
  0x8c   : > { %v2681_v47 = vor.u32 %v2679_v36, %v2677_v43  ;;  %v2196_v57 = vshrl.u32 %v1605_v35, 16  ;;  %v2199_v58 = vshll.u32 %v1605_v35, 16  ;;  %v1654_v59 = vcombine.low %v854_v53, %v17261_v44  ;;  %v301_v43 = vld [vmem:[%s16915_s23 + $0xb8] sm:$0xff] }
  0x8d   : > { %v2206_v60 = vshrl.u32 %v1629_v54, 16  ;;  %v2209_v62 = vshll.u32 %v1629_v54, 16  ;;  %v1638_v63 = vrot.slane %v1630_v48, %v16939_v25  ;;  %v1645_v0 = vrot.slane %v1631_v55, %v16939_v25 }
  0x8e   : > { %v17269_v2 = vld [vmem:[#allocation2 + $0x48] sm:$0xff]   ;;  %v2198_v40 = vrot.slane %v2196_v57, 6  ;;  %v2201_v3 = vrot.slane %v2199_v58, 7  ;;  %v1662_v4 = vrot.slane %v1654_v59, %v16939_v25  ;;  %v1669_v5 = vrot.slane %v1655_v56, %v16939_v25 }
  0x8f   : > { %v2208_v7 = vrot.slane %v2206_v60, 6  ;;  %v2211_v9 = vrot.slane %v2209_v62, 7  ;;  %v1646_v51 = vcombine.low %v1638_v63, %v1645_v0  ;;  %v13860_v10 = vpack.c.bf16 %v299_v33, %v299_v33  ;;  %v17299_v60 = vld [vmem:[%s16915_s23 + $0xc0] sm:$0xff]  ;;  %v17302_v62 = vld [vmem:[%s16915_s23 + $0xc8] sm:$0xff] }
  0x90   : > { %v2683_v11 = vshll.u32 %v17269_v2, 16  ;;  %v2202_v13 = vor.u32 %v2201_v3, %v2198_v40  ;;  %v1670_v20 = vcombine.low %v1662_v4, %v1669_v5  ;;  %v855_v50 = vcombine.high %v17261_v44, %v17261_v44 }
  0x91   : > { %v2212_v14 = vor.u32 %v2211_v9, %v2208_v7  ;;  %v1653_v15 = vrot.slane %v1646_v51, %v16939_v25  ;;  %v863_v16 = vrot.slane %v320_v52, %v16936_v24  ;;  %v870_v17 = vrot.slane %v13860_v10, %v16936_v24  ;;  %v17310_v51 = vld [vmem:[%s16915_s23 + $0xd0] sm:$0xff]  ;;  %v17313_v10 = vld [vmem:[%s16915_s23 + $0xd8] sm:$0xff] }
  0x92   : > { %v2685_v18 = vrot.slane %v2683_v11, 1  ;;  %v2203_v19 = vsel %vm17012_vm8, %v2194_v31, %v2202_v13  ;;  %v2204_v21 = vrot.slane %v2202_v13, 4  ;;  %v1677_v22 = vrot.slane %v1670_v20, %v16939_v25 }
  0x93   : > { %2435 = vst.msk [vmem:[#allocation2 + $0x50] sm:$0xf] %vm21875_vm0, %v2203_v19  ;;  %v2687_v23 = vshrl.u32 %v17269_v2, 16  ;;  %v2216_v26 = vshrl.u32 %v1653_v15, 16  ;;  %v2219_v30 = vshll.u32 %v1653_v15, 16  ;;  %v871_v32 = vcombine.high %v863_v16, %v863_v16 }
  0x94   : > { %v2686_v33 = vsel %vm21874_vm9, %v2681_v47, %v2685_v18  ;;  %v2213_v37 = vsel %vm17012_vm8, %v2204_v21, %v2212_v14  ;;  %v2214_v38 = vrot.slane %v2212_v14, 4  ;;  %v2226_v41 = vshrl.u32 %v1677_v22, 16 }
  0x95   : > { %15017 = vmatprep.mubr.msk.bf16.mxu0 %vm21873_vm10, %v2686_v33  ;;  %2436 = vst.msk [vmem:[#allocation2 + $0x54] sm:$0xf] %vm21875_vm0, %v2213_v37  ;;  %v2218_v31 = vrot.slane %v2216_v26, 6  ;;  %v2221_v36 = vrot.slane %v2219_v30, 7  ;;  %v2229_v46 = vshll.u32 %v1677_v22, 16  ;;  %v872_v42 = vcombine.high %v870_v17, %v870_v17 }
  0x96   : > { %v2228_v28 = vrot.slane %v2226_v41, 6  ;;  %v879_v1 = vrot.slane %v863_v16, %v16936_v24  ;;  %v886_v34 = vrot.slane %v870_v17, %v16936_v24  ;;  %v893_v52 = vrot.slane %v871_v32, %v16936_v24 }
  0x97   : > { %v2222_v29 = vor.u32 %v2221_v36, %v2218_v31  ;;  %v2231_v35 = vrot.slane %v2229_v46, 7  ;;  %v900_v44 = vrot.slane %v872_v42, %v16936_v24  ;;  %v321_v53 = vpack.c.bf16 %v301_v43, %v300_v45 }
  0x98   : > { %v901_v54 = vcombine.high %v879_v1, %v879_v1  ;;  %v903_v48 = vcombine.high %v893_v52, %v893_v52  ;;  %v1678_v55 = vcombine.low %v855_v50, %v879_v1  ;;  %v1679_v56 = vcombine.low %v16968_v49, %v893_v52 }
  0x99   : > { %v2223_v47 = vsel %vm17012_vm8, %v2214_v38, %v2222_v29  ;;  %v2224_v57 = vrot.slane %v2222_v29, 4  ;;  %v2232_v58 = vor.u32 %v2231_v35, %v2228_v28  ;;  %v902_v59 = vcombine.high %v886_v34, %v886_v34 }
  0x9a   : > { %2437 = vst.msk [vmem:[#allocation2 + $0x58] sm:$0xf] %vm21875_vm0, %v2223_v47  ;;  %v1686_v63 = vrot.slane %v1678_v55, %v16939_v25  ;;  %v1693_v0 = vrot.slane %v1679_v56, %v16939_v25  ;;  %v1702_v40 = vcombine.low %v901_v54, %v886_v34  ;;  %v1703_v3 = vcombine.low %v903_v48, %v900_v44 }
  0x9b   : > { %v2689_v4 = vor.u32 %v2687_v23, %v2685_v18  ;;  %v2233_v5 = vsel %vm17012_vm8, %v2224_v57, %v2232_v58  ;;  %v2234_v7 = vrot.slane %v2232_v58, 4  ;;  %v13861_v9 = vpack.c.bf16 %v301_v43, %v301_v43 }
  0x9c   : > { %v17315_v11 = vld [vmem:[#allocation2 + $0x50] sm:$0xff]   ;;  %2438 = vst.msk [vmem:[#allocation2 + $0x5c] sm:$0xf] %vm21875_vm0, %v2233_v5  ;;  %v1694_v13 = vcombine.low %v1686_v63, %v1693_v0  ;;  %v1710_v20 = vrot.slane %v1702_v40, %v16939_v25  ;;  %v1717_v50 = vrot.slane %v1703_v3, %v16939_v25  ;;  %v912_v14 = vrot.slane %v321_v53, %v16936_v24 }
  0x9d   : > { %v904_v15 = vcombine.high %v900_v44, %v900_v44  ;;  %v919_v16 = vrot.slane %v13861_v9, %v16936_v24  ;;  %v1726_v17 = vcombine.low %v902_v59, %v16968_v49  ;;  %v322_v18 = vpack.c.bf16 %v17302_v62, %v17299_v60 }
  0x9e   : > { %v2691_v19 = vshll.u32 %v17315_v11, 16  ;;  %v1701_v21 = vrot.slane %v1694_v13, %v16939_v25  ;;  %v1718_v22 = vcombine.low %v1710_v20, %v1717_v50  ;;  %v323_v23 = vpack.c.bf16 %v17313_v10, %v17310_v51 }
  0x9f   : > { %v2695_v26 = vshrl.u32 %v17315_v11, 16  ;;  %v920_v30 = vcombine.high %v912_v14, %v912_v14  ;;  %v928_v32 = vrot.slane %v912_v14, %v16936_v24  ;;  %v935_v33 = vrot.slane %v919_v16, %v16936_v24 }
  0xa0   : > { %v2693_v37 = vrot.slane %v2691_v19, 1  ;;  %v1725_v38 = vrot.slane %v1718_v22, %v16939_v25  ;;  %v2236_v41 = vshrl.u32 %v1701_v21, 16  ;;  %v2239_v45 = vshll.u32 %v1701_v21, 16 }
  0xa1   : > { %v942_v43 = vrot.slane %v920_v30, %v16936_v24  ;;  %v950_v31 = vcombine.high %v928_v32, %v928_v32  ;;  %v1727_v36 = vcombine.low %v904_v15, %v928_v32  ;;  %v921_v46 = vcombine.high %v919_v16, %v919_v16 }
  0xa2   : > { %v2694_v42 = vsel %vm21874_vm9, %v2689_v4, %v2693_v37  ;;  %v2238_v28 = vrot.slane %v2236_v41, 6  ;;  %v2241_v1 = vrot.slane %v2239_v45, 7  ;;  %v1734_v34 = vrot.slane %v1726_v17, %v16939_v25 }
  0xa3   : > { %15018 = vmatmul.mubr.msk.bf16.gmra.mrb[16].mxu0 %vm21873_vm10, %v2694_v42  ;;  %v17337_v52 = vld [vmem:[#allocation2 + $0x58] sm:$0xff]   ;;  %v2246_v29 = vshrl.u32 %v1725_v38, 16  ;;  %v2249_v35 = vshll.u32 %v1725_v38, 16  ;;  %v952_v44 = vcombine.high %v942_v43, %v942_v43  ;;  %v1741_v53 = vrot.slane %v1727_v36, %v16939_v25 }
  0xa4   : > { %v2242_v54 = vor.u32 %v2241_v1, %v2238_v28  ;;  %v1751_v48 = vcombine.low %v950_v31, %v935_v33  ;;  %v949_v55 = vrot.slane %v921_v46, %v16936_v24  ;;  %v951_v56 = vcombine.high %v935_v33, %v935_v33 }
  0xa5   : > { %v2697_v47 = vor.u32 %v2695_v26, %v2693_v37  ;;  %v2699_v57 = vshll.u32 %v17337_v52, 16  ;;  %v2248_v58 = vrot.slane %v2246_v29, 6  ;;  %v2251_v59 = vrot.slane %v2249_v35, 7 }
  0xa6   : > { %v2243_v60 = vsel %vm17012_vm8, %v2234_v7, %v2242_v54  ;;  %v2244_v63 = vrot.slane %v2242_v54, 4  ;;  %v1742_v0 = vcombine.low %v1734_v34, %v1741_v53  ;;  %v1750_v40 = vcombine.low %v942_v43, %v952_v44 }
  0xa7   : > { %v2701_v3 = vrot.slane %v2699_v57, 1  ;;  %v2252_v4 = vor.u32 %v2251_v59, %v2248_v58  ;;  %2439 = vst.msk [vmem:[#allocation2 + $0x60] sm:$0xf] %vm21875_vm0, %v2243_v60  ;;  %v1765_v5 = vrot.slane %v1751_v48, %v16939_v25  ;;  %v953_v9 = vcombine.high %v949_v55, %v949_v55 }
  0xa8   : > { %v1749_v13 = vrot.slane %v1742_v0, %v16939_v25  ;;  %v1758_v20 = vrot.slane %v1750_v40, %v16939_v25  ;;  %v961_v50 = vrot.slane %v322_v18, %v16936_v24  ;;  %v1775_v14 = vcombine.low %v951_v56, %v16968_v49 }
  0xa9   : > { %v2702_v7 = vsel %vm21874_vm9, %v2697_v47, %v2701_v3  ;;  %v2253_v15 = vsel %vm17012_vm8, %v2244_v63, %v2252_v4  ;;  %v2703_v16 = vshrl.u32 %v17337_v52, 16  ;;  %v2254_v17 = vrot.slane %v2252_v4, 4 }
  0xaa   : > { %15021 = vmatprep.mubr.msk.bf16.mxu0 %vm21873_vm10, %v2702_v7  ;;  %2440 = vst.msk [vmem:[#allocation2 + $0x64] sm:$0xf] %vm21875_vm0, %v2253_v15  ;;  %v1766_v19 = vcombine.low %v1758_v20, %v1765_v5  ;;  %v2256_v21 = vshrl.u32 %v1749_v13, 16  ;;  %v2259_v22 = vshll.u32 %v1749_v13, 16  ;;  %v969_v26 = vcombine.high %v961_v50, %v961_v50 }
  0xab   : > { %v977_v18 = vrot.slane %v961_v50, %v16936_v24  ;;  %v1774_v30 = vcombine.low %v949_v55, %v953_v9  ;;  %v1789_v32 = vrot.slane %v1775_v14, %v16939_v25  ;;  %v13862_v33 = vpack.c.bf16 %v17302_v62, %v17302_v62 }
  0xac   : > { %v1773_v37 = vrot.slane %v1766_v19, %v16939_v25  ;;  %v2258_v38 = vrot.slane %v2256_v21, 6  ;;  %v2261_v41 = vrot.slane %v2259_v22, 7  ;;  %v991_v45 = vrot.slane %v969_v26, %v16936_v24  ;;  %v306_v22 = vld [vmem:[%s16915_s23 + $0xe0] sm:$0xff]  ;;  %v17388_v26 = vld [vmem:[%s16915_s23 + $0xe8] sm:$0xff] }
  0xad   : > { %v999_v43 = vcombine.high %v977_v18, %v977_v18  ;;  %v1782_v31 = vrot.slane %v1774_v30, %v16939_v25  ;;  %v968_v36 = vrot.slane %v13862_v33, %v16936_v24  ;;  %v1010_v46 = vrot.slane %v323_v23, %v16936_v24 }
  0xae   : > { %v2262_v42 = vor.u32 %v2261_v41, %v2258_v38  ;;  %v2266_v28 = vshrl.u32 %v1773_v37, 16  ;;  %v2269_v1 = vshll.u32 %v1773_v37, 16  ;;  %v1001_v62 = vcombine.high %v991_v45, %v991_v45 }
  0xaf   : > { %v1790_v34 = vcombine.low %v1782_v31, %v1789_v32  ;;  %v1798_v29 = vcombine.low %v977_v18, %v999_v43  ;;  %v970_v35 = vcombine.high %v968_v36, %v968_v36  ;;  %v984_v44 = vrot.slane %v968_v36, %v16936_v24 }
  0xb0   : > { %v2263_v53 = vsel %vm17012_vm8, %v2254_v17, %v2262_v42  ;;  %v2264_v54 = vrot.slane %v2262_v42, 4  ;;  %v2268_v48 = vrot.slane %v2266_v28, 6  ;;  %v2271_v55 = vrot.slane %v2269_v1, 7 }
  0xb1   : > { %v17371_v56 = vld [vmem:[#allocation2 + $0x60] sm:$0xff]   ;;  %2441 = vst.msk [vmem:[#allocation2 + $0x68] sm:$0xf] %vm21875_vm0, %v2263_v53  ;;  %v1797_v51 = vrot.slane %v1790_v34, %v16939_v25  ;;  %v1799_v23 = vcombine.low %v991_v45, %v1001_v62  ;;  %v1806_v47 = vrot.slane %v1798_v29, %v16939_v25  ;;  %v998_v57 = vrot.slane %v970_v35, %v16936_v24 }
  0xb2   : > { %v2272_v58 = vor.u32 %v2271_v55, %v2268_v48  ;;  %v1000_v59 = vcombine.high %v984_v44, %v984_v44  ;;  %v1018_v60 = vcombine.high %v1010_v46, %v1010_v46  ;;  %v1026_v63 = vrot.slane %v1010_v46, %v16936_v24 }
  0xb3   : > { %v2705_v0 = vor.u32 %v2703_v16, %v2701_v3  ;;  %v2707_v40 = vshll.u32 %v17371_v56, 16  ;;  %v1813_v4 = vrot.slane %v1799_v23, %v16939_v25  ;;  %v2276_v5 = vshrl.u32 %v1797_v51, 16 }
  0xb4   : > { %v2273_v9 = vsel %vm17012_vm8, %v2264_v54, %v2272_v58  ;;  %v2274_v13 = vrot.slane %v2272_v58, 4  ;;  %v2279_v20 = vshll.u32 %v1797_v51, 16  ;;  %v1002_v50 = vcombine.high %v998_v57, %v998_v57 }
  0xb5   : > { %v2709_v14 = vrot.slane %v2707_v40, 1  ;;  %2442 = vst.msk [vmem:[#allocation2 + $0x6c] sm:$0xf] %vm21875_vm0, %v2273_v9  ;;  %v1814_v7 = vcombine.low %v1806_v47, %v1813_v4  ;;  %v2278_v15 = vrot.slane %v2276_v5, 6  ;;  %v17384_v3 = vrot.slane %v1018_v60, %v16936_v24  ;;  %v308_v5 = vld [vmem:[%s16915_s23 + $0xf0] sm:$0xff]  ;;  %v17422_v9 = vld [vmem:[%s16915_s23 + $0xf8] sm:$0xff] }
  0xb6   : > { %v2281_v16 = vrot.slane %v2279_v20, 7  ;;  %v1048_v17 = vcombine.high %v1026_v63, %v1026_v63  ;;  %v1822_v19 = vcombine.low %v984_v44, %v1000_v59  ;;  %v1823_v21 = vcombine.low %v998_v57, %v1002_v50 }
  0xb7   : > { %v2710_v18 = vsel %vm21874_vm9, %v2705_v0, %v2709_v14  ;;  %v2711_v30 = vshrl.u32 %v17371_v56, 16  ;;  %v1821_v32 = vrot.slane %v1814_v7, %v16939_v25  ;;  %v1846_v33 = vcombine.low %v16968_v49, %v17384_v3 }
  0xb8   : > { %15022 = vmatmul.mubr.msk.bf16.gmra.mrb[20].mxu0 %vm21873_vm10, %v2710_v18  ;;  %v2282_v37 = vor.u32 %v2281_v16, %v2278_v15  ;;  %v1830_v38 = vrot.slane %v1822_v19, %v16939_v25  ;;  %v1837_v41 = vrot.slane %v1823_v21, %v16939_v25  ;;  %v1847_v45 = vcombine.low %v1026_v63, %v1048_v17 }
  0xb9   : > { %v2286_v43 = vshrl.u32 %v1821_v32, 16  ;;  %v2289_v31 = vshll.u32 %v1821_v32, 16  ;;  %v1854_v36 = vrot.slane %v1846_v33, %v16939_v25  ;;  %v324_v46 = vpack.c.bf16 %v17388_v26, %v306_v22 }
  0xba   : > { %v2283_v42 = vsel %vm17012_vm8, %v2274_v13, %v2282_v37  ;;  %v1838_v28 = vcombine.low %v1830_v38, %v1837_v41  ;;  %v1861_v1 = vrot.slane %v1847_v45, %v16939_v25  ;;  %v2284_v62 = vrot.slane %v2282_v37, 4 }
  0xbb   : > { %v2288_v34 = vrot.slane %v2286_v43, 6  ;;  %v2291_v29 = vrot.slane %v2289_v31, 7  ;;  %2443 = vst.msk [vmem:[#allocation2 + $0x70] sm:$0xf] %vm21875_vm0, %v2283_v42  ;;  %v13863_v35 = vpack.c.bf16 %v17313_v10, %v17313_v10  ;;  %v2713_v53 = vor.u32 %v2711_v30, %v2709_v14 }
  0xbc   : > { %v17406_v44 = vld [vmem:[#allocation2 + $0x68] sm:$0xff]   ;;  %v1845_v54 = vrot.slane %v1838_v28, %v16939_v25  ;;  %v1862_v48 = vcombine.low %v1854_v36, %v1861_v1  ;;  %v1050_v55 = vcombine.high %v17384_v3, %v17384_v3  ;;  %v1059_v47 = vrot.slane %v324_v46, %v16936_v24 }
  0xbd   : > { %v2292_v51 = vor.u32 %v2291_v29, %v2288_v34  ;;  %v1017_v23 = vrot.slane %v13863_v35, %v16936_v24  ;;  %v13864_v57 = vpack.c.bf16 %v17388_v26, %v17388_v26  ;;  %v2715_v10 = vshll.u32 %v17406_v44, 16 }
  0xbe   : > { %v2719_v58 = vshrl.u32 %v17406_v44, 16  ;;  %v1869_v59 = vrot.slane %v1862_v48, %v16939_v25  ;;  %v2296_v60 = vshrl.u32 %v1845_v54, 16  ;;  %v2299_v40 = vshll.u32 %v1845_v54, 16 }
  0xbf   : > { %v2293_v63 = vsel %vm17012_vm8, %v2284_v62, %v2292_v51  ;;  %v2294_v0 = vrot.slane %v2292_v51, 4  ;;  %v1019_v4 = vcombine.high %v1017_v23, %v1017_v23  ;;  %v2717_v13 = vrot.slane %v2715_v10, 1 }
  0xc0   : > { %2444 = vst.msk [vmem:[#allocation2 + $0x74] sm:$0xf] %vm21875_vm0, %v2293_v63  ;;  %v2298_v20 = vrot.slane %v2296_v60, 6  ;;  %v2306_v50 = vshrl.u32 %v1869_v59, 16  ;;  %v2309_v14 = vshll.u32 %v1869_v59, 16  ;;  %v2301_v7 = vrot.slane %v2299_v40, 7 }
  0xc1   : > { %v1033_v15 = vrot.slane %v1017_v23, %v16936_v24  ;;  %v1047_v3 = vrot.slane %v1019_v4, %v16936_v24  ;;  %v1067_v16 = vcombine.high %v1059_v47, %v1059_v47  ;;  %v2718_v17 = vsel %vm21874_vm9, %v2713_v53, %v2717_v13 }
  0xc2   : > { %v2308_v19 = vrot.slane %v2306_v50, 6  ;;  %v2311_v21 = vrot.slane %v2309_v14, 7  ;;  %v325_v22 = vpack.c.bf16 %v17422_v9, %v308_v5  ;;  %15025 = vmatprep.mubr.msk.bf16.mxu0 %vm21873_vm10, %v2718_v17  ;;  %v2302_v26 = vor.u32 %v2301_v7, %v2298_v20 }
  0xc3   : > { %v1049_v18 = vcombine.high %v1033_v15, %v1033_v15  ;;  %v1051_v30 = vcombine.high %v1047_v3, %v1047_v3  ;;  %v1075_v32 = vrot.slane %v1059_v47, %v16936_v24  ;;  %v1089_v37 = vrot.slane %v1067_v16, %v16936_v24 }
  0xc4   : > { %v17431_v33 = vor.u32 %v2311_v21, %v2308_v19  ;;  %v1870_v38 = vcombine.low %v1050_v55, %v1047_v3  ;;  %v1066_v41 = vrot.slane %v13864_v57, %v16936_v24  ;;  %v2303_v45 = vsel %vm17012_vm8, %v2294_v0, %v2302_v26 }
  0xc5   : > { %v2304_v43 = vrot.slane %v2302_v26, 4  ;;  %v1871_v31 = vcombine.low %v1033_v15, %v1049_v18  ;;  %v1894_v36 = vcombine.low %v1051_v30, %v1075_v32  ;;  %v2721_v46 = vor.u32 %v2719_v58, %v2717_v13  ;;  %2445 = vst.msk [vmem:[#allocation2 + $0x78] sm:$0xf] %vm21875_vm0, %v2303_v45 }
  0xc6   : > { %v1878_v42 = vrot.slane %v1870_v38, %v16939_v25  ;;  %v1895_v28 = vcombine.low %v16968_v49, %v1089_v37  ;;  %v1068_v1 = vcombine.high %v1066_v41, %v1066_v41  ;;  %v1082_v53 = vrot.slane %v1066_v41, %v16936_v24 }
  0xc7   : > { %v17440_v62 = vld [vmem:[#allocation2 + $0x70] sm:$0xff]   ;;  %v2313_v34 = vsel %vm17012_vm8, %v2304_v43, %v17431_v33  ;;  %v1885_v29 = vrot.slane %v1871_v31, %v16939_v25  ;;  %v1902_v35 = vrot.slane %v1894_v36, %v16939_v25  ;;  %v1097_v55 = vcombine.high %v1075_v32, %v1075_v32 }
  0xc8   : > { %2446 = vst.msk [vmem:[#allocation2 + $0x7c] sm:$0xf] %vm21875_vm0, %v2313_v34  ;;  %v1909_v54 = vrot.slane %v1895_v28, %v16939_v25  ;;  %v1096_v48 = vrot.slane %v1068_v1, %v16936_v24  ;;  %v1099_v51 = vcombine.high %v1089_v37, %v1089_v37  ;;  %v2723_v23 = vshll.u32 %v17440_v62, 16 }
  0xc9   : > { %v1886_v47 = vcombine.low %v1878_v42, %v1885_v29  ;;  %v2314_v57 = vrot.slane %v17431_v33, 4  ;;  %v1098_v10 = vcombine.high %v1082_v53, %v1082_v53  ;;  %v1108_v60 = vrot.slane %v325_v22, %v16936_v24 }
  0xca   : > { %v1910_v58 = vcombine.low %v1902_v35, %v1909_v54  ;;  %v1100_v59 = vcombine.high %v1096_v48, %v1096_v48  ;;  %v1918_v63 = vcombine.low %v1097_v55, %v1082_v53  ;;  %v2725_v0 = vrot.slane %v2723_v23, 1 }
  0xcb   : > { %v1893_v40 = vrot.slane %v1886_v47, %v16939_v25  ;;  %v1919_v4 = vcombine.low %v1099_v51, %v1096_v48  ;;  %v1942_v5 = vcombine.low %v1098_v10, %v16968_v49  ;;  %v2727_v13 = vshrl.u32 %v17440_v62, 16 }
  0xcc   : > { %v1917_v20 = vrot.slane %v1910_v58, %v16939_v25  ;;  %v1124_v50 = vrot.slane %v1108_v60, %v16936_v24  ;;  %v1926_v14 = vrot.slane %v1918_v63, %v16939_v25  ;;  %v2726_v7 = vsel %vm21874_vm9, %v2721_v46, %v2725_v0 }
  0xcd   : > { %v2316_v15 = vshrl.u32 %v1893_v40, 16  ;;  %v2319_v3 = vshll.u32 %v1893_v40, 16  ;;  %v13865_v16 = vpack.c.bf16 %v17422_v9, %v17422_v9  ;;  %15026 = vmatmul.mubr.msk.bf16.gmra.mrb[24].mxu0 %vm21873_vm10, %v2726_v7  ;;  %v1933_v21 = vrot.slane %v1919_v4, %v16939_v25 }
  0xce   : > { %v2326_v17 = vshrl.u32 %v1917_v20, 16  ;;  %v2329_v19 = vshll.u32 %v1917_v20, 16  ;;  %v1943_v22 = vcombine.low %v1100_v59, %v1124_v50  ;;  %v1950_v32 = vrot.slane %v1942_v5, %v16939_v25 }
  0xcf   : > { %v17465_v26 = vld [vmem:[#allocation2 + $0x78] sm:$0xff]   ;;  %v2318_v18 = vrot.slane %v2316_v15, 6  ;;  %v2321_v30 = vrot.slane %v2319_v3, 7  ;;  %v1116_v33 = vcombine.high %v1108_v60, %v1108_v60  ;;  %v1934_v41 = vcombine.low %v1926_v14, %v1933_v21 }
  0xd0   : > { %v2328_v37 = vrot.slane %v2326_v17, 6  ;;  %v2331_v38 = vrot.slane %v2329_v19, 7  ;;  %v1957_v45 = vrot.slane %v1943_v22, %v16939_v25  ;;  %v2729_v9 = vor.u32 %v2727_v13, %v2725_v0 }
  0xd1   : > { %v2731_v43 = vshll.u32 %v17465_v26, 16  ;;  %v2322_v31 = vor.u32 %v2321_v30, %v2318_v18  ;;  %v17471_v36 = vrot.slane %v13865_v16, %v16936_v24  ;;  %v1941_v42 = vrot.slane %v1934_v41, %v16939_v25 }
  0xd2   : > { %v2332_v46 = vor.u32 %v2331_v38, %v2328_v37  ;;  %v1958_v28 = vcombine.low %v1950_v32, %v1957_v45  ;;  %v1138_v35 = vrot.slane %v1116_v33, %v16936_v24  ;;  %v1146_v60 = vcombine.high %v1124_v50, %v1124_v50 }
  0xd3   : > { %v2733_v1 = vrot.slane %v2731_v43, 1  ;;  %v2323_v34 = vsel %vm17012_vm8, %v2314_v57, %v2322_v31  ;;  %v2324_v29 = vrot.slane %v2322_v31, 4  ;;  %v2336_v54 = vshrl.u32 %v1941_v42, 16 }
  0xd4   : > { %2447 = vst.msk [vmem:[#allocation2 + $0x80] sm:$0xf] %vm21875_vm0, %v2323_v34  ;;  %v1965_v53 = vrot.slane %v1958_v28, %v16939_v25  ;;  %v2339_v48 = vshll.u32 %v1941_v42, 16  ;;  %v2334_v23 = vrot.slane %v2332_v46, 4  ;;  %v17484_v47 = vrot.slane %v17471_v36, %v16936_v24 }
  0xd5   : > { %v2734_v55 = vsel %vm21874_vm9, %v2729_v9, %v2733_v1  ;;  %v2333_v51 = vsel %vm17012_vm8, %v2324_v29, %v2332_v46  ;;  %v2338_v57 = vrot.slane %v2336_v54, 6  ;;  %v1148_v63 = vcombine.high %v1138_v35, %v1138_v35 }
  0xd6   : > { %15029 = vmatprep.mubr.msk.bf16.mxu0 %vm21873_vm10, %v2734_v55  ;;  %2448 = vst.msk [vmem:[#allocation2 + $0x84] sm:$0xf] %vm21875_vm0, %v2333_v51  ;;  %v2341_v10 = vrot.slane %v2339_v48, 7  ;;  %v2346_v58 = vshrl.u32 %v1965_v53, 16  ;;  %v2349_v59 = vshll.u32 %v1965_v53, 16  ;;  %v1967_v13 = vcombine.low %v1146_v60, %v17484_v47  ;;  %v16506_v51 = vld [vmem:[%s21861_s1 + $0x48] sm:$0xff]  }
  0xd7   : > { %v1966_v5 = vcombine.low %v1138_v35, %v1148_v63  ;;  %v2735_v15 = vshrl.u32 %v17465_v26, 16  ;;  %v17548_v60 = vld [vmem:[#allocation2 + $0x20] sm:$0xff]   ;;  %vm21869_vm11 = vcmask 1046528   ;;  %vm21872_vm12 = vsmask.f32 6400 }
  0xd8   : > { %v2342_v0 = vor.u32 %v2341_v10, %v2338_v57  ;;  %v2348_v40 = vrot.slane %v2346_v58, 6  ;;  %v2351_v4 = vrot.slane %v2349_v59, 7  ;;  %v1981_v50 = vrot.slane %v1967_v13, %v16939_v25  ;;  %v16672_v57 = vld [vmem:[%s21861_s1 + $0x40] sm:$0xff]   ;;  %v17534_v10 = vld [vmem:[#allocation2 + $0x10] sm:$0xff]   ;;  %v16508_v58 = vld [vmem:[%s21861_s1 + $0x58] sm:$0xff]  }
  0xd9   : > { %v1974_v3 = vrot.slane %v1966_v5, %v16939_v25  ;;  %v2737_v21 = vor.u32 %v2735_v15, %v2733_v1  ;;  %v17544_v59 = vld [vmem:[#allocation2 + $0x18] sm:$0xff]   ;;  %v16509_v63 = vld [vmem:[%s21861_s1 + $0x60] sm:$0xff]   ;;  %v1117_v5 = vcombine.high %v17471_v36, %v17471_v36  ;;  %vm21871_vm13 = vcmask 1045504  }
  0xda   : > { %v2343_v20 = vsel %vm17012_vm8, %v2334_v23, %v2342_v0  ;;  %v2344_v14 = vrot.slane %v2342_v0, 4  ;;  %v2352_v7 = vor.u32 %v2351_v4, %v2348_v40  ;;  %v17527_v23 = vld [vmem:[#allocation2 + $0x8] sm:$0xff]   ;;  %v17559_v40 = vld [vmem:[#allocation2 + $0x30] sm:$0xff]   ;;  %v17563_v4 = vld [vmem:[#allocation2 + $0x38] sm:$0xff]   ;;  %vm21870_vm14 = vsmask.f32 5376 }
  0xdb   : > { %2449 = vst.msk [vmem:[#allocation2 + $0x88] sm:$0xf] %vm21875_vm0, %v2343_v20  ;;  %v1982_v19 = vcombine.low %v1974_v3, %v1981_v50  ;;  %v17555_v0 = vld [vmem:[#allocation2 + $0x28] sm:$0xff]   ;;  %v1145_v13 = vrot.slane %v1117_v5, %v16936_v24  ;;  %v16679_v3 = vld [vmem:[#allocation2 + $0x4] sm:$0xf]  ;;  %v3287_v5 = vrot.slane %v17337_v52, 1 }
  0xdc   : > { %v2353_v16 = vsel %vm17012_vm8, %v2344_v14, %v2352_v7  ;;  %v2354_v41 = vrot.slane %v2352_v7, 4  ;;  %v3252_v14 = vld [vmem:[#allocation2] sm:$0xe]  ;;  %vm21868_vm15 = vcmask 1044480  }
  0xdd   : > { %v17497_v17 = vld [vmem:[#allocation2 + $0x80] sm:$0xff]   ;;  %2450 = vst.msk [vmem:[#allocation2 + $0x8c] sm:$0xf] %vm21875_vm0, %v2353_v16  ;;  %v1989_v18 = vrot.slane %v1982_v19, %v16939_v25  ;;  %v1149_v20 = vcombine.high %v1145_v13, %v1145_v13  ;;  %v13945_v24 = vcombine.low %v3252_v14, %v16679_v3  ;;  %v3267_v16 = vrot.slane %v17527_v23, 1  ;;  %v3594_v3 = vld [vmem:[#allocation2 + $0x8] sm:$0xe] }
  0xde   : > { %v2739_v22 = vshll.u32 %v17497_v17, 16  ;;  %v2743_v32 = vshrl.u32 %v17497_v17, 16 }
  0xdf   : > { %v2356_v33 = vshrl.u32 %v1989_v18, 16  ;;  %v2359_v37 = vshll.u32 %v1989_v18, 16  ;;  %v1990_v7 = vcombine.low %v1145_v13, %v1149_v20  ;;  %v3291_v20 = vrot.slane %v17406_v44, 1 }
  0xe0   : > { %v2741_v30 = vrot.slane %v2739_v22, 1 }
  0xe1   : > { %v2358_v45 = vrot.slane %v2356_v33, 6  ;;  %v2361_v9 = vrot.slane %v2359_v37, 7  ;;  %v1998_v36 = vrot.slane %v1990_v7, %v16939_v25 }
  0xe2   : > { %v2742_v38 = vsel %vm21874_vm9, %v2737_v21, %v2741_v30  ;;  %v2745_v46 = vor.u32 %v2743_v32, %v2741_v30 }
  0xe3   : > { %15030 = vmatmul.mubr.msk.bf16.gmra.mrb[28].mxu0 %vm21873_vm10, %v2742_v38  ;;  %v17507_v31 = vor.u32 %v2361_v9, %v2358_v45  ;;  %v3271_v38 = vrot.slane %v17544_v59, 1  ;;  %v2453_v45 = vld [vmem:[#allocation2 + $0x98] sm:$0x3] }
  0xe4   : > { %v17505_v43 = vld [vmem:[#allocation2 + $0x88] sm:$0xff]  }
  0xe5   : > { %v2747_v42 = vshll.u32 %v17505_v43, 16  ;;  %v2363_v28 = vsel %vm17012_vm8, %v2354_v41, %v17507_v31  ;;  %v2751_v29 = vshrl.u32 %v17505_v43, 16  ;;  %v2364_v30 = vrot.slane %v17507_v31, 4 }
  0xe6   : > { %2451 = vst.msk [vmem:[#allocation2 + $0x90] sm:$0xf] %vm21875_vm0, %v2363_v28  ;;  %v3273_v28 = vrot.slane %v17548_v60, 1 }
  0xe7   : > { %v2749_v1 = vrot.slane %v2747_v42, 1  ;;  %v16510_v42 = vld [vmem:[%s21861_s1 + $0x68] sm:$0xff]  }
  0xe9   : > { %v2750_v34 = vsel %vm21874_vm9, %v2745_v46, %v2749_v1  ;;  %v2753_v53 = vor.u32 %v2751_v29, %v2749_v1  ;;  %v3275_v1 = vrot.slane %v17555_v0, 1 }
  0xea   : > { %15033 = vmatprep.mubr.msk.bf16.mxu0 %vm21873_vm10, %v2750_v34  ;;  %v16511_v34 = vld [vmem:[%s21861_s1 + $0x70] sm:$0xff]  }
  0xed   : > { %v17517_v35 = vld [vmem:[#allocation2 + $0x90] ss:$0 sps:$4 sm:$0x11]  }
  0xee   : > { %v2755_v54 = vshll.u32 %v17517_v35, 16 }
  0xf0   : > { %v2757_v48 = vrot.slane %v2755_v54, 1  ;;  %v3274_v54 = vsel %vm21869_vm11, %v3271_v38, %v3273_v28 }
  0xf2   : > { %v2758_v55 = vsel %vm21874_vm9, %v2753_v53, %v2757_v48  ;;  %v3276_v48 = vsel %vm21869_vm11, %v3273_v28, %v3275_v1  ;;  %v16531_v28 = vld [vmem:[%s21861_s1 + $0x98] sm:$0xff]  }
  0xf3   : > { %15034 = vmatmul.mubr.msk.bf16.gmra.mrb[32].mxu0 %vm21873_vm10, %v2758_v55  ;;  %v16512_v55 = vld [vmem:[%s21861_s1 + $0x78] sm:$0xff]  }
  0xf4   : > { %15045 = vmatprep.mubr.msk.bf16.mxu0 %vm21873_vm10, %v16954_v39  ;;  %v16507_v39 = vld [vmem:[%s21861_s1 + $0x50] sm:$0xff]  }
  0xfb   : > { %15046 = vmatmul.mubr.msk.bf16.vlgmr.msra.gmra.mrb[0].mxu0 %vm21873_vm10, %v17527_v23  ;;  %v3279_v23 = vrot.slane %v17563_v4, 1 }
  0xfc   : > { %15082 = vmatpush3.bf16.msra.mxu0 %v16672_v57  ;;  %15049 = vmatprep.mubr.msk.bf16.mxu0 %vm21873_vm10, %v17534_v10  ;;  %v16515_v57 = vld [vmem:[%s21861_s1 + $0x80] sm:$0xff]  }
  0xfd   : > { %15083 = vmatprep.subr.bf16.mxu0 %v16506_v51 }
 0x100   : > { %15084 = vmatpush3.bf16.msra.mxu0 %v16506_v51  ;;  %v3277_v51 = vrot.slane %v17559_v40, 1 }
 0x101   : > { %15085 = vmatprep.subr.bf16.mxu0 %v16507_v39 }
 0x103   : > { %15050 = vmatmul.mubr.msk.bf16.gmra.mrb[4].mxu0 %vm21873_vm10, %v17544_v59 }
 0x104   : > { %15053 = vmatprep.mubr.msk.bf16.mxu0 %vm21873_vm10, %v17548_v60  ;;  %15086 = vmatpush3.bf16.msra.mxu0 %v16507_v39  ;;  %v3280_v39 = vsel %vm21869_vm11, %v3277_v51, %v3279_v23  ;;  %v16681_v60 = vld [vmem:[#allocation2 + $0x48] sm:$0xff]  }
 0x105   : > { %15087 = vmatprep.subr.bf16.mxu0 %v16508_v58 }
 0x108   : > { %15088 = vmatpush3.bf16.msra.mxu0 %v16508_v58  ;;  %v16680_v58 = vld [vmem:[#allocation2 + $0x40] sm:$0xff]  }
 0x109   : > { %15125 = vmatprep.subr.bf16.mxu0 %v16509_v63  ;;  %v3281_v59 = vrot.slane %v16680_v58, 1  ;;  %v17734_v58 = vld [vmem:[#allocation2 + $0x60] sm:$0xff]  }
 0x10b   : > { %15054 = vmatmul.mubr.msk.bf16.gmra.mrb[8].mxu0 %vm21873_vm10, %v17555_v0  ;;  %v3282_v0 = vsel %vm21869_vm11, %v3279_v23, %v3281_v59 }
 0x10c   : > { %15057 = vmatprep.mubr.msk.bf16.mxu0 %vm21873_vm10, %v17559_v40 }
 0x113   : > { %15058 = vmatmul.mubr.msk.bf16.gmra.mrb[12].mxu0 %vm21873_vm10, %v17563_v4  ;;  %v3285_v4 = vrot.slane %v17315_v11, 1 }
 0x114   : > { %15061 = vmatprep.mubr.msk.bf16.mxu0 %vm21873_vm10, %v17237_v27  ;;  %v1147_v27 = vcombine.high %v17484_v47, %v17484_v47  ;;  %v3266_v47 = vrot.slane %v13945_v24, 1  ;;  %v17661_v24 = vld [vmem:[#allocation2 + $0xc] sm:$0xf] }
 0x116   : > { %v3268_v32 = vsel %vm21869_vm11, %v3266_v47, %v3267_v16 }
 0x11b   : > { %15062 = vmatmul.mubr.msk.bf16.gmra.mrb[16].mxu0 %vm21873_vm10, %v17269_v2  ;;  %v1991_v2 = vcombine.low %v1147_v27, %v16968_v49  ;;  %v3288_v27 = vsel %vm21869_vm11, %v3285_v4, %v3287_v5 }
 0x11c   : > { %15065 = vmatprep.mubr.msk.bf16.mxu0 %vm21873_vm10, %v17315_v11  ;;  %v3293_v11 = vrot.slane %v17440_v62, 1 }
 0x11d   : > { %v2005_v15 = vrot.slane %v1991_v2, %v16939_v25  ;;  %v3289_v2 = vrot.slane %v17371_v56, 1 }
 0x11f   : > { %v2006_v50 = vcombine.low %v1998_v36, %v2005_v15  ;;  %v3290_v14 = vsel %vm21869_vm11, %v3287_v5, %v3289_v2  ;;  %v3292_v7 = vsel %vm21869_vm11, %v3289_v2, %v3291_v20  ;;  %v3294_v36 = vsel %vm21869_vm11, %v3291_v20, %v3293_v11  ;;  %v17751_v2 = vld [vmem:[#allocation2 + $0x78] sm:$0xff]  }
 0x121   : > { %v2013_v49 = vrot.slane %v2006_v50, %v16939_v25  ;;  %v3269_v25 = vrot.slane %v17534_v10, 1  ;;  %v3278_v10 = vsel %vm21869_vm11, %v3275_v1, %v3277_v51 }
 0x123   : > { %15066 = vmatmul.mubr.msk.bf16.gmra.mrb[20].mxu0 %vm21873_vm10, %v17337_v52  ;;  %v2366_v19 = vshrl.u32 %v2013_v49, 16  ;;  %v2369_v21 = vshll.u32 %v2013_v49, 16  ;;  %v3270_v31 = vsel %vm21869_vm11, %v3267_v16, %v3269_v25  ;;  %v3272_v46 = vsel %vm21869_vm11, %v3269_v25, %v3271_v38  ;;  %v17668_v49 = vld [vmem:[#allocation2 + $0x10] sm:$0xff]  }
 0x124   : > { %15069 = vmatprep.mubr.msk.bf16.mxu0 %vm21873_vm10, %v17371_v56  ;;  %v3295_v52 = vrot.slane %v17465_v26, 1  ;;  %v3297_v56 = vrot.slane %v17497_v17, 1  ;;  %v3734_v47 = vrot.slane %v17668_v49, 1  ;;  %v17689_v25 = vld [vmem:[#allocation2 + $0x30] sm:$0xff]  }
 0x125   : > { %v2368_v22 = vrot.slane %v2366_v19, 6  ;;  %v2371_v18 = vrot.slane %v2369_v21, 7  ;;  %v17676_v19 = vld [vmem:[#allocation2 + $0x18] sm:$0xff]  }
 0x126   : > { %v3296_v15 = vsel %vm21869_vm11, %v3293_v11, %v3295_v52  ;;  %v3298_v50 = vsel %vm21869_vm11, %v3295_v52, %v3297_v56 }
 0x127   : > { %v2372_v33 = vor.u32 %v2371_v18, %v2368_v22  ;;  %v17679_v22 = vld [vmem:[#allocation2 + $0x20] sm:$0xff]   ;;  %v3736_v18 = vrot.slane %v17676_v19, 1 }
 0x129   : > { %v2374_v37 = vrot.slane %v2372_v33, 4  ;;  %v2373_v41 = vsel %vm17012_vm8, %v2364_v30, %v2372_v33  ;;  %v3737_v30 = vsel %vm21869_vm11, %v3734_v47, %v3736_v18 }
 0x12a   : > { %2452 = vst.msk [vmem:[#allocation2 + $0x94] sm:$0xf] %vm21875_vm0, %v2373_v41  ;;  %v3742_v41 = vrot.slane %v17689_v25, 1 }
 0x12b   : > { %15070 = vmatmul.mubr.msk.bf16.gmra.mrb[24].mxu0 %vm21873_vm10, %v17406_v44  ;;  %v2454_v9 = vsel %vm16918_vm3, %v2374_v37, %v2453_v45  ;;  %v3299_v44 = vrot.slane %v17505_v43, 1  ;;  %v16521_v37 = vld [vmem:[%s21861_s1 + $0x88] sm:$0xff]   ;;  %v16526_v45 = vld [vmem:[%s21861_s1 + $0x90] sm:$0xff]  }
 0x12c   : > { %15073 = vmatprep.mubr.msk.bf16.mxu0 %vm21873_vm10, %v17440_v62  ;;  %2455 = vst [vmem:[#allocation2 + $0x98] sm:$0x3] %v2454_v9 }
 0x12d   : > { %v3300_v62 = vsel %vm21869_vm11, %v3297_v56, %v3299_v44 }
 0x133   : > { %15074 = vmatmul.mubr.msk.bf16.gmra.mrb[28].mxu0 %vm21873_vm10, %v17465_v26  ;;  %v2456_v29 = vld [vmem:[#allocation2 + $0x98] sm:$0xe]  ;;  %v17666_v26 = vcombine.low %v3594_v3, %v17661_v24 }
 0x134   : > { %15077 = vmatprep.mubr.msk.bf16.mxu0 %vm21873_vm10, %v17497_v17  ;;  %v2457_v53 = vsel %vm17004_vm7, 0, %v2456_v29  ;;  %v3301_v17 = vrot.slane %v17517_v35, 1  ;;  %v3738_v35 = vrot.slane %v17679_v22, 1  ;;  %v17717_v29 = vld [vmem:[%s21861_s1 + $0xa0] sm:$0xff]  }
 0x135   : > { %2458 = vst [vmem:[#allocation2 + $0x98] sm:$0xe] %v2457_v53 }
 0x136   : > { %v3302_v16 = vsel %vm21869_vm11, %v3299_v44, %v3301_v17  ;;  %v3739_v33 = vsel %vm21869_vm11, %v3736_v18, %v3738_v35  ;;  %v4084_v17 = vshrl.u32 %v17668_v49, 16 }
 0x13b   : > { %15078 = vmatmul.mubr.msk.bf16.gmra.mrb[32].mxu0 %vm21873_vm10, %v17505_v43  ;;  %v3733_v43 = vrot.slane %v17666_v26, 1 }
 0x13c   : > { %15089 = vmatprep.mubr.msk.bf16.mxu0 %vm21873_vm10, %v3268_v32  ;;  %v17686_v32 = vld [vmem:[#allocation2 + $0x28] sm:$0xff]  }
 0x13d   : > { %v3735_v21 = vsel %vm21869_vm11, %v3733_v43, %v3734_v47  ;;  %v3740_v38 = vrot.slane %v17686_v32, 1  ;;  %v4087_v43 = vshll.u32 %v17668_v49, 16 }
 0x13f   : > { %v3741_v9 = vsel %vm21869_vm11, %v3738_v35, %v3740_v38 }
 0x143   : > { %15090 = vmatmul.mubr.msk.bf16.vlgmr.msra.gmra.mrb[0].mxu0 %vm21873_vm10, %v3270_v31  ;;  %v17702_v31 = vld [vmem:[#allocation2 + $0x38] sm:$0xff]  }
 0x144   : > { %15126 = vmatpush3.bf16.msra.mxu0 %v16509_v63  ;;  %15093 = vmatprep.mubr.msk.bf16.mxu0 %vm21873_vm10, %v3272_v46  ;;  %v3283_v63 = vrot.slane %v16681_v60, 1  ;;  %v3743_v46 = vsel %vm21869_vm11, %v3740_v38, %v3742_v41  ;;  %v3744_v1 = vrot.slane %v17702_v31, 1  ;;  %v3754_v60 = vrot.slane %v17734_v58, 1 }
 0x145   : > { %15127 = vmatprep.subr.bf16.mxu0 %v16510_v42  ;;  %v4096_v38 = vshll.u32 %v17676_v19, 16 }
 0x146   : > { %v3284_v40 = vsel %vm21869_vm11, %v3281_v59, %v3283_v63  ;;  %v3286_v13 = vsel %vm21869_vm11, %v3283_v63, %v3285_v4  ;;  %v3745_v53 = vsel %vm21869_vm11, %v3742_v41, %v3744_v1  ;;  %v17744_v4 = vld [vmem:[#allocation2 + $0x70] sm:$0xff]  }
 0x148   : > { %15128 = vmatpush3.bf16.msra.mxu0 %v16510_v42  ;;  %v17705_v42 = vld [vmem:[#allocation2 + $0x40] sm:$0xff]  }
 0x149   : > { %15129 = vmatprep.subr.bf16.mxu0 %v16511_v34 }
 0x14b   : > { %15094 = vmatmul.mubr.msk.bf16.gmra.mrb[4].mxu0 %vm21873_vm10, %v3274_v54  ;;  %v17720_v54 = vld [vmem:[#allocation2 + $0x48] sm:$0xff]  }
 0x14c   : > { %15097 = vmatprep.mubr.msk.bf16.mxu0 %vm21873_vm10, %v3276_v48  ;;  %15130 = vmatpush3.bf16.msra.mxu0 %v16511_v34  ;;  %v3746_v34 = vrot.slane %v17705_v42, 1  ;;  %v3748_v51 = vrot.slane %v17720_v54, 1 }
 0x14d   : > { %15131 = vmatprep.subr.bf16.mxu0 %v16512_v55 }
 0x14e   : > { %v3747_v48 = vsel %vm21869_vm11, %v3744_v1, %v3746_v34 }
 0x150   : > { %15132 = vmatpush3.bf16.msra.mxu0 %v16512_v55  ;;  %v17723_v55 = vld [vmem:[#allocation2 + $0x50] sm:$0xff]  }
 0x151   : > { %15169 = vmatprep.subr.bf16.mxu0 %v16515_v57  ;;  %v3750_v23 = vrot.slane %v17723_v55, 1 }
 0x153   : > { %15098 = vmatmul.mubr.msk.bf16.gmra.mrb[8].mxu0 %vm21873_vm10, %v3278_v10  ;;  %v17731_v10 = vld [vmem:[#allocation2 + $0x58] sm:$0xff]  }
 0x154   : > { %15101 = vmatprep.mubr.msk.bf16.mxu0 %vm21873_vm10, %v3280_v39  ;;  %v3751_v39 = vsel %vm21869_vm11, %v3748_v51, %v3750_v23  ;;  %v3752_v59 = vrot.slane %v17731_v10, 1 }
 0x156   : > { %v3753_v63 = vsel %vm21869_vm11, %v3750_v23, %v3752_v59 }
 0x15b   : > { %15102 = vmatmul.mubr.msk.bf16.gmra.mrb[12].mxu0 %vm21873_vm10, %v3282_v0  ;;  %v17741_v0 = vld [vmem:[#allocation2 + $0x68] sm:$0xff]  }
 0x15c   : > { %15105 = vmatprep.mubr.msk.bf16.mxu0 %vm21873_vm10, %v3284_v40  ;;  %v3755_v40 = vsel %vm21869_vm11, %v3752_v59, %v3754_v60  ;;  %v3756_v5 = vrot.slane %v17741_v0, 1 }
 0x163   : > { %15106 = vmatmul.mubr.msk.bf16.gmra.mrb[16].mxu0 %vm21873_vm10, %v3286_v13  ;;  %v3758_v13 = vrot.slane %v17744_v4, 1 }
 0x164   : > { %15109 = vmatprep.mubr.msk.bf16.mxu0 %vm21873_vm10, %v3288_v27  ;;  %v3757_v27 = vsel %vm21869_vm11, %v3754_v60, %v3756_v5  ;;  %v4120_v60 = vshrl.u32 %v17689_v25, 16 }
 0x165   : > { %v3759_v20 = vsel %vm21869_vm11, %v3756_v5, %v3758_v13 }
 0x16b   : > { %15110 = vmatmul.mubr.msk.bf16.gmra.mrb[20].mxu0 %vm21873_vm10, %v3290_v14  ;;  %v17754_v14 = vld [vmem:[#allocation2 + $0x80] sm:$0xff]  }
 0x16c   : > { %15113 = vmatprep.mubr.msk.bf16.mxu0 %vm21873_vm10, %v3292_v7  ;;  %v3760_v7 = vrot.slane %v17751_v2, 1  ;;  %v3762_v11 = vrot.slane %v17754_v14, 1 }
 0x16e   : > { %v3761_v52 = vsel %vm21869_vm11, %v3758_v13, %v3760_v7  ;;  %v3763_v56 = vsel %vm21869_vm11, %v3760_v7, %v3762_v11 }
 0x173   : > { %15114 = vmatmul.mubr.msk.bf16.gmra.mrb[24].mxu0 %vm21873_vm10, %v3294_v36  ;;  %v17761_v36 = vld [vmem:[#allocation2 + $0x88] sm:$0xff]  }
 0x174   : > { %15117 = vmatprep.mubr.msk.bf16.mxu0 %vm21873_vm10, %v3296_v15  ;;  %v17763_v15 = vld [vmem:[#allocation2 + $0x90] sm:$0xff]   ;;  %v3764_v44 = vrot.slane %v17761_v36, 1 }
 0x175   : > { %v3766_v3 = vrot.slane %v17763_v15, 1 }
 0x176   : > { %v3765_v47 = vsel %vm21869_vm11, %v3762_v11, %v3764_v44  ;;  %v16537_v11 = vld [vmem:[%s21861_s1 + $0xa8] sm:$0xff]  }
 0x17b   : > { %15118 = vmatmul.mubr.msk.bf16.gmra.mrb[28].mxu0 %vm21873_vm10, %v3298_v50  ;;  %v4076_v50 = vshrl.u32 %v17666_v26, 16 }
 0x17c   : > { %15121 = vmatprep.mubr.msk.bf16.mxu0 %vm21873_vm10, %v3300_v62  ;;  %v4079_v62 = vshll.u32 %v17666_v26, 16  ;;  %v4093_v26 = vshrl.u32 %v17676_v19, 16 }
 0x17d   : > { %v4078_v18 = vrot.slane %v4076_v50, 1  ;;  %v4138_v50 = vshrl.u32 %v17705_v42, 16 }
 0x17e   : > { %v4081_v35 = vrot.slane %v4079_v62, 2  ;;  %v4095_v1 = vrot.slane %v4093_v26, 1  ;;  %v4141_v62 = vshll.u32 %v17705_v42, 16 }
 0x180   : > { %v4082_v41 = vor.u32 %v4081_v35, %v4078_v18  ;;  %v4143_v18 = vrot.slane %v4141_v62, 2  ;;  %v16539_v35 = vld [vmem:[%s21861_s1 + $0xb8] sm:$0xff]  }
 0x183   : > { %15122 = vmatmul.mubr.msk.bf16.gmra.mrb[32].mxu0 %vm21873_vm10, %v3302_v16  ;;  %v3767_v16 = vsel %vm21869_vm11, %v3764_v44, %v3766_v3  ;;  %v4132_v44 = vshll.u32 %v17702_v31, 16 }
 0x184   : > { %15133 = vmatprep.mubr.msk.bf16.mxu0 %vm21873_vm10, %v3735_v21  ;;  %v16535_v21 = vld [vmem:[#allocation2 + $0x98] ss:$0 sps:$4 sm:$0x11]  }
 0x18b   : > { %15134 = vmatmul.mubr.msk.bf16.vlgmr.msra.gmra.mrb[0].mxu0 %vm21873_vm10, %v3737_v30  ;;  %v4086_v30 = vrot.slane %v4084_v17, 1  ;;  %v16538_v17 = vld [vmem:[%s21861_s1 + $0xb0] sm:$0xff]  }
 0x18c   : > { %15170 = vmatpush3.bf16.msra.mxu0 %v16515_v57  ;;  %15137 = vmatprep.mubr.msk.bf16.mxu0 %vm21873_vm10, %v3739_v33  ;;  %v3749_v57 = vsel %vm21869_vm11, %v3746_v34, %v3748_v51  ;;  %v4089_v33 = vrot.slane %v4087_v43, 2  ;;  %v4098_v34 = vrot.slane %v4096_v38, 2  ;;  %v4156_v38 = vshrl.u32 %v17723_v55, 16 }
 0x18d   : > { %15171 = vmatprep.subr.bf16.mxu0 %v16521_v37 }
 0x18e   : > { %v4099_v23 = vor.u32 %v4098_v34, %v4095_v1  ;;  %v4158_v34 = vrot.slane %v4156_v38, 1 }
 0x190   : > { %15172 = vmatpush3.bf16.msra.mxu0 %v16521_v37  ;;  %v3768_v37 = vrot.slane %v16535_v21, 1  ;;  %v4140_v21 = vrot.slane %v4138_v50, 1 }
 0x191   : > { %15173 = vmatprep.subr.bf16.mxu0 %v16526_v45 }
 0x192   : > { %v4144_v26 = vor.u32 %v4143_v18, %v4140_v21  ;;  %v4204_v21 = vshll.u32 %v17751_v2, 16 }
 0x193   : > { %15138 = vmatmul.mubr.msk.bf16.gmra.mrb[4].mxu0 %vm21873_vm10, %v3741_v9  ;;  %v4102_v9 = vshrl.u32 %v17679_v22, 16 }
 0x194   : > { %15141 = vmatprep.mubr.msk.bf16.mxu0 %vm21873_vm10, %v3743_v46  ;;  %15174 = vmatpush3.bf16.msra.mxu0 %v16526_v45  ;;  %v4090_v45 = vor.u32 %v4089_v33, %v4086_v30  ;;  %v4105_v46 = vshll.u32 %v17679_v22, 16  ;;  %v4147_v33 = vshrl.u32 %v17720_v54, 16 }
 0x195   : > { %15175 = vmatprep.subr.bf16.mxu0 %v16531_v28 }
 0x196   : > { %v4107_v51 = vrot.slane %v4105_v46, 2  ;;  %v4149_v46 = vrot.slane %v4147_v33, 1 }
 0x198   : > { %15176 = vmatpush3.bf16.msra.mxu0 %v16531_v28  ;;  %v3769_v28 = vsel %vm21869_vm11, %v3766_v3, %v3768_v37  ;;  %v4150_v37 = vshll.u32 %v17720_v54, 16 }
 0x199   : > { %15213 = vmatprep.subr.bf16.mxu0 %v17717_v29 }
 0x19b   : > { %15142 = vmatmul.mubr.msk.bf16.gmra.mrb[8].mxu0 %vm21873_vm10, %v3745_v53  ;;  %v4091_v53 = vsel %vm21872_vm12, %v4082_v41, %v4090_v45  ;;  %v4159_v41 = vshll.u32 %v17723_v55, 16 }
 0x19c   : > { %15145 = vmatprep.mubr.msk.bf16.mxu0 %vm21873_vm10, %v3747_v48  ;;  %v4104_v48 = vrot.slane %v4102_v9, 1 }
 0x19e   : > { %v4108_v59 = vor.u32 %v4107_v51, %v4104_v48  ;;  %v4165_v51 = vshrl.u32 %v17731_v10, 16 }
 0x1a3   : > { %15146 = vmatmul.mubr.msk.bf16.gmra.mrb[12].mxu0 %vm21873_vm10, %v3749_v57  ;;  %v4111_v57 = vshrl.u32 %v17686_v32, 16 }
 0x1a4   : > { %15149 = vmatprep.mubr.msk.bf16.mxu0 %vm21873_vm10, %v3751_v39  ;;  %v4114_v39 = vshll.u32 %v17686_v32, 16 }
 0x1a5   : > { %v4113_v5 = vrot.slane %v4111_v57, 1 }
 0x1a6   : > { %v4116_v13 = vrot.slane %v4114_v39, 2  ;;  %v4174_v39 = vshrl.u32 %v17734_v58, 16 }
 0x1ab   : > { %15150 = vmatmul.mubr.msk.bf16.gmra.mrb[16].mxu0 %vm21873_vm10, %v3753_v63  ;;  %v4123_v63 = vshll.u32 %v17689_v25, 16 }
 0x1ac   : > { %15153 = vmatprep.mubr.msk.bf16.mxu0 %vm21873_vm10, %v3755_v40  ;;  %v4100_v40 = vsel %vm21872_vm12, %v4090_v45, %v4099_v23  ;;  %v17819_v45 = vld [vmem:[%s21861_s1 + $0xc0] sm:$0xff]  }
 0x1ad   : > { %v4125_v7 = vrot.slane %v4123_v63, 2  ;;  %v4167_v63 = vrot.slane %v4165_v51, 1 }
 0x1b3   : > { %15154 = vmatmul.mubr.msk.bf16.gmra.mrb[20].mxu0 %vm21873_vm10, %v3757_v27  ;;  %v4109_v27 = vsel %vm21872_vm12, %v4099_v23, %v4108_v59  ;;  %v4168_v23 = vshll.u32 %v17731_v10, 16 }
 0x1b4   : > { %15157 = vmatprep.mubr.msk.bf16.mxu0 %vm21873_vm10, %v3759_v20  ;;  %v4122_v20 = vrot.slane %v4120_v60, 1 }
 0x1b6   : > { %v4126_v3 = vor.u32 %v4125_v7, %v4122_v20  ;;  %v4183_v7 = vshrl.u32 %v17741_v0, 16 }
 0x1b8   : > { %v4185_v50 = vrot.slane %v4183_v7, 1 }
 0x1bb   : > { %15158 = vmatmul.mubr.msk.bf16.gmra.mrb[24].mxu0 %vm21873_vm10, %v3761_v52  ;;  %v4117_v52 = vor.u32 %v4116_v13, %v4113_v5  ;;  %v4176_v13 = vrot.slane %v4174_v39, 1  ;;  %v17855_v39 = vld [vmem:[#allocation2 + $0x98] ss:$0 sps:$4 sm:$0x33]  }
 0x1bc   : > { %15161 = vmatprep.mubr.msk.bf16.mxu0 %vm21873_vm10, %v3763_v56  ;;  %v4129_v56 = vshrl.u32 %v17702_v31, 16 }
 0x1bd   : > { %v4118_v43 = vsel %vm21872_vm12, %v4108_v59, %v4117_v52  ;;  %v4177_v59 = vshll.u32 %v17734_v58, 16 }
 0x1c3   : > { %15162 = vmatmul.mubr.msk.bf16.gmra.mrb[28].mxu0 %vm21873_vm10, %v3765_v47  ;;  %v4134_v47 = vrot.slane %v4132_v44, 2  ;;  %v4195_v44 = vshll.u32 %v17744_v4, 16 }
 0x1c4   : > { %15165 = vmatprep.mubr.msk.bf16.mxu0 %vm21873_vm10, %v3767_v16  ;;  %v4127_v16 = vsel %vm21872_vm12, %v4117_v52, %v4126_v3 }
 0x1cb   : > { %15166 = vmatmul.mubr.msk.bf16.gmra.mrb[32].mxu0 %vm21873_vm10, %v3769_v28  ;;  %v4152_v28 = vrot.slane %v4150_v37, 2 }
 0x1cc   : > { %15177 = vmatprep.mubr.msk.bf16.mxu0 %vm21873_vm10, %v4091_v53  ;;  %v4161_v53 = vrot.slane %v4159_v41, 2 }
 0x1cd   : > { %v4153_v48 = vor.u32 %v4152_v28, %v4149_v46  ;;  %v4219_v28 = vshrl.u32 %v17761_v36, 16 }
 0x1ce   : > { %v4162_v57 = vor.u32 %v4161_v53, %v4158_v34  ;;  %v4228_v53 = vshrl.u32 %v17763_v15, 16 }
 0x1cf   : > { %v4154_v60 = vsel %vm21872_vm12, %v4144_v26, %v4153_v48 }
 0x1d0   : > { %v4163_v5 = vsel %vm21872_vm12, %v4153_v48, %v4162_v57  ;;  %v4231_v48 = vshll.u32 %v17763_v15, 16 }
 0x1d3   : > { %15178 = vmatmul.mubr.msk.bf16.vlgmr.msra.gmra.mrb[0].mxu0 %vm21873_vm10, %v4100_v40  ;;  %v4170_v40 = vrot.slane %v4168_v23, 2  ;;  %v4221_v23 = vrot.slane %v4219_v28, 1 }
 0x1d4   : > { %15214 = vmatpush3.bf16.msra.mxu0 %v17717_v29  ;;  %15181 = vmatprep.mubr.msk.bf16.mxu0 %vm21873_vm10, %v4109_v27  ;;  %v4131_v29 = vrot.slane %v4129_v56, 1  ;;  %v4179_v27 = vrot.slane %v4177_v59, 2  ;;  %v4192_v56 = vshrl.u32 %v17744_v4, 16 }
 0x1d5   : > { %15215 = vmatprep.subr.bf16.mxu0 %v16537_v11  ;;  %v4171_v20 = vor.u32 %v4170_v40, %v4167_v63  ;;  %v4233_v63 = vrot.slane %v4231_v48, 2 }
 0x1d6   : > { %v4135_v30 = vor.u32 %v4134_v47, %v4131_v29  ;;  %v4180_v52 = vor.u32 %v4179_v27, %v4176_v13  ;;  %v4197_v29 = vrot.slane %v4195_v44, 2  ;;  %v4240_v13 = vshll.u32 %v17855_v39, 16 }
 0x1d8   : > { %15216 = vmatpush3.bf16.msra.mxu0 %v16537_v11  ;;  %v4136_v9 = vsel %vm21872_vm12, %v4126_v3, %v4135_v30  ;;  %v4145_v1 = vsel %vm21872_vm12, %v4135_v30, %v4144_v26  ;;  %v4186_v11 = vshll.u32 %v17741_v0, 16  ;;  %v4172_v3 = vsel %vm21872_vm12, %v4162_v57, %v4171_v20 }
 0x1d9   : > { %15217 = vmatprep.subr.bf16.mxu0 %v16538_v17  ;;  %v4213_v30 = vshll.u32 %v17754_v14, 16  ;;  %v4206_v26 = vrot.slane %v4204_v21, 2  ;;  %v4557_v21 = vrot.slane %v17686_v32, 2  ;;  %v4561_v32 = vrot.slane %v17702_v31, 2 }
 0x1da   : > { %v4188_v62 = vrot.slane %v4186_v11, 2  ;;  %v4565_v31 = vrot.slane %v17720_v54, 2  ;;  %v4573_v54 = vrot.slane %v17741_v0, 2  ;;  %v4581_v0 = vrot.slane %v17761_v36, 2 }
 0x1db   : > { %15182 = vmatmul.mubr.msk.bf16.gmra.mrb[4].mxu0 %vm21873_vm10, %v4118_v43  ;;  %v4194_v43 = vrot.slane %v4192_v56, 1 }
 0x1dc   : > { %15185 = vmatprep.mubr.msk.bf16.mxu0 %vm21873_vm10, %v4127_v16  ;;  %15218 = vmatpush3.bf16.msra.mxu0 %v16538_v17  ;;  %v4181_v17 = vsel %vm21872_vm12, %v4171_v20, %v4180_v52  ;;  %v4189_v47 = vor.u32 %v4188_v62, %v4185_v50  ;;  %v4201_v16 = vshrl.u32 %v17751_v2, 16  ;;  %v4536_v20 = vld [vmem:[#allocation2 + $0x8] sm:$0xc]  ;;  %v4551_v62 = vrot.slane %v17668_v49, 2 }
 0x1dd   : > { %15219 = vmatprep.subr.bf16.mxu0 %v16539_v35  ;;  %v4198_v18 = vor.u32 %v4197_v29, %v4194_v43  ;;  %v14056_v44 = vcombine.low %v4536_v20, %v17661_v24  ;;  %v4553_v29 = vrot.slane %v17676_v19, 2  ;;  %v4555_v24 = vrot.slane %v17679_v22, 2  ;;  %v16542_v49 = vld [vmem:[%s21861_s1 + $0xc8] sm:$0xff]   ;;  %v16543_v22 = vld [vmem:[%s21861_s1 + $0xd0] sm:$0xff]  }
 0x1de   : > { %v4190_v33 = vsel %vm21872_vm12, %v4180_v52, %v4189_v47  ;;  %v4203_v37 = vrot.slane %v4201_v16, 1  ;;  %v4242_v52 = vrot.slane %v4240_v13, 2  ;;  %v4559_v19 = vrot.slane %v17689_v25, 2  ;;  %v17947_v13 = vld [vmem:[#allocation2 + $0x28] sm:$0xff]  }
 0x1df   : > { %v4199_v38 = vsel %vm21872_vm12, %v4189_v47, %v4198_v18  ;;  %v4550_v50 = vrot.slane %v14056_v44, 2  ;;  %v4554_v47 = vsel %vm21871_vm13, %v4551_v62, %v4553_v29  ;;  %v4556_v16 = vsel %vm21871_vm13, %v4553_v29, %v4555_v24  ;;  %v17973_v29 = vld [vmem:[#allocation2 + $0x48] sm:$0xff]  }
 0x1e0   : > { %15220 = vmatpush3.bf16.msra.mxu0 %v16539_v35  ;;  %v4210_v35 = vshrl.u32 %v17754_v14, 16  ;;  %v4207_v46 = vor.u32 %v4206_v26, %v4203_v37  ;;  %v4563_v25 = vrot.slane %v17705_v42, 2  ;;  %v4567_v26 = vrot.slane %v17723_v55, 2 }
 0x1e1   : > { %15257 = vmatprep.subr.bf16.mxu0 %v17819_v45  ;;  %v4552_v43 = vsel %vm21871_vm13, %v4550_v50, %v4551_v62  ;;  %v4575_v55 = vrot.slane %v17744_v4, 2  ;;  %v4583_v4 = vrot.slane %v17763_v15, 2  ;;  %v16558_v50 = vld [vmem:[%s21861_s1 + $0xf0] sm:$0xff]  }
 0x1e2   : > { %v4212_v41 = vrot.slane %v4210_v35, 1  ;;  %v4208_v51 = vsel %vm21872_vm12, %v4198_v18, %v4207_v46  ;;  %v4558_v18 = vsel %vm21871_vm13, %v4555_v24, %v4557_v21  ;;  %v4560_v35 = vsel %vm21871_vm13, %v4557_v21, %v4559_v19  ;;  %v16563_v24 = vld [vmem:[%s21861_s1 + $0xf8] sm:$0xff]  }
 0x1e3   : > { %15186 = vmatmul.mubr.msk.bf16.gmra.mrb[8].mxu0 %vm21873_vm10, %v4136_v9  ;;  %v4215_v9 = vrot.slane %v4213_v30, 2  ;;  %v16547_v30 = vld [vmem:[%s21861_s1 + $0xe0] sm:$0xff]   ;;  %v4564_v37 = vsel %vm21871_vm13, %v4561_v32, %v4563_v25  ;;  %v4566_v42 = vsel %vm21871_vm13, %v4563_v25, %v4565_v31 }
 0x1e4   : > { %15189 = vmatprep.mubr.msk.bf16.mxu0 %vm21873_vm10, %v4145_v1  ;;  %v4222_v1 = vshll.u32 %v17761_v36, 16  ;;  %v4585_v36 = vrot.slane %v17855_v39, 2  ;;  %v17999_v25 = vld [vmem:[#allocation2 + $0x60] sm:$0xff]  }
 0x1e5   : > { %v4216_v34 = vor.u32 %v4215_v9, %v4212_v41  ;;  %v4569_v41 = vrot.slane %v17731_v10, 2  ;;  %v4571_v9 = vrot.slane %v17734_v58, 2  ;;  %v4577_v10 = vrot.slane %v17751_v2, 2 }
 0x1e6   : > { %v4224_v57 = vrot.slane %v4222_v1, 2  ;;  %v4579_v58 = vrot.slane %v17754_v14, 2  ;;  %v4584_v2 = vsel %vm21871_vm13, %v4581_v0, %v4583_v4 }
 0x1e7   : > { %v4217_v59 = vsel %vm21872_vm12, %v4207_v46, %v4216_v34  ;;  %v4570_v46 = vsel %vm21871_vm13, %v4567_v26, %v4569_v41  ;;  %v4572_v28 = vsel %vm21871_vm13, %v4569_v41, %v4571_v9  ;;  %v4574_v1 = vsel %vm21871_vm13, %v4571_v9, %v4573_v54  ;;  %v18012_v41 = vld [vmem:[#allocation2 + $0x78] sm:$0xff]  }
 0x1e8   : > { %v4225_v40 = vor.u32 %v4224_v57, %v4221_v23  ;;  %v4580_v48 = vsel %vm21871_vm13, %v4577_v10, %v4579_v58  ;;  %v17929_v23 = vld [vmem:[#allocation2 + $0x14] sm:$0xf]  ;;  %v4582_v57 = vsel %vm21871_vm13, %v4579_v58, %v4581_v0 }
 0x1ea   : > { %v4226_v7 = vsel %vm21872_vm12, %v4216_v34, %v4225_v40  ;;  %v4576_v34 = vsel %vm21871_vm13, %v4573_v54, %v4575_v55  ;;  %v18019_v54 = vld [vmem:[#allocation2 + $0x80] sm:$0xff]  }
 0x1eb   : > { %15190 = vmatmul.mubr.msk.bf16.gmra.mrb[12].mxu0 %vm21873_vm10, %v4154_v60  ;;  %v4230_v60 = vrot.slane %v4228_v53, 1  ;;  %v4578_v53 = vsel %vm21871_vm13, %v4575_v55, %v4577_v10 }
 0x1ec   : > { %15193 = vmatprep.mubr.msk.bf16.mxu0 %vm21873_vm10, %v4163_v5  ;;  %v4237_v5 = vshrl.u32 %v17855_v39, 16  ;;  %v5022_v39 = vrot.slane %v17947_v13, 2 }
 0x1ed   : > { %v4234_v27 = vor.u32 %v4233_v63, %v4230_v60  ;;  %v4586_v63 = vsel %vm21871_vm13, %v4583_v4, %v4585_v36 }
 0x1ee   : > { %v4239_v11 = vrot.slane %v4237_v5, 1 }
 0x1ef   : > { %v4235_v56 = vsel %vm21872_vm12, %v4225_v40, %v4234_v27  ;;  %v17944_v40 = vld [vmem:[#allocation2 + $0x20] sm:$0xff]  }
 0x1f3   : > { %15194 = vmatmul.mubr.msk.bf16.gmra.mrb[16].mxu0 %vm21873_vm10, %v4172_v3  ;;  %v4243_v3 = vor.u32 %v4242_v52, %v4239_v11  ;;  %v17957_v52 = vld [vmem:[#allocation2 + $0x38] sm:$0xff]  }
 0x1f4   : > { %15197 = vmatprep.mubr.msk.bf16.mxu0 %vm21873_vm10, %v4181_v17 }
 0x1f5   : > { %v4244_v17 = vsel %vm21872_vm12, %v4234_v27, %v4243_v3  ;;  %v5020_v27 = vrot.slane %v17944_v40, 2  ;;  %v5026_v3 = vrot.slane %v17957_v52, 2 }
 0x1f7   : > { %v5023_v11 = vsel %vm21871_vm13, %v5020_v27, %v5022_v39 }
 0x1fb   : > { %15198 = vmatmul.mubr.msk.bf16.gmra.mrb[20].mxu0 %vm21873_vm10, %v4190_v33  ;;  %v4562_v33 = vsel %vm21871_vm13, %v4559_v19, %v4561_v32  ;;  %v17988_v19 = vld [vmem:[#allocation2 + $0x50] sm:$0xff]  }
 0x1fc   : > { %15201 = vmatprep.mubr.msk.bf16.mxu0 %vm21873_vm10, %v4199_v38  ;;  %v4568_v38 = vsel %vm21871_vm13, %v4565_v31, %v4567_v26 }
 0x203   : > { %15202 = vmatmul.mubr.msk.bf16.gmra.mrb[24].mxu0 %vm21873_vm10, %v4208_v51  ;;  %v4878_v51 = vld [vmem:[#allocation2 + $0x10] sm:$0xc] }
 0x204   : > { %15205 = vmatprep.mubr.msk.bf16.mxu0 %vm21873_vm10, %v4217_v59  ;;  %v17934_v14 = vcombine.low %v4878_v51, %v17929_v23  ;;  %v17936_v59 = vld [vmem:[#allocation2 + $0x18] sm:$0xff]  }
 0x205   : > { %v5018_v60 = vrot.slane %v17936_v59, 2  ;;  %v5368_v36 = vshrl.u32 %v17936_v59, 16 }
 0x206   : > { %v5017_v15 = vrot.slane %v17934_v14, 2 }
 0x207   : > { %v5021_v20 = vsel %vm21871_vm13, %v5018_v60, %v5020_v27 }
 0x208   : > { %v5019_v5 = vsel %vm21871_vm13, %v5017_v15, %v5018_v60  ;;  %v5371_v15 = vshll.u32 %v17936_v59, 16 }
 0x20b   : > { %15206 = vmatmul.mubr.msk.bf16.gmra.mrb[28].mxu0 %vm21873_vm10, %v4226_v7  ;;  %v17954_v7 = vld [vmem:[#allocation2 + $0x30] sm:$0xff]  }
 0x20c   : > { %15209 = vmatprep.mubr.msk.bf16.mxu0 %vm21873_vm10, %v4235_v56  ;;  %v16553_v56 = vld [vmem:[%s21861_s1 + $0xe8] sm:$0xff]   ;;  %v5024_v44 = vrot.slane %v17954_v7, 2 }
 0x20e   : > { %v5025_v62 = vsel %vm21871_vm13, %v5022_v39, %v5024_v44 }
 0x213   : > { %15210 = vmatmul.mubr.msk.bf16.gmra.mrb[32].mxu0 %vm21873_vm10, %v4244_v17  ;;  %v17970_v17 = vld [vmem:[#allocation2 + $0x40] sm:$0xff]  }
 0x214   : > { %15221 = vmatprep.mubr.msk.bf16.mxu0 %vm21873_vm10, %v4552_v43  ;;  %v5027_v43 = vsel %vm21871_vm13, %v5024_v44, %v5026_v3  ;;  %v5380_v44 = vshll.u32 %v17944_v40, 16 }
 0x21b   : > { %15222 = vmatmul.mubr.msk.bf16.vlgmr.msra.gmra.mrb[0].mxu0 %vm21873_vm10, %v4554_v47  ;;  %v5028_v47 = vrot.slane %v17970_v17, 2 }
 0x21c   : > { %15258 = vmatpush3.bf16.msra.mxu0 %v17819_v45  ;;  %15225 = vmatprep.mubr.msk.bf16.mxu0 %vm21873_vm10, %v4556_v16  ;;  %v16544_v45 = vld [vmem:[%s21861_s1 + $0xd8] sm:$0xff]   ;;  %v5030_v16 = vrot.slane %v17973_v29, 2 }
 0x21d   : > { %15259 = vmatprep.subr.bf16.mxu0 %v16542_v49  ;;  %v5029_v21 = vsel %vm21871_vm13, %v5026_v3, %v5028_v47 }
 0x220   : > { %15260 = vmatpush3.bf16.msra.mxu0 %v16542_v49  ;;  %v17985_v49 = vld [vmem:[%s21861_s1 + $0x100] sm:$0xff]  }
 0x221   : > { %15261 = vmatprep.subr.bf16.mxu0 %v16543_v22 }
 0x223   : > { %15226 = vmatmul.mubr.msk.bf16.gmra.mrb[4].mxu0 %vm21873_vm10, %v4558_v18  ;;  %v17991_v18 = vld [vmem:[#allocation2 + $0x58] sm:$0xff]  }
 0x224   : > { %15229 = vmatprep.mubr.msk.bf16.mxu0 %vm21873_vm10, %v4560_v35  ;;  %15262 = vmatpush3.bf16.msra.mxu0 %v16543_v22  ;;  %v5031_v22 = vsel %vm21871_vm13, %v5028_v47, %v5030_v16  ;;  %v5032_v35 = vrot.slane %v17988_v19, 2 }
 0x225   : > { %15263 = vmatprep.subr.bf16.mxu0 %v16544_v45 }
 0x226   : > { %v5033_v32 = vsel %vm21871_vm13, %v5030_v16, %v5032_v35  ;;  %v5382_v16 = vrot.slane %v5380_v44, 3  ;;  %v5440_v44 = vshrl.u32 %v17991_v18, 16 }
 0x228   : > { %15264 = vmatpush3.bf16.msra.mxu0 %v16544_v45  ;;  %v5034_v45 = vrot.slane %v17991_v18, 2 }
 0x229   : > { %15301 = vmatprep.subr.bf16.mxu0 %v16547_v30 }
 0x22b   : > { %15230 = vmatmul.mubr.msk.bf16.gmra.mrb[8].mxu0 %vm21873_vm10, %v4562_v33  ;;  %v18002_v33 = vld [vmem:[#allocation2 + $0x68] sm:$0xff]  }
 0x22c   : > { %15233 = vmatprep.mubr.msk.bf16.mxu0 %vm21873_vm10, %v4564_v37  ;;  %v5036_v37 = vrot.slane %v17999_v25, 2  ;;  %v5038_v31 = vrot.slane %v18002_v33, 2 }
 0x22e   : > { %v5037_v26 = vsel %vm21871_vm13, %v5034_v45, %v5036_v37 }
 0x233   : > { %15234 = vmatmul.mubr.msk.bf16.gmra.mrb[12].mxu0 %vm21873_vm10, %v4566_v42  ;;  %v18009_v42 = vld [vmem:[#allocation2 + $0x70] sm:$0xff]  }
 0x234   : > { %15237 = vmatprep.mubr.msk.bf16.mxu0 %vm21873_vm10, %v4568_v38  ;;  %v5039_v38 = vsel %vm21871_vm13, %v5036_v37, %v5038_v31  ;;  %v5040_v9 = vrot.slane %v18009_v42, 2 }
 0x23b   : > { %15238 = vmatmul.mubr.msk.bf16.gmra.mrb[16].mxu0 %vm21873_vm10, %v4570_v46  ;;  %v5042_v46 = vrot.slane %v18012_v41, 2 }
 0x23c   : > { %15241 = vmatprep.mubr.msk.bf16.mxu0 %vm21873_vm10, %v4572_v28  ;;  %v5041_v28 = vsel %vm21871_vm13, %v5038_v31, %v5040_v9  ;;  %v5404_v31 = vshrl.u32 %v17957_v52, 16 }
 0x23d   : > { %v5043_v55 = vsel %vm21871_vm13, %v5040_v9, %v5042_v46 }
 0x243   : > { %15242 = vmatmul.mubr.msk.bf16.gmra.mrb[20].mxu0 %vm21873_vm10, %v4574_v1  ;;  %v18022_v1 = vld [vmem:[#allocation2 + $0x88] sm:$0xff]  }
 0x244   : > { %15245 = vmatprep.mubr.msk.bf16.mxu0 %vm21873_vm10, %v4576_v34  ;;  %v5044_v34 = vrot.slane %v18019_v54, 2  ;;  %v5046_v10 = vrot.slane %v18022_v1, 2 }
 0x246   : > { %v5045_v58 = vsel %vm21871_vm13, %v5042_v46, %v5044_v34  ;;  %v5047_v0 = vsel %vm21871_vm13, %v5044_v34, %v5046_v10 }
 0x24b   : > { %15246 = vmatmul.mubr.msk.bf16.gmra.mrb[24].mxu0 %vm21873_vm10, %v4578_v53  ;;  %v18029_v53 = vld [vmem:[#allocation2 + $0x90] sm:$0xff]  }
 0x24c   : > { %15249 = vmatprep.mubr.msk.bf16.mxu0 %vm21873_vm10, %v4580_v48  ;;  %v18031_v48 = vld [vmem:[#allocation2 + $0x98] sm:$0xff]   ;;  %v5048_v4 = vrot.slane %v18029_v53, 2 }
 0x24d   : > { %v5050_v51 = vrot.slane %v18031_v48, 2 }
 0x24e   : > { %v5049_v60 = vsel %vm21871_vm13, %v5046_v10, %v5048_v4  ;;  %v16569_v10 = vld [vmem:[%s21861_s1 + $0x108] sm:$0xff]  }
 0x253   : > { %15250 = vmatmul.mubr.msk.bf16.gmra.mrb[28].mxu0 %vm21873_vm10, %v4582_v57  ;;  %v5360_v57 = vshrl.u32 %v17934_v14, 16 }
 0x254   : > { %15253 = vmatprep.mubr.msk.bf16.mxu0 %vm21873_vm10, %v4584_v2  ;;  %v5363_v2 = vshll.u32 %v17934_v14, 16  ;;  %v5377_v14 = vshrl.u32 %v17944_v40, 16 }
 0x255   : > { %v5362_v27 = vrot.slane %v5360_v57, 2  ;;  %v5422_v57 = vshrl.u32 %v17973_v29, 16 }
 0x256   : > { %v5365_v39 = vrot.slane %v5363_v2, 3  ;;  %v5379_v47 = vrot.slane %v5377_v14, 2  ;;  %v5425_v2 = vshll.u32 %v17973_v29, 16 }
 0x258   : > { %v5366_v3 = vor.u32 %v5365_v39, %v5362_v27  ;;  %v5427_v27 = vrot.slane %v5425_v2, 3  ;;  %v16571_v39 = vld [vmem:[%s21861_s1 + $0x118] sm:$0xff]  }
 0x25b   : > { %15254 = vmatmul.mubr.msk.bf16.gmra.mrb[32].mxu0 %vm21873_vm10, %v4586_v63  ;;  %v5051_v63 = vsel %vm21871_vm13, %v5048_v4, %v5050_v51  ;;  %v5416_v4 = vshll.u32 %v17970_v17, 16 }
 0x25c   : > { %15265 = vmatprep.mubr.msk.bf16.mxu0 %vm21873_vm10, %v5019_v5  ;;  %v16567_v5 = vld [vmem:[#allocation2 + $0xa0] ss:$0 sps:$4 sm:$0x33]  }
 0x263   : > { %15266 = vmatmul.mubr.msk.bf16.vlgmr.msra.gmra.mrb[0].mxu0 %vm21873_vm10, %v5021_v20  ;;  %v5370_v20 = vrot.slane %v5368_v36, 2  ;;  %v16570_v36 = vld [vmem:[%s21861_s1 + $0x110] sm:$0xff]  }
 0x264   : > { %15302 = vmatpush3.bf16.msra.mxu0 %v16547_v30  ;;  %15269 = vmatprep.mubr.msk.bf16.mxu0 %vm21873_vm10, %v5023_v11  ;;  %v5035_v30 = vsel %vm21871_vm13, %v5032_v35, %v5034_v45  ;;  %v5373_v11 = vrot.slane %v5371_v15, 3  ;;  %v5383_v45 = vor.u32 %v5382_v16, %v5379_v47  ;;  %v5442_v47 = vrot.slane %v5440_v44, 2 }
 0x265   : > { %15303 = vmatprep.subr.bf16.mxu0 %v16553_v56 }
 0x268   : > { %15304 = vmatpush3.bf16.msra.mxu0 %v16553_v56  ;;  %v5052_v56 = vrot.slane %v16567_v5, 2  ;;  %v5424_v5 = vrot.slane %v5422_v57, 2 }
 0x269   : > { %15305 = vmatprep.subr.bf16.mxu0 %v16558_v50 }
 0x26a   : > { %v5428_v14 = vor.u32 %v5427_v27, %v5424_v5  ;;  %v5494_v27 = vshrl.u32 %v18022_v1, 16 }
 0x26b   : > { %15270 = vmatmul.mubr.msk.bf16.gmra.mrb[4].mxu0 %vm21873_vm10, %v5025_v62  ;;  %v5386_v62 = vshrl.u32 %v17947_v13, 16 }
 0x26c   : > { %15273 = vmatprep.mubr.msk.bf16.mxu0 %vm21873_vm10, %v5027_v43  ;;  %15306 = vmatpush3.bf16.msra.mxu0 %v16558_v50  ;;  %v5374_v50 = vor.u32 %v5373_v11, %v5370_v20  ;;  %v5389_v43 = vshll.u32 %v17947_v13, 16  ;;  %v5431_v11 = vshrl.u32 %v17988_v19, 16  ;;  %v5496_v44 = vrot.slane %v5494_v27, 2 }
 0x26d   : > { %15307 = vmatprep.subr.bf16.mxu0 %v16563_v24 }
 0x26e   : > { %v5391_v35 = vrot.slane %v5389_v43, 3 }
 0x270   : > { %15308 = vmatpush3.bf16.msra.mxu0 %v16563_v24  ;;  %v5053_v24 = vsel %vm21871_vm13, %v5050_v51, %v5052_v56  ;;  %v5434_v56 = vshll.u32 %v17988_v19, 16 }
 0x271   : > { %15345 = vmatprep.subr.bf16.mxu0 %v17985_v49 }
 0x272   : > { %v5436_v43 = vrot.slane %v5434_v56, 3 }
 0x273   : > { %15274 = vmatmul.mubr.msk.bf16.gmra.mrb[8].mxu0 %vm21873_vm10, %v5029_v21  ;;  %v5375_v21 = vsel %vm21870_vm14, %v5366_v3, %v5374_v50  ;;  %v5443_v3 = vshll.u32 %v17991_v18, 16 }
 0x274   : > { %15277 = vmatprep.mubr.msk.bf16.mxu0 %vm21873_vm10, %v5031_v22  ;;  %v5388_v22 = vrot.slane %v5386_v62, 2  ;;  %v5433_v62 = vrot.slane %v5431_v11, 2 }
 0x275   : > { %v5445_v16 = vrot.slane %v5443_v3, 3 }
 0x276   : > { %v5392_v37 = vor.u32 %v5391_v35, %v5388_v22  ;;  %v5449_v22 = vshrl.u32 %v17999_v25, 16  ;;  %v5452_v35 = vshll.u32 %v17999_v25, 16 }
 0x27b   : > { %15278 = vmatmul.mubr.msk.bf16.gmra.mrb[12].mxu0 %vm21873_vm10, %v5033_v32  ;;  %v5395_v32 = vshrl.u32 %v17954_v7, 16 }
 0x27c   : > { %15281 = vmatprep.mubr.msk.bf16.mxu0 %vm21873_vm10, %v5035_v30  ;;  %v5398_v30 = vshll.u32 %v17954_v7, 16 }
 0x27d   : > { %v5397_v9 = vrot.slane %v5395_v32, 2  ;;  %v5458_v32 = vshrl.u32 %v18002_v33, 16 }
 0x27e   : > { %v5400_v46 = vrot.slane %v5398_v30, 3  ;;  %v5461_v30 = vshll.u32 %v18002_v33, 16 }
 0x283   : > { %15282 = vmatmul.mubr.msk.bf16.gmra.mrb[16].mxu0 %vm21873_vm10, %v5037_v26  ;;  %v5407_v26 = vshll.u32 %v17957_v52, 16 }
 0x284   : > { %15285 = vmatprep.mubr.msk.bf16.mxu0 %vm21873_vm10, %v5039_v38  ;;  %v5384_v38 = vsel %vm21870_vm14, %v5374_v50, %v5383_v45 }
 0x285   : > { %v5409_v34 = vrot.slane %v5407_v26, 3  ;;  %v5454_v26 = vrot.slane %v5452_v35, 3 }
 0x28b   : > { %15286 = vmatmul.mubr.msk.bf16.gmra.mrb[20].mxu0 %vm21873_vm10, %v5041_v28  ;;  %v5393_v28 = vsel %vm21870_vm14, %v5383_v45, %v5392_v37  ;;  %v5446_v45 = vor.u32 %v5445_v16, %v5442_v47  ;;  %v5512_v47 = vshrl.u32 %v18031_v48, 16  ;;  %v5515_v16 = vshll.u32 %v18031_v48, 16 }
 0x28c   : > { %15289 = vmatprep.mubr.msk.bf16.mxu0 %vm21873_vm10, %v5043_v55  ;;  %v5406_v55 = vrot.slane %v5404_v31, 2  ;;  %v5451_v31 = vrot.slane %v5449_v22, 2 }
 0x28e   : > { %v5410_v51 = vor.u32 %v5409_v34, %v5406_v55  ;;  %v5467_v55 = vshrl.u32 %v18009_v42, 16  ;;  %v5470_v34 = vshll.u32 %v18009_v42, 16 }
 0x290   : > { %v5472_v57 = vrot.slane %v5470_v34, 3 }
 0x293   : > { %15290 = vmatmul.mubr.msk.bf16.gmra.mrb[24].mxu0 %vm21873_vm10, %v5045_v58  ;;  %v5401_v58 = vor.u32 %v5400_v46, %v5397_v9  ;;  %v5460_v9 = vrot.slane %v5458_v32, 2  ;;  %v5463_v46 = vrot.slane %v5461_v30, 3  ;;  %v5514_v30 = vrot.slane %v5512_v47, 2  ;;  %v6989_v47 = vld [vmem:[#allocation3 + $0x8] sm:$0x3] }
 0x294   : > { %15293 = vmatprep.mubr.msk.bf16.mxu0 %vm21873_vm10, %v5047_v0  ;;  %v5413_v0 = vshrl.u32 %v17970_v17, 16 }
 0x295   : > { %v5402_v15 = vsel %vm21870_vm14, %v5392_v37, %v5401_v58 }
 0x29b   : > { %15294 = vmatmul.mubr.msk.bf16.gmra.mrb[28].mxu0 %vm21873_vm10, %v5049_v60  ;;  %v5418_v60 = vrot.slane %v5416_v4, 3 }
 0x29c   : > { %15297 = vmatprep.mubr.msk.bf16.mxu0 %vm21873_vm10, %v5051_v63  ;;  %v5411_v63 = vsel %vm21870_vm14, %v5401_v58, %v5410_v51  ;;  %v5476_v58 = vshrl.u32 %v18012_v41, 16 }
 0x2a3   : > { %15298 = vmatmul.mubr.msk.bf16.gmra.mrb[32].mxu0 %vm21873_vm10, %v5053_v24 }
 0x2a4   : > { %15309 = vmatprep.mubr.msk.bf16.mxu0 %vm21873_vm10, %v5375_v21  ;;  %v5437_v21 = vor.u32 %v5436_v43, %v5433_v62  ;;  %v5503_v62 = vshrl.u32 %v18029_v53, 16  ;;  %v5506_v43 = vshll.u32 %v18029_v53, 16 }
 0x2a6   : > { %v5438_v37 = vsel %vm21870_vm14, %v5428_v14, %v5437_v21  ;;  %v5505_v22 = vrot.slane %v5503_v62, 2  ;;  %v5508_v35 = vrot.slane %v5506_v43, 3 }
 0x2ab   : > { %15310 = vmatmul.mubr.msk.bf16.vlgmr.msra.gmra.mrb[0].mxu0 %vm21873_vm10, %v5384_v38  ;;  %v5447_v38 = vsel %vm21870_vm14, %v5437_v21, %v5446_v45 }
 0x2ac   : > { %15346 = vmatpush3.bf16.msra.mxu0 %v17985_v49  ;;  %15313 = vmatprep.mubr.msk.bf16.mxu0 %vm21873_vm10, %v5393_v28  ;;  %v5415_v49 = vrot.slane %v5413_v0, 2  ;;  %v5455_v28 = vor.u32 %v5454_v26, %v5451_v31  ;;  %v5479_v0 = vshll.u32 %v18012_v41, 16  ;;  %v5509_v31 = vor.u32 %v5508_v35, %v5505_v22 }
 0x2ad   : > { %15347 = vmatprep.subr.bf16.mxu0 %v16569_v10  ;;  %v6166_v35 = vadd.s32 24, %v16926_v12 }
 0x2ae   : > { %v5419_v20 = vor.u32 %v5418_v60, %v5415_v49  ;;  %v5456_v4 = vsel %vm21870_vm14, %v5446_v45, %v5455_v28  ;;  %v5485_v60 = vshrl.u32 %v18019_v54, 16  ;;  %v18117_v45 = vld [vmem:[#allocation2 + $0xa0] ss:$0 sps:$4 sm:$0x77]  }
 0x2af   : > { %v5521_v26 = vshrl.u32 %v18117_v45, 16 }
 0x2b0   : > { %15348 = vmatpush3.bf16.msra.mxu0 %v16569_v10  ;;  %v5420_v50 = vsel %vm21870_vm14, %v5410_v51, %v5419_v20  ;;  %v5429_v24 = vsel %vm21870_vm14, %v5419_v20, %v5428_v14  ;;  %v5464_v10 = vor.u32 %v5463_v46, %v5460_v9  ;;  %v5469_v51 = vrot.slane %v5467_v55, 2  ;;  %v5820_v46 = vld [vmem:[#allocation2 + $0x10] sm:$0x8] }
 0x2b1   : > { %15349 = vmatprep.subr.bf16.mxu0 %v16570_v36  ;;  %v5487_v11 = vrot.slane %v5485_v60, 2  ;;  %v5523_v55 = vrot.slane %v5521_v26, 2  ;;  %v5843_v60 = vrot.slane %v17957_v52, 3  ;;  %v5851_v52 = vrot.slane %v17991_v18, 3 }
 0x2b2   : > { %v5465_v2 = vsel %vm21870_vm14, %v5455_v28, %v5464_v10  ;;  %v5473_v49 = vor.u32 %v5472_v57, %v5469_v51  ;;  %v5835_v51 = vrot.slane %v17936_v59, 3  ;;  %v5841_v59 = vrot.slane %v17954_v7, 3 }
 0x2b3   : > { %15314 = vmatmul.mubr.msk.bf16.gmra.mrb[4].mxu0 %vm21873_vm10, %v5402_v15  ;;  %v5481_v15 = vrot.slane %v5479_v0, 3  ;;  %v5849_v7 = vrot.slane %v17988_v19, 3  ;;  %v5857_v19 = vrot.slane %v18009_v42, 3  ;;  %v5859_v18 = vrot.slane %v18012_v41, 3 }
 0x2b4   : > { %15317 = vmatprep.mubr.msk.bf16.mxu0 %vm21873_vm10, %v5411_v63  ;;  %15350 = vmatpush3.bf16.msra.mxu0 %v16570_v36  ;;  %v5478_v36 = vrot.slane %v5476_v58, 2  ;;  %v5488_v63 = vshll.u32 %v18019_v54, 16  ;;  %v5474_v20 = vsel %vm21870_vm14, %v5464_v10, %v5473_v49  ;;  %v14167_v58 = vcombine.low %v5820_v46, %v17929_v23 }
 0x2b5   : > { %15351 = vmatprep.subr.bf16.mxu0 %v16571_v39  ;;  %v5839_v23 = vrot.slane %v17947_v13, 3  ;;  %v5847_v13 = vrot.slane %v17973_v29, 3  ;;  %v5855_v29 = vrot.slane %v18002_v33, 3  ;;  %v5863_v33 = vrot.slane %v18022_v1, 3 }
 0x2b6   : > { %v5482_v5 = vor.u32 %v5481_v15, %v5478_v36  ;;  %v5490_v56 = vrot.slane %v5488_v63, 3  ;;  %v5837_v36 = vrot.slane %v17944_v40, 3  ;;  %v5845_v40 = vrot.slane %v17970_v17, 3 }
 0x2b7   : > { %v5842_v63 = vsel %vm21868_vm15, %v5839_v23, %v5841_v59  ;;  %v5853_v17 = vrot.slane %v17999_v25, 3  ;;  %v5861_v25 = vrot.slane %v18019_v54, 3  ;;  %v5865_v42 = vrot.slane %v18029_v53, 3 }
 0x2b8   : > { %15352 = vmatpush3.bf16.msra.mxu0 %v16571_v39  ;;  %v5497_v39 = vshll.u32 %v18022_v1, 16  ;;  %v5483_v14 = vsel %vm21870_vm14, %v5473_v49, %v5482_v5  ;;  %v5838_v15 = vsel %vm21868_vm15, %v5835_v51, %v5837_v36  ;;  %v5840_v49 = vsel %vm21868_vm15, %v5837_v36, %v5839_v23  ;;  %v16577_v36 = vld [vmem:[%s21862_s2 + $0x38] sm:$0xff]  }
 0x2b9   : > { %v5846_v27 = vsel %vm21868_vm15, %v5843_v60, %v5845_v40  ;;  %v5864_v62 = vsel %vm21868_vm15, %v5861_v25, %v5863_v33  ;;  %v5867_v41 = vrot.slane %v18031_v48, 3  ;;  %v5866_v43 = vsel %vm21868_vm15, %v5863_v33, %v5865_v42 }
 0x2ba   : > { %v5499_v3 = vrot.slane %v5497_v39, 3  ;;  %v5848_v39 = vsel %vm21868_vm15, %v5845_v40, %v5847_v13  ;;  %v5869_v54 = vrot.slane %v18117_v45, 3  ;;  %v6990_v53 = vsel %vm16918_vm3, 0, %v6989_v47 }
 0x2bb   : > { %15318 = vmatmul.mubr.msk.bf16.gmra.mrb[8].mxu0 %vm21873_vm10, %v5420_v50  ;;  %v5491_v50 = vor.u32 %v5490_v56, %v5487_v11  ;;  %v5852_v11 = vsel %vm21868_vm15, %v5849_v7, %v5851_v52  ;;  %v5854_v56 = vsel %vm21868_vm15, %v5851_v52, %v5853_v17  ;;  %6991 = vst [vmem:[#allocation3 + $0x8] sm:$0x3] %v6990_v53  ;;  %v6165_v48 = vadd.s32 16, %v16926_v12 }
 0x2bc   : > { %15321 = vmatprep.mubr.msk.bf16.mxu0 %vm21873_vm10, %v5429_v24  ;;  %v5500_v24 = vor.u32 %v5499_v3, %v5496_v44  ;;  %v5858_v44 = vsel %vm21868_vm15, %v5855_v29, %v5857_v19  ;;  %v5860_v3 = vsel %vm21868_vm15, %v5857_v19, %v5859_v18  ;;  %v5870_v1 = vsel %vm21868_vm15, %v5867_v41, %v5869_v54 }
 0x2bd   : > { %v5492_v21 = vsel %vm21870_vm14, %v5482_v5, %v5491_v50  ;;  %v5844_v5 = vsel %vm21868_vm15, %v5841_v59, %v5843_v60 }
 0x2be   : > { %v5501_v32 = vsel %vm21870_vm14, %v5491_v50, %v5500_v24  ;;  %v5510_v28 = vsel %vm21870_vm14, %v5500_v24, %v5509_v31  ;;  %v5862_v50 = vsel %vm21868_vm15, %v5859_v18, %v5861_v25  ;;  %v5868_v24 = vsel %vm21868_vm15, %v5865_v42, %v5867_v41 }
 0x2c3   : > { %15322 = vmatmul.mubr.msk.bf16.gmra.mrb[12].mxu0 %vm21873_vm10, %v5438_v37  ;;  %v5517_v37 = vrot.slane %v5515_v16, 3  ;;  %v16574_v16 = vld [vmem:[%s21862_s2 + $0x20] sm:$0xff]  }
 0x2c4   : > { %15325 = vmatprep.mubr.msk.bf16.mxu0 %vm21873_vm10, %v5447_v38  ;;  %v5524_v38 = vshll.u32 %v18117_v45, 16  ;;  %15389 = vmatprep.subr.bf16.mxu1 %v16574_v16 }
 0x2c5   : > { %v5518_v9 = vor.u32 %v5517_v37, %v5514_v30  ;;  %15390 = vmatpush3.bf16.msra.mxu1 %v16574_v16  ;;  %v16575_v30 = vld [vmem:[%s21862_s2 + $0x28] sm:$0xff]   ;;  %v6164_v37 = vadd.s32 8, %v16926_v12  ;;  %v18314_v16 = vadd.s32 112, %v16926_v12 }
 0x2c6   : > { %v5526_v34 = vrot.slane %v5524_v38, 3  ;;  %15391 = vmatprep.subr.bf16.mxu1 %v16575_v30 }
 0x2c7   : > { %v5519_v10 = vsel %vm21870_vm14, %v5509_v31, %v5518_v9  ;;  %v18203_v31 = vmul.u32.u64.low 3817748708, %v6166_v35  ;;  %v18204_v26 = vmul.u32.u64.high 3817748708, %v6166_v35, %v18203_v31 }
 0x2c8   : > { %v5527_v0 = vor.u32 %v5526_v34, %v5523_v55  ;;  %v16576_v55 = vld [vmem:[%s21862_s2 + $0x30] sm:$0xff]  }
 0x2c9   : > { %15392 = vmatpush3.bf16.msra.mxu1 %v16575_v30 }
 0x2ca   : > { %v5528_v57 = vsel %vm21870_vm14, %v5518_v9, %v5527_v0  ;;  %v18207_v9 = vmul.u32.u64.low 3817748708, %v6164_v37  ;;  %v18208_v46 = vmul.u32.u64.high 3817748708, %v6164_v37, %v18207_v9  ;;  %15393 = vmatprep.subr.bf16.mxu1 %v16576_v55  ;;  %v18221_v0 = vadd.s32 56, %v16926_v12 }
 0x2cb   : > { %15326 = vmatmul.mubr.msk.bf16.gmra.mrb[16].mxu0 %vm21873_vm10, %v5456_v4  ;;  %v5834_v4 = vrot.slane %v14167_v58, 3 }
 0x2cc   : > { %15329 = vmatprep.mubr.msk.bf16.mxu0 %vm21873_vm10, %v5465_v2 }
 0x2cd   : > { %v5836_v2 = vsel %vm21868_vm15, %v5834_v4, %v5835_v51  ;;  %15394 = vmatpush3.bf16.msra.mxu1 %v16576_v55  ;;  %v6238_v4 = vshrl.u32 %v18204_v26, 4 }
 0x2ce   : > { %15395 = vmatprep.subr.bf16.mxu1 %v16577_v36 }
 0x2d1   : > { %15396 = vmatpush3.bf16.msra.mxu1 %v16577_v36 }
 0x2d3   : > { %15330 = vmatmul.mubr.msk.bf16.gmra.mrb[20].mxu0 %vm21873_vm10, %v5474_v20  ;;  %v5850_v20 = vsel %vm21868_vm15, %v5847_v13, %v5849_v7  ;;  %v6239_v13 = vmul.u32 18, %v6238_v4  ;;  %v18253_v7 = vadd.s32 64, %v16926_v12 }
 0x2d4   : > { %15333 = vmatprep.mubr.msk.bf16.mxu0 %vm21873_vm10, %v5483_v14  ;;  %v5856_v14 = vsel %vm21868_vm15, %v5853_v17, %v5855_v29  ;;  %v18263_v17 = vadd.s32 88, %v16926_v12 }
 0x2db   : > { %15334 = vmatmul.mubr.msk.bf16.gmra.mrb[24].mxu0 %vm21873_vm10, %v5492_v21  ;;  %v18191_v21 = vmul.u32.u64.low 3817748708, %v6165_v48  ;;  %v18192_v22 = vmul.u32.u64.high 3817748708, %v6165_v48, %v18191_v21 }
 0x2dc   : > { %15337 = vmatprep.mubr.msk.bf16.mxu0 %vm21873_vm10, %v5501_v32  ;;  %v18196_v45 = vmul.u32.u64.low 3817748708, %v16926_v12  ;;  %v18197_v32 = vmul.u32.u64.high 3817748708, %v16926_v12, %v18196_v45 }
 0x2dd   : > { %v6227_v38 = vshrl.u32 %v18192_v22, 4 }
 0x2de   : > { %v6205_v34 = vshrl.u32 %v18197_v32, 4  ;;  %v22026_v32 = vmov 0 }
 0x2df   : > { %v6228_v58 = vmul.u32 18, %v6227_v38 }
 0x2e0   : > { %v6206_v23 = vmul.u32 18, %v6205_v34  ;;  %v18345_v34 = vadd.s32 120, %v16926_v12 }
 0x2e1   : > { %v18241_v60 = vsub.s32 %v6165_v48, %v6228_v58  ;;  %v18574_v58 = vadd.s32 176, %v16926_v12 }
 0x2e2   : > { %v18256_v52 = vsub.s32 %v16926_v12, %v6206_v23 }
 0x2e3   : > { %15338 = vmatmul.mubr.msk.bf16.gmra.mrb[28].mxu0 %vm21873_vm10, %v5510_v28  ;;  %v18211_v28 = vadd.s32 48, %v16926_v12  ;;  %vm6597_vm1 = vcmp.ne.s32.totalorder %v18241_v60, 0  ;;  %vm6633_vm2 = vcmp.lt.s32.totalorder %v18241_v60, 0 }
 0x2e4   : > { %15341 = vmatprep.mubr.msk.bf16.mxu0 %vm21873_vm10, %v5519_v10  ;;  %v18218_v10 = vadd.s32 32, %v16926_v12  ;;  %vm6595_vm4 = vcmp.ne.s32.totalorder %v18256_v52, 0  ;;  %vm6631_vm5 = vcmp.lt.s32.totalorder %v18256_v52, 0  ;;  %v18283_v25 = vadd.s32 18, %v18256_v52  ;;  %vm18294_vm6 = vmand %vm6633_vm2, %vm6597_vm1 }
 0x2e5   : > { %vm18305_vm15 = vmand %vm6631_vm5, %vm6595_vm4  ;;  %v18602_v45 = vmul.u32.u64.low 3817748708, %v18574_v58  ;;  %v18603_v21 = vmul.u32.u64.high 3817748708, %v18574_v58, %v18602_v45 }
 0x2eb   : > { %15342 = vmatmul.mubr.msk.bf16.gmra.mrb[32].mxu0 %vm21873_vm10, %v5528_v57  ;;  %v18225_v51 = vmul.u32.u64.low 3817748708, %v18211_v28  ;;  %v18226_v57 = vmul.u32.u64.high 3817748708, %v18211_v28, %v18225_v51 }
 0x2ec   : > { %15353 = vmatprep.mubr.msk.bf16.mxu0 %vm21873_vm10, %v5836_v2  ;;  %v18229_v2 = vadd.s32 40, %v16926_v12 }
 0x2ed   : > { %v6271_v19 = vshrl.u32 %v18226_v57, 4 }
 0x2ef   : > { %v6272_v47 = vmul.u32 18, %v6271_v19 }
 0x2f1   : > { %v18337_v31 = vsub.s32 %v18211_v28, %v6272_v47 }
 0x2f3   : > { %15354 = vmatmul.mubr.msk.bf16.vlgmr.msra.gmra.mrb[0].mxu0 %vm21873_vm10, %v5838_v15  ;;  %v18235_v15 = vadd.s32 80, %v16926_v12 }
 0x2f4   : > { %15357 = vmatprep.mubr.msk.bf16.mxu0 %vm21873_vm10, %v5840_v49  ;;  %v18238_v49 = vmul.u32.u64.low 3817748708, %v18218_v10  ;;  %v18239_v59 = vmul.u32.u64.high 3817748708, %v18218_v10, %v18238_v49 }
 0x2f6   : > { %v6249_v33 = vshrl.u32 %v18239_v59, 4  ;;  %v18369_v59 = vadd.s32 18, %v18337_v31 }
 0x2fb   : > { %15358 = vmatmul.mubr.msk.bf16.gmra.mrb[4].mxu0 %vm21873_vm10, %v5842_v63  ;;  %v6216_v63 = vshrl.u32 %v18208_v46, 4  ;;  %v18341_v46 = vmul.u32.u64.low 3817748708, %v18314_v16  ;;  %v18342_v55 = vmul.u32.u64.high 3817748708, %v18314_v16, %v18341_v46 }
 0x2fc   : > { %15361 = vmatprep.mubr.msk.bf16.mxu0 %vm21873_vm10, %v5844_v5  ;;  %v18245_v5 = vmul.u32.u64.low 3817748708, %v18221_v0  ;;  %v18246_v40 = vmul.u32.u64.high 3817748708, %v18221_v0, %v18245_v5 }
 0x2fd   : > { %v6217_v29 = vmul.u32 18, %v6216_v63  ;;  %v6359_v19 = vshrl.u32 %v18342_v55, 4 }
 0x2ff   : > { %v18298_v41 = vsub.s32 %v6164_v37, %v6217_v29  ;;  %v18333_v37 = vadd.s32 96, %v16926_v12  ;;  %v18401_v29 = vadd.s32 128, %v16926_v12 }
 0x301   : > { %vm6596_vm2 = vcmp.ne.s32.totalorder %v18298_v41, 0  ;;  %vm6632_vm4 = vcmp.lt.s32.totalorder %v18298_v41, 0  ;;  %v18352_v4 = vadd.s32 18, %v18298_v41 }
 0x302   : > { %v18363_v23 = vmul.u32.u64.low 3817748708, %v18333_v37  ;;  %v18364_v49 = vmul.u32.u64.high 3817748708, %v18333_v37, %v18363_v23 }
 0x303   : > { %15362 = vmatmul.mubr.msk.bf16.gmra.mrb[8].mxu0 %vm21873_vm10, %v5846_v27 }
 0x304   : > { %15365 = vmatprep.mubr.msk.bf16.mxu0 %vm21873_vm10, %v5848_v39  ;;  %v18249_v27 = vmul.u32.u64.low 3817748708, %v18229_v2  ;;  %v18250_v39 = vmul.u32.u64.high 3817748708, %v18229_v2, %v18249_v27 }
 0x305   : > { %v18384_v27 = vadd.s32 104, %v16926_v12 }
 0x306   : > { %v6260_v53 = vshrl.u32 %v18250_v39, 4 }
 0x308   : > { %v6261_v26 = vmul.u32 18, %v6260_v53  ;;  %v18453_v53 = vadd.s32 152, %v16926_v12 }
 0x30a   : > { %v18372_v63 = vsub.s32 %v18229_v2, %v6261_v26 }
 0x30b   : > { %15366 = vmatmul.mubr.msk.bf16.gmra.mrb[12].mxu0 %vm21873_vm10, %v5850_v20 }
 0x30c   : > { %15369 = vmatprep.mubr.msk.bf16.mxu0 %vm21873_vm10, %v5852_v11  ;;  %v18259_v20 = vmul.u32.u64.low 3817748708, %v18235_v15  ;;  %v18260_v11 = vmul.u32.u64.high 3817748708, %v18235_v15, %v18259_v20  ;;  %vm6600_vm9 = vcmp.ne.s32.totalorder %v18372_v63, 0  ;;  %vm6636_vm0 = vcmp.lt.s32.totalorder %v18372_v63, 0 }
 0x30d   : > { %vm18475_vm13 = vmand %vm6636_vm0, %vm6600_vm9  ;;  %v18480_v46 = vadd.s32 18, %v18372_v63 }
 0x30e   : > { %v6315_v48 = vshrl.u32 %v18260_v11, 4 }
 0x310   : > { %v6316_v9 = vmul.u32 18, %v6315_v48  ;;  %v16580_v48 = vld [vmem:[%s21862_s2] sm:$0xff]  }
 0x311   : > { %15433 = vmatprep.subr.bf16.mxu1 %v16580_v48 }
 0x313   : > { %15370 = vmatmul.mubr.msk.bf16.gmra.mrb[16].mxu0 %vm21873_vm10, %v5854_v56  ;;  %v18268_v56 = vadd.s32 72, %v16926_v12 }
 0x314   : > { %15373 = vmatprep.mubr.msk.bf16.mxu0 %vm21873_vm10, %v5856_v14  ;;  %v18270_v14 = vsub.s32 %v6166_v35, %v6239_v13  ;;  %v6250_v35 = vmul.u32 18, %v6249_v33 }
 0x316   : > { %vm6598_vm11 = vcmp.ne.s32.totalorder %v18270_v14, 0  ;;  %vm6634_vm14 = vcmp.lt.s32.totalorder %v18270_v14, 0  ;;  %v18321_v22 = vadd.s32 18, %v18270_v14  ;;  %v18355_v28 = vsub.s32 %v18218_v10, %v6250_v35 }
 0x317   : > { %vm18327_vm1 = vmand %vm6634_vm14, %vm6598_vm11  ;;  %vm6601_vm11 = vcmp.ne.s32.totalorder %v18337_v31, 0  ;;  %vm6637_vm14 = vcmp.lt.s32.totalorder %v18337_v31, 0  ;;  %v22041_v35 = vmov 0 }
 0x318   : > { %v22027_v32 = vsel %vm18327_vm1, 4294967295, %v22026_v32  ;;  %vm6599_vm5 = vcmp.ne.s32.totalorder %v18355_v28, 0  ;;  %v18387_v39 = vadd.s32 18, %v18355_v28  ;;  %vm18427_vm12 = vmand %vm6637_vm14, %vm6601_vm11 }
 0x31b   : > { %15374 = vmatmul.mubr.msk.bf16.gmra.mrb[20].mxu0 %vm21873_vm10, %v5858_v44  ;;  %v18274_v18 = vmul.u32.u64.low 3817748708, %v18253_v7  ;;  %v18275_v44 = vmul.u32.u64.high 3817748708, %v18253_v7, %v18274_v18 }
 0x31c   : > { %15377 = vmatprep.mubr.msk.bf16.mxu0 %vm21873_vm10, %v5860_v3  ;;  %v18278_v3 = vadd.s32 18, %v18241_v60 }
 0x31d   : > { %v6293_v38 = vshrl.u32 %v18275_v44, 4  ;;  %v18420_v44 = vmul.u32.u64.low 3817748708, %v18384_v27  ;;  %v18421_v33 = vmul.u32.u64.high 3817748708, %v18384_v27, %v18420_v44 }
 0x31f   : > { %v6294_v10 = vmul.u32 18, %v6293_v38  ;;  %v18469_v38 = vadd.s32 136, %v16926_v12 }
 0x321   : > { %v18398_v11 = vsub.s32 %v18253_v7, %v6294_v10 }
 0x323   : > { %15378 = vmatmul.mubr.msk.bf16.gmra.mrb[24].mxu0 %vm21873_vm10, %v5862_v50  ;;  %22029 = vst [vmem:[#allocation12_spill] sm:$0xff] %v18398_v11  ;;  %vm22053_vm7 = vcmp.lt.s32.totalorder %v18398_v11, 0 }
 0x324   : > { %15381 = vmatprep.mubr.msk.bf16.mxu0 %vm21873_vm10, %v5864_v62  ;;  %v18287_v50 = vmul.u32.u64.low 3817748708, %v18263_v17  ;;  %v18288_v62 = vmul.u32.u64.high 3817748708, %v18263_v17, %v18287_v50 }
 0x326   : > { %v6326_v51 = vshrl.u32 %v18288_v62, 4 }
 0x328   : > { %v6327_v13 = vmul.u32 18, %v6326_v51  ;;  %v22048_v51 = vmov 0 }
 0x32a   : > { %v18417_v7 = vsub.s32 %v18263_v17, %v6327_v13 }
 0x32b   : > { %15382 = vmatmul.mubr.msk.bf16.gmra.mrb[28].mxu0 %vm21873_vm10, %v5866_v43  ;;  %v6282_v43 = vshrl.u32 %v18246_v40, 4  ;;  %v18378_v5 = vmul.u32.u64.low 3817748708, %v18345_v34  ;;  %v18379_v40 = vmul.u32.u64.high 3817748708, %v18345_v34, %v18378_v5 }
 0x32c   : > { %15385 = vmatprep.mubr.msk.bf16.mxu0 %vm21873_vm10, %v5868_v24  ;;  %v18302_v24 = vmul.u32.u64.low 3817748708, %v18268_v56  ;;  %v18303_v54 = vmul.u32.u64.high 3817748708, %v18268_v56, %v18302_v24  ;;  %22032 = vst [vmem:[#allocation13_spill] sm:$0xff] %v18417_v7  ;;  %v18509_v10 = vadd.s32 18, %v18417_v7 }
 0x32d   : > { %v6283_v30 = vmul.u32 18, %v6282_v43  ;;  %v6337_v43 = vshrl.u32 %v18364_v49, 4  ;;  %v6370_v26 = vshrl.u32 %v18379_v40, 4  ;;  %v22054_v49 = vmov 0 }
 0x32e   : > { %v6304_v36 = vshrl.u32 %v18303_v54, 4  ;;  %v22037_v54 = vmov 0  ;;  %22057 = vst [vmem:[#allocation19_spill] sm:$0xff] %v18509_v10  ;;  %v18515_v40 = vmul.u32.u64.low 3817748708, %v18453_v53  ;;  %v18516_v13 = vmul.u32.u64.high 3817748708, %v18453_v53, %v18515_v40 }
 0x32f   : > { %v18359_v57 = vsub.s32 %v18221_v0, %v6283_v30  ;;  %v18375_v0 = vsub.s32 %v18235_v15, %v6316_v9  ;;  %v18391_v15 = vadd.s32 144, %v16926_v12  ;;  %v6360_v30 = vmul.u32 18, %v6359_v19 }
 0x330   : > { %v6305_v2 = vmul.u32 18, %v6304_v36  ;;  %v22043_v9 = vmov 0  ;;  %v18496_v36 = vadd.s32 18, %v18398_v11  ;;  %v6338_v23 = vmul.u32 18, %v6337_v43 }
 0x331   : > { %22028 = vst [vmem:[#allocation11_spill] sm:$0xff] %v18375_v0  ;;  %v18395_v20 = vadd.s32 18, %v18359_v57  ;;  %v18436_v17 = vmul.u32.u64.low 3817748708, %v18391_v15  ;;  %v18437_v24 = vmul.u32.u64.high 3817748708, %v18391_v15, %v18436_v17  ;;  %vm22039_vm14 = vcmp.ne.s32.totalorder %v18359_v57, 0 }
 0x332   : > { %v18432_v62 = vsub.s32 %v18268_v56, %v6305_v2  ;;  %v18449_v47 = vmul.u32.u64.low 3817748708, %v18401_v29  ;;  %v18450_v56 = vmul.u32.u64.high 3817748708, %v18401_v29, %v18449_v47  ;;  %v22044_v9 = vsel %vm18475_vm13, 4294967295, %v22043_v9  ;;  %22051 = vst [vmem:[#allocation17_spill] sm:$0xff] %v18496_v36 }
 0x333   : > { %15386 = vmatmul.mubr.msk.bf16.gmra.mrb[32].mxu0 %vm21873_vm10, %v5870_v1  ;;  %vm18411_vm10 = vmand %vm6632_vm4, %vm6596_vm2  ;;  %vm22036_vm2 = vcmp.lt.s32.totalorder %v18355_v28, 0  ;;  %v18483_v55 = vadd.s32 18, %v18375_v0  ;;  %vm22046_vm11 = vcmp.ne.s32.totalorder %v18375_v0, 0  ;;  %vm22047_vm3 = vcmp.lt.s32.totalorder %v18375_v0, 0 }
 0x334   : > { %22035 = vst [vmem:[#allocation14_spill] sm:$0xff] %v18432_v62  ;;  %vm18443_vm4 = vmand %vm22036_vm2, %vm6599_vm5  ;;  %vm22040_vm5 = vcmp.lt.s32.totalorder %v18359_v57, 0  ;;  %vm6604_vm0 = vcmp.ne.s32.totalorder %v18432_v62, 0  ;;  %vm6640_vm9 = vcmp.lt.s32.totalorder %v18432_v62, 0  ;;  %v18512_v5 = vadd.s32 18, %v18432_v62 }
 0x335   : > { %v22038_v54 = vsel %vm18443_vm4, 4294967295, %v22037_v54  ;;  %vm18462_vm2 = vmand %vm22040_vm5, %vm22039_vm14  ;;  %22045 = vst [vmem:[#allocation15_spill] sm:$0xff] %v18483_v55  ;;  %vm6642_vm5 = vcmp.lt.s32.totalorder %v18417_v7, 0  ;;  %vm22052_vm14 = vcmp.ne.s32.totalorder %v18398_v11, 0  ;;  %v22060_v2 = vmov 0 }
 0x336   : > { %v22042_v35 = vsel %vm18462_vm2, 4294967295, %v22041_v35  ;;  %vm18491_vm8 = vmand %vm22047_vm3, %vm22046_vm11  ;;  %22058 = vst [vmem:[#allocation20_spill] sm:$0xff] %v18512_v5  ;;  %vm22059_vm3 = vcmp.ne.s32.totalorder %v18417_v7, 0  ;;  %v18525_v19 = vsub.s32 %v18314_v16, %v6360_v30  ;;  %v6371_v44 = vmul.u32 18, %v6370_v26 }
 0x337   : > { %v22049_v51 = vsel %vm18491_vm8, 4294967295, %v22048_v51  ;;  %vm18504_vm1 = vmand %vm22053_vm7, %vm22052_vm14  ;;  %v18528_v43 = vmul.u32.u64.low 3817748708, %v18469_v38  ;;  %v18529_v17 = vmul.u32.u64.high 3817748708, %v18469_v38, %v18528_v43  ;;  %v22064_v30 = vmov 0 }
 0x338   : > { %22050 = vst [vmem:[#allocation16_spill] sm:$0xff] %v22049_v51  ;;  %v22055_v49 = vsel %vm18504_vm1, 4294967295, %v22054_v49  ;;  %vm18520_vm11 = vmand %vm6642_vm5, %vm22059_vm3  ;;  %v6348_v26 = vshrl.u32 %v18421_v33, 4  ;;  %v18561_v16 = vsub.s32 %v18333_v37, %v6338_v23  ;;  %v6403_v48 = vshrl.u32 %v18437_v24, 4 }
 0x339   : > { %22056 = vst [vmem:[#allocation18_spill] sm:$0xff] %v22055_v49  ;;  %v22061_v2 = vsel %vm18520_vm11, 4294967295, %v22060_v2  ;;  %22063 = vst [vmem:[#allocation22_spill] sm:$0xff] %v18525_v19  ;;  %v6381_v47 = vshrl.u32 %v18450_v56, 4  ;;  %vm6609_vm14 = vcmp.ne.s32.totalorder %v18525_v19, 0  ;;  %v18586_v23 = vsub.s32 %v18345_v34, %v6371_v44 }
 0x33a   : > { %22062 = vst [vmem:[#allocation21_spill] sm:$0xff] %v22061_v2  ;;  %vm18547_vm7 = vmand %vm6640_vm9, %vm6604_vm0  ;;  %vm6645_vm5 = vcmp.lt.s32.totalorder %v18525_v19, 0  ;;  %v18590_v56 = vadd.s32 18, %v18525_v19  ;;  %v6349_v40 = vmul.u32 18, %v6348_v26  ;;  %v18593_v33 = vadd.s32 160, %v16926_v12 }
 0x33b   : > { %v22065_v30 = vsel %vm18547_vm7, 4294967295, %v22064_v30  ;;  %22067 = vst [vmem:[#allocation24_spill] sm:$0xff] %v18561_v16  ;;  %22068 = vst [vmem:[#allocation25_spill] sm:$0xff] %v18586_v23  ;;  %v6404_v37 = vmul.u32 18, %v6403_v48  ;;  %v18598_v24 = vadd.s32 184, %v16926_v12  ;;  %v6382_v43 = vmul.u32 18, %v6381_v47 }
 0x33c   : > { %22066 = vst [vmem:[#allocation23_spill] sm:$0xff] %v22065_v30  ;;  %22069 = vst [vmem:[#allocation26_spill] sm:$0xff] %v18590_v56  ;;  %v6414_v34 = vshrl.u32 %v18516_v13, 4  ;;  %v7525_v44 = vld [vmem:[#allocation3] sm:$0xf]  ;;  %v22070_v26 = vmov 0  ;;  %v18621_v45 = vsub.s32 %v18384_v27, %v6349_v40 }
 0x33d   : > { %vm18607_vm3 = vmand %vm6645_vm5, %vm6609_vm14  ;;  %vm6610_vm9 = vcmp.ne.s32.totalorder %v18586_v23, 0  ;;  %vm6646_vm0 = vcmp.lt.s32.totalorder %v18586_v23, 0  ;;  %v6392_v48 = vshrl.u32 %v18529_v17, 4  ;;  %v7526_v47 = vld [vmem:[#allocation3 + $0x4] sm:$0xf]  ;;  %v18615_v13 = vadd.s32 168, %v16926_v12 }
 0x33e   : > { %v22071_v26 = vsel %vm18607_vm3, 4294967295, %v22070_v26  ;;  %v18618_v6 = vadd.s32 18, %v18561_v16  ;;  %22074 = vst [vmem:[#allocation29_spill] sm:$0xff] %v18621_v45  ;;  %v18624_v62 = vmul.u32.u64.low 3817748708, %v18593_v33  ;;  %v18625_v5 = vmul.u32.u64.high 3817748708, %v18593_v33, %v18624_v62  ;;  %vm18649_vm11 = vmand %vm6646_vm0, %vm6610_vm9 }
 0x33f   : > { %22072 = vst [vmem:[#allocation27_spill] sm:$0xff] %v22071_v26  ;;  %vm22075_vm14 = vcmp.ne.s32.totalorder %v18561_v16, 0  ;;  %vm22076_vm5 = vcmp.lt.s32.totalorder %v18561_v16, 0  ;;  %v22077_v17 = vmov 0  ;;  %v18636_v30 = vadd.s32 18, %v18586_v23 }
 0x340   : > { %22073 = vst [vmem:[#allocation28_spill] sm:$0xff] %v18618_v6  ;;  %vm18631_vm7 = vmand %vm22076_vm5, %vm22075_vm14  ;;  %v18639_v7 = vsub.s32 %v18391_v15, %v6404_v37  ;;  %v18642_v27 = vmul.u32.u64.low 3817748708, %v18598_v24  ;;  %v18643_v40 = vmul.u32.u64.high 3817748708, %v18598_v24, %v18642_v27  ;;  %v22082_v10 = vmov 0 }
 0x341   : > { %v22078_v17 = vsel %vm18631_vm7, 4294967295, %v22077_v17  ;;  %22080 = vst [vmem:[#allocation31_spill] sm:$0xff] %v18636_v30  ;;  %v22083_v10 = vsel %vm18649_vm11, 4294967295, %v22082_v10  ;;  %v18654_v2 = vsub.s32 %v18401_v29, %v6382_v43  ;;  %v6415_v8 = vmul.u32 18, %v6414_v34 }
 0x342   : > { %22079 = vst [vmem:[#allocation30_spill] sm:$0xff] %v22078_v17  ;;  %22081 = vst [vmem:[#allocation32_spill] sm:$0xff] %v18639_v7  ;;  %v18656_v11 = vcombine.low %v7525_v44, %v7526_v47  ;;  %v6393_v15 = vmul.u32 18, %v6392_v48  ;;  %v18659_v37 = vmul.u32.u64.low 3817748708, %v18615_v13  ;;  %v18660_v36 = vmul.u32.u64.high 3817748708, %v18615_v13, %v18659_v37 }
 0x343   : > { %22084 = vst [vmem:[#allocation33_spill] sm:$0xff] %v22083_v10  ;;  %22085 = vst [vmem:[#allocation34_spill] sm:$0xff] %v18654_v2  ;;  %v18663_v27 = vadd.s32 208, %v16926_v12  ;;  %vm6608_vm0 = vcmp.ne.s32.totalorder %v18621_v45, 0  ;;  %v18672_v29 = vadd.s32 18, %v18621_v45  ;;  %v18681_v34 = vadd.s32 192, %v16926_v12 }
 0x344   : > { %22086 = vst [vmem:[#allocation35_spill] sm:$0xff] %v18656_v11  ;;  %v18684_v44 = vadd.s32 18, %v18639_v7  ;;  %v18688_v48 = vsub.s32 %v18453_v53, %v6415_v8  ;;  %v6447_v47 = vshrl.u32 %v18603_v21, 4  ;;  %v18692_v37 = vsub.s32 %v18469_v38, %v6393_v15 }
 0x345   : > { %22087 = vst [vmem:[#allocation36_spill] sm:$0xff] %v18672_v29  ;;  %v7675_v43 = vshll.u32 %v18656_v11, 16  ;;  %v18696_v62 = vmul.u32.u64.low 3817748708, %v18663_v27  ;;  %v18697_v23 = vmul.u32.u64.high 3817748708, %v18663_v27, %v18696_v62  ;;  %v18701_v30 = vadd.s32 18, %v18654_v2 }
 0x346   : > { %22088 = vst [vmem:[#allocation37_spill] sm:$0xff] %v18684_v44  ;;  %22089 = vst [vmem:[#allocation38_spill] sm:$0xff] %v18688_v48  ;;  %v6425_v10 = vshrl.u32 %v18625_v5, 4  ;;  %v18705_v8 = vadd.s32 216, %v16926_v12  ;;  %v6458_v21 = vshrl.u32 %v18643_v40, 4  ;;  %v18713_v15 = vadd.s32 200, %v16926_v12 }
 0x347   : > { %22090 = vst [vmem:[#allocation39_spill] sm:$0xff] %v18692_v37  ;;  %22091 = vst [vmem:[#allocation40_spill] sm:$0xff] %v18701_v30  ;;  %v18709_v53 = vmul.u32.u64.low 3817748708, %v18681_v34  ;;  %v18710_v38 = vmul.u32.u64.high 3817748708, %v18681_v34, %v18709_v53  ;;  %vm22092_vm5 = vcmp.lt.s32.totalorder %v18621_v45, 0  ;;  %v22093_v62 = vmov 0 }
 0x348   : > { %vm18719_vm9 = vmand %vm22092_vm5, %vm6608_vm0  ;;  %vm6614_vm14 = vcmp.ne.s32.totalorder %v18688_v48, 0  ;;  %vm6650_vm11 = vcmp.lt.s32.totalorder %v18688_v48, 0  ;;  %v7673_v5 = vshrl.u32 %v18656_v11, 16  ;;  %v6448_v40 = vmul.u32 18, %v6447_v47 }
 0x349   : > { %v22094_v62 = vsel %vm18719_vm9, 4294967295, %v22093_v62  ;;  %vm22096_vm7 = vcmp.ne.s32.totalorder %v18639_v7, 0  ;;  %vm22097_vm3 = vcmp.lt.s32.totalorder %v18639_v7, 0  ;;  %v22098_v53 = vmov 0 }
 0x34a   : > { %22095 = vst [vmem:[#allocation41_spill] sm:$0xff] %v22094_v62  ;;  %vm18730_vm1 = vmand %vm22097_vm3, %vm22096_vm7  ;;  %vm6612_vm0 = vcmp.ne.s32.totalorder %v18692_v37, 0  ;;  %vm6648_vm5 = vcmp.lt.s32.totalorder %v18692_v37, 0  ;;  %v7677_v16 = vrot.slane %v7675_v43, 1  ;;  %v6436_v6 = vshrl.u32 %v18660_v36, 4 }
 0x34b   : > { %v22099_v53 = vsel %vm18730_vm1, 4294967295, %v22098_v53  ;;  %vm22101_vm8 = vcmp.ne.s32.totalorder %v18654_v2, 0  ;;  %vm22102_vm13 = vcmp.lt.s32.totalorder %v18654_v2, 0  ;;  %v22103_v47 = vmov 0  ;;  %vm18752_vm7 = vmand %vm6650_vm11, %vm6614_vm14 }
 0x34c   : > { %22100 = vst [vmem:[#allocation42_spill] sm:$0xff] %v22099_v53  ;;  %vm18741_vm2 = vmand %vm22102_vm13, %vm22101_vm8  ;;  %v18746_v11 = vadd.s32 18, %v18688_v48  ;;  %v6426_v17 = vmul.u32 18, %v6425_v10  ;;  %v18749_v19 = vmul.u32.u64.low 3817748708, %v18705_v8  ;;  %v18750_v56 = vmul.u32.u64.high 3817748708, %v18705_v8, %v18749_v19 }
 0x34d   : > { %v22104_v47 = vsel %vm18741_vm2, 4294967295, %v22103_v47  ;;  %v22107_v43 = vmov 0  ;;  %v18757_v36 = vadd.s32 18, %v18692_v37  ;;  %v6459_v26 = vmul.u32 18, %v6458_v21  ;;  %vm18769_vm8 = vmand %vm6648_vm5, %vm6612_vm0 }
 0x34e   : > { %22105 = vst [vmem:[#allocation43_spill] sm:$0xff] %v22104_v47  ;;  %22106 = vst [vmem:[#allocation44_spill] sm:$0xff] %v18746_v11  ;;  %v22108_v43 = vsel %vm18752_vm7, 4294967295, %v22107_v43  ;;  %v18760_v49 = vmul.u32.u64.low 3817748708, %v18713_v15  ;;  %v18761_v61 = vmul.u32.u64.high 3817748708, %v18713_v15, %v18760_v49  ;;  %v22111_v19 = vmov 0 }
 0x34f   : > { %22109 = vst [vmem:[#allocation45_spill] sm:$0xff] %v22108_v43  ;;  %22110 = vst [vmem:[#allocation46_spill] sm:$0xff] %v18757_v36  ;;  %v22112_v19 = vsel %vm18769_vm8, 4294967295, %v22111_v19  ;;  %v18774_v0 = vsub.s32 %v18574_v58, %v6448_v40  ;;  %v18777_v21 = vadd.s32 240, %v16926_v12  ;;  %v18780_v55 = vadd.s32 224, %v16926_v12 }
 0x350   : > { %22113 = vst [vmem:[#allocation47_spill] sm:$0xff] %v22112_v19  ;;  %v6437_v45 = vmul.u32 18, %v6436_v6  ;;  %v6491_v58 = vshrl.u32 %v18697_v23, 4  ;;  %v18795_v29 = vor.u32 %v7677_v16, %v7673_v5  ;;  %v18798_v62 = vsub.s32 %v18593_v33, %v6426_v17 }
 0x351   : > { %22114 = vst [vmem:[#allocation48_spill] sm:$0xff] %v18774_v0  ;;  %v18801_v49 = vadd.s32 248, %v16926_v12  ;;  %v18808_v23 = vsub.s32 %v18598_v24, %v6459_v26  ;;  %v6469_v10 = vshrl.u32 %v18710_v38, 4  ;;  %v18812_v40 = vadd.s32 232, %v16926_v12 }
 0x352   : > { %22115 = vst [vmem:[#allocation49_spill] sm:$0xff] %v18795_v29  ;;  %vm6617_vm13 = vcmp.ne.s32.totalorder %v18774_v0, 0  ;;  %v18816_v16 = vmul.u32.u64.low 3817748708, %v18777_v21  ;;  %v18817_v33 = vmul.u32.u64.high 3817748708, %v18777_v21, %v18816_v16  ;;  %vm6653_vm11 = vcmp.lt.s32.totalorder %v18774_v0, 0 }
 0x353   : > { %v18820_v17 = vmul.u32.u64.low 3817748708, %v18780_v55  ;;  %v18821_v5 = vmul.u32.u64.high 3817748708, %v18780_v55, %v18820_v17  ;;  %v18825_v24 = vadd.s32 18, %v18774_v0  ;;  %v18828_v26 = vsub.s32 %v18615_v13, %v6437_v45  ;;  %vm18899_vm5 = vmand %vm6653_vm11, %vm6617_vm13 }
 0x354   : > { %v6492_v38 = vmul.u32 18, %v6491_v58  ;;  %v6502_v6 = vshrl.u32 %v18750_v56, 4  ;;  %v18833_v29 = vmul.u32.u64.low 3817748708, %v18801_v49  ;;  %v18834_v16 = vmul.u32.u64.high 3817748708, %v18801_v49, %v18833_v29 }
 0x355   : > { %22116 = vst [vmem:[#allocation50_spill] sm:$0xff] %v18825_v24  ;;  %22117 = vst [vmem:[#allocation51_spill] sm:$0xff] %v18828_v26  ;;  %v6470_v37 = vmul.u32 18, %v6469_v10  ;;  %v6480_v17 = vshrl.u32 %v18761_v61, 4  ;;  %v18838_v36 = vmul.u32.u64.low 3817748708, %v18812_v40  ;;  %v18839_v19 = vmul.u32.u64.high 3817748708, %v18812_v40, %v18838_v36 }
 0x356   : > { %v18843_v13 = vadd.s32 18, %v18798_v62  ;;  %v18848_v56 = vadd.s32 18, %v18808_v23  ;;  %v18852_v61 = vsub.s32 %v18663_v27, %v6492_v38  ;;  %v18855_v45 = vadd.s32 272, %v16926_v12 }
 0x357   : > { %v6503_v29 = vmul.u32 18, %v6502_v6  ;;  %v18858_v36 = vadd.s32 256, %v16926_v12  ;;  %v18861_v10 = vadd.s32 280, %v16926_v12  ;;  %v18864_v58 = vadd.s32 264, %v16926_v12 }
 0x358   : > { %v18867_v48 = vsub.s32 %v18681_v34, %v6470_v37  ;;  %v6481_v11 = vmul.u32 18, %v6480_v17  ;;  %v18870_v27 = vmul.u32.u64.low 3817748708, %v18855_v45  ;;  %v18871_v38 = vmul.u32.u64.high 3817748708, %v18855_v45, %v18870_v27 }
 0x359   : > { %v6535_v43 = vshrl.u32 %v18817_v33, 4  ;;  %v6513_v6 = vshrl.u32 %v18821_v5, 4  ;;  %v18876_v2 = vmul.u32.u64.low 3817748708, %v18858_v36  ;;  %v18877_v30 = vmul.u32.u64.high 3817748708, %v18858_v36, %v18876_v2 }
 0x35a   : > { %v18880_v47 = vmul.u32.u64.low 3817748708, %v18861_v10  ;;  %v18881_v12 = vmul.u32.u64.high 3817748708, %v18861_v10, %v18880_v47  ;;  %v18884_v34 = vmul.u32.u64.low 3817748708, %v18864_v58  ;;  %v18885_v37 = vmul.u32.u64.high 3817748708, %v18864_v58, %v18884_v34 }
 0x35b   : > { %v18889_v17 = vadd.s32 18, %v18828_v26  ;;  %v18892_v33 = vsub.s32 %v18705_v8, %v6503_v29  ;;  %v6546_v5 = vshrl.u32 %v18834_v16, 4  ;;  %v22118_v2 = vmov 0 }
 0x35c   : > { %v22119_v2 = vsel %vm18899_vm5, 4294967295, %v22118_v2  ;;  %v18906_v47 = vsub.s32 %v18713_v15, %v6481_v11  ;;  %v6524_v8 = vshrl.u32 %v18839_v19, 4  ;;  %vm22122_vm14 = vcmp.ne.s32.totalorder %v18798_v62, 0 }
 0x35d   : > { %22120 = vst [vmem:[#allocation52_spill] sm:$0xff] %v22119_v2  ;;  %vm22123_vm8 = vcmp.lt.s32.totalorder %v18798_v62, 0  ;;  %v22124_v16 = vmov 0  ;;  %v18918_v29 = vadd.s32 18, %v18852_v61  ;;  %v6536_v27 = vmul.u32 18, %v6535_v43 }
 0x35e   : > { %22121 = vst [vmem:[#allocation53_spill] sm:$0xff] %v18906_v47  ;;  %vm18913_vm7 = vmand %vm22123_vm8, %vm22122_vm14  ;;  %v6579_v34 = vshrl.u32 %v18871_v38, 4  ;;  %vm22126_vm11 = vcmp.ne.s32.totalorder %v18808_v23, 0  ;;  %vm22127_vm3 = vcmp.lt.s32.totalorder %v18808_v23, 0  ;;  %v22128_v11 = vmov 0 }
 0x35f   : > { %v22125_v16 = vsel %vm18913_vm7, 4294967295, %v22124_v16  ;;  %vm18926_vm0 = vmand %vm22127_vm3, %vm22126_vm11  ;;  %v18932_v15 = vadd.s32 18, %v18867_v48  ;;  %v6514_v19 = vmul.u32 18, %v6513_v6  ;;  %v6557_v7 = vshrl.u32 %v18877_v30, 4 }
 0x360   : > { %v22129_v11 = vsel %vm18926_vm0, 4294967295, %v22128_v11  ;;  %vm22130_vm14 = vcmp.ne.s32.totalorder %v18828_v26, 0  ;;  %vm22131_vm13 = vcmp.lt.s32.totalorder %v18828_v26, 0  ;;  %v22132_v43 = vmov 0 }
 0x361   : > { %vm18939_vm2 = vmand %vm22131_vm13, %vm22130_vm14  ;;  %vm6658_vm11 = vcmp.lt.s32.totalorder %v18892_v33, 0  ;;  %v6547_v38 = vmul.u32 18, %v6546_v5  ;;  %v6590_v44 = vshrl.u32 %v18881_v12, 4  ;;  %vm22134_vm8 = vcmp.ne.s32.totalorder %v18852_v61, 0 }
 0x362   : > { %v22133_v43 = vsel %vm18939_vm2, 4294967295, %v22132_v43  ;;  %vm22135_vm1 = vcmp.lt.s32.totalorder %v18852_v61, 0  ;;  %v22136_v30 = vmov 0  ;;  %vm6620_vm13 = vcmp.ne.s32.totalorder %v18906_v47, 0 }
 0x363   : > { %vm18950_vm9 = vmand %vm22135_vm1, %vm22134_vm8  ;;  %v6525_v6 = vmul.u32 18, %v6524_v8  ;;  %v6568_v53 = vshrl.u32 %v18885_v37, 4  ;;  %vm22138_vm3 = vcmp.ne.s32.totalorder %v18867_v48, 0  ;;  %vm22139_vm4 = vcmp.lt.s32.totalorder %v18867_v48, 0 }
 0x364   : > { %v22137_v30 = vsel %vm18950_vm9, 4294967295, %v22136_v30  ;;  %vm18965_vm1 = vmand %vm22139_vm4, %vm22138_vm3  ;;  %v22140_v5 = vmov 0  ;;  %v18970_v51 = vadd.s32 18, %v18892_v33  ;;  %v18973_v8 = vsub.s32 %v18777_v21, %v6536_v27 }
 0x365   : > { %v22141_v5 = vsel %vm18965_vm1, 4294967295, %v22140_v5  ;;  %v6580_v37 = vmul.u32 18, %v6579_v34  ;;  %vm22143_vm8 = vcmp.ne.s32.totalorder %v18892_v33, 0  ;;  %v22144_v0 = vmov 0 }
 0x366   : > { %22142 = vst [vmem:[#allocation54_spill] sm:$0xff] %v18973_v8  ;;  %vm18981_vm14 = vmand %vm6658_vm11, %vm22143_vm8  ;;  %v18986_v24 = vadd.s32 18, %v18906_v47  ;;  %v18989_v2 = vsub.s32 %v18780_v55, %v6514_v19  ;;  %v6558_v21 = vmul.u32 18, %v6557_v7  ;;  %vm22147_vm4 = vcmp.lt.s32.totalorder %v18906_v47, 0 }
 0x367   : > { %v22145_v0 = vsel %vm18981_vm14, 4294967295, %v22144_v0  ;;  %vm19003_vm3 = vmand %vm22147_vm4, %vm6620_vm13  ;;  %v22148_v12 = vmov 0  ;;  %v19008_v7 = vsub.s32 %v18801_v49, %v6547_v38  ;;  %v6591_v55 = vmul.u32 18, %v6590_v44 }
 0x368   : > { %22146 = vst [vmem:[#allocation55_spill] sm:$0xff] %v18986_v24  ;;  %v22149_v12 = vsel %vm19003_vm3, 4294967295, %v22148_v12  ;;  %v19019_v27 = vsub.s32 %v18812_v40, %v6525_v6  ;;  %v6569_v26 = vmul.u32 18, %v6568_v53  ;;  %v22153_v49 = vsel %vm18294_vm6, %v18278_v3, %v18241_v60 }
 0x369   : > { %22150 = vst [vmem:[#allocation56_spill] sm:$0xff] %v22149_v12  ;;  %22151 = vst [vmem:[#allocation57_spill] sm:$0xff] %v19008_v7  ;;  %vm19026_vm11 = vcmp.lt.s32.totalorder %v22153_v49, 16  ;;  %v19037_v53 = vsub.s32 %v18855_v45, %v6580_v37  ;;  %v22157_v60 = vsel %vm18305_vm15, %v18283_v25, %v18256_v52  ;;  %v19055_v40 = vsub.s32 %v18858_v36, %v6558_v21  ;;  %v19060_v52 = vld [vmem:[%s21863_s3] ss:$0 sm:$0xff] }
 0x36a   : > { %22152 = vst [vmem:[#allocation58_spill] sm:$0xff] %v19019_v27  ;;  %vm19044_vm6 = vcmp.lt.s32.totalorder %v22157_v60, 16  ;;  %vm22161_vm15 = vnez %v22027_v32  ;;  %v19072_v45 = vadd.s32 18, %v18973_v8  ;;  %v19077_v36 = vsub.s32 %v18861_v10, %v6591_v55  ;;  %v19082_v32 = vld [vmem:[%s21864_s4] ss:$0 sm:$0xff] }
 0x36b   : > { %22156 = vst [vmem:[#allocation59_spill] sm:$0xff] %v19037_v53  ;;  %22160 = vst [vmem:[#allocation60_spill] sm:$0xff] %v19055_v40  ;;  %v22162_v25 = vsel %vm22161_vm15, %v18321_v22, %v18270_v14  ;;  %v22166_v14 = vsel %vm18411_vm10, %v18352_v4, %v18298_v41  ;;  %vm22169_vm8 = vcmp.ne.s32.totalorder %v18973_v8, 0  ;;  %vm22170_vm4 = vcmp.lt.s32.totalorder %v18973_v8, 0 }
 0x36c   : > { %vm19067_vm13 = vcmp.lt.s32.totalorder %v22162_v25, 16  ;;  %22165 = vst [vmem:[#allocation61_spill] sm:$0xff] %v19077_v36  ;;  %vm19089_vm15 = vcmp.lt.s32.totalorder %v22166_v14, 16  ;;  %vm19097_vm3 = vmand %vm22170_vm4, %vm22169_vm8  ;;  %v19102_v6 = vadd.s32 18, %v18989_v2  ;;  %v19107_v41 = vsub.s32 %v18864_v58, %v6569_v26 }
 0x36d   : > { %vm22174_vm10 = vcmp.ne.s32.totalorder %v18989_v2, 0  ;;  %vm22175_vm9 = vcmp.lt.s32.totalorder %v18989_v2, 0  ;;  %v19118_v37 = vadd.s32 18, %v19008_v7  ;;  %v19121_v21 = vadd.s32 18, %v19019_v27 }
 0x36e   : > { %22173 = vst [vmem:[#allocation62_spill] sm:$0xff] %v19107_v41  ;;  %vm19113_vm2 = vmand %vm22175_vm9, %vm22174_vm10  ;;  %vm22179_vm1 = vcmp.ne.s32.totalorder %v19008_v7, 0  ;;  %vm22180_vm9 = vcmp.lt.s32.totalorder %v19008_v7, 0  ;;  %v19135_v49 = vadd.s32 18, %v19037_v53  ;;  %vm22184_vm4 = vcmp.ne.s32.totalorder %v19019_v27, 0 }
 0x36f   : > { %22178 = vst [vmem:[#allocation63_spill] sm:$0xff] %v19121_v21  ;;  %vm19130_vm10 = vmand %vm22180_vm9, %vm22179_vm1  ;;  %vm22185_vm0 = vcmp.lt.s32.totalorder %v19019_v27, 0  ;;  %v22186_v14 = vmov 0  ;;  %vm6630_vm1 = vcmp.ne.s32.totalorder %v19077_v36, 0  ;;  %vm22190_vm8 = vcmp.ne.s32.totalorder %v19037_v53, 0 }
 0x370   : > { %22183 = vst [vmem:[#allocation64_spill] sm:$0xff] %v19135_v49  ;;  %vm19144_vm7 = vmand %vm22185_vm0, %vm22184_vm4  ;;  %vm22191_vm14 = vcmp.lt.s32.totalorder %v19037_v53, 0  ;;  %v22192_v34 = vmov 0  ;;  %vm6628_vm4 = vcmp.ne.s32.totalorder %v19107_v41, 0  ;;  %vm22195_vm9 = vcmp.ne.s32.totalorder %v19055_v40, 0 }
 0x371   : > { %v22187_v14 = vsel %vm19144_vm7, 4294967295, %v22186_v14  ;;  %vm19159_vm0 = vmand %vm22191_vm14, %vm22190_vm8  ;;  %vm22196_vm14 = vcmp.lt.s32.totalorder %v19055_v40, 0  ;;  %v19180_v24 = vadd.s32 18, %v19077_v36  ;;  %v19205_v50 = vadd.s32 18, %v19107_v41 }
 0x372   : > { %22188 = vst [vmem:[#allocation65_spill] sm:$0xff] %v22187_v14  ;;  %v22193_v34 = vsel %vm19159_vm0, 4294967295, %v22192_v34  ;;  %vm19175_vm8 = vmand %vm22196_vm14, %vm22195_vm9  ;;  %vm22204_vm9 = vcmp.lt.s32.totalorder %v19077_v36, 0  ;;  %v22210_v8 = vmov 0 }
 0x373   : > { %22194 = vst [vmem:[#allocation67_spill] sm:$0xff] %v22193_v34  ;;  %22200 = vst [vmem:[#allocation69_spill] sm:$0xff] %v19180_v24 }
 0x374   : > { %vm19200_vm14 = vmand %vm22204_vm9, %vm6630_vm1  ;;  %22208 = vst [vmem:[#allocation71_spill] sm:$0xff] %v19205_v50 }
 0x3c6   : > { %v15355_v4 = vpop.f32.mrb[0].mxu0 }
 0x3c7   : > { %v6820_v26 = vmul.f32 %v15355_v4, %v19060_v52  ;;  %v5983_v58 = vpop.f32.mrb[1].mxu0  ;;  %v19149_v4 = vadd.s32 18, %v19055_v40  ;;  %v22262_v40 = vld [vmem:[#allocation26_spill] sm:$0xff] }
 0x3c8   : > { %v6818_v60 = vmul.f32 %v19060_v52, %v5983_v58  ;;  %v15356_v25 = vpop.f32.mrb[2].mxu0 }
 0x3c9   : > { %22189 = vst [vmem:[#allocation66_spill] sm:$0xff] %v19149_v4  ;;  %v6863_v42 = vadd.f32 %v19082_v32, %v6820_v26  ;;  %v6821_v58 = vmul.f32 %v15356_v25, %v19060_v52  ;;  %v5986_v38 = vpop.f32.mrb[3].mxu0  ;;  %v22197_v25 = vmov 0  ;;  %v22263_v4 = vld [vmem:[#allocation22_spill] sm:$0xff] }
 0x3ca   : > { %v6861_v19 = vadd.f32 %v19082_v32, %v6818_v60  ;;  %v6819_v47 = vmul.f32 %v19060_v52, %v5986_v38  ;;  %v22198_v25 = vsel %vm19175_vm8, 4294967295, %v22197_v25  ;;  %v22201_v38 = vsel %vm18427_vm12, %v18369_v59, %v18337_v31 }
 0x3cb   : > { %22199 = vst [vmem:[#allocation68_spill] sm:$0xff] %v22198_v25  ;;  %v6899_v12 = vmax.f32 %v6863_v42, 0.0  ;;  %v6864_v60 = vadd.f32 %v19082_v32, %v6821_v58  ;;  %vm19188_vm5 = vcmp.lt.s32.totalorder %v22201_v38, 16  ;;  %v22205_v42 = vmov 0 }
 0x3cc   : > { %v22206_v42 = vsel %vm19200_vm14, 4294967295, %v22205_v42  ;;  %v6897_v31 = vmax.f32 %v6861_v19, 0.0  ;;  %v6862_v59 = vadd.f32 %v19082_v32, %v6819_v47  ;;  %vm22209_vm12 = vcmp.lt.s32.totalorder %v19107_v41, 0  ;;  %v7478_v41 = vld [vmem:[#allocation3 + $0x8] sm:$0xe] }
 0x3cd   : > { %22207 = vst [vmem:[#allocation70_spill] sm:$0xff] %v22206_v42  ;;  %vm19220_vm1 = vmand %vm22209_vm12, %vm6628_vm4  ;;  %v6935_v47 = vsel %vm19026_vm11, %v6899_v12, 0.0  ;;  %v6900_v19 = vmax.f32 %v6864_v60, 0.0  ;;  %vm22213_vm11 = vnez %v22038_v54  ;;  %vm22221_vm4 = vnez %v22044_v9 }
 0x3ce   : > { %v22211_v8 = vsel %vm19220_vm1, 4294967295, %v22210_v8  ;;  %v14562_v27 = vpack.c.bf16 %v6935_v47, %v6935_v47  ;;  %v6933_v21 = vsel %vm19044_vm6, %v6897_v31, 0.0  ;;  %v6898_v14 = vmax.f32 %v6862_v59, 0.0  ;;  %v15359_v7 = vpop.f32.mrb[4].mxu0 }
 0x3cf   : > { %22212 = vst [vmem:[#allocation72_spill] sm:$0xff] %v22211_v8  ;;  %v14560_v44 = vpack.c.bf16 %v6933_v21, %v6933_v21  ;;  %v6936_v60 = vsel %vm19067_vm13, %v6900_v19, 0.0  ;;  %v6824_v58 = vmul.f32 %v15359_v7, %v19060_v52  ;;  %v5999_v53 = vpop.f32.mrb[5].mxu0  ;;  %v22214_v7 = vsel %vm22213_vm11, %v18387_v39, %v18355_v28 }
 0x3d0   : > { %v7102_v31 = vshrl.u32 %v14562_v27, 16  ;;  %v7105_v59 = vshll.u32 %v14562_v27, 16  ;;  %v14563_v47 = vpack.c.bf16 %v6936_v60, %v6936_v60  ;;  %v6934_v38 = vsel %vm19089_vm15, %v6898_v14, 0.0  ;;  %v15360_v42 = vpop.f32.mrb[6].mxu0 }
 0x3d1   : > { %v7083_v12 = vshrl.u32 %v14560_v44, 16  ;;  %v7086_v21 = vshll.u32 %v14560_v44, 16  ;;  %v14561_v36 = vpack.c.bf16 %v6934_v38, %v6934_v38  ;;  %v6867_v1 = vadd.f32 %v19082_v32, %v6824_v58  ;;  %v6002_v14 = vpop.f32.mrb[7].mxu0 }
 0x3d2   : > { %vm19255_vm13 = vcmp.lt.s32.totalorder %v22214_v7, 16  ;;  %vm22217_vm6 = vnez %v22042_v35  ;;  %v7104_v58 = vrot.slane %v7102_v31, 6  ;;  %v7107_v38 = vrot.slane %v7105_v59, 7  ;;  %v22227_v59 = vld [vmem:[#allocation15_spill] sm:$0xff] }
 0x3d3   : > { %v22218_v27 = vsel %vm22217_vm6, %v18395_v20, %v18359_v57  ;;  %v7112_v54 = vshrl.u32 %v14563_v47, 16  ;;  %v7115_v44 = vshll.u32 %v14563_v47, 16  ;;  %v7085_v60 = vrot.slane %v7083_v12, 6  ;;  %v22228_v47 = vld [vmem:[#allocation11_spill] sm:$0xff] }
 0x3d4   : > { %vm19264_vm15 = vcmp.lt.s32.totalorder %v22218_v27, 16  ;;  %v7088_v28 = vrot.slane %v7086_v21, 7  ;;  %v7092_v39 = vshrl.u32 %v14561_v36, 16  ;;  %v7095_v7 = vshll.u32 %v14561_v36, 16  ;;  %v22225_v36 = vld [vmem:[#allocation16_spill] sm:$0xff] }
 0x3d5   : > { %v7108_v3 = vor.u32 %v7107_v38, %v7104_v58  ;;  %v7114_v50 = vrot.slane %v7112_v54, 6  ;;  %v7117_v35 = vrot.slane %v7115_v44, 7  ;;  %v6903_v8 = vmax.f32 %v6867_v1, 0.0  ;;  %v22232_v54 = vld [vmem:[#allocation9_spill] sm:$0xff] }
 0x3d6   : > { %v7089_v24 = vor.u32 %v7088_v28, %v7085_v60  ;;  %v7094_v57 = vrot.slane %v7092_v39, 6  ;;  %v7097_v20 = vrot.slane %v7095_v7, 7  ;;  %v6822_v27 = vmul.f32 %v19060_v52, %v5999_v53  ;;  %v22234_v7 = vld [vmem:[#allocation18_spill] sm:$0xff] }
 0x3d7   : > { %v22222_v31 = vsel %vm22221_vm4, %v18480_v46, %v18372_v63  ;;  %vm22226_vm12 = vnez %v22225_v36  ;;  %v7110_v58 = vrot.slane %v7108_v3, 4  ;;  %v19287_v53 = vor.u32 %v7117_v35, %v7114_v50  ;;  %v15363_v46 = vpop.f32.mrb[8].mxu0  ;;  %v22237_v36 = vld [vmem:[#allocation12_spill] sm:$0xff] }
 0x3d8   : > { %vm19274_vm9 = vcmp.lt.s32.totalorder %v22222_v31, 16  ;;  %v22229_v21 = vsel %vm22226_vm12, %v22227_v59, %v22228_v47  ;;  %v6939_v9 = vsel %vm19188_vm5, %v6903_v8, 0.0  ;;  %v6825_v63 = vmul.f32 %v15360_v42, %v19060_v52  ;;  %v6015_v39 = vpop.f32.mrb[9].mxu0  ;;  %v22236_v31 = vld [vmem:[#allocation17_spill] sm:$0xff]  ;;  %v22241_v8 = vld [vmem:[#allocation10_spill] sm:$0xff] }
 0x3d9   : > { %vm19283_vm11 = vcmp.lt.s32.totalorder %v22229_v21, 16  ;;  %v7090_v38 = vrot.slane %v7089_v24, 4  ;;  %vm22233_vm6 = vnez %v22232_v54  ;;  %v7098_v60 = vor.u32 %v7097_v20, %v7094_v57  ;;  %v15364_v35 = vpop.f32.mrb[10].mxu0  ;;  %v22256_v42 = vld [vmem:[#allocation14_spill] sm:$0xff] }
 0x3da   : > { %v7479_v44 = vsel %vm22233_vm6, %v7089_v24, %v7478_v41  ;;  %v14566_v28 = vpack.c.bf16 %v6939_v9, %v6939_v9  ;;  %vm22235_vm4 = vnez %v22234_v7  ;;  %vm22242_vm5 = vnez %v22241_v8  ;;  %v6018_v9 = vpop.f32.mrb[11].mxu0 }
 0x3db   : > { %v22238_v59 = vsel %vm22235_vm4, %v22236_v31, %v22237_v36  ;;  %7480 = vst [vmem:[#allocation3 + $0x8] sm:$0xe] %v7479_v44  ;;  %v7119_v26 = vsel %vm22242_vm5, %v7110_v58, %v19287_v53  ;;  %v6865_v24 = vadd.f32 %v19082_v32, %v6822_v27  ;;  %v6868_v41 = vadd.f32 %v19082_v32, %v6825_v63 }
 0x3dc   : > { %vm19299_vm12 = vcmp.lt.s32.totalorder %v22238_v59, 16  ;;  %vm22243_vm6 = vcmask 519168   ;;  %v7099_v57 = vsel %vm22242_vm5, %v7090_v38, %v7098_v60  ;;  %v7100_v20 = vrot.slane %v7098_v60, 4 }
 0x3dd   : > { %7483 = vst.msk [vmem:[#allocation3 + $0x14] sm:$0xf] %vm22243_vm6, %v7119_v26  ;;  %v7142_v47 = vshrl.u32 %v14566_v28, 16  ;;  %v7145_v21 = vshll.u32 %v14566_v28, 16  ;;  %vm22244_vm4 = vmmov %vm22243_vm6  ;;  %v6901_v44 = vmax.f32 %v6865_v24, 0.0  ;;  %v6904_v58 = vmax.f32 %v6868_v41, 0.0 }
 0x3de   : > { %7481 = vst.msk [vmem:[#allocation3 + $0xc] sm:$0xf] %vm22244_vm4, %v7099_v57  ;;  %v6823_v7 = vmul.f32 %v19060_v52, %v6002_v14  ;;  %v6828_v27 = vmul.f32 %v15363_v46, %v19060_v52  ;;  %v7109_v63 = vsel %vm22242_vm5, %v7100_v20, %v7108_v3  ;;  %v6826_v59 = vmul.f32 %v19060_v52, %v6015_v39  ;;  %vm22245_vm6 = vmmov %vm22244_vm4  ;;  %v22246_v46 = vld [vmem:[#allocation21_spill] sm:$0xff]  ;;  %v22248_v26 = vld [vmem:[#allocation19_spill] sm:$0xff] }
 0x3df   : > { %v7144_v31 = vrot.slane %v7142_v47, 6  ;;  %v7147_v36 = vrot.slane %v7145_v21, 7  ;;  %7482 = vst.msk [vmem:[#allocation3 + $0x10] sm:$0xf] %vm22245_vm6, %v7109_v63  ;;  %v6937_v38 = vsel %vm19255_vm13, %v6901_v44, 0.0  ;;  %v6940_v60 = vsel %vm19264_vm15, %v6904_v58, 0.0 }
 0x3e0   : > { %v6866_v28 = vadd.f32 %v19082_v32, %v6823_v7  ;;  %v6871_v14 = vadd.f32 %v19082_v32, %v6828_v27  ;;  %vm22247_vm4 = vnez %v22246_v46  ;;  %v22249_v3 = vld [vmem:[#allocation13_spill] sm:$0xff]  ;;  %v14564_v19 = vpack.c.bf16 %v6937_v38, %v6937_v38  ;;  %v15367_v58 = vpop.f32.mrb[12].mxu0 }
 0x3e1   : > { %v22250_v24 = vsel %vm22247_vm4, %v22248_v26, %v22249_v3  ;;  %v19334_v39 = vor.u32 %v7147_v36, %v7144_v31  ;;  %v14567_v57 = vpack.c.bf16 %v6940_v60, %v6940_v60  ;;  %v6869_v22 = vadd.f32 %v19082_v32, %v6826_v59  ;;  %v6031_v26 = vpop.f32.mrb[13].mxu0  ;;  %v22276_v41 = vld [vmem:[#allocation33_spill] sm:$0xff] }
 0x3e2   : > { %vm19330_vm1 = vcmp.lt.s32.totalorder %v22250_v24, 16  ;;  %v6902_v20 = vmax.f32 %v6866_v28, 0.0  ;;  %v6907_v47 = vmax.f32 %v6871_v14, 0.0  ;;  %v6829_v21 = vmul.f32 %v15364_v35, %v19060_v52  ;;  %v15368_v38 = vpop.f32.mrb[14].mxu0  ;;  %v22253_v14 = vld [vmem:[#allocation23_spill] sm:$0xff]  ;;  %v22255_v24 = vld [vmem:[#allocation20_spill] sm:$0xff] }
 0x3e3   : > { %v6827_v44 = vmul.f32 %v19060_v52, %v6018_v9  ;;  %v7150_v7 = vrot.slane %v19334_v39, 4  ;;  %v7122_v27 = vshrl.u32 %v14564_v19, 16  ;;  %v7125_v63 = vshll.u32 %v14564_v19, 16  ;;  %v19353_v12 = vpop.f32.mrb[15].mxu0 }
 0x3e4   : > { %v7152_v46 = vshrl.u32 %v14567_v57, 16  ;;  %v7155_v3 = vshll.u32 %v14567_v57, 16  ;;  %v6938_v31 = vsel %vm19274_vm9, %v6902_v20, 0.0  ;;  %v6943_v36 = vsel %vm19283_vm11, %v6907_v47, 0.0 }
 0x3e5   : > { %v6905_v59 = vmax.f32 %v6869_v22, 0.0  ;;  %v7124_v60 = vrot.slane %v7122_v27, 6  ;;  %v7127_v35 = vrot.slane %v7125_v63, 7  ;;  %v14565_v9 = vpack.c.bf16 %v6938_v31, %v6938_v31 }
 0x3e6   : > { %v7154_v28 = vrot.slane %v7152_v46, 6  ;;  %vm22254_vm13 = vnez %v22253_v14  ;;  %v7157_v57 = vrot.slane %v7155_v3, 7  ;;  %v14570_v1 = vpack.c.bf16 %v6943_v36, %v6943_v36 }
 0x3e7   : > { %v22257_v19 = vsel %vm22254_vm13, %v22255_v24, %v22256_v42  ;;  %v6941_v22 = vsel %vm19299_vm12, %v6905_v59, 0.0  ;;  %v6872_v20 = vadd.f32 %v19082_v32, %v6829_v21  ;;  %v7128_v47 = vor.u32 %v7127_v35, %v7124_v60  ;;  %vm22268_vm12 = vmmov %vm22245_vm6 }
 0x3e8   : > { %vm19349_vm15 = vcmp.lt.s32.totalorder %v22257_v19, 16  ;;  %v7132_v27 = vshrl.u32 %v14565_v9, 16  ;;  %v7135_v63 = vshll.u32 %v14565_v9, 16  ;;  %v14568_v46 = vpack.c.bf16 %v6941_v22, %v6941_v22  ;;  %v22260_v19 = vld [vmem:[#allocation27_spill] sm:$0xff]  ;;  %v22269_v22 = vld [vmem:[#allocation30_spill] sm:$0xff] }
 0x3e9   : > { %v7158_v31 = vor.u32 %v7157_v57, %v7154_v28  ;;  %v7182_v14 = vshrl.u32 %v14570_v1, 16  ;;  %v7185_v42 = vshll.u32 %v14570_v1, 16  ;;  %v6908_v24 = vmax.f32 %v6872_v20, 0.0  ;;  %v22271_v20 = vld [vmem:[#allocation28_spill] sm:$0xff] }
 0x3ea   : > { %vm22261_vm9 = vnez %v22260_v19  ;;  %v22267_v50 = vrot.slane %v19287_v53, 4  ;;  %v7130_v36 = vrot.slane %v7128_v47, 4  ;;  %v7134_v59 = vrot.slane %v7132_v27, 6  ;;  %v22279_v19 = vld [vmem:[#allocation25_spill] sm:$0xff] }
 0x3eb   : > { %v22264_v25 = vsel %vm22261_vm9, %v22262_v40, %v22263_v4  ;;  %v7137_v60 = vrot.slane %v7135_v63, 7  ;;  %v7159_v35 = vsel %vm22242_vm5, %v7150_v7, %v7158_v31  ;;  %v7160_v28 = vrot.slane %v7158_v31, 4  ;;  %v15371_v4 = vpop.f32.mrb[16].mxu0 }
 0x3ec   : > { %vm19363_vm11 = vcmp.lt.s32.totalorder %v22264_v25, 16  ;;  %v7129_v21 = vsel %vm22242_vm5, %v22267_v50, %v7128_v47  ;;  %v7184_v9 = vrot.slane %v7182_v14, 6  ;;  %v7187_v40 = vrot.slane %v7185_v42, 7  ;;  %7487 = vst.msk [vmem:[#allocation3 + $0x24] sm:$0xf] %vm22245_vm6, %v7159_v35  ;;  %v22272_v47 = vld [vmem:[#allocation24_spill] sm:$0xff] }
 0x3ed   : > { %7484 = vst.msk [vmem:[#allocation3 + $0x18] sm:$0xf] %vm22268_vm12, %v7129_v21  ;;  %v7138_v25 = vor.u32 %v7137_v60, %v7134_v59  ;;  %v7162_v57 = vshrl.u32 %v14568_v46, 16  ;;  %v7165_v53 = vshll.u32 %v14568_v46, 16  ;;  %v6944_v1 = vsel %vm19330_vm1, %v6908_v24, 0.0  ;;  %v19386_v7 = vpop.f32.mrb[17].mxu0  ;;  %vm22283_vm12 = vmmov %vm22245_vm6 }
 0x3ee   : > { %vm22270_vm4 = vnez %v22269_v22  ;;  %v19388_v31 = vor.u32 %v7187_v40, %v7184_v9  ;;  %v14571_v14 = vpack.c.bf16 %v6944_v1, %v6944_v1  ;;  %v6870_v42 = vadd.f32 %v19082_v32, %v6827_v44  ;;  %v22278_v24 = vld [vmem:[#allocation31_spill] sm:$0xff]  ;;  %v19401_v59 = vpop.f32.mrb[18].mxu0 }
 0x3ef   : > { %v22273_v27 = vsel %vm22270_vm4, %v22271_v20, %v22272_v47  ;;  %v6832_v46 = vmul.f32 %v15367_v58, %v19060_v52  ;;  %vm22277_vm1 = vnez %v22276_v41  ;;  %v7139_v60 = vsel %vm22242_vm5, %v7130_v36, %v7138_v25  ;;  %v19405_v44 = vpop.f32.mrb[19].mxu0 }
 0x3f0   : > { %vm19382_vm13 = vcmp.lt.s32.totalorder %v22273_v27, 16  ;;  %v22280_v50 = vsel %vm22277_vm1, %v22278_v24, %v22279_v19  ;;  %v7140_v35 = vrot.slane %v7138_v25, 4  ;;  %v7164_v9 = vrot.slane %v7162_v57, 6  ;;  %7485 = vst.msk [vmem:[#allocation3 + $0x1c] sm:$0xf] %vm22283_vm12, %v7139_v60  ;;  %v22284_v25 = vld [vmem:[#allocation41_spill] sm:$0xff]  ;;  %vm22291_vm1 = vmmov %vm22283_vm12 }
 0x3f1   : > { %vm19397_vm9 = vcmp.lt.s32.totalorder %v22280_v50, 16  ;;  %v7167_v40 = vrot.slane %v7165_v53, 7  ;;  %v7190_v58 = vrot.slane %v19388_v31, 4  ;;  %v7192_v1 = vshrl.u32 %v14571_v14, 16  ;;  %v22286_v57 = vld [vmem:[#allocation36_spill] sm:$0xff]  ;;  %v22287_v53 = vld [vmem:[#allocation29_spill] sm:$0xff] }
 0x3f2   : > { %v7195_v22 = vshll.u32 %v14571_v14, 16  ;;  %v6906_v20 = vmax.f32 %v6870_v42, 0.0  ;;  %v7149_v47 = vsel %vm22242_vm5, %v7140_v35, %v19334_v39  ;;  %v6875_v41 = vadd.f32 %v19082_v32, %v6832_v46 }
 0x3f3   : > { %v7168_v27 = vor.u32 %v7167_v40, %v7164_v9  ;;  %v6830_v36 = vmul.f32 %v19060_v52, %v6031_v26  ;;  %vm22285_vm6 = vnez %v22284_v25  ;;  %7486 = vst.msk [vmem:[#allocation3 + $0x20] sm:$0xf] %vm22291_vm1, %v7149_v47  ;;  %v7194_v14 = vrot.slane %v7192_v1, 6  ;;  %v22292_v9 = vld [vmem:[#allocation42_spill] sm:$0xff]  ;;  %v22294_v40 = vld [vmem:[#allocation37_spill] sm:$0xff]  ;;  %v22295_v25 = vld [vmem:[#allocation32_spill] sm:$0xff] }
 0x3f4   : > { %v22288_v24 = vsel %vm22285_vm6, %v22286_v57, %v22287_v53  ;;  %v7197_v42 = vrot.slane %v7195_v22, 7  ;;  %v6942_v39 = vsel %vm19349_vm15, %v6906_v20, 0.0  ;;  %v6833_v46 = vmul.f32 %v15368_v38, %v19060_v52  ;;  %v19445_v22 = vpop.f32.mrb[20].mxu0  ;;  %vm22299_vm15 = vmmov %vm22291_vm1 }
 0x3f5   : > { %vm19419_vm4 = vcmp.lt.s32.totalorder %v22288_v24, 16  ;;  %v7169_v26 = vsel %vm22242_vm5, %v7160_v28, %v7168_v27  ;;  %v7170_v50 = vrot.slane %v7168_v27, 4  ;;  %v14569_v60 = vpack.c.bf16 %v6942_v39, %v6942_v39  ;;  %v19450_v24 = vpop.f32.mrb[21].mxu0 }
 0x3f6   : > { %v6911_v35 = vmax.f32 %v6875_v41, 0.0  ;;  %vm22293_vm12 = vnez %v22292_v9  ;;  %7488 = vst.msk [vmem:[#allocation3 + $0x28] sm:$0xf] %vm22291_vm1, %v7169_v26  ;;  %v19439_v54 = vor.u32 %v7197_v42, %v7194_v14  ;;  %v6873_v38 = vadd.f32 %v19082_v32, %v6830_v36 }
 0x3f7   : > { %v22296_v57 = vsel %vm22293_vm12, %v22294_v40, %v22295_v25  ;;  %v6876_v28 = vadd.f32 %v19082_v32, %v6833_v46  ;;  %v6831_v1 = vmul.f32 %v19060_v52, %v19353_v12  ;;  %v7172_v20 = vshrl.u32 %v14569_v60, 16  ;;  %v19456_v12 = vpop.f32.mrb[22].mxu0 }
 0x3f8   : > { %vm19434_vm6 = vcmp.lt.s32.totalorder %v22296_v57, 16  ;;  %v7175_v27 = vshll.u32 %v14569_v60, 16  ;;  %v6947_v41 = vsel %vm19363_vm11, %v6911_v35, 0.0  ;;  %v6836_v53 = vmul.f32 %v15371_v4, %v19060_v52  ;;  %v19460_v4 = vpop.f32.mrb[23].mxu0  ;;  %vm22300_vm11 = vmmov %vm22291_vm1 }
 0x3f9   : > { %v7199_v36 = vsel %vm22242_vm5, %v7190_v58, %v19439_v54  ;;  %v7200_v14 = vrot.slane %v19439_v54, 4  ;;  %v14574_v42 = vpack.c.bf16 %v6947_v41, %v6947_v41  ;;  %v6909_v39 = vmax.f32 %v6873_v38, 0.0  ;;  %v19490_v19 = vpop.f32.mrb[24].mxu0 }
 0x3fa   : > { %7491 = vst.msk [vmem:[#allocation3 + $0x34] sm:$0xf] %vm22299_vm15, %v7199_v36  ;;  %v7174_v46 = vrot.slane %v7172_v20, 6  ;;  %v7177_v26 = vrot.slane %v7175_v27, 7  ;;  %v6912_v3 = vmax.f32 %v6876_v28, 0.0  ;;  %v6874_v60 = vadd.f32 %v19082_v32, %v6831_v1 }
 0x3fb   : > { %v7222_v35 = vshrl.u32 %v14574_v42, 16  ;;  %v7225_v9 = vshll.u32 %v14574_v42, 16  ;;  %v6945_v58 = vsel %vm19382_vm13, %v6909_v39, 0.0  ;;  %v6879_v40 = vadd.f32 %v19082_v32, %v6836_v53 }
 0x3fc   : > { %v7178_v25 = vor.u32 %v7177_v26, %v7174_v46  ;;  %v14572_v57 = vpack.c.bf16 %v6945_v58, %v6945_v58  ;;  %v6948_v54 = vsel %vm19397_vm9, %v6912_v3, 0.0  ;;  %v6910_v38 = vmax.f32 %v6874_v60, 0.0  ;;  %v22301_v46 = vld [vmem:[#allocation43_spill] sm:$0xff]  ;;  %v22303_v26 = vld [vmem:[#allocation40_spill] sm:$0xff]  ;;  %v22304_v3 = vld [vmem:[#allocation34_spill] sm:$0xff] }
 0x3fd   : > { %v7224_v20 = vrot.slane %v7222_v35, 6  ;;  %v7227_v27 = vrot.slane %v7225_v9, 7  ;;  %v14575_v28 = vpack.c.bf16 %v6948_v54, %v6948_v54  ;;  %v6915_v41 = vmax.f32 %v6879_v40, 0.0  ;;  %v22310_v9 = vld [vmem:[#allocation44_spill] sm:$0xff]  ;;  %v22311_v58 = vld [vmem:[#allocation38_spill] sm:$0xff] }
 0x3fe   : > { %v7179_v1 = vsel %vm22242_vm5, %v7170_v50, %v7178_v25  ;;  %v7180_v36 = vrot.slane %v7178_v25, 4  ;;  %v7202_v42 = vshrl.u32 %v14572_v57, 16  ;;  %v7205_v49 = vshll.u32 %v14572_v57, 16  ;;  %v22308_v50 = vld [vmem:[#allocation45_spill] sm:$0xff] }
 0x3ff   : > { %7489 = vst.msk [vmem:[#allocation3 + $0x2c] sm:$0xf] %vm22300_vm11, %v7179_v1  ;;  %v7228_v63 = vor.u32 %v7227_v27, %v7224_v20  ;;  %v7232_v53 = vshrl.u32 %v14575_v28, 16  ;;  %v7235_v39 = vshll.u32 %v14575_v28, 16  ;;  %v6946_v21 = vsel %vm19419_vm4, %v6910_v38, 0.0  ;;  %v22315_v27 = vld [vmem:[#allocation47_spill] sm:$0xff] }
 0x400   : > { %vm22302_vm13 = vnez %v22301_v46  ;;  %vm22309_vm12 = vnez %v22308_v50  ;;  %v7189_v57 = vsel %vm22242_vm5, %v7180_v36, %v19388_v31  ;;  %v7204_v54 = vrot.slane %v7202_v42, 6  ;;  %v22317_v28 = vld [vmem:[#allocation46_spill] sm:$0xff]  ;;  %v22318_v1 = vld [vmem:[#allocation39_spill] sm:$0xff] }
 0x401   : > { %v22305_v60 = vsel %vm22302_vm13, %v22303_v26, %v22304_v3  ;;  %v22312_v40 = vsel %vm22309_vm12, %v22310_v9, %v22311_v58  ;;  %v7207_v38 = vrot.slane %v7205_v49, 7  ;;  %v14573_v20 = vpack.c.bf16 %v6946_v21, %v6946_v21  ;;  %v19504_v3 = vpop.f32.mrb[25].mxu0  ;;  %7490 = vst.msk [vmem:[#allocation3 + $0x30] sm:$0xf] %vm22300_vm11, %v7189_v57  ;;  %v16586_v26 = vld [vmem:[%s21862_s2 + $0x8] sm:$0xff]  }
 0x402   : > { %vm19477_vm9 = vcmp.lt.s32.totalorder %v22305_v60, 16  ;;  %vm19486_vm1 = vcmp.lt.s32.totalorder %v22312_v40, 16  ;;  %vm22316_vm4 = vnez %v22315_v27  ;;  %v7230_v60 = vrot.slane %v7228_v63, 4  ;;  %v19509_v31 = vpop.f32.mrb[26].mxu0 }
 0x403   : > { %v22319_v46 = vsel %vm22316_vm4, %v22317_v28, %v22318_v1  ;;  %v7234_v50 = vrot.slane %v7232_v53, 6  ;;  %v7237_v9 = vrot.slane %v7235_v39, 7  ;;  %v6951_v49 = vsel %vm19434_vm6, %v6915_v41, 0.0  ;;  %v19511_v40 = vpop.f32.mrb[27].mxu0  ;;  %v16579_v41 = vld [vmem:[#allocation3 + $0x8] sm:$0xff]   ;;  %vm22322_vm6 = vmmov %vm22300_vm11 }
 0x404   : > { %vm19500_vm15 = vcmp.lt.s32.totalorder %v22319_v46, 16  ;;  %v7208_v36 = vor.u32 %v7207_v38, %v7204_v54  ;;  %v7212_v42 = vshrl.u32 %v14573_v20, 16  ;;  %v7215_v21 = vshll.u32 %v14573_v20, 16  ;;  %v19528_v46 = vld [vmem:[#allocation3 + $0x10] sm:$0xff]   ;;  %vm22323_vm13 = vmmov %vm22322_vm6 }
 0x405   : > { %v14578_v58 = vpack.c.bf16 %v6951_v49, %v6951_v49  ;;  %v19513_v27 = vor.u32 %v7237_v9, %v7234_v50  ;;  %v6834_v28 = vmul.f32 %v19060_v52, %v19386_v7  ;;  %v6837_v53 = vmul.f32 %v19401_v59, %v19060_v52  ;;  %v22327_v7 = vld [vmem:[#allocation48_spill] sm:$0xff]  ;;  %vm22331_vm11 = vmmov %vm22322_vm6 }
 0x406   : > { %v6835_v47 = vmul.f32 %v19060_v52, %v19405_v44  ;;  %v7209_v39 = vsel %vm22242_vm5, %v7200_v14, %v7208_v36  ;;  %v7210_v57 = vrot.slane %v7208_v36, 4  ;;  %v7214_v54 = vrot.slane %v7212_v42, 6 }
 0x407   : > { %v7217_v38 = vrot.slane %v7215_v21, 7  ;;  %7492 = vst.msk [vmem:[#allocation3 + $0x38] sm:$0xf] %vm22322_vm6, %v7209_v39  ;;  %v7239_v20 = vsel %vm22242_vm5, %v7230_v60, %v19513_v27  ;;  %v7262_v1 = vshrl.u32 %v14578_v58, 16  ;;  %v7265_v59 = vshll.u32 %v14578_v58, 16  ;;  %v22324_v60 = vld [vmem:[#allocation52_spill] sm:$0xff] }
 0x408   : > { %7495 = vst.msk [vmem:[#allocation3 + $0x44] sm:$0xf] %vm22323_vm13, %v7239_v20  ;;  %v6877_v14 = vadd.f32 %v19082_v32, %v6834_v28  ;;  %v6880_v50 = vadd.f32 %v19082_v32, %v6837_v53  ;;  %v6878_v9 = vadd.f32 %v19082_v32, %v6835_v47  ;;  %v7680_v42 = vshll.u32 %v16579_v41, 16  ;;  %v22326_v39 = vld [vmem:[#allocation50_spill] sm:$0xff] }
 0x409   : > { %v7218_v44 = vor.u32 %v7217_v38, %v7214_v54  ;;  %v7264_v49 = vrot.slane %v7262_v1, 6  ;;  %v7267_v36 = vrot.slane %v7265_v59, 7  ;;  %v7684_v21 = vshrl.u32 %v16579_v41, 16  ;;  %v19543_v54 = vpop.f32.mrb[28].mxu0 }
 0x40a   : > { %vm22325_vm12 = vnez %v22324_v60  ;;  %v6913_v47 = vmax.f32 %v6877_v14, 0.0  ;;  %v6916_v38 = vmax.f32 %v6880_v50, 0.0  ;;  %v6914_v20 = vmax.f32 %v6878_v9, 0.0  ;;  %v19551_v59 = vpop.f32.mrb[29].mxu0 }
 0x40b   : > { %v22328_v58 = vsel %vm22325_vm12, %v22326_v39, %v22327_v7  ;;  %v7219_v28 = vsel %vm22242_vm5, %v7210_v57, %v7218_v44  ;;  %v7220_v53 = vrot.slane %v7218_v44, 4  ;;  %v19548_v41 = vor.u32 %v7267_v36, %v7264_v49  ;;  %v19561_v14 = vpop.f32.mrb[30].mxu0 }
 0x40c   : > { %vm19539_vm4 = vcmp.lt.s32.totalorder %v22328_v58, 16  ;;  %7493 = vst.msk [vmem:[#allocation3 + $0x3c] sm:$0xf] %vm22331_vm11, %v7219_v28  ;;  %v7682_v1 = vrot.slane %v7680_v42, 1  ;;  %v7688_v7 = vshll.u32 %v19528_v46, 16  ;;  %v6949_v39 = vsel %vm19477_vm9, %v6913_v47, 0.0 }
 0x40d   : > { %v7229_v60 = vsel %vm22242_vm5, %v7220_v53, %v7228_v63  ;;  %v6952_v57 = vsel %vm19486_vm1, %v6916_v38, 0.0  ;;  %v6840_v44 = vmul.f32 %v19445_v22, %v19060_v52  ;;  %v7270_v50 = vrot.slane %v19548_v41, 4  ;;  %v19576_v22 = vpop.f32.mrb[31].mxu0  ;;  %v22336_v42 = vld [vmem:[#allocation49_spill] sm:$0xff] }
 0x40e   : > { %7494 = vst.msk [vmem:[#allocation3 + $0x40] sm:$0xf] %vm22322_vm6, %v7229_v60  ;;  %v14576_v9 = vpack.c.bf16 %v6949_v39, %v6949_v39  ;;  %v14579_v49 = vpack.c.bf16 %v6952_v57, %v6952_v57  ;;  %v6950_v63 = vsel %vm19500_vm15, %v6914_v20, 0.0  ;;  %vm22332_vm13 = vnez %v22125_v16 }
 0x40f   : > { %v22333_v35 = vsel %vm22332_vm13, %v18843_v13, %v18798_v62  ;;  %v14577_v36 = vpack.c.bf16 %v6950_v63, %v6950_v63  ;;  %vm22337_vm1 = vsmask.f32 7424  ;;  %v7686_v28 = vor.u32 %v7684_v21, %v7682_v1 }
 0x410   : > { %vm19572_vm9 = vcmp.lt.s32.totalorder %v22333_v35, 16  ;;  %v7683_v58 = vsel %vm22337_vm1, %v22336_v42, %v7682_v1  ;;  %v7690_v53 = vrot.slane %v7688_v7, 1  ;;  %v7242_v16 = vshrl.u32 %v14576_v9, 16  ;;  %vm22339_vm12 = vmmov %vm22337_vm1  ;;  %v22345_v7 = vld [vmem:[#allocation51_spill] sm:$0xff] }
 0x411   : > { %v7245_v47 = vshll.u32 %v14576_v9, 16  ;;  %v7272_v38 = vshrl.u32 %v14579_v49, 16  ;;  %v7275_v62 = vshll.u32 %v14579_v49, 16  ;;  %vm22338_vm15 = vcmask 523264   ;;  %v16591_v42 = vld [vmem:[%s21862_s2 + $0x10] sm:$0xff]  }
 0x412   : > { %15397 = vmatprep.mubr.msk.bf16.mxu1 %vm22338_vm15, %v7683_v58  ;;  %v7252_v13 = vshrl.u32 %v14577_v36, 16  ;;  %v7255_v20 = vshll.u32 %v14577_v36, 16  ;;  %v7691_v60 = vsel %vm22339_vm12, %v7686_v28, %v7690_v53  ;;  %v6883_v39 = vadd.f32 %v19082_v32, %v6840_v44 }
 0x413   : > { %vm22340_vm11 = vnez %v22129_v11  ;;  %vm22344_vm13 = vnez %v22133_v43  ;;  %v7244_v49 = vrot.slane %v7242_v16, 6  ;;  %v7247_v44 = vrot.slane %v7245_v47, 7  ;;  %15398 = vmatmul.mubr.msk.bf16.vlgmr.msra.gmra.mrb[0].mxu1 %vm22338_vm15, %v7691_v60  ;;  %v16682_v43 = vld [vmem:[%s21862_s2] sm:$0xff]  }
 0x414   : > { %v22341_v21 = vsel %vm22340_vm11, %v18848_v56, %v18808_v23  ;;  %v22346_v57 = vsel %vm22344_vm13, %v18889_v17, %v22345_v7  ;;  %v7274_v63 = vrot.slane %v7272_v38, 6  ;;  %v7277_v11 = vrot.slane %v7275_v62, 7  ;;  %v19605_v23 = vpop.f32.mrb[32].mxu0  ;;  %15434 = vmatpush3.bf16.msra.mxu1 %v16682_v43  ;;  %v16582_v38 = vld [vmem:[#allocation3 + $0x18] sm:$0xff]   ;;  %v16596_v43 = vld [vmem:[%s21862_s2 + $0x18] sm:$0xff]  }
 0x415   : > { %vm19591_vm6 = vcmp.lt.s32.totalorder %v22341_v21, 16  ;;  %vm19600_vm1 = vcmp.lt.s32.totalorder %v22346_v57, 16  ;;  %v7254_v56 = vrot.slane %v7252_v13, 6  ;;  %v7257_v35 = vrot.slane %v7255_v20, 7  ;;  %15435 = vmatprep.subr.bf16.mxu1 %v16586_v26  ;;  %v19621_v62 = vpop.f32.mrb[33].mxu0 }
 0x416   : > { %v6919_v17 = vmax.f32 %v6883_v39, 0.0  ;;  %v6838_v36 = vmul.f32 %v19060_v52, %v19450_v24  ;;  %v7248_v58 = vor.u32 %v7247_v44, %v7244_v49  ;;  %v19615_v28 = vor.u32 %v7277_v11, %v7274_v63  ;;  %v19627_v39 = vpop.f32.mrb[34].mxu0  ;;  %v19642_v63 = vld [vmem:[#allocation3 + $0x20] sm:$0xff]  }
 0x417   : > { %v6841_v16 = vmul.f32 %v19456_v12, %v19060_v52  ;;  %v6839_v47 = vmul.f32 %v19060_v52, %v19460_v4  ;;  %v7258_v13 = vor.u32 %v7257_v35, %v7254_v56  ;;  %v7692_v60 = vshrl.u32 %v19528_v46, 16  ;;  %v19637_v34 = vpop.f32.mrb[35].mxu0 }
 0x418   : > { %v6955_v24 = vsel %vm19539_vm4, %v6919_v17, 0.0  ;;  %v6881_v20 = vadd.f32 %v19082_v32, %v6838_v36  ;;  %v22349_v21 = vrot.slane %v19513_v27, 4  ;;  %v7250_v4 = vrot.slane %v7248_v58, 4  ;;  %15436 = vmatpush3.bf16.msra.mxu1 %v16586_v26 }
 0x419   : > { %v7279_v7 = vsel %vm22242_vm5, %v7270_v50, %v19615_v28  ;;  %v7280_v57 = vrot.slane %v19615_v28, 4  ;;  %vm22350_vm4 = vcmask 519168   ;;  %v7260_v46 = vrot.slane %v7258_v13, 4  ;;  %15437 = vmatprep.subr.bf16.mxu1 %v16591_v42 }
 0x41a   : > { %v7249_v12 = vsel %vm22242_vm5, %v22349_v21, %v7248_v58  ;;  %vm22351_vm12 = vmmov %vm22350_vm4  ;;  %v14582_v49 = vpack.c.bf16 %v6955_v24, %v6955_v24  ;;  %v6917_v44 = vmax.f32 %v6881_v20, 0.0  ;;  %v6884_v27 = vadd.f32 %v19082_v32, %v6841_v16 }
 0x41b   : > { %7496 = vst.msk [vmem:[#allocation3 + $0x48] sm:$0xf] %vm22350_vm4, %v7249_v12  ;;  %v7259_v11 = vsel %vm22242_vm5, %v7250_v4, %v7258_v13  ;;  %v6882_v50 = vadd.f32 %v19082_v32, %v6839_v47  ;;  %v7694_v56 = vor.u32 %v7692_v60, %v7690_v53  ;;  %v7696_v35 = vshll.u32 %v16582_v38, 16  ;;  %vm22352_vm11 = vmmov %vm22350_vm4 }
 0x41c   : > { %7499 = vst.msk [vmem:[#allocation3 + $0x54] sm:$0xf] %vm22351_vm12, %v7279_v7  ;;  %v7269_v17 = vsel %vm22242_vm5, %v7260_v46, %v19548_v41  ;;  %v7302_v36 = vshrl.u32 %v14582_v49, 16  ;;  %v7305_v26 = vshll.u32 %v14582_v49, 16  ;;  %v6953_v58 = vsel %vm19572_vm9, %v6917_v44, 0.0  ;;  %vm22353_vm13 = vmmov %vm22350_vm4  ;;  %15438 = vmatpush3.bf16.msra.mxu1 %v16591_v42 }
 0x41d   : > { %7497 = vst.msk [vmem:[#allocation3 + $0x4c] sm:$0xf] %vm22352_vm11, %v7259_v11  ;;  %v14580_v53 = vpack.c.bf16 %v6953_v58, %v6953_v58  ;;  %v6920_v16 = vmax.f32 %v6884_v27, 0.0  ;;  %v6918_v47 = vmax.f32 %v6882_v50, 0.0  ;;  %v7698_v13 = vrot.slane %v7696_v35, 1  ;;  %15439 = vmatprep.subr.bf16.mxu1 %v16596_v43 }
 0x41e   : > { %7498 = vst.msk [vmem:[#allocation3 + $0x50] sm:$0xf] %vm22353_vm13, %v7269_v17  ;;  %v7304_v24 = vrot.slane %v7302_v36, 6  ;;  %v7307_v20 = vrot.slane %v7305_v26, 7  ;;  %v7700_v60 = vshrl.u32 %v16582_v38, 16  ;;  %v7704_v21 = vshll.u32 %v19642_v63, 16 }
 0x41f   : > { %vm22354_vm15 = vnez %v22137_v30  ;;  %v7282_v25 = vshrl.u32 %v14580_v53, 16  ;;  %v7285_v4 = vshll.u32 %v14580_v53, 16  ;;  %v6956_v7 = vsel %vm19591_vm6, %v6920_v16, 0.0  ;;  %v22370_v36 = vld [vmem:[#allocation55_spill] sm:$0xff]  ;;  %v22371_v26 = vld [vmem:[#allocation53_spill] sm:$0xff] }
 0x420   : > { %v22355_v41 = vsel %vm22354_vm15, %v18918_v29, %v18852_v61  ;;  %v6954_v38 = vsel %vm19600_vm1, %v6918_v47, 0.0  ;;  %vm22358_vm9 = vnez %v22141_v5  ;;  %v19683_v29 = vld [vmem:[%s21862_s2 + $0x40] sm:$0xff]   ;;  %v7308_v1 = vor.u32 %v7307_v20, %v7304_v24  ;;  %15440 = vmatpush3.bf16.msra.mxu1 %v16596_v43  ;;  %v19708_v47 = vld [vmem:[#allocation3 + $0x28] sm:$0xff]  }
 0x421   : > { %vm19663_vm4 = vcmp.lt.s32.totalorder %v22355_v41, 16  ;;  %v22359_v30 = vsel %vm22358_vm9, %v18932_v15, %v18867_v48  ;;  %v14583_v42 = vpack.c.bf16 %v6956_v7, %v6956_v7  ;;  %v14581_v46 = vpack.c.bf16 %v6954_v38, %v6954_v38  ;;  %15477 = vmatprep.subr.bf16.mxu1 %v19683_v29 }
 0x422   : > { %vm19676_vm12 = vcmp.lt.s32.totalorder %v22359_v30, 16  ;;  %vm22362_vm6 = vsmask.f32 7424  ;;  %v7284_v49 = vrot.slane %v7282_v25, 6  ;;  %v7287_v5 = vrot.slane %v7285_v4, 7 }
 0x423   : > { %v7699_v9 = vsel %vm22362_vm6, %v7694_v56, %v7698_v13  ;;  %vm22363_vm1 = vcmask 523264   ;;  %v7702_v48 = vor.u32 %v7700_v60, %v7698_v13  ;;  %v7706_v15 = vrot.slane %v7704_v21, 1  ;;  %v22368_v56 = vld [vmem:[#allocation56_spill] sm:$0xff] }
 0x424   : > { %15401 = vmatprep.mubr.msk.bf16.mxu1 %vm22363_vm1, %v7699_v9  ;;  %vm22364_vm11 = vnez %v22145_v0  ;;  %v7310_v11 = vrot.slane %v7308_v1, 4  ;;  %v7312_v50 = vshrl.u32 %v14583_v42, 16  ;;  %v7315_v35 = vshll.u32 %v14583_v42, 16 }
 0x425   : > { %v22365_v44 = vsel %vm22364_vm11, %v18970_v51, %v18892_v33  ;;  %v7292_v17 = vshrl.u32 %v14581_v46, 16  ;;  %vm22369_vm15 = vnez %v22368_v56  ;;  %v7288_v0 = vor.u32 %v7287_v5, %v7284_v49 }
 0x426   : > { %vm19692_vm13 = vcmp.lt.s32.totalorder %v22365_v44, 16  ;;  %v22372_v58 = vsel %vm22369_vm15, %v22370_v36, %v22371_v26  ;;  %v7295_v51 = vshll.u32 %v14581_v46, 16  ;;  %v7707_v33 = vsel %vm22362_vm6, %v7702_v48, %v7706_v15 }
 0x427   : > { %vm19701_vm9 = vcmp.lt.s32.totalorder %v22372_v58, 16  ;;  %v6844_v16 = vmul.f32 %v19490_v19, %v19060_v52  ;;  %v7314_v13 = vrot.slane %v7312_v50, 6  ;;  %v7317_v24 = vrot.slane %v7315_v35, 7  ;;  %15402 = vmatmul.mubr.msk.bf16.gmra.mrb[4].mxu1 %vm22363_vm1, %v7707_v33  ;;  %v19751_v33 = vld [vmem:[#allocation3 + $0x30] sm:$0xff]  }
 0x428   : > { %v7294_v20 = vrot.slane %v7292_v17, 6  ;;  %v6842_v60 = vmul.f32 %v19060_v52, %v19504_v3  ;;  %v7289_v43 = vsel %vm22242_vm5, %v7280_v57, %v7288_v0  ;;  %v7290_v21 = vrot.slane %v7288_v0, 4 }
 0x429   : > { %v7297_v41 = vrot.slane %v7295_v51, 7  ;;  %v6887_v19 = vadd.f32 %v19082_v32, %v6844_v16  ;;  %vm22375_vm11 = vcmask 519168   ;;  %v19720_v25 = vor.u32 %v7317_v24, %v7314_v13 }
 0x42a   : > { %7500 = vst.msk [vmem:[#allocation3 + $0x58] sm:$0xf] %vm22375_vm11, %v7289_v43  ;;  %v6885_v4 = vadd.f32 %v19082_v32, %v6842_v60  ;;  %v6845_v7 = vmul.f32 %v19509_v31, %v19060_v52  ;;  %v6843_v3 = vmul.f32 %v19060_v52, %v19511_v40  ;;  %v7708_v57 = vshrl.u32 %v19642_v63, 16  ;;  %vm22376_vm15 = vmmov %vm22375_vm11 }
 0x42b   : > { %v7298_v28 = vor.u32 %v7297_v41, %v7294_v20  ;;  %v6923_v38 = vmax.f32 %v6887_v19, 0.0  ;;  %v7712_v30 = vshll.u32 %v19708_v47, 16  ;;  %v7319_v42 = vsel %vm22242_vm5, %v7310_v11, %v19720_v25  ;;  %vm22377_vm6 = vmmov %vm22375_vm11 }
 0x42c   : > { %v7320_v46 = vrot.slane %v19720_v25, 4  ;;  %v6921_v9 = vmax.f32 %v6885_v4, 0.0  ;;  %v6888_v49 = vadd.f32 %v19082_v32, %v6845_v7  ;;  %7503 = vst.msk [vmem:[#allocation3 + $0x64] sm:$0xf] %vm22376_vm15, %v7319_v42  ;;  %v6886_v5 = vadd.f32 %v19082_v32, %v6843_v3  ;;  %vm22378_vm1 = vmmov %vm22377_vm6  ;;  %v22388_v3 = vld [vmem:[#allocation57_spill] sm:$0xff]  ;;  %v22393_v42 = vld [vmem:[#allocation63_spill] sm:$0xff] }
 0x42d   : > { %v7299_v52 = vsel %vm22242_vm5, %v7290_v21, %v7298_v28  ;;  %v7300_v31 = vrot.slane %v7298_v28, 4  ;;  %v6959_v40 = vsel %vm19663_vm4, %v6923_v38, 0.0  ;;  %v7710_v50 = vor.u32 %v7708_v57, %v7706_v15  ;;  %vm22400_vm11 = vmmov %vm22378_vm1  ;;  %v22413_v38 = vld [vmem:[#allocation66_spill] sm:$0xff] }
 0x42e   : > { %7501 = vst.msk [vmem:[#allocation3 + $0x5c] sm:$0xf] %vm22377_vm6, %v7299_v52  ;;  %v14586_v48 = vpack.c.bf16 %v6959_v40, %v6959_v40  ;;  %v6957_v44 = vsel %vm19676_vm12, %v6921_v9, 0.0  ;;  %v6924_v11 = vmax.f32 %v6888_v49, 0.0  ;;  %v6922_v56 = vmax.f32 %v6886_v5, 0.0  ;;  %v22394_v9 = vld [vmem:[#allocation58_spill] sm:$0xff]  ;;  %vm22402_vm6 = vmmov %vm22378_vm1 }
 0x42f   : > { %v7309_v35 = vsel %vm22242_vm5, %v7300_v31, %v7308_v1  ;;  %v14584_v17 = vpack.c.bf16 %v6957_v44, %v6957_v44  ;;  %v7714_v36 = vrot.slane %v7712_v30, 1  ;;  %v7716_v58 = vshrl.u32 %v19708_v47, 16  ;;  %v22379_v1 = vld [vmem:[#allocation54_spill] sm:$0xff]  ;;  %v19795_v40 = vld [vmem:[%s21863_s3] ss:$0 sm:$0xff] }
 0x430   : > { %7502 = vst.msk [vmem:[#allocation3 + $0x60] sm:$0xf] %vm22378_vm1, %v7309_v35  ;;  %v7342_v12 = vshrl.u32 %v14586_v48, 16  ;;  %v7345_v26 = vshll.u32 %v14586_v48, 16  ;;  %v6960_v32 = vsel %vm19692_vm13, %v6924_v11, 0.0  ;;  %v6958_v15 = vsel %vm19701_vm9, %v6922_v56, 0.0 }
 0x431   : > { %v7322_v0 = vshrl.u32 %v14584_v17, 16  ;;  %v7325_v61 = vshll.u32 %v14584_v17, 16  ;;  %v14587_v51 = vpack.c.bf16 %v6960_v32, %v6960_v32  ;;  %v22380_v16 = vsel %vm19097_vm3, %v19072_v45, %v22379_v1  ;;  %v19803_v35 = vld [vmem:[#allocation3 + $0x38] sm:$0xff]  }
 0x432   : > { %vm19758_vm4 = vcmp.lt.s32.totalorder %v22380_v16, 16  ;;  %v7344_v27 = vrot.slane %v7342_v12, 6  ;;  %v7347_v24 = vrot.slane %v7345_v26, 7  ;;  %v14585_v20 = vpack.c.bf16 %v6958_v15, %v6958_v15  ;;  %v19809_v56 = vld [vmem:[%s21864_s4] ss:$0 sm:$0xff] }
 0x433   : > { %vm22383_vm12 = vsmask.f32 7424  ;;  %v7324_v43 = vrot.slane %v7322_v0, 6  ;;  %v7327_v21 = vrot.slane %v7325_v61, 7  ;;  %v7352_v53 = vshrl.u32 %v14587_v51, 16 }
 0x434   : > { %v7715_v60 = vsel %vm22383_vm12, %v7710_v50, %v7714_v36  ;;  %v7355_v41 = vshll.u32 %v14587_v51, 16  ;;  %vm22384_vm13 = vcmask 523264   ;;  %v22385_v45 = vsel %vm19113_vm2, %v19102_v6, %v18989_v2  ;;  %v19828_v51 = vld [vmem:[#allocation3 + $0x40] sm:$0xff]  }
 0x435   : > { %15405 = vmatprep.mubr.msk.bf16.mxu1 %vm22384_vm13, %v7715_v60  ;;  %vm19769_vm3 = vcmp.lt.s32.totalorder %v22385_v45, 16  ;;  %v7348_v19 = vor.u32 %v7347_v24, %v7344_v27  ;;  %v7332_v25 = vshrl.u32 %v14585_v20, 16  ;;  %v7335_v4 = vshll.u32 %v14585_v20, 16  ;;  %vm22401_vm15 = vmmov %vm22384_vm13 }
 0x436   : > { %v7718_v7 = vor.u32 %v7716_v58, %v7714_v36  ;;  %v22389_v28 = vsel %vm19130_vm10, %v19118_v37, %v22388_v3  ;;  %v7328_v18 = vor.u32 %v7327_v21, %v7324_v43  ;;  %v7354_v57 = vrot.slane %v7352_v53, 6  ;;  %vm22399_vm10 = vmmov %vm22383_vm12  ;;  %v22404_v21 = vld [vmem:[#allocation64_spill] sm:$0xff]  ;;  %v22405_v53 = vld [vmem:[#allocation59_spill] sm:$0xff] }
 0x437   : > { %vm19778_vm9 = vcmp.lt.s32.totalorder %v22389_v28, 16  ;;  %v7357_v2 = vrot.slane %v7355_v41, 7  ;;  %v7720_v6 = vshll.u32 %v19751_v33, 16  ;;  %v22395_v49 = vsel %vm19144_vm7, %v22393_v42, %v22394_v9  ;;  %vm22398_vm7 = vmmov %vm22378_vm1 }
 0x438   : > { %vm19788_vm2 = vcmp.lt.s32.totalorder %v22395_v49, 16  ;;  %v7350_v55 = vrot.slane %v7348_v19, 4  ;;  %v7334_v37 = vrot.slane %v7332_v25, 6  ;;  %v7337_v31 = vrot.slane %v7335_v4, 7  ;;  %vm22409_vm12 = vmmov %vm22402_vm6 }
 0x439   : > { %v6848_v5 = vmul.f32 %v19795_v40, %v19543_v54  ;;  %v7329_v48 = vsel %vm22242_vm5, %v7320_v46, %v7328_v18  ;;  %v7330_v44 = vrot.slane %v7328_v18, 4  ;;  %v19801_v11 = vor.u32 %v7357_v2, %v7354_v57 }
 0x43a   : > { %v7722_v50 = vrot.slane %v7720_v6, 1  ;;  %7504 = vst.msk [vmem:[#allocation3 + $0x68] sm:$0xf] %vm22398_vm7, %v7329_v48  ;;  %v7338_v17 = vor.u32 %v7337_v31, %v7334_v37  ;;  %v6846_v54 = vmul.f32 %v19795_v40, %v19551_v59  ;;  %v6849_v46 = vmul.f32 %v19795_v40, %v19561_v14  ;;  %vm22433_vm7 = vmmov %vm22402_vm6 }
 0x43b   : > { %v6891_v36 = vadd.f32 %v19809_v56, %v6848_v5  ;;  %v7359_v12 = vsel %vm22242_vm5, %v7350_v55, %v19801_v11  ;;  %v7360_v26 = vrot.slane %v19801_v11, 4  ;;  %v6847_v58 = vmul.f32 %v19795_v40, %v19576_v22 }
 0x43c   : > { %v7723_v32 = vsel %vm22399_vm10, %v7718_v7, %v7722_v50  ;;  %7507 = vst.msk [vmem:[#allocation3 + $0x74] sm:$0xf] %vm22400_vm11, %v7359_v12  ;;  %v7339_v0 = vsel %vm22242_vm5, %v7330_v44, %v7338_v17  ;;  %v7340_v59 = vrot.slane %v7338_v17, 4  ;;  %v6889_v61 = vadd.f32 %v19809_v56, %v6846_v54  ;;  %v22419_v12 = vld [vmem:[#allocation69_spill] sm:$0xff]  ;;  %vm22435_vm11 = vmmov %vm22402_vm6 }
 0x43d   : > { %15406 = vmatmul.mubr.msk.bf16.gmra.mrb[8].mxu1 %vm22401_vm15, %v7723_v32  ;;  %v6927_v14 = vmax.f32 %v6891_v36, 0.0  ;;  %7505 = vst.msk [vmem:[#allocation3 + $0x6c] sm:$0xf] %vm22402_vm6, %v7339_v0  ;;  %v6892_v15 = vadd.f32 %v19809_v56, %v6849_v46  ;;  %v6890_v1 = vadd.f32 %v19809_v56, %v6847_v58  ;;  %v7724_v22 = vshrl.u32 %v19751_v33, 16  ;;  %v22414_v36 = vld [vmem:[#allocation60_spill] sm:$0xff]  ;;  %v22420_v32 = vld [vmem:[#allocation61_spill] sm:$0xff]  ;;  %vm22436_vm15 = vmmov %vm22402_vm6 }
 0x43e   : > { %v7728_v16 = vshll.u32 %v19803_v35, 16  ;;  %v7349_v27 = vsel %vm22242_vm5, %v7340_v59, %v7348_v19  ;;  %v6925_v20 = vmax.f32 %v6889_v61, 0.0  ;;  %v7732_v60 = vshrl.u32 %v19803_v35, 16  ;;  %v19922_v17 = vld [vmem:[#allocation3 + $0x58] sm:$0xff]  }
 0x43f   : > { %v6963_v24 = vsel %vm19758_vm4, %v6927_v14, 0.0  ;;  %v22406_v41 = vsel %vm19159_vm0, %v22404_v21, %v22405_v53  ;;  %7506 = vst.msk [vmem:[#allocation3 + $0x70] sm:$0xf] %vm22409_vm12, %v7349_v27  ;;  %v6928_v4 = vmax.f32 %v6892_v15, 0.0  ;;  %v6926_v19 = vmax.f32 %v6890_v1, 0.0  ;;  %vm22410_vm0 = vmmov %vm22399_vm10 }
 0x440   : > { %vm19845_vm1 = vcmp.lt.s32.totalorder %v22406_v41, 16  ;;  %v14590_v25 = vpack.c.bf16 %v6963_v24, %v6963_v24  ;;  %v7726_v7 = vor.u32 %v7724_v22, %v7722_v50  ;;  %v6961_v13 = vsel %vm19769_vm3, %v6925_v20, 0.0  ;;  %vm22411_vm4 = vmmov %vm22384_vm13  ;;  %v22424_v24 = vld [vmem:[#allocation72_spill] sm:$0xff]  ;;  %v22426_v20 = vld [vmem:[#allocation71_spill] sm:$0xff] }
 0x441   : > { %v7730_v3 = vrot.slane %v7728_v16, 1  ;;  %v7736_v28 = vshll.u32 %v19828_v51, 16  ;;  %v6852_v18 = vmul.f32 %v19795_v40, %v19605_v23  ;;  %v14588_v6 = vpack.c.bf16 %v6961_v13, %v6961_v13  ;;  %vm22434_vm10 = vmmov %vm22402_vm6 }
 0x442   : > { %v7382_v57 = vshrl.u32 %v14590_v25, 16  ;;  %v7385_v2 = vshll.u32 %v14590_v25, 16  ;;  %v6964_v30 = vsel %vm19778_vm9, %v6928_v4, 0.0  ;;  %v6962_v9 = vsel %vm19788_vm2, %v6926_v19, 0.0  ;;  %vm22432_vm2 = vmmov %vm22411_vm4 }
 0x443   : > { %v14591_v42 = vpack.c.bf16 %v6964_v30, %v6964_v30  ;;  %v7731_v49 = vsel %vm22410_vm0, %v7726_v7, %v7730_v3  ;;  %v7734_v10 = vor.u32 %v7732_v60, %v7730_v3  ;;  %v7362_v31 = vshrl.u32 %v14588_v6, 16  ;;  %v22427_v60 = vld [vmem:[#allocation62_spill] sm:$0xff]  ;;  %vm22437_vm6 = vmmov %vm22410_vm0 }
 0x444   : > { %v7384_v55 = vrot.slane %v7382_v57, 6  ;;  %v7387_v37 = vrot.slane %v7385_v2, 7  ;;  %v7365_v5 = vshll.u32 %v14588_v6, 16  ;;  %15409 = vmatprep.mubr.msk.bf16.mxu1 %vm22411_vm4, %v7731_v49  ;;  %v14589_v44 = vpack.c.bf16 %v6962_v9, %v6962_v9  ;;  %vm22439_vm12 = vmmov %vm22410_vm0 }
 0x445   : > { %v7392_v23 = vshrl.u32 %v14591_v42, 16  ;;  %v7395_v48 = vshll.u32 %v14591_v42, 16  ;;  %v7738_v50 = vrot.slane %v7736_v28, 1  ;;  %v22415_v54 = vsel %vm19175_vm8, %v22413_v38, %v22414_v36  ;;  %v19908_v42 = vld [vmem:[#allocation3 + $0x48] sm:$0xff]   ;;  %vm22441_vm4 = vmmov %vm22437_vm6 }
 0x446   : > { %vm19866_vm13 = vcmp.lt.s32.totalorder %v22415_v54, 16  ;;  %v22421_v58 = vsel %vm19200_vm14, %v22419_v12, %v22420_v32  ;;  %v7388_v59 = vor.u32 %v7387_v37, %v7384_v55  ;;  %v7364_v14 = vrot.slane %v7362_v31, 6  ;;  %vm22431_vm14 = vmmov %vm22410_vm0 }
 0x447   : > { %vm19875_vm3 = vcmp.lt.s32.totalorder %v22421_v58, 16  ;;  %v7367_v61 = vrot.slane %v7365_v5, 7  ;;  %v6895_v15 = vadd.f32 %v19809_v56, %v6852_v18  ;;  %v7394_v1 = vrot.slane %v7392_v23, 6 }
 0x448   : > { %v7397_v22 = vrot.slane %v7395_v48, 7  ;;  %v7372_v16 = vshrl.u32 %v14589_v44, 16  ;;  %v7375_v27 = vshll.u32 %v14589_v44, 16  ;;  %vm22425_vm8 = vnez %v22424_v24  ;;  %v19920_v44 = vld [vmem:[#allocation3 + $0x50] sm:$0xff]  }
 0x449   : > { %v22428_v43 = vsel %vm22425_vm8, %v22426_v20, %v22427_v60  ;;  %v7390_v53 = vrot.slane %v7388_v59, 4  ;;  %v7368_v41 = vor.u32 %v7367_v61, %v7364_v14  ;;  %v7739_v25 = vsel %vm22431_vm14, %v7734_v10, %v7738_v50  ;;  %vm22444_vm8 = vmmov %vm22433_vm7 }
 0x44a   : > { %vm19885_vm9 = vcmp.lt.s32.totalorder %v22428_v43, 16  ;;  %v6931_v4 = vmax.f32 %v6895_v15, 0.0  ;;  %v19890_v19 = vor.u32 %v7397_v22, %v7394_v1  ;;  %v7374_v7 = vrot.slane %v7372_v16, 6  ;;  %15410 = vmatmul.mubr.msk.bf16.gmra.mrb[12].mxu1 %vm22432_vm2, %v7739_v25  ;;  %v19939_v43 = vld [vmem:[#allocation3 + $0x60] sm:$0xff]   ;;  %vm22447_vm14 = vmmov %vm22433_vm7 }
 0x44b   : > { %v7377_v13 = vrot.slane %v7375_v27, 7  ;;  %v6850_v3 = vmul.f32 %v19795_v40, %v19621_v62  ;;  %v7369_v28 = vsel %vm22242_vm5, %v7360_v26, %v7368_v41  ;;  %v7370_v18 = vrot.slane %v7368_v41, 4 }
 0x44c   : > { %v6967_v57 = vsel %vm19845_vm1, %v6931_v4, 0.0  ;;  %v6853_v2 = vmul.f32 %v19795_v40, %v19627_v39  ;;  %7508 = vst.msk [vmem:[#allocation3 + $0x78] sm:$0xf] %vm22433_vm7, %v7369_v28  ;;  %v7399_v6 = vsel %vm22242_vm5, %v7390_v53, %v19890_v19  ;;  %v7400_v62 = vrot.slane %v19890_v19, 4  ;;  %vm22438_vm1 = vmmov %vm22432_vm2 }
 0x44d   : > { %v7378_v30 = vor.u32 %v7377_v13, %v7374_v7  ;;  %v14594_v11 = vpack.c.bf16 %v6967_v57, %v6967_v57  ;;  %7511 = vst.msk [vmem:[#allocation3 + $0x84] sm:$0xf] %vm22434_vm10, %v7399_v6  ;;  %v6893_v26 = vadd.f32 %v19809_v56, %v6850_v3  ;;  %v6851_v39 = vmul.f32 %v19795_v40, %v19637_v34  ;;  %vm22440_vm0 = vmmov %vm22438_vm1 }
 0x44e   : > { %v6896_v45 = vadd.f32 %v19809_v56, %v6853_v2  ;;  %v7740_v9 = vshrl.u32 %v19828_v51, 16  ;;  %v7744_v36 = vshll.u32 %v19908_v42, 16  ;;  %v7748_v46 = vshrl.u32 %v19908_v42, 16  ;;  %vm22448_vm2 = vmmov %vm22441_vm4 }
 0x44f   : > { %v7379_v49 = vsel %vm22242_vm5, %v7370_v18, %v7378_v30  ;;  %v7380_v10 = vrot.slane %v7378_v30, 4  ;;  %v7422_v55 = vshrl.u32 %v14594_v11, 16  ;;  %v7425_v37 = vshll.u32 %v14594_v11, 16  ;;  %v7516_v18 = vld [vmem:[#allocation3 + $0x98] sm:$0x3]  ;;  %v19944_v30 = vld [vmem:[#allocation3 + $0x68] sm:$0xff]   ;;  %vm22449_vm10 = vmmov %vm22448_vm2 }
 0x450   : > { %7509 = vst.msk [vmem:[#allocation3 + $0x7c] sm:$0xf] %vm22435_vm11, %v7379_v49  ;;  %v6929_v31 = vmax.f32 %v6893_v26, 0.0  ;;  %v6932_v5 = vmax.f32 %v6896_v45, 0.0  ;;  %v6894_v23 = vadd.f32 %v19809_v56, %v6851_v39  ;;  %v7742_v48 = vor.u32 %v7740_v9, %v7738_v50  ;;  %v19948_v9 = vld [vmem:[#allocation3 + $0x70] sm:$0xff]   ;;  %vm22450_vm11 = vmmov %vm22440_vm0 }
 0x451   : > { %v7389_v34 = vsel %vm22242_vm5, %v7380_v10, %v7388_v59  ;;  %v7424_v40 = vrot.slane %v7422_v55, 6  ;;  %v7427_v38 = vrot.slane %v7425_v37, 7  ;;  %v7746_v14 = vrot.slane %v7744_v36, 1 }
 0x452   : > { %7510 = vst.msk [vmem:[#allocation3 + $0x80] sm:$0xf] %vm22436_vm15, %v7389_v34  ;;  %v6965_v54 = vsel %vm19866_vm13, %v6929_v31, 0.0  ;;  %v6968_v56 = vsel %vm19875_vm3, %v6932_v5, 0.0  ;;  %v6930_v50 = vmax.f32 %v6894_v23, 0.0  ;;  %v7752_v61 = vshll.u32 %v19920_v44, 16  ;;  %vm22442_vm13 = vmmov %vm22433_vm7 }
 0x453   : > { %v7428_v12 = vor.u32 %v7427_v38, %v7424_v40  ;;  %v14592_v32 = vpack.c.bf16 %v6965_v54, %v6965_v54  ;;  %v14595_v58 = vpack.c.bf16 %v6968_v56, %v6968_v56  ;;  %v7756_v15 = vshrl.u32 %v19920_v44, 16  ;;  %vm22443_vm3 = vmmov %vm22440_vm0  ;;  %v22445_v40 = vld [vmem:[#allocation7_spill] sm:$0xff] }
 0x454   : > { %v6966_v59 = vsel %vm19885_vm9, %v6930_v50, 0.0  ;;  %v7760_v52 = vshll.u32 %v19922_v17, 16  ;;  %v7747_v20 = vsel %vm22437_vm6, %v7742_v48, %v7746_v14  ;;  %v7750_v60 = vor.u32 %v7748_v46, %v7746_v14  ;;  %vm22451_vm15 = vmmov %vm22440_vm0 }
 0x455   : > { %v7430_v1 = vrot.slane %v7428_v12, 4  ;;  %v7402_v22 = vshrl.u32 %v14592_v32, 16  ;;  %v7405_v0 = vshll.u32 %v14592_v32, 16  ;;  %v7432_v16 = vshrl.u32 %v14595_v58, 16  ;;  %15413 = vmatprep.mubr.msk.bf16.mxu1 %vm22438_vm1, %v7747_v20  ;;  %vm22454_vm6 = vmmov %vm22448_vm2 }
 0x456   : > { %v7435_v27 = vshll.u32 %v14595_v58, 16  ;;  %v14593_v24 = vpack.c.bf16 %v6966_v59, %v6966_v59  ;;  %v7754_v25 = vrot.slane %v7752_v61, 1  ;;  %v7762_v3 = vrot.slane %v7760_v52, 1  ;;  %vm22455_vm1 = vmmov %vm22448_vm2 }
 0x457   : > { %v7404_v53 = vrot.slane %v7402_v22, 6  ;;  %v7407_v21 = vrot.slane %v7405_v0, 7  ;;  %v7434_v41 = vrot.slane %v7432_v16, 6  ;;  %v7764_v6 = vshrl.u32 %v19922_v17, 16  ;;  %v19959_v34 = vld [vmem:[#allocation3 + $0x78] sm:$0xff]  }
 0x458   : > { %v7437_v4 = vrot.slane %v7435_v27, 7  ;;  %v7412_v7 = vshrl.u32 %v14593_v24, 16  ;;  %v7415_v13 = vshll.u32 %v14593_v24, 16  ;;  %v7755_v57 = vsel %vm22439_vm12, %v7750_v60, %v7754_v25  ;;  %v22452_v24 = vld [vmem:[#allocation9_spill] sm:$0xff]  ;;  %vm22456_vm12 = vmmov %vm22440_vm0 }
 0x459   : > { %v7408_v28 = vor.u32 %v7407_v21, %v7404_v53  ;;  %v7758_v2 = vor.u32 %v7756_v15, %v7754_v25  ;;  %15414 = vmatmul.mubr.msk.bf16.gmra.mrb[16].mxu1 %vm22440_vm0, %v7755_v57  ;;  %v7768_v39 = vshll.u32 %v19939_v43, 16  ;;  %v7766_v37 = vor.u32 %v7764_v6, %v7762_v3  ;;  %v19978_v52 = vld [vmem:[#allocation3 + $0x80] sm:$0xff]  }
 0x45a   : > { %v7438_v11 = vor.u32 %v7437_v4, %v7434_v41  ;;  %v7414_v26 = vrot.slane %v7412_v7, 6  ;;  %v7417_v45 = vrot.slane %v7415_v13, 7  ;;  %v7772_v19 = vshrl.u32 %v19939_v43, 16 }
 0x45b   : > { %v7409_v49 = vsel %vm22242_vm5, %v7400_v62, %v7408_v28  ;;  %v7410_v10 = vrot.slane %v7408_v28, 4  ;;  %v7763_v55 = vsel %vm22441_vm4, %v7758_v2, %v7762_v3  ;;  %v7770_v48 = vrot.slane %v7768_v39, 1  ;;  %vm22457_vm4 = vmmov %vm22455_vm1  ;;  %v8653_v39 = vld [vmem:[#allocation3 + $0x8] sm:$0xe] }
 0x45c   : > { %7512 = vst.msk [vmem:[#allocation3 + $0x88] sm:$0xf] %vm22442_vm13, %v7409_v49  ;;  %v7439_v31 = vsel %vm22242_vm5, %v7430_v1, %v7438_v11  ;;  %v7440_v5 = vrot.slane %v7438_v11, 4  ;;  %v7418_v23 = vor.u32 %v7417_v45, %v7414_v26  ;;  %15417 = vmatprep.mubr.msk.bf16.mxu1 %vm22443_vm3, %v7763_v55  ;;  %v7776_v62 = vshll.u32 %v19944_v30, 16  ;;  %vm22458_vm13 = vmmov %vm22455_vm1  ;;  %v20000_v11 = vld [vmem:[#allocation3 + $0xc] sm:$0xf] }
 0x45d   : > { %7515 = vst.msk [vmem:[#allocation3 + $0x94] sm:$0xf] %vm22444_vm8, %v7439_v31  ;;  %vm22446_vm9 = vnez %v22445_v40  ;;  %v7784_v56 = vshll.u32 %v19948_v9, 16  ;;  %v7771_v50 = vsel %vm22448_vm2, %v7766_v37, %v7770_v48  ;;  %v7774_v46 = vor.u32 %v7772_v19, %v7770_v48  ;;  %vm22459_vm3 = vmmov %vm22440_vm0  ;;  %v20009_v55 = vld [vmem:[#allocation3 + $0x18] sm:$0xff]   ;;  %v20012_v31 = vld [vmem:[#allocation3 + $0x20] sm:$0xff]  }
 0x45e   : > { %v7517_v38 = vsel %vm22446_vm9, %v7440_v5, %v7516_v18  ;;  %v7419_v36 = vsel %vm22242_vm5, %v7410_v10, %v7418_v23  ;;  %v7420_v54 = vrot.slane %v7418_v23, 4  ;;  %v7778_v32 = vrot.slane %v7776_v62, 1  ;;  %vm22460_vm8 = vmmov %vm22440_vm0  ;;  %v20007_v10 = vld [vmem:[#allocation3 + $0x10] sm:$0xff]   ;;  %v20014_v5 = vld [vmem:[#allocation3 + $0x28] sm:$0xff]  }
 0x45f   : > { %7518 = vst [vmem:[#allocation3 + $0x98] sm:$0x3] %v7517_v38  ;;  %7513 = vst.msk [vmem:[#allocation3 + $0x8c] sm:$0xf] %vm22447_vm14, %v7419_v36  ;;  %v7792_v14 = vshll.u32 %v19959_v34, 16  ;;  %v7780_v61 = vshrl.u32 %v19944_v30, 16  ;;  %v20005_v49 = vcombine.low %v8653_v39, %v20000_v11 }
 0x460   : > { %v7429_v58 = vsel %vm22242_vm5, %v7420_v54, %v7428_v12  ;;  %v7779_v59 = vsel %vm22449_vm10, %v7774_v46, %v7778_v32  ;;  %v7786_v15 = vrot.slane %v7784_v56, 1  ;;  %v7788_v22 = vshrl.u32 %v19948_v9, 16  ;;  %vm22461_vm9 = vmmov %vm22455_vm1  ;;  %v20018_v19 = vld [vmem:[#allocation3 + $0x8] sm:$0xc]  ;;  %v20024_v38 = vld [vmem:[#allocation3 + $0x30] sm:$0xff]  }
 0x461   : > { %7514 = vst.msk [vmem:[#allocation3 + $0x90] sm:$0xf] %vm22433_vm7, %v7429_v58  ;;  %15418 = vmatmul.mubr.msk.bf16.gmra.mrb[20].mxu1 %vm22450_vm11, %v7771_v50  ;;  %v7782_v1 = vor.u32 %v7780_v61, %v7778_v32  ;;  %v7794_v8 = vrot.slane %v7792_v14, 1  ;;  %v7800_v16 = vshll.u32 %v19978_v52, 16  ;;  %vm22453_vm5 = vnez %v22452_v24  ;;  %vm22462_vm14 = vmmov %vm22440_vm0  ;;  %v22463_v46 = vld [vmem:[#allocation35_spill] sm:$0xff]  ;;  %v20030_v32 = vld [vmem:[#allocation3 + $0x38] sm:$0xff]  }
 0x462   : > { %15421 = vmatprep.mubr.msk.bf16.mxu1 %vm22451_vm15, %v7779_v59  ;;  %v7790_v0 = vor.u32 %v7788_v22, %v7786_v15  ;;  %v7796_v41 = vshrl.u32 %v19959_v34, 16  ;;  %v7804_v13 = vshrl.u32 %v19978_v52, 16  ;;  %v9134_v23 = vshrl.u32 %v20005_v49, 16  ;;  %vm22464_vm2 = vmmov %vm22440_vm0 }
 0x463   : > { %v7787_v60 = vsel %vm22454_vm6, %v7782_v1, %v7786_v15  ;;  %v7802_v25 = vrot.slane %v7800_v16, 1  ;;  %v9137_v48 = vshll.u32 %v20005_v49, 16  ;;  %v9142_v62 = vshrl.u32 %v20007_v10, 16  ;;  %vm22471_vm15 = vmmov %vm22440_vm0 }
 0x464   : > { %v7795_v53 = vsel %vm22455_vm1, %v7790_v0, %v7794_v8  ;;  %v7798_v4 = vor.u32 %v7796_v41, %v7794_v8  ;;  %v9136_v36 = vrot.slane %v9134_v23, 1  ;;  %v9145_v56 = vshll.u32 %v20007_v10, 16 }
 0x465   : > { %v7806_v28 = vor.u32 %v7804_v13, %v7802_v25  ;;  %v9139_v54 = vrot.slane %v9137_v48, 2  ;;  %v9151_v50 = vshrl.u32 %v20009_v55, 16  ;;  %v9144_v58 = vrot.slane %v9142_v62, 1  ;;  %v20059_v62 = vld [vmem:[#allocation3 + $0x8] sm:$0xff]  }
 0x466   : > { %v7519_v12 = vld [vmem:[#allocation3 + $0x98] sm:$0xe]  ;;  %v19983_v27 = vld [vmem:[#allocation3 + $0x88] sm:$0xff]   ;;  %v7803_v18 = vsel %vm22457_vm4, %v7798_v4, %v7802_v25  ;;  %v9154_v14 = vshll.u32 %v20009_v55, 16  ;;  %v9160_v59 = vshrl.u32 %v20012_v31, 16  ;;  %v9163_v61 = vshll.u32 %v20012_v31, 16 }
 0x467   : > { %v7520_v20 = vsel %vm22453_vm5, 0, %v7519_v12  ;;  %v7808_v21 = vshll.u32 %v19983_v27, 16  ;;  %v7812_v6 = vshrl.u32 %v19983_v27, 16  ;;  %v9140_v15 = vor.u32 %v9139_v54, %v9136_v36  ;;  %v20041_v25 = vld [vmem:[#allocation3 + $0x48] sm:$0xff]   ;;  %v20043_v4 = vld [vmem:[#allocation3 + $0x50] sm:$0xff]   ;;  %v20063_v36 = vld [vmem:[#allocation3 + $0x58] sm:$0xff]  }
 0x468   : > { %7521 = vst [vmem:[#allocation3 + $0x98] sm:$0xe] %v7520_v20  ;;  %v19993_v7 = vld [vmem:[#allocation3 + $0x90] ss:$0 sps:$4 sm:$0x11]   ;;  %v9147_v1 = vrot.slane %v9145_v56, 2  ;;  %vm22472_vm5 = vmmov %vm22440_vm0 }
 0x469   : > { %15422 = vmatmul.mubr.msk.bf16.gmra.mrb[24].mxu1 %vm22456_vm12, %v7787_v60  ;;  %v7810_v3 = vrot.slane %v7808_v21, 1  ;;  %v7816_v57 = vshll.u32 %v19993_v7, 16  ;;  %v9153_v22 = vrot.slane %v9151_v50, 1  ;;  %v9169_v8 = vshrl.u32 %v20014_v5, 16  ;;  %v20037_v20 = vld [vmem:[#allocation3 + $0x40] sm:$0xff]  }
 0x46a   : > { %15425 = vmatprep.mubr.msk.bf16.mxu1 %vm22440_vm0, %v7795_v53  ;;  %v9156_v12 = vrot.slane %v9154_v14, 2  ;;  %v9162_v0 = vrot.slane %v9160_v59, 1  ;;  %v9165_v16 = vrot.slane %v9163_v61, 2  ;;  %v9172_v24 = vshll.u32 %v20014_v5, 16  ;;  %v20072_v14 = vld [vmem:[#allocation3 + $0x60] sm:$0xff]  }
 0x46b   : > { %v7811_v2 = vsel %vm22458_vm13, %v7806_v28, %v7810_v3  ;;  %v7814_v26 = vor.u32 %v7812_v6, %v7810_v3  ;;  %v7818_v45 = vrot.slane %v7816_v57, 1  ;;  %v9148_v60 = vor.u32 %v9147_v1, %v9144_v58  ;;  %v16602_v57 = vld [vmem:[%s21862_s2 + $0x48] sm:$0xff]   ;;  %v20068_v58 = vld [vmem:[#allocation3 + $0x10] sm:$0xff]   ;;  %vm22486_vm13 = vmmov %vm22464_vm2 }
 0x46c   : > { %v9171_v53 = vrot.slane %v9169_v8, 1  ;;  %v9178_v21 = vshrl.u32 %v20024_v38, 16  ;;  %v9181_v41 = vshll.u32 %v20024_v38, 16  ;;  %v9157_v13 = vor.u32 %v9156_v12, %v9153_v22  ;;  %v20083_v22 = vld [vmem:[#allocation3 + $0x68] sm:$0xff]  }
 0x46d   : > { %v7819_v37 = vsel %vm22461_vm9, %v7814_v26, %v7818_v45  ;;  %v9166_v3 = vor.u32 %v9165_v16, %v9162_v0  ;;  %v9174_v28 = vrot.slane %v9172_v24, 2  ;;  %vm22465_vm7 = vsmask.f32 6400 }
 0x46e   : > { %v9180_v6 = vrot.slane %v9178_v21, 1  ;;  %v9183_v26 = vrot.slane %v9181_v41, 2  ;;  %v9190_v45 = vshll.u32 %v20030_v32, 16  ;;  %vm22467_vm10 = vmmov %vm22465_vm7  ;;  %v9196_v50 = vshrl.u32 %v20037_v20, 16  ;;  %v20089_v41 = vld [vmem:[#allocation3 + $0x70] sm:$0xff]  }
 0x46f   : > { %v20054_v39 = vsel %vm22467_vm10, %v9148_v60, %v9157_v13  ;;  %vm22469_vm11 = vmmov %vm22465_vm7  ;;  %v9175_v23 = vor.u32 %v9174_v28, %v9171_v53  ;;  %v9205_v61 = vshrl.u32 %v20041_v25, 16  ;;  %v9214_v1 = vshrl.u32 %v20043_v4, 16  ;;  %22477 = vst [vmem:[#allocation12_spill] sm:$0xff] %v20089_v41 }
 0x470   : > { %22468 = vst [vmem:[#allocation15_spill] sm:$0xff] %v20054_v39  ;;  %v9184_v54 = vor.u32 %v9183_v26, %v9180_v6  ;;  %v9192_v56 = vrot.slane %v9190_v45, 2  ;;  %vm22473_vm6 = vmmov %vm22465_vm7  ;;  %v9198_v0 = vrot.slane %v9196_v50, 1  ;;  %v9217_v21 = vshll.u32 %v20043_v4, 16  ;;  %v20096_v6 = vld [vmem:[#allocation3 + $0x78] sm:$0xff]  }
 0x471   : > { %15426 = vmatmul.mubr.msk.bf16.gmra.mrb[28].mxu1 %vm22459_vm3, %v7803_v18  ;;  %v9187_v18 = vshrl.u32 %v20030_v32, 16  ;;  %v20075_v59 = vsel %vm22473_vm6, %v9166_v3, %v9175_v23  ;;  %vm22475_vm1 = vmmov %vm22473_vm6  ;;  %v9207_v24 = vrot.slane %v9205_v61, 1  ;;  %v9216_v53 = vrot.slane %v9214_v1, 1  ;;  %22480 = vst [vmem:[#allocation21_spill] sm:$0xff] %v20096_v6  ;;  %v20107_v61 = vld [vmem:[#allocation3 + $0x80] sm:$0xff]  }
 0x472   : > { %15429 = vmatprep.mubr.msk.bf16.mxu1 %vm22460_vm8, %v7811_v2  ;;  %v20050_v2 = vsel %vm22465_vm7, %v9140_v15, %v9148_v60  ;;  %22474 = vst [vmem:[#allocation18_spill] sm:$0xff] %v20075_v59  ;;  %v9208_v15 = vshll.u32 %v20041_v25, 16  ;;  %v20086_v8 = vsel %vm22475_vm1, %v9175_v23, %v9184_v54  ;;  %vm22478_vm12 = vmmov %vm22475_vm1  ;;  %v9223_v28 = vshrl.u32 %v20063_v36, 16 }
 0x473   : > { %22466 = vst [vmem:[#allocation16_spill] sm:$0xff] %v20050_v2  ;;  %v9189_v48 = vrot.slane %v9187_v18, 1  ;;  %22476 = vst [vmem:[#allocation17_spill] sm:$0xff] %v20086_v8  ;;  %v9226_v18 = vshll.u32 %v20063_v36, 16  ;;  %v9219_v45 = vrot.slane %v9217_v21, 2  ;;  %v9232_v23 = vshrl.u32 %v20072_v14, 16 }
 0x474   : > { %v9210_v60 = vrot.slane %v9208_v15, 2  ;;  %vm22481_vm0 = vmmov %vm22475_vm1  ;;  %v9225_v50 = vrot.slane %v9223_v28, 1  ;;  %22483 = vst [vmem:[#allocation13_spill] sm:$0xff] %v20107_v61  ;;  %v9244_v28 = vshll.u32 %v20083_v22, 16  ;;  %v9268_v40 = vshrl.u32 %v20107_v61, 16 }
 0x475   : > { %v9193_v12 = vor.u32 %v9192_v56, %v9189_v48  ;;  %v9235_v48 = vshll.u32 %v20072_v14, 16  ;;  %vm22484_vm4 = vmmov %vm22481_vm0  ;;  %v9220_v1 = vor.u32 %v9219_v45, %v9216_v53  ;;  %v20122_v53 = vld [vmem:[#allocation3 + $0x90] sm:$0xff]   ;;  %vm22510_vm1 = vcmask 1045504  }
 0x476   : > { %v9211_v26 = vor.u32 %v9210_v60, %v9207_v24  ;;  %v20112_v24 = vld [vmem:[#allocation3 + $0x18] sm:$0xff]   ;;  %v20116_v60 = vld [vmem:[#allocation3 + $0x88] sm:$0xff]   ;;  %vm22488_vm3 = vmmov %vm22464_vm2  ;;  %22489 = vst [vmem:[#allocation14_spill] sm:$0xff] %v20122_v53 }
 0x477   : > { %22487 = vst [vmem:[#allocation20_spill] sm:$0xff] %v20116_v60  ;;  %vm22490_vm8 = vmmov %vm22481_vm0 }
 0x478   : > { %vm22492_vm9 = vmmov %vm22481_vm0 }
 0x479   : > { %15430 = vmatmul.mubr.msk.bf16.gmra.mrb[32].mxu1 %vm22462_vm14, %v7819_v37  ;;  %v20057_v37 = vsel %vm22469_vm11, %v9157_v13, %v9166_v3  ;;  %v20092_v13 = vsel %vm22478_vm12, %v9184_v54, %v9193_v12  ;;  %v16604_v54 = vld [vmem:[%s21862_s2 + $0x58] sm:$0xff]   ;;  %vm22494_vm14 = vmmov %vm22481_vm0 }
 0x47a   : > { %15441 = vmatprep.mubr.msk.bf16.mxu1 %vm22464_vm2, %v22463_v46  ;;  %22470 = vst [vmem:[#allocation11_spill] sm:$0xff] %v20057_v37  ;;  %v9199_v46 = vshll.u32 %v20037_v20, 16  ;;  %22479 = vst [vmem:[#allocation10_spill] sm:$0xff] %v20092_v13  ;;  %v9277_v13 = vshrl.u32 %v20116_v60, 16 }
 0x47b   : > { %vm22496_vm2 = vmmov %vm22481_vm0 }
 0x47c   : > { %v9201_v16 = vrot.slane %v9199_v46, 2  ;;  %v9228_v46 = vrot.slane %v9226_v18, 2  ;;  %v9250_v18 = vshrl.u32 %v20089_v41, 16  ;;  %vm22498_vm7 = vmmov %vm22481_vm0 }
 0x47d   : > { %vm22500_vm10 = vmmov %vm22488_vm3 }
 0x47e   : > { %v9202_v3 = vor.u32 %v9201_v16, %v9198_v0  ;;  %v9234_v0 = vrot.slane %v9232_v23, 1  ;;  %v9237_v16 = vrot.slane %v9235_v48, 2  ;;  %v9253_v23 = vshll.u32 %v20089_v41, 16  ;;  %vm22501_vm11 = vmmov %vm22481_vm0 }
 0x47f   : > { %v9259_v48 = vshrl.u32 %v20096_v6, 16  ;;  %vm22507_vm6 = vmmov %vm22481_vm0 }
 0x480   : > { %v20104_v56 = vsel %vm22481_vm0, %v9193_v12, %v9202_v3  ;;  %v20110_v15 = vsel %vm22484_vm4, %v9202_v3, %v9211_v26  ;;  %v9229_v12 = vor.u32 %v9228_v46, %v9225_v50  ;;  %v20125_v3 = vsel %vm22490_vm8, %v9211_v26, %v9220_v1  ;;  %v20132_v50 = vld [vmem:[%s21862_s2 + $0x60] sm:$0xff]   ;;  %vm22512_vm12 = vmmov %vm22510_vm1 }
 0x481   : > { %15442 = vmatmul.mubr.msk.bf16.vlgmr.msra.gmra.mrb[0].mxu1 %vm22471_vm15, %v20059_v62  ;;  %22482 = vst [vmem:[#allocation19_spill] sm:$0xff] %v20104_v56  ;;  %22485 = vst [vmem:[#allocation23_spill] sm:$0xff] %v20110_v15  ;;  %v9238_v45 = vor.u32 %v9237_v16, %v9234_v0  ;;  %v9255_v0 = vrot.slane %v9253_v23, 2  ;;  %v9261_v16 = vrot.slane %v9259_v48, 1  ;;  %v9271_v56 = vshll.u32 %v20107_v61, 16 }
 0x482   : > { %15478 = vmatpush3.bf16.msra.mxu1 %v19683_v29  ;;  %15445 = vmatprep.mubr.msk.bf16.mxu1 %vm22472_vm5, %v20068_v58  ;;  %v16603_v29 = vld [vmem:[%s21862_s2 + $0x50] sm:$0xff]   ;;  %22491 = vst [vmem:[#allocation27_spill] sm:$0xff] %v20125_v3  ;;  %v20135_v46 = vsel %vm22492_vm9, %v9220_v1, %v9229_v12  ;;  %vm22503_vm15 = vmmov %vm22488_vm3 }
 0x483   : > { %15479 = vmatprep.subr.bf16.mxu1 %v16602_v57  ;;  %22493 = vst [vmem:[#allocation26_spill] sm:$0xff] %v20135_v46  ;;  %v20139_v26 = vsel %vm22494_vm14, %v9229_v12, %v9238_v45  ;;  %v9270_v46 = vrot.slane %v9268_v40, 1  ;;  %v9273_v48 = vrot.slane %v9271_v56, 2  ;;  %vm22505_vm5 = vmmov %vm22481_vm0 }
 0x484   : > { %22495 = vst [vmem:[#allocation22_spill] sm:$0xff] %v20139_v26  ;;  %vm22515_vm4 = vmmov %vm22510_vm1 }
 0x485   : > { %vm22522_vm8 = vmmov %vm22510_vm1 }
 0x486   : > { %15480 = vmatpush3.bf16.msra.mxu1 %v16602_v57  ;;  %v9241_v57 = vshrl.u32 %v20083_v22, 16  ;;  %vm22524_vm9 = vmmov %vm22510_vm1 }
 0x487   : > { %15481 = vmatprep.subr.bf16.mxu1 %v16603_v29  ;;  %vm22526_vm14 = vmmov %vm22500_vm10 }
 0x488   : > { %v9243_v21 = vrot.slane %v9241_v57, 1  ;;  %v9262_v57 = vshll.u32 %v20096_v6, 16 }
 0x489   : > { %15446 = vmatmul.mubr.msk.bf16.gmra.mrb[4].mxu1 %vm22486_vm13, %v20112_v24  ;;  %vm22517_vm13 = vmmov %vm22510_vm1 }
 0x48a   : > { %15449 = vmatprep.mubr.msk.bf16.mxu1 %vm22488_vm3, %v19642_v63  ;;  %15482 = vmatpush3.bf16.msra.mxu1 %v16603_v29  ;;  %v9246_v63 = vrot.slane %v9244_v28, 2  ;;  %v9252_v29 = vrot.slane %v9250_v18, 1  ;;  %v9264_v15 = vrot.slane %v9262_v57, 2  ;;  %v9280_v28 = vshll.u32 %v20116_v60, 16  ;;  %vm22519_vm3 = vmmov %vm22510_vm1 }
 0x48b   : > { %15483 = vmatprep.subr.bf16.mxu1 %v16604_v54  ;;  %v9286_v18 = vshrl.u32 %v20122_v53, 16 }
 0x48c   : > { %v9247_v3 = vor.u32 %v9246_v63, %v9243_v21  ;;  %v9256_v1 = vor.u32 %v9255_v0, %v9252_v29  ;;  %v9265_v23 = vor.u32 %v9264_v15, %v9261_v16  ;;  %v9279_v21 = vrot.slane %v9277_v13, 1 }
 0x48d   : > { %v9282_v57 = vrot.slane %v9280_v28, 2  ;;  %v9288_v26 = vrot.slane %v9286_v18, 1  ;;  %v9274_v29 = vor.u32 %v9273_v48, %v9270_v46  ;;  %v22504_v13 = vcombine.low %v20018_v19, %v20000_v11 }
 0x48e   : > { %15484 = vmatpush3.bf16.msra.mxu1 %v16604_v54  ;;  %v20148_v12 = vsel %vm22496_vm2, %v9238_v45, %v9247_v3  ;;  %v20151_v63 = vsel %vm22498_vm7, %v9247_v3, %v9256_v1  ;;  %v9289_v54 = vshll.u32 %v20122_v53, 16  ;;  %v20157_v40 = vsel %vm22501_vm11, %v9256_v1, %v9265_v23  ;;  %vm22527_vm2 = vmmov %vm22510_vm1 }
 0x48f   : > { %15521 = vmatprep.subr.bf16.mxu1 %v20132_v50  ;;  %22497 = vst [vmem:[#allocation30_spill] sm:$0xff] %v20148_v12  ;;  %22499 = vst [vmem:[#allocation28_spill] sm:$0xff] %v20151_v63  ;;  %v9283_v15 = vor.u32 %v9282_v57, %v9279_v21  ;;  %v9607_v3 = vrot.slane %v22504_v13, 2  ;;  %v9608_v45 = vrot.slane %v20007_v10, 2  ;;  %v20166_v0 = vsel %vm22505_vm5, %v9265_v23, %v9274_v29 }
 0x490   : > { %22502 = vst [vmem:[#allocation24_spill] sm:$0xff] %v20157_v40  ;;  %v9291_v56 = vrot.slane %v9289_v54, 2  ;;  %22506 = vst [vmem:[#allocation33_spill] sm:$0xff] %v20166_v0  ;;  %v9612_v1 = vrot.slane %v20012_v31, 2  ;;  %v9614_v19 = vrot.slane %v20014_v5, 2  ;;  %v9616_v28 = vrot.slane %v20024_v38, 2 }
 0x491   : > { %15450 = vmatmul.mubr.msk.bf16.gmra.mrb[8].mxu1 %vm22500_vm10, %v19708_v47  ;;  %v9610_v47 = vrot.slane %v20009_v55, 2  ;;  %v20170_v16 = vsel %vm22507_vm6, %v9274_v29, %v9283_v15  ;;  %v9620_v48 = vrot.slane %v20037_v20, 2  ;;  %v9622_v54 = vrot.slane %v20041_v25, 2  ;;  %v20199_v29 = vld [vmem:[#allocation3 + $0x98] ss:$0 sps:$4 sm:$0x33]   ;;  %vm22529_vm7 = vmmov %vm22500_vm10 }
 0x492   : > { %15453 = vmatprep.mubr.msk.bf16.mxu1 %vm22503_vm15, %v19751_v33  ;;  %22508 = vst [vmem:[#allocation31_spill] sm:$0xff] %v20170_v16  ;;  %v20172_v46 = vor.u32 %v9291_v56, %v9288_v26  ;;  %v20175_v33 = vsel %vm22510_vm1, %v9607_v3, %v9608_v45  ;;  %v9618_v26 = vrot.slane %v20030_v32, 2  ;;  %v20193_v21 = vsel %vm22517_vm13, %v9612_v1, %v9614_v19  ;;  %vm22530_vm10 = vmmov %vm22510_vm1  ;;  %v20295_v16 = vld [vmem:[#allocation3 + $0x48] sm:$0xff]  }
 0x493   : > { %22511 = vst [vmem:[#allocation41_spill] sm:$0xff] %v20175_v33  ;;  %v20179_v11 = vsel %vm22512_vm12, %v9608_v45, %v9610_v47  ;;  %v20188_v23 = vsel %vm22515_vm4, %v9610_v47, %v9612_v1  ;;  %22518 = vst [vmem:[#allocation37_spill] sm:$0xff] %v20193_v21  ;;  %v20196_v57 = vsel %vm22519_vm3, %v9614_v19, %v9616_v28  ;;  %v9624_v13 = vrot.slane %v20043_v4, 2 }
 0x494   : > { %22509 = vst [vmem:[#allocation25_spill] sm:$0xff] %v20172_v46  ;;  %22513 = vst [vmem:[#allocation36_spill] sm:$0xff] %v20179_v11  ;;  %v20185_v18 = vsel %vm22481_vm0, %v9283_v15, %v20172_v46  ;;  %v20202_v15 = vsel %vm22522_vm8, %v9616_v28, %v9618_v26  ;;  %v20205_v56 = vsel %vm22524_vm9, %v9618_v26, %v9620_v48  ;;  %v9626_v3 = vrot.slane %v20063_v36, 2 }
 0x495   : > { %22514 = vst [vmem:[#allocation29_spill] sm:$0xff] %v20185_v18  ;;  %22516 = vst [vmem:[#allocation42_spill] sm:$0xff] %v20188_v23  ;;  %v20212_v45 = vsel %vm22527_vm2, %v9620_v48, %v9622_v54  ;;  %v9628_v47 = vrot.slane %v20072_v14, 2  ;;  %v9630_v1 = vrot.slane %v20083_v22, 2  ;;  %v9632_v19 = vrot.slane %v20089_v41, 2 }
 0x496   : > { %22520 = vst [vmem:[#allocation32_spill] sm:$0xff] %v20196_v57  ;;  %22521 = vst [vmem:[#allocation43_spill] sm:$0xff] %v20199_v29  ;;  %v20220_v28 = vsel %vm22530_vm10, %v9622_v54, %v9624_v13  ;;  %v9636_v48 = vrot.slane %v20107_v61, 2  ;;  %vm22554_vm2 = vsmask.f32 5376 }
 0x497   : > { %22523 = vst [vmem:[#allocation40_spill] sm:$0xff] %v20202_v15  ;;  %22525 = vst [vmem:[#allocation34_spill] sm:$0xff] %v20205_v56 }
 0x498   : > { %22528 = vst [vmem:[#allocation45_spill] sm:$0xff] %v20212_v45  ;;  %22531 = vst [vmem:[#allocation44_spill] sm:$0xff] %v20220_v28  ;;  %v9642_v28 = vrot.slane %v20199_v29, 2 }
 0x499   : > { %15454 = vmatmul.mubr.msk.bf16.gmra.mrb[12].mxu1 %vm22526_vm14, %v19803_v35  ;;  %vm22532_vm11 = vmmov %vm22510_vm1  ;;  %v9634_v35 = vrot.slane %v20096_v6, 2 }
 0x49a   : > { %15457 = vmatprep.mubr.msk.bf16.mxu1 %vm22529_vm7, %v19828_v51  ;;  %v20223_v26 = vsel %vm22532_vm11, %v9624_v13, %v9626_v3  ;;  %vm22534_vm15 = vmmov %vm22510_vm1  ;;  %v9638_v51 = vrot.slane %v20116_v60, 2 }
 0x49b   : > { %22533 = vst [vmem:[#allocation38_spill] sm:$0xff] %v20223_v26  ;;  %v20228_v45 = vsel %vm22534_vm15, %v9626_v3, %v9628_v47  ;;  %vm22536_vm5 = vmmov %vm22510_vm1  ;;  %v20238_v54 = vsel %vm22510_vm1, %v9632_v19, %v9634_v35  ;;  %v9640_v26 = vrot.slane %v20122_v53, 2 }
 0x49c   : > { %22535 = vst [vmem:[#allocation47_spill] sm:$0xff] %v20228_v45  ;;  %v20231_v56 = vsel %vm22536_vm5, %v9628_v47, %v9630_v1  ;;  %vm22538_vm6 = vmmov %vm22510_vm1  ;;  %v20282_v45 = vld [vmem:[#allocation3 + $0x38] sm:$0xff]  }
 0x49d   : > { %22537 = vst [vmem:[#allocation46_spill] sm:$0xff] %v20231_v56  ;;  %v20234_v15 = vsel %vm22538_vm6, %v9630_v1, %v9632_v19  ;;  %22540 = vst [vmem:[#allocation52_spill] sm:$0xff] %v20238_v54  ;;  %v9935_v56 = vld [vmem:[#allocation3 + $0x10] sm:$0xc]  ;;  %v20256_v19 = vld [vmem:[#allocation3 + $0x14] sm:$0xf] }
 0x49e   : > { %22539 = vst [vmem:[#allocation39_spill] sm:$0xff] %v20234_v15  ;;  %vm22541_vm12 = vmmov %vm22510_vm1  ;;  %v8312_v15 = vld [vmem:[#allocation3] sm:$0xe]  ;;  %v10460_v12 = vshrl.u32 %v20282_v45, 16 }
 0x49f   : > { %v20241_v13 = vsel %vm22541_vm12, %v9634_v35, %v9636_v48  ;;  %vm22543_vm0 = vmmov %vm22510_vm1  ;;  %v16688_v35 = vld [vmem:[#allocation3 + $0x4] sm:$0xf] }
 0x4a0   : > { %22542 = vst [vmem:[#allocation50_spill] sm:$0xff] %v20241_v13  ;;  %v20246_v3 = vsel %vm22543_vm0, %v9636_v48, %v9638_v51  ;;  %vm22545_vm4 = vmmov %vm22543_vm0  ;;  %v14307_v13 = vcombine.low %v8312_v15, %v16688_v35  ;;  %v20261_v48 = vcombine.low %v9935_v56, %v20256_v19 }
 0x4a1   : > { %22544 = vst [vmem:[#allocation48_spill] sm:$0xff] %v20246_v3  ;;  %v20249_v47 = vsel %vm22545_vm4, %v9638_v51, %v9640_v26  ;;  %vm22547_vm13 = vmmov %vm22543_vm0  ;;  %v20263_v51 = vld [vmem:[#allocation3 + $0x18] sm:$0xff]  }
 0x4a2   : > { %22546 = vst [vmem:[#allocation49_spill] sm:$0xff] %v20249_v47  ;;  %v20252_v1 = vsel %vm22547_vm13, %v9640_v26, %v9642_v28  ;;  %vm22549_vm3 = vmmov %vm22529_vm7  ;;  %v20265_v47 = vld [vmem:[#allocation3 + $0x20] sm:$0xff]   ;;  %v20267_v28 = vld [vmem:[#allocation3 + $0x10] sm:$0x8]  ;;  %v10416_v3 = vshrl.u32 %v20261_v48, 16  ;;  %v10424_v56 = vshrl.u32 %v20263_v51, 16 }
 0x4a3   : > { %22548 = vst [vmem:[#allocation51_spill] sm:$0xff] %v20252_v1  ;;  %15458 = vmatmul.mubr.msk.bf16.gmra.mrb[16].mxu1 %vm22549_vm3, %v19908_v42  ;;  %vm22550_vm8 = vmmov %vm22549_vm3  ;;  %v20269_v26 = vld [vmem:[#allocation3 + $0x28] sm:$0xff]   ;;  %v20271_v1 = vrot.slane %v14307_v13, 1  ;;  %v20273_v42 = vld [vmem:[#allocation3 + $0x30] sm:$0xff]   ;;  %v10427_v35 = vshll.u32 %v20263_v51, 16  ;;  %v10433_v21 = vshrl.u32 %v20265_v47, 16 }
 0x4a4   : > { %15461 = vmatprep.mubr.msk.bf16.mxu1 %vm22550_vm8, %v19920_v44  ;;  %22551 = vst [vmem:[#allocation56_spill] sm:$0xff] %v20261_v48  ;;  %v10419_v44 = vshll.u32 %v20261_v48, 16  ;;  %v10418_v57 = vrot.slane %v10416_v3, 2  ;;  %v10436_v23 = vshll.u32 %v20265_v47, 16  ;;  %vm22552_vm9 = vmmov %vm22549_vm3  ;;  %v20288_v48 = vld [vmem:[#allocation3 + $0x40] sm:$0xff]   ;;  %v10426_v15 = vrot.slane %v10424_v56, 2 }
 0x4a5   : > { %v10429_v11 = vrot.slane %v10427_v35, 3  ;;  %v10442_v33 = vshrl.u32 %v20269_v26, 16  ;;  %v10445_v46 = vshll.u32 %v20269_v26, 16  ;;  %vm22553_vm14 = vmmov %vm22549_vm3  ;;  %v10451_v18 = vshrl.u32 %v20273_v42, 16  ;;  %v20298_v35 = vld [vmem:[#allocation3 + $0x50] sm:$0xff]  }
 0x4a6   : > { %v10421_v13 = vrot.slane %v10419_v44, 3  ;;  %v10435_v44 = vrot.slane %v10433_v21, 2  ;;  %v10438_v54 = vrot.slane %v10436_v23, 3  ;;  %v10454_v56 = vshll.u32 %v20273_v42, 16  ;;  %vm22556_vm7 = vmmov %vm22554_vm2 }
 0x4a7   : > { %v10430_v29 = vor.u32 %v10429_v11, %v10426_v15  ;;  %v10447_v0 = vrot.slane %v10445_v46, 3  ;;  %v10453_v63 = vrot.slane %v10451_v18, 2  ;;  %v10462_v11 = vrot.slane %v10460_v12, 2  ;;  %vm22558_vm10 = vmmov %vm22554_vm2 }
 0x4a8   : > { %v10422_v3 = vor.u32 %v10421_v13, %v10418_v57  ;;  %v10439_v40 = vor.u32 %v10438_v54, %v10435_v44  ;;  %v20302_v57 = vld [vmem:[#allocation3 + $0x58] sm:$0xff]   ;;  %v10456_v13 = vrot.slane %v10454_v56, 3  ;;  %v10472_v18 = vshll.u32 %v20288_v48, 16  ;;  %v20312_v54 = vld [vmem:[#allocation3 + $0x60] sm:$0xff]   ;;  %vm22560_vm11 = vmmov %vm22549_vm3 }
 0x4a9   : > { %v10487_v12 = vshrl.u32 %v20298_v35, 16  ;;  %vm22561_vm15 = vmmov %vm22554_vm2  ;;  %v10508_v2 = vshll.u32 %v20312_v54, 16 }
 0x4aa   : > { %v20305_v23 = vsel %vm22554_vm2, %v10422_v3, %v10430_v29  ;;  %v20309_v46 = vsel %vm22556_vm7, %v10430_v29, %v10439_v40  ;;  %v10457_v8 = vor.u32 %v10456_v13, %v10453_v63  ;;  %v10478_v3 = vshrl.u32 %v20295_v16, 16  ;;  %vm22563_vm5 = vmmov %vm22549_vm3 }
 0x4ab   : > { %15462 = vmatmul.mubr.msk.bf16.gmra.mrb[20].mxu1 %vm22552_vm9, %v19922_v17  ;;  %v10444_v17 = vrot.slane %v10442_v33, 2  ;;  %22555 = vst [vmem:[#allocation55_spill] sm:$0xff] %v20305_v23  ;;  %v10469_v33 = vshrl.u32 %v20288_v48, 16  ;;  %22557 = vst [vmem:[#allocation53_spill] sm:$0xff] %v20309_v46  ;;  %v10474_v56 = vrot.slane %v10472_v18, 3  ;;  %v10481_v29 = vshll.u32 %v20295_v16, 16 }
 0x4ac   : > { %15465 = vmatprep.mubr.msk.bf16.mxu1 %vm22553_vm14, %v19939_v43  ;;  %v10463_v43 = vshll.u32 %v20282_v45, 16  ;;  %v10490_v63 = vshll.u32 %v20298_v35, 16  ;;  %v10496_v13 = vshrl.u32 %v20302_v57, 16  ;;  %vm22564_vm6 = vmmov %vm22554_vm2  ;;  %vm22583_vm7 = vcmask 1046528  }
 0x4ad   : > { %v10448_v21 = vor.u32 %v10447_v0, %v10444_v17  ;;  %v10471_v59 = vrot.slane %v10469_v33, 2  ;;  %v20318_v0 = vld [vmem:[#allocation3 + $0x68] sm:$0xff]   ;;  %v20331_v33 = vld [vmem:[#allocation3 + $0x70] sm:$0xff]   ;;  %v10483_v18 = vrot.slane %v10481_v29, 3  ;;  %vm22566_vm1 = vmmov %vm22554_vm2 }
 0x4ae   : > { %v10465_v15 = vrot.slane %v10463_v43, 3  ;;  %v10492_v46 = vrot.slane %v10490_v63, 3  ;;  %v10498_v23 = vrot.slane %v10496_v13, 2  ;;  %vm22568_vm12 = vmmov %vm22566_vm1  ;;  %v10510_v13 = vrot.slane %v10508_v2, 3 }
 0x4af   : > { %v20315_v44 = vsel %vm22558_vm10, %v10439_v40, %v10448_v21  ;;  %v20325_v43 = vsel %vm22561_vm15, %v10448_v21, %v10457_v8  ;;  %v10480_v40 = vrot.slane %v10478_v3, 2  ;;  %v10499_v21 = vshll.u32 %v20302_v57, 16  ;;  %vm22570_vm0 = vmmov %vm22566_vm1 }
 0x4b0   : > { %22559 = vst [vmem:[#allocation54_spill] sm:$0xff] %v20315_v44  ;;  %v10466_v17 = vor.u32 %v10465_v15, %v10462_v11  ;;  %22562 = vst [vmem:[#allocation57_spill] sm:$0xff] %v20325_v43  ;;  %v10475_v15 = vor.u32 %v10474_v56, %v10471_v59  ;;  %v10489_v44 = vrot.slane %v10487_v12, 2  ;;  %v10505_v3 = vshrl.u32 %v20312_v54, 16  ;;  %v20338_v43 = vld [vmem:[#allocation3 + $0x78] sm:$0xff]  }
 0x4b1   : > { %v10484_v39 = vor.u32 %v10483_v18, %v10480_v40  ;;  %v10501_v56 = vrot.slane %v10499_v21, 3  ;;  %v10517_v12 = vshll.u32 %v20318_v0, 16  ;;  %v10535_v2 = vshll.u32 %v20338_v43, 16  ;;  %vm22572_vm4 = vmmov %vm22549_vm3 }
 0x4b2   : > { %v20334_v11 = vsel %vm22564_vm6, %v10457_v8, %v10466_v17  ;;  %v20341_v37 = vsel %vm22566_vm1, %v10466_v17, %v10475_v15  ;;  %v10514_v8 = vshrl.u32 %v20318_v0, 16  ;;  %v10493_v59 = vor.u32 %v10492_v46, %v10489_v44  ;;  %v20358_v44 = vld [vmem:[#allocation3 + $0x90] sm:$0xff]   ;;  %vm22573_vm13 = vmmov %vm22570_vm0 }
 0x4b3   : > { %15466 = vmatmul.mubr.msk.bf16.gmra.mrb[24].mxu1 %vm22560_vm11, %v19944_v30  ;;  %22565 = vst [vmem:[#allocation65_spill] sm:$0xff] %v20334_v11  ;;  %22567 = vst [vmem:[#allocation63_spill] sm:$0xff] %v20341_v37  ;;  %v20345_v11 = vld [vmem:[#allocation3 + $0x80] sm:$0xff]   ;;  %v10507_v29 = vrot.slane %v10505_v3, 2  ;;  %v20349_v63 = vsel %vm22568_vm12, %v10475_v15, %v10484_v39  ;;  %v10523_v17 = vshrl.u32 %v20331_v33, 16  ;;  %v20352_v37 = vld [vmem:[#allocation3 + $0x88] sm:$0xff]   ;;  %v10502_v18 = vor.u32 %v10501_v56, %v10498_v23 }
 0x4b4   : > { %15469 = vmatprep.mubr.msk.bf16.mxu1 %vm22563_vm5, %v19948_v9  ;;  %22569 = vst [vmem:[#allocation58_spill] sm:$0xff] %v20349_v63  ;;  %v10516_v53 = vrot.slane %v10514_v8, 2  ;;  %v20355_v40 = vsel %vm22570_vm0, %v10484_v39, %v10493_v59  ;;  %v10519_v60 = vrot.slane %v10517_v12, 3  ;;  %v10526_v46 = vshll.u32 %v20331_v33, 16  ;;  %v20364_v8 = vld [vmem:[#allocation3 + $0x98] sm:$0xff]   ;;  %vm22575_vm8 = vmmov %vm22570_vm0 }
 0x4b5   : > { %22571 = vst [vmem:[#allocation67_spill] sm:$0xff] %v20355_v40  ;;  %v10511_v21 = vor.u32 %v10510_v13, %v10507_v29  ;;  %v10525_v3 = vrot.slane %v10523_v17, 2  ;;  %v10532_v15 = vshrl.u32 %v20338_v43, 16  ;;  %v20367_v39 = vsel %vm22573_vm13, %v10493_v59, %v10502_v18  ;;  %vm22577_vm9 = vmmov %vm22570_vm0 }
 0x4b6   : > { %22574 = vst [vmem:[#allocation64_spill] sm:$0xff] %v20367_v39  ;;  %v10520_v23 = vor.u32 %v10519_v60, %v10516_v53  ;;  %v10528_v56 = vrot.slane %v10526_v46, 3  ;;  %v10541_v12 = vshrl.u32 %v20345_v11, 16  ;;  %v10537_v17 = vrot.slane %v10535_v2, 3  ;;  %vm22579_vm14 = vmmov %vm22570_vm0 }
 0x4b7   : > { %v20373_v29 = vsel %vm22575_vm8, %v10502_v18, %v10511_v21  ;;  %v10534_v13 = vrot.slane %v10532_v15, 2  ;;  %v10544_v40 = vshll.u32 %v20345_v11, 16  ;;  %v10550_v60 = vshrl.u32 %v20352_v37, 16  ;;  %vm22581_vm2 = vmmov %vm22570_vm0 }
 0x4b8   : > { %22576 = vst [vmem:[#allocation59_spill] sm:$0xff] %v20373_v29  ;;  %v20377_v63 = vsel %vm22577_vm9, %v10511_v21, %v10520_v23  ;;  %v10529_v61 = vor.u32 %v10528_v56, %v10525_v3  ;;  %v10543_v59 = vrot.slane %v10541_v12, 2  ;;  %v10553_v39 = vshll.u32 %v20352_v37, 16  ;;  %vm22584_vm10 = vmmov %vm22570_vm0 }
 0x4b9   : > { %22578 = vst [vmem:[#allocation68_spill] sm:$0xff] %v20377_v63  ;;  %v10538_v53 = vor.u32 %v10537_v17, %v10534_v13  ;;  %v10546_v46 = vrot.slane %v10544_v40, 3  ;;  %v10559_v6 = vshrl.u32 %v20358_v44, 16  ;;  %v10552_v15 = vrot.slane %v10550_v60, 2  ;;  %vm22585_vm11 = vmmov %vm22549_vm3 }
 0x4ba   : > { %v20383_v18 = vsel %vm22579_vm14, %v10520_v23, %v10529_v61  ;;  %v10562_v2 = vshll.u32 %v20358_v44, 16  ;;  %v10568_v29 = vshrl.u32 %v20364_v8, 16  ;;  %v10555_v56 = vrot.slane %v10553_v39, 3  ;;  %vm22587_vm15 = vmmov %vm22549_vm3 }
 0x4bb   : > { %15470 = vmatmul.mubr.msk.bf16.gmra.mrb[28].mxu1 %vm22572_vm4, %v19959_v34  ;;  %22580 = vst [vmem:[#allocation66_spill] sm:$0xff] %v20383_v18  ;;  %v20388_v21 = vsel %vm22581_vm2, %v10529_v61, %v10538_v53  ;;  %v10547_v3 = vor.u32 %v10546_v46, %v10543_v59  ;;  %v10561_v12 = vrot.slane %v10559_v6, 2  ;;  %v10571_v17 = vshll.u32 %v20364_v8, 16  ;;  %vm22588_vm5 = vmmov %vm22570_vm0 }
 0x4bc   : > { %15473 = vmatprep.mubr.msk.bf16.mxu1 %vm22549_vm3, %v19978_v52  ;;  %v10564_v13 = vrot.slane %v10562_v2, 3  ;;  %v10570_v40 = vrot.slane %v10568_v29, 2  ;;  %v22582_v63 = vrot.slane %v20059_v62, 1  ;;  %v8328_v60 = vrot.slane %v20068_v58, 1  ;;  %vm22589_vm6 = vmmov %vm22570_vm0 }
 0x4bd   : > { %v20397_v18 = vsel %vm22584_vm10, %v10538_v53, %v10547_v3  ;;  %v10556_v41 = vor.u32 %v10555_v56, %v10552_v15  ;;  %v10573_v6 = vrot.slane %v10571_v17, 3  ;;  %v22586_v39 = vcombine.low %v20267_v28, %v20256_v19  ;;  %vm22592_vm12 = vmmov %vm22583_vm7 }
 0x4be   : > { %v8327_v23 = vsel %vm22583_vm7, %v20271_v1, %v22582_v63  ;;  %v10565_v61 = vor.u32 %v10564_v13, %v10561_v12  ;;  %v10890_v59 = vrot.slane %v20263_v51, 3  ;;  %v8330_v1 = vrot.slane %v20112_v24, 1  ;;  %vm22595_vm13 = vmmov %vm22581_vm2 }
 0x4bf   : > { %v10889_v29 = vrot.slane %v22586_v39, 3  ;;  %v20408_v58 = vsel %vm22588_vm5, %v10547_v3, %v10556_v41  ;;  %v10892_v63 = vrot.slane %v20265_v47, 3  ;;  %v10894_v53 = vrot.slane %v20269_v26, 3  ;;  %vm22598_vm8 = vmmov %vm22583_vm7 }
 0x4c0   : > { %v20413_v46 = vsel %vm22589_vm6, %v10556_v41, %v10565_v61  ;;  %v20415_v15 = vor.u32 %v10573_v6, %v10570_v40  ;;  %vm22590_vm1 = vcmask 1044480   ;;  %v10896_v28 = vrot.slane %v20273_v42, 3  ;;  %vm22613_vm6 = vmmov %vm22585_vm11 }
 0x4c1   : > { %v20418_v19 = vsel %vm22590_vm1, %v10889_v29, %v10890_v59  ;;  %v22591_v2 = vrot.slane %v20059_v62, 1  ;;  %vm22593_vm0 = vmmov %vm22590_vm1  ;;  %v10898_v41 = vrot.slane %v20282_v45, 3  ;;  %v10900_v40 = vrot.slane %v20288_v48, 3  ;;  %v20449_v29 = vld [vmem:[#allocation3 + $0xa0] ss:$0 sps:$4 sm:$0x77]  }
 0x4c2   : > { %v20425_v3 = vsel %vm22593_vm0, %v10890_v59, %v10892_v63  ;;  %vm22594_vm4 = vmmov %vm22593_vm0  ;;  %v20433_v12 = vsel %vm22595_vm13, %v10565_v61, %v20415_v15  ;;  %v10902_v62 = vrot.slane %v20295_v16, 3  ;;  %v8331_v17 = vsel %vm22598_vm8, %v8328_v60, %v8330_v1  ;;  %v16606_v61 = vld [vmem:[%s21862_s2 + $0x68] sm:$0xff]  }
 0x4c3   : > { %15474 = vmatmul.mubr.msk.bf16.gmra.mrb[32].mxu1 %vm22585_vm11, %v19983_v27  ;;  %v8329_v24 = vsel %vm22592_vm12, %v22591_v2, %v8328_v60  ;;  %v20428_v56 = vsel %vm22594_vm4, %v10892_v63, %v10894_v53  ;;  %vm22596_vm3 = vmmov %vm22593_vm0  ;;  %v10904_v6 = vrot.slane %v20298_v35, 3  ;;  %v10906_v39 = vrot.slane %v20302_v57, 3 }
 0x4c4   : > { %15485 = vmatprep.mubr.msk.bf16.mxu1 %vm22587_vm15, %v8327_v23  ;;  %v20436_v13 = vsel %vm22596_vm3, %v10894_v53, %v10896_v28  ;;  %vm22599_vm9 = vmmov %vm22593_vm0  ;;  %v10908_v60 = vrot.slane %v20312_v54, 3  ;;  %v10910_v53 = vrot.slane %v20318_v0, 3 }
 0x4c5   : > { %22597 = vst [vmem:[#allocation60_spill] sm:$0xff] %v20436_v13  ;;  %v20442_v23 = vsel %vm22599_vm9, %v10896_v28, %v10898_v41  ;;  %vm22601_vm14 = vmmov %vm22593_vm0  ;;  %v10914_v13 = vrot.slane %v20338_v43, 3  ;;  %vm22623_vm9 = vcmask 1046528  }
 0x4c6   : > { %22600 = vst [vmem:[#allocation70_spill] sm:$0xff] %v20442_v23  ;;  %v20452_v59 = vsel %vm22601_vm14, %v10898_v41, %v10900_v40  ;;  %vm22603_vm2 = vmmov %vm22593_vm0  ;;  %v10912_v23 = vrot.slane %v20331_v33, 3 }
 0x4c7   : > { %22602 = vst [vmem:[#allocation69_spill] sm:$0xff] %v20452_v59  ;;  %v20455_v63 = vsel %vm22603_vm2, %v10900_v40, %v10902_v62  ;;  %vm22605_vm7 = vmmov %vm22593_vm0 }
 0x4c8   : > { %22604 = vst [vmem:[#allocation61_spill] sm:$0xff] %v20455_v63  ;;  %v20460_v28 = vsel %vm22605_vm7, %v10902_v62, %v10904_v6  ;;  %vm22607_vm10 = vmmov %vm22593_vm0  ;;  %v10916_v63 = vrot.slane %v20345_v11, 3  ;;  %v10918_v62 = vrot.slane %v20352_v37, 3 }
 0x4c9   : > { %22606 = vst [vmem:[#allocation72_spill] sm:$0xff] %v20460_v28  ;;  %v20463_v2 = vsel %vm22607_vm10, %v10904_v6, %v10906_v39  ;;  %vm22609_vm15 = vmmov %vm22593_vm0 }
 0x4ca   : > { %22608 = vst [vmem:[#allocation71_spill] sm:$0xff] %v20463_v2  ;;  %v20469_v41 = vsel %vm22609_vm15, %v10906_v39, %v10908_v60  ;;  %vm22611_vm5 = vmmov %vm22593_vm0  ;;  %v10922_v39 = vrot.slane %v20364_v8, 3 }
 0x4cb   : > { %15486 = vmatmul.mubr.msk.bf16.vlgmr.msra.gmra.mrb[0].mxu1 %vm22585_vm11, %v8329_v24  ;;  %22610 = vst [vmem:[#allocation62_spill] sm:$0xff] %v20469_v41  ;;  %v20472_v40 = vsel %vm22611_vm5, %v10908_v60, %v10910_v53  ;;  %vm22614_vm1 = vmmov %vm22593_vm0  ;;  %v10920_v24 = vrot.slane %v20358_v44, 3  ;;  %v16607_v60 = vld [vmem:[%s21862_s2 + $0x70] sm:$0xff]  }
 0x4cc   : > { %22612 = vst [vmem:[#allocation7_spill] sm:$0xff] %v20472_v40  ;;  %15522 = vmatpush3.bf16.msra.mxu1 %v20132_v50  ;;  %15489 = vmatprep.mubr.msk.bf16.mxu1 %vm22613_vm6, %v8331_v17  ;;  %v20479_v6 = vsel %vm22614_vm1, %v10910_v53, %v10912_v23  ;;  %vm22616_vm12 = vmmov %vm22593_vm0  ;;  %v20490_v40 = vsel %vm22593_vm0, %v10914_v13, %v10916_v63  ;;  %v10924_v17 = vrot.slane %v20449_v29, 3  ;;  %v16689_v53 = vld [vmem:[#allocation3 + $0x20] sm:$0xff]   ;;  %v16690_v41 = vld [vmem:[#allocation3 + $0x28] sm:$0xff]  }
 0x4cd   : > { %22615 = vst [vmem:[#allocation9_spill] sm:$0xff] %v20479_v6  ;;  %v20482_v2 = vsel %vm22616_vm12, %v10912_v23, %v10914_v13  ;;  %15523 = vmatprep.subr.bf16.mxu1 %v16606_v61  ;;  %vm22618_vm4 = vmmov %vm22593_vm0  ;;  %v8332_v23 = vrot.slane %v16689_v53, 1  ;;  %v8334_v28 = vrot.slane %v16690_v41, 1  ;;  %v16608_v13 = vld [vmem:[%s21862_s2 + $0x78] sm:$0xff]   ;;  %v16611_v41 = vld [vmem:[%s21862_s2 + $0x80] sm:$0xff]  }
 0x4ce   : > { %22617 = vst [vmem:[#allocation35_spill] sm:$0xff] %v20482_v2  ;;  %v20493_v50 = vsel %vm22618_vm4, %v10916_v63, %v10918_v62  ;;  %vm22619_vm13 = vmmov %vm22593_vm0 }
 0x4cf   : > { %v20497_v2 = vsel %vm22619_vm13, %v10918_v62, %v10920_v24  ;;  %vm22620_vm3 = vmmov %vm22593_vm0  ;;  %v8333_v63 = vsel %vm22623_vm9, %v8330_v1, %v8332_v23 }
 0x4d0   : > { %v20500_v6 = vsel %vm22620_vm3, %v10920_v24, %v10922_v39  ;;  %vm22621_vm8 = vmmov %vm22593_vm0  ;;  %15524 = vmatpush3.bf16.msra.mxu1 %v16606_v61  ;;  %v16691_v61 = vld [vmem:[#allocation3 + $0x30] sm:$0xff]  }
 0x4d1   : > { %v20503_v59 = vsel %vm22621_vm8, %v10922_v39, %v10924_v17  ;;  %15525 = vmatprep.subr.bf16.mxu1 %v16607_v60  ;;  %vm22624_vm14 = vmmov %vm22613_vm6  ;;  %v8336_v24 = vrot.slane %v16691_v61, 1  ;;  %v16692_v39 = vld [vmem:[#allocation3 + $0x38] sm:$0xff]  }
 0x4d2   : > { %22622 = vst [vmem:[#allocation73_spill] sm:$0xff] %v20503_v59  ;;  %vm22625_vm2 = vmmov %vm22623_vm9  ;;  %v8338_v17 = vrot.slane %v16692_v39, 1  ;;  %v16696_v39 = vld [vmem:[#allocation3 + $0x58] sm:$0xff]  }
 0x4d3   : > { %15490 = vmatmul.mubr.msk.bf16.gmra.mrb[4].mxu1 %vm22624_vm14, %v8333_v63  ;;  %v8335_v62 = vsel %vm22625_vm2, %v8332_v23, %v8334_v28  ;;  %vm22626_vm7 = vmmov %vm22613_vm6  ;;  %v16694_v63 = vld [vmem:[#allocation3 + $0x48] sm:$0xff]  }
 0x4d4   : > { %15493 = vmatprep.mubr.msk.bf16.mxu1 %vm22626_vm7, %v8335_v62  ;;  %15526 = vmatpush3.bf16.msra.mxu1 %v16607_v60  ;;  %vm22627_vm10 = vmmov %vm22625_vm2  ;;  %v16693_v60 = vld [vmem:[#allocation3 + $0x40] sm:$0xff]   ;;  %v8342_v62 = vrot.slane %v16694_v63, 1 }
 0x4d5   : > { %15527 = vmatprep.subr.bf16.mxu1 %v16608_v13  ;;  %v8337_v1 = vsel %vm22627_vm10, %v8334_v28, %v8336_v24  ;;  %vm22628_vm11 = vmmov %vm22613_vm6  ;;  %v8340_v23 = vrot.slane %v16693_v60, 1  ;;  %v16697_v60 = vld [vmem:[#allocation3 + $0x60] sm:$0xff]  }
 0x4d6   : > { %vm22629_vm15 = vmmov %vm22625_vm2 }
 0x4d7   : > { %v8339_v53 = vsel %vm22629_vm15, %v8336_v24, %v8338_v17  ;;  %vm22630_vm5 = vmmov %vm22613_vm6 }
 0x4d8   : > { %15528 = vmatpush3.bf16.msra.mxu1 %v16608_v13  ;;  %vm22631_vm6 = vmmov %vm22625_vm2  ;;  %v16695_v13 = vld [vmem:[#allocation3 + $0x50] sm:$0xff]  }
 0x4d9   : > { %15565 = vmatprep.subr.bf16.mxu1 %v16611_v41  ;;  %v8341_v59 = vsel %vm22631_vm6, %v8338_v17, %v8340_v23  ;;  %vm22632_vm1 = vmmov %vm22630_vm5  ;;  %v8344_v28 = vrot.slane %v16695_v13, 1  ;;  %v8348_v17 = vrot.slane %v16697_v60, 1 }
 0x4da   : > { %vm22633_vm12 = vmmov %vm22625_vm2 }
 0x4db   : > { %15494 = vmatmul.mubr.msk.bf16.gmra.mrb[8].mxu1 %vm22628_vm11, %v8337_v1  ;;  %v8343_v61 = vsel %vm22633_vm12, %v8340_v23, %v8342_v62  ;;  %vm22634_vm0 = vmmov %vm22632_vm1  ;;  %v8346_v1 = vrot.slane %v16696_v39, 1  ;;  %v8358_v39 = vrot.slane %v19983_v27, 1  ;;  %v8795_v27 = vrot.slane %v20009_v55, 1  ;;  %v16623_v55 = vld [vmem:[%s21862_s2 + $0x90] sm:$0xff]  }
 0x4dc   : > { %15497 = vmatprep.mubr.msk.bf16.mxu1 %vm22630_vm5, %v8339_v53  ;;  %vm22635_vm4 = vmmov %vm22625_vm2 }
 0x4dd   : > { %v8345_v24 = vsel %vm22635_vm4, %v8342_v62, %v8344_v28  ;;  %vm22636_vm13 = vmmov %vm22634_vm0  ;;  %v8352_v62 = vrot.slane %v19948_v9, 1 }
 0x4de   : > { %vm22637_vm3 = vmmov %vm22625_vm2 }
 0x4df   : > { %v8347_v53 = vsel %vm22637_vm3, %v8344_v28, %v8346_v1  ;;  %vm22638_vm8 = vmmov %vm22634_vm0 }
 0x4e0   : > { %vm22639_vm9 = vmmov %vm22625_vm2 }
 0x4e1   : > { %v8349_v23 = vsel %vm22639_vm9, %v8346_v1, %v8348_v17  ;;  %vm22640_vm14 = vmmov %vm22634_vm0 }
 0x4e2   : > { %vm22641_vm7 = vmmov %vm22634_vm0 }
 0x4e3   : > { %15498 = vmatmul.mubr.msk.bf16.gmra.mrb[12].mxu1 %vm22632_vm1, %v8341_v59  ;;  %v8350_v59 = vrot.slane %v19944_v30, 1  ;;  %vm22642_vm10 = vmmov %vm22625_vm2  ;;  %v8356_v30 = vrot.slane %v19978_v52, 1 }
 0x4e4   : > { %15501 = vmatprep.mubr.msk.bf16.mxu1 %vm22634_vm0, %v8343_v61  ;;  %v8354_v61 = vrot.slane %v19959_v34, 1  ;;  %vm22643_vm11 = vmmov %vm22634_vm0  ;;  %v8360_v34 = vrot.slane %v19993_v7, 1  ;;  %v16618_v7 = vld [vmem:[%s21862_s2 + $0x88] sm:$0xff]  }
 0x4e5   : > { %v8351_v63 = vsel %vm22625_vm2, %v8348_v17, %v8350_v59  ;;  %v8353_v13 = vsel %vm22642_vm10, %v8350_v59, %v8352_v62  ;;  %vm22644_vm15 = vmmov %vm22625_vm2  ;;  %v8797_v17 = vrot.slane %v20012_v31, 1  ;;  %v8799_v31 = vrot.slane %v20014_v5, 1  ;;  %v16632_v5 = vld [vmem:[%s21862_s2 + $0xa0] sm:$0xff]  }
 0x4e6   : > { %v8355_v28 = vsel %vm22644_vm15, %v8352_v62, %v8354_v61  ;;  %vm22645_vm5 = vmmov %vm22634_vm0  ;;  %v8801_v59 = vrot.slane %v20024_v38, 1  ;;  %v8803_v38 = vrot.slane %v20030_v32, 1  ;;  %v8805_v62 = vrot.slane %v20037_v20, 1 }
 0x4e7   : > { %vm22646_vm6 = vmmov %vm22625_vm2  ;;  %v8811_v20 = vrot.slane %v20063_v36, 1 }
 0x4e8   : > { %v8357_v1 = vsel %vm22646_vm6, %v8354_v61, %v8356_v30  ;;  %vm22647_vm1 = vmmov %vm22634_vm0 }
 0x4e9   : > { %vm22648_vm12 = vmmov %vm22625_vm2 }
 0x4ea   : > { %v8359_v9 = vsel %vm22648_vm12, %v8356_v30, %v8358_v39  ;;  %vm22649_vm4 = vmmov %vm22625_vm2  ;;  %v8809_v30 = vrot.slane %v20043_v4, 1  ;;  %v8815_v4 = vrot.slane %v20083_v22, 1 }
 0x4eb   : > { %15502 = vmatmul.mubr.msk.bf16.gmra.mrb[16].mxu1 %vm22636_vm13, %v8345_v24  ;;  %v8792_v24 = vrot.slane %v20005_v49, 1  ;;  %v8361_v60 = vsel %vm22649_vm4, %v8358_v39, %v8360_v34  ;;  %vm22650_vm13 = vmmov %vm22634_vm0  ;;  %v22670_v34 = vld [vmem:[#allocation12_spill] sm:$0xff] }
 0x4ec   : > { %15505 = vmatprep.mubr.msk.bf16.mxu1 %vm22638_vm8, %v8347_v53  ;;  %v8793_v53 = vrot.slane %v20007_v10, 1  ;;  %vm22651_vm3 = vmmov %vm22625_vm2  ;;  %v8798_v10 = vsel %vm22625_vm2, %v8795_v27, %v8797_v17 }
 0x4ed   : > { %vm22652_vm8 = vmmov %vm22634_vm0 }
 0x4ee   : > { %v8794_v52 = vsel %vm22651_vm3, %v8792_v24, %v8793_v53  ;;  %vm22653_vm9 = vmmov %vm22625_vm2  ;;  %v8817_v24 = vrot.slane %v22670_v34, 1  ;;  %v22707_v34 = vld [vmem:[#allocation22_spill] sm:$0xff] }
 0x4ef   : > { %v8796_v49 = vsel %vm22653_vm9, %v8793_v53, %v8795_v27  ;;  %vm22656_vm10 = vmmov %vm22625_vm2 }
 0x4f0   : > { %vm22658_vm15 = vmmov %vm22625_vm2 }
 0x4f1   : > { %vm22660_vm6 = vmmov %vm22625_vm2 }
 0x4f2   : > { %v8804_v61 = vsel %vm22660_vm6, %v8801_v59, %v8803_v38  ;;  %vm22662_vm12 = vmmov %vm22625_vm2 }
 0x4f3   : > { %15506 = vmatmul.mubr.msk.bf16.gmra.mrb[20].mxu1 %vm22640_vm14, %v8349_v23  ;;  %vm22654_vm14 = vmmov %vm22634_vm0  ;;  %v16628_v23 = vld [vmem:[%s21862_s2 + $0x98] sm:$0xff]  }
 0x4f4   : > { %15509 = vmatprep.mubr.msk.bf16.mxu1 %vm22641_vm7, %v8351_v63  ;;  %vm22655_vm7 = vmmov %vm22634_vm0  ;;  %v8800_v63 = vsel %vm22656_vm10, %v8797_v17, %v8799_v31 }
 0x4f5   : > { %vm22663_vm4 = vmmov %vm22625_vm2 }
 0x4f6   : > { %vm22665_vm3 = vmmov %vm22625_vm2 }
 0x4f7   : > { %vm22667_vm9 = vmmov %vm22625_vm2 }
 0x4f8   : > { %vm22671_vm10 = vmmov %vm22625_vm2 }
 0x4f9   : > { %vm22677_vm6 = vmmov %vm22625_vm2 }
 0x4fb   : > { %15510 = vmatmul.mubr.msk.bf16.gmra.mrb[24].mxu1 %vm22643_vm11, %v8353_v13  ;;  %vm22657_vm11 = vmmov %vm22634_vm0  ;;  %v8806_v13 = vsel %vm22662_vm12, %v8803_v38, %v8805_v62  ;;  %v22688_v38 = vld [vmem:[#allocation16_spill] sm:$0xff] }
 0x4fc   : > { %15513 = vmatprep.mubr.msk.bf16.mxu1 %vm22645_vm5, %v8355_v28  ;;  %vm22659_vm5 = vmmov %vm22634_vm0  ;;  %v8807_v28 = vrot.slane %v20041_v25, 1 }
 0x4fd   : > { %vm22679_vm12 = vmmov %vm22625_vm2 }
 0x4fe   : > { %v8808_v39 = vsel %vm22663_vm4, %v8805_v62, %v8807_v28  ;;  %v8810_v32 = vsel %vm22665_vm3, %v8807_v28, %v8809_v30  ;;  %vm22682_vm4 = vmmov %vm22625_vm2  ;;  %v16633_v62 = vld [vmem:[%s21862_s2 + $0xa8] sm:$0xff]   ;;  %v16634_v28 = vld [vmem:[%s21862_s2 + $0xb0] sm:$0xff]  }
 0x4ff   : > { %vm22684_vm3 = vmmov %vm22625_vm2 }
 0x503   : > { %15514 = vmatmul.mubr.msk.bf16.gmra.mrb[28].mxu1 %vm22647_vm1, %v8357_v1  ;;  %vm22661_vm1 = vmmov %vm22634_vm0  ;;  %v8813_v1 = vrot.slane %v20072_v14, 1  ;;  %v22675_v14 = vld [vmem:[#allocation21_spill] sm:$0xff] }
 0x504   : > { %15517 = vmatprep.mubr.msk.bf16.mxu1 %vm22634_vm0, %v8359_v9  ;;  %v8812_v9 = vsel %vm22667_vm9, %v8809_v30, %v8811_v20  ;;  %vm22686_vm9 = vmmov %vm22625_vm2  ;;  %v16635_v30 = vld [vmem:[%s21862_s2 + $0xb8] sm:$0xff]  }
 0x505   : > { %v8814_v25 = vsel %vm22625_vm2, %v8811_v20, %v8813_v1  ;;  %v8816_v53 = vsel %vm22671_vm10, %v8813_v1, %v8815_v4  ;;  %vm22693_vm10 = vmmov %vm22634_vm0  ;;  %v22698_v20 = vld [vmem:[#allocation10_spill] sm:$0xff]  ;;  %v22700_v1 = vld [vmem:[#allocation19_spill] sm:$0xff] }
 0x50b   : > { %15518 = vmatmul.mubr.msk.bf16.gmra.mrb[32].mxu1 %vm22650_vm13, %v8361_v60  ;;  %vm22664_vm13 = vmmov %vm22634_vm0  ;;  %v8819_v60 = vrot.slane %v22675_v14, 1  ;;  %v22715_v14 = vld [vmem:[#allocation33_spill] sm:$0xff] }
 0x50c   : > { %15529 = vmatprep.mubr.msk.bf16.mxu1 %vm22652_vm8, %v8794_v52  ;;  %vm22666_vm8 = vmmov %vm22634_vm0  ;;  %v22676_v52 = vld [vmem:[#allocation13_spill] sm:$0xff] }
 0x50d   : > { %v8821_v27 = vrot.slane %v22676_v52, 1  ;;  %v8820_v17 = vsel %vm22677_vm6, %v8817_v24, %v8819_v60  ;;  %vm22701_vm6 = vmmov %vm22634_vm0 }
 0x50f   : > { %v8822_v22 = vsel %vm22679_vm12, %v8819_v60, %v8821_v27  ;;  %vm22705_vm12 = vmmov %vm22634_vm0  ;;  %v22717_v60 = vld [vmem:[#allocation43_spill] sm:$0xff] }
 0x510   : > { %v9295_v52 = vshrl.u32 %v22717_v60, 16 }
 0x513   : > { %15530 = vmatmul.mubr.msk.bf16.vlgmr.msra.gmra.mrb[0].mxu1 %vm22654_vm14, %v8796_v49  ;;  %vm22668_vm14 = vmmov %vm22634_vm0 }
 0x514   : > { %15566 = vmatpush3.bf16.msra.mxu1 %v16611_v41  ;;  %15533 = vmatprep.mubr.msk.bf16.mxu1 %vm22655_vm7, %v8798_v10  ;;  %v8802_v41 = vsel %vm22658_vm15, %v8799_v31, %v8801_v59  ;;  %vm22669_vm7 = vmmov %vm22634_vm0  ;;  %v22681_v10 = vld [vmem:[#allocation14_spill] sm:$0xff]  ;;  %v16631_v59 = vld [vmem:[#allocation3 + $0x98] ss:$0 sps:$4 sm:$0x11]  }
 0x515   : > { %15567 = vmatprep.subr.bf16.mxu1 %v16618_v7  ;;  %vm22673_vm15 = vmmov %vm22625_vm2 }
 0x516   : > { %v8818_v36 = vsel %vm22673_vm15, %v8815_v4, %v8817_v24  ;;  %vm22689_vm2 = vmmov %vm22634_vm0  ;;  %v22706_v4 = vld [vmem:[#allocation26_spill] sm:$0xff] }
 0x517   : > { %vm22697_vm15 = vmmov %vm22634_vm0  ;;  %v22709_v24 = vld [vmem:[#allocation30_spill] sm:$0xff] }
 0x518   : > { %15568 = vmatpush3.bf16.msra.mxu1 %v16618_v7  ;;  %v22680_v7 = vld [vmem:[#allocation20_spill] sm:$0xff] }
 0x519   : > { %15569 = vmatprep.subr.bf16.mxu1 %v16623_v55  ;;  %v8823_v49 = vrot.slane %v22680_v7, 1  ;;  %v22718_v7 = vld [vmem:[#allocation31_spill] sm:$0xff] }
 0x51b   : > { %15534 = vmatmul.mubr.msk.bf16.gmra.mrb[4].mxu1 %vm22657_vm11, %v8800_v63  ;;  %vm22672_vm11 = vmmov %vm22634_vm0  ;;  %v8824_v31 = vsel %vm22682_vm4, %v8821_v27, %v8823_v49  ;;  %v8827_v63 = vrot.slane %v16631_v59, 1  ;;  %v9298_v27 = vshll.u32 %v22717_v60, 16  ;;  %v22725_v59 = vld [vmem:[#allocation41_spill] sm:$0xff] }
 0x51c   : > { %15537 = vmatprep.mubr.msk.bf16.mxu1 %vm22659_vm5, %v8802_v41  ;;  %15570 = vmatpush3.bf16.msra.mxu1 %v16623_v55  ;;  %vm22674_vm5 = vmmov %vm22634_vm0  ;;  %v8825_v55 = vrot.slane %v22681_v10, 1 }
 0x51d   : > { %15571 = vmatprep.subr.bf16.mxu1 %v16628_v23  ;;  %vm22708_vm4 = vmmov %vm22634_vm0 }
 0x51e   : > { %v8828_v41 = vsel %vm22686_vm9, %v8825_v55, %v8827_v63  ;;  %vm22716_vm9 = vmmov %vm22634_vm0  ;;  %v22727_v63 = vld [vmem:[#allocation36_spill] sm:$0xff] }
 0x520   : > { %15572 = vmatpush3.bf16.msra.mxu1 %v16628_v23  ;;  %v8826_v23 = vsel %vm22684_vm3, %v8823_v49, %v8825_v55  ;;  %vm22712_vm3 = vmmov %vm22634_vm0  ;;  %v22720_v49 = vld [vmem:[#allocation29_spill] sm:$0xff] }
 0x521   : > { %15609 = vmatprep.subr.bf16.mxu1 %v16632_v5  ;;  %v22722_v55 = vld [vmem:[#allocation25_spill] sm:$0xff] }
 0x523   : > { %15538 = vmatmul.mubr.msk.bf16.gmra.mrb[8].mxu1 %vm22661_vm1, %v8804_v61  ;;  %vm22678_vm1 = vmmov %vm22634_vm0  ;;  %v22690_v61 = vld [vmem:[#allocation15_spill] sm:$0xff] }
 0x524   : > { %15541 = vmatprep.mubr.msk.bf16.mxu1 %vm22634_vm0, %v8806_v13  ;;  %v22692_v13 = vld [vmem:[#allocation11_spill] sm:$0xff] }
 0x52b   : > { %15542 = vmatmul.mubr.msk.bf16.gmra.mrb[12].mxu1 %vm22664_vm13, %v8808_v39  ;;  %vm22683_vm13 = vmmov %vm22634_vm0  ;;  %v22694_v39 = vld [vmem:[#allocation18_spill] sm:$0xff] }
 0x52c   : > { %15545 = vmatprep.mubr.msk.bf16.mxu1 %vm22666_vm8, %v8810_v32  ;;  %vm22685_vm8 = vmmov %vm22634_vm0  ;;  %v22696_v32 = vld [vmem:[#allocation17_spill] sm:$0xff] }
 0x533   : > { %15546 = vmatmul.mubr.msk.bf16.gmra.mrb[16].mxu1 %vm22668_vm14, %v8812_v9  ;;  %vm22687_vm14 = vmmov %vm22634_vm0  ;;  %v22702_v9 = vld [vmem:[#allocation23_spill] sm:$0xff] }
 0x534   : > { %15549 = vmatprep.mubr.msk.bf16.mxu1 %vm22669_vm7, %v8814_v25  ;;  %vm22691_vm7 = vmmov %vm22634_vm0  ;;  %v22704_v25 = vld [vmem:[#allocation27_spill] sm:$0xff] }
 0x53b   : > { %15550 = vmatmul.mubr.msk.bf16.gmra.mrb[20].mxu1 %vm22672_vm11, %v8816_v53  ;;  %vm22695_vm11 = vmmov %vm22634_vm0  ;;  %v22711_v53 = vld [vmem:[#allocation28_spill] sm:$0xff] }
 0x53c   : > { %15553 = vmatprep.mubr.msk.bf16.mxu1 %vm22674_vm5, %v8818_v36  ;;  %vm22699_vm5 = vmmov %vm22634_vm0  ;;  %v22713_v36 = vld [vmem:[#allocation24_spill] sm:$0xff] }
 0x543   : > { %15554 = vmatmul.mubr.msk.bf16.gmra.mrb[24].mxu1 %vm22678_vm1, %v8820_v17  ;;  %vm22703_vm1 = vmmov %vm22634_vm0  ;;  %v9297_v17 = vrot.slane %v9295_v52, 1  ;;  %v22759_v52 = vld [vmem:[#allocation51_spill] sm:$0xff] }
 0x544   : > { %15557 = vmatprep.mubr.msk.bf16.mxu1 %vm22634_vm0, %v8822_v22  ;;  %v9300_v22 = vrot.slane %v9298_v27, 2 }
 0x546   : > { %v9301_v10 = vor.u32 %v9300_v22, %v9297_v17  ;;  %v10077_v17 = vrot.slane %v20265_v47, 2  ;;  %v10079_v22 = vrot.slane %v20269_v26, 2  ;;  %v16656_v47 = vld [vmem:[%s21862_s2 + $0xf0] sm:$0xff]   ;;  %v10081_v26 = vrot.slane %v20273_v42, 2 }
 0x547   : > { %v10085_v42 = vrot.slane %v20288_v48, 2  ;;  %v10093_v48 = vrot.slane %v20312_v54, 2 }
 0x54b   : > { %15558 = vmatmul.mubr.msk.bf16.gmra.mrb[28].mxu1 %vm22683_vm13, %v8824_v31  ;;  %vm22710_vm13 = vmmov %vm22634_vm0 }
 0x54c   : > { %15561 = vmatprep.mubr.msk.bf16.mxu1 %vm22685_vm8, %v8826_v23  ;;  %vm22714_vm8 = vmmov %vm22634_vm0  ;;  %v16639_v23 = vld [vmem:[%s21862_s2 + $0xc8] sm:$0xff]  }
 0x553   : > { %15562 = vmatmul.mubr.msk.bf16.gmra.mrb[32].mxu1 %vm22687_vm14, %v8828_v41  ;;  %vm22719_vm14 = vmmov %vm22634_vm0  ;;  %v22729_v41 = vld [vmem:[#allocation42_spill] sm:$0xff] }
 0x554   : > { %15573 = vmatprep.mubr.msk.bf16.mxu1 %vm22689_vm2, %v22688_v38  ;;  %vm22721_vm2 = vmmov %vm22634_vm0  ;;  %v16640_v38 = vld [vmem:[%s21862_s2 + $0xd0] sm:$0xff]  }
 0x55b   : > { %15574 = vmatmul.mubr.msk.bf16.vlgmr.msra.gmra.mrb[0].mxu1 %vm22691_vm7, %v22690_v61  ;;  %vm22723_vm7 = vsmask.f32 6400  ;;  %v22731_v61 = vld [vmem:[#allocation37_spill] sm:$0xff] }
 0x55c   : > { %15610 = vmatpush3.bf16.msra.mxu1 %v16632_v5  ;;  %15577 = vmatprep.mubr.msk.bf16.mxu1 %vm22693_vm10, %v22692_v13  ;;  %v16638_v5 = vld [vmem:[%s21862_s2 + $0xc0] sm:$0xff]   ;;  %v9302_v31 = vsel %vm22723_vm7, %v22722_v55, %v9301_v10  ;;  %vm22724_vm10 = vmmov %vm22634_vm0  ;;  %v22733_v13 = vld [vmem:[#allocation32_spill] sm:$0xff]  ;;  %v10083_v10 = vrot.slane %v20282_v45, 2 }
 0x55d   : > { %15611 = vmatprep.subr.bf16.mxu1 %v16633_v62  ;;  %vm22753_vm7 = vmmov %vm22634_vm0  ;;  %v16661_v55 = vld [vmem:[%s21862_s2 + $0xf8] sm:$0xff]   ;;  %v16665_v45 = vld [vmem:[%s21862_s2 + $0x100] sm:$0xff]  }
 0x560   : > { %15612 = vmatpush3.bf16.msra.mxu1 %v16633_v62  ;;  %v16641_v62 = vld [vmem:[%s21862_s2 + $0xd8] sm:$0xff]  }
 0x561   : > { %15613 = vmatprep.subr.bf16.mxu1 %v16634_v28 }
 0x563   : > { %15578 = vmatmul.mubr.msk.bf16.gmra.mrb[4].mxu1 %vm22695_vm11, %v22694_v39  ;;  %vm22726_vm11 = vmmov %vm22634_vm0  ;;  %v22737_v39 = vld [vmem:[#allocation34_spill] sm:$0xff] }
 0x564   : > { %15581 = vmatprep.mubr.msk.bf16.mxu1 %vm22697_vm15, %v22696_v32  ;;  %15614 = vmatpush3.bf16.msra.mxu1 %v16634_v28  ;;  %vm22728_vm15 = vmmov %vm22634_vm0  ;;  %v16644_v28 = vld [vmem:[%s21862_s2 + $0xe0] sm:$0xff]  }
 0x565   : > { %15615 = vmatprep.subr.bf16.mxu1 %v16635_v30  ;;  %v22738_v32 = vld [vmem:[#allocation45_spill] sm:$0xff] }
 0x568   : > { %15616 = vmatpush3.bf16.msra.mxu1 %v16635_v30  ;;  %v22735_v30 = vld [vmem:[#allocation40_spill] sm:$0xff] }
 0x569   : > { %15653 = vmatprep.subr.bf16.mxu1 %v16638_v5 }
 0x56b   : > { %15582 = vmatmul.mubr.msk.bf16.gmra.mrb[8].mxu1 %vm22699_vm5, %v22698_v20  ;;  %vm22730_vm5 = vmmov %vm22634_vm0  ;;  %v22742_v20 = vld [vmem:[#allocation38_spill] sm:$0xff] }
 0x56c   : > { %15585 = vmatprep.mubr.msk.bf16.mxu1 %vm22701_vm6, %v22700_v1  ;;  %vm22732_vm6 = vmmov %vm22634_vm0  ;;  %v22744_v1 = vld [vmem:[#allocation47_spill] sm:$0xff] }
 0x573   : > { %15586 = vmatmul.mubr.msk.bf16.gmra.mrb[12].mxu1 %vm22703_vm1, %v22702_v9  ;;  %vm22734_vm1 = vmmov %vm22634_vm0  ;;  %v22746_v9 = vld [vmem:[#allocation46_spill] sm:$0xff] }
 0x574   : > { %15589 = vmatprep.mubr.msk.bf16.mxu1 %vm22705_vm12, %v22704_v25  ;;  %vm22736_vm12 = vmmov %vm22634_vm0  ;;  %v22748_v25 = vld [vmem:[#allocation39_spill] sm:$0xff] }
 0x57b   : > { %15590 = vmatmul.mubr.msk.bf16.gmra.mrb[16].mxu1 %vm22634_vm0, %v22706_v4  ;;  %v22750_v4 = vld [vmem:[#allocation52_spill] sm:$0xff] }
 0x57c   : > { %15593 = vmatprep.mubr.msk.bf16.mxu1 %vm22708_vm4, %v22707_v34  ;;  %vm22739_vm4 = vmmov %vm22634_vm0  ;;  %v22752_v34 = vld [vmem:[#allocation50_spill] sm:$0xff] }
 0x583   : > { %15594 = vmatmul.mubr.msk.bf16.gmra.mrb[20].mxu1 %vm22710_vm13, %v22709_v24  ;;  %vm22741_vm13 = vmmov %vm22634_vm0  ;;  %v22754_v24 = vld [vmem:[#allocation48_spill] sm:$0xff] }
 0x584   : > { %15597 = vmatprep.mubr.msk.bf16.mxu1 %vm22712_vm3, %v22711_v53  ;;  %vm22743_vm3 = vmmov %vm22634_vm0  ;;  %v22756_v53 = vld [vmem:[#allocation49_spill] sm:$0xff] }
 0x58b   : > { %15598 = vmatmul.mubr.msk.bf16.gmra.mrb[24].mxu1 %vm22714_vm8, %v22713_v36  ;;  %vm22745_vm8 = vmmov %vm22634_vm0  ;;  %v10075_v36 = vrot.slane %v20263_v51, 2 }
 0x58c   : > { %15601 = vmatprep.mubr.msk.bf16.mxu1 %vm22716_vm9, %v22715_v14  ;;  %vm22747_vm9 = vmmov %vm22634_vm0  ;;  %v22758_v14 = vld [vmem:[#allocation56_spill] sm:$0xff] }
 0x58d   : > { %v10074_v60 = vrot.slane %v22758_v14, 2  ;;  %v22802_v14 = vld [vmem:[#allocation65_spill] sm:$0xff] }
 0x593   : > { %15602 = vmatmul.mubr.msk.bf16.gmra.mrb[28].mxu1 %vm22719_vm14, %v22718_v7  ;;  %vm22749_vm14 = vmmov %vm22634_vm0  ;;  %v16651_v7 = vld [vmem:[%s21862_s2 + $0xe8] sm:$0xff]  }
 0x594   : > { %15605 = vmatprep.mubr.msk.bf16.mxu1 %vm22721_vm2, %v22720_v49  ;;  %vm22751_vm2 = vmmov %vm22634_vm0 }
 0x59b   : > { %15606 = vmatmul.mubr.msk.bf16.gmra.mrb[32].mxu1 %vm22724_vm10, %v9302_v31  ;;  %vm22755_vm10 = vmmov %vm22634_vm0 }
 0x59c   : > { %15617 = vmatprep.mubr.msk.bf16.mxu1 %vm22726_vm11, %v22725_v59  ;;  %vm22757_vm11 = vmmov %vm22634_vm0 }
 0x5a3   : > { %15618 = vmatmul.mubr.msk.bf16.vlgmr.msra.gmra.mrb[0].mxu1 %vm22728_vm15, %v22727_v63  ;;  %vm22760_vm15 = vmmov %vm22634_vm0 }
 0x5a4   : > { %15654 = vmatpush3.bf16.msra.mxu1 %v16638_v5  ;;  %15621 = vmatprep.mubr.msk.bf16.mxu1 %vm22730_vm5, %v22729_v41  ;;  %v22740_v5 = vld [vmem:[#allocation44_spill] sm:$0xff]  ;;  %vm22761_vm5 = vcmask 1045504  }
 0x5a5   : > { %15655 = vmatprep.subr.bf16.mxu1 %v16639_v23  ;;  %v10076_v27 = vsel %vm22761_vm5, %v10074_v60, %v10075_v36  ;;  %v22804_v60 = vld [vmem:[#allocation63_spill] sm:$0xff] }
 0x5a8   : > { %15656 = vmatpush3.bf16.msra.mxu1 %v16639_v23  ;;  %v10087_v23 = vrot.slane %v20295_v16, 2 }
 0x5a9   : > { %15657 = vmatprep.subr.bf16.mxu1 %v16640_v38 }
 0x5ab   : > { %15622 = vmatmul.mubr.msk.bf16.gmra.mrb[4].mxu1 %vm22732_vm6, %v22731_v61  ;;  %vm22762_vm6 = vmmov %vm22634_vm0 }
 0x5ac   : > { %15625 = vmatprep.mubr.msk.bf16.mxu1 %vm22734_vm1, %v22733_v13  ;;  %15658 = vmatpush3.bf16.msra.mxu1 %v16640_v38  ;;  %vm22763_vm1 = vmmov %vm22761_vm5  ;;  %v10089_v38 = vrot.slane %v20298_v35, 2  ;;  %v10095_v13 = vrot.slane %v20318_v0, 2  ;;  %v10101_v0 = vrot.slane %v20345_v11, 2 }
 0x5ad   : > { %15659 = vmatprep.subr.bf16.mxu1 %v16641_v62  ;;  %v10078_v49 = vsel %vm22763_vm1, %v10075_v36, %v10077_v17  ;;  %v22800_v36 = vld [vmem:[#allocation57_spill] sm:$0xff] }
 0x5b0   : > { %15660 = vmatpush3.bf16.msra.mxu1 %v16641_v62  ;;  %v10091_v62 = vrot.slane %v20302_v57, 2  ;;  %v10097_v57 = vrot.slane %v20331_v33, 2 }
 0x5b1   : > { %15697 = vmatprep.subr.bf16.mxu1 %v16644_v28 }
 0x5b3   : > { %15626 = vmatmul.mubr.msk.bf16.gmra.mrb[8].mxu1 %vm22736_vm12, %v22735_v30  ;;  %vm22764_vm12 = vmmov %vm22634_vm0  ;;  %v10099_v30 = vrot.slane %v20338_v43, 2  ;;  %v10105_v43 = vrot.slane %v20358_v44, 2  ;;  %v16666_v44 = vld [vmem:[%s21862_s2 + $0x108] sm:$0xff]  }
 0x5b4   : > { %15629 = vmatprep.mubr.msk.bf16.mxu1 %vm22634_vm0, %v22737_v39  ;;  %vm22765_vm0 = vmmov %vm22763_vm1 }
 0x5b5   : > { %v10080_v51 = vsel %vm22765_vm0, %v10077_v17, %v10079_v22  ;;  %vm22776_vm5 = vmmov %vm22765_vm0  ;;  %v10096_v35 = vsel %vm22765_vm0, %v10093_v48, %v10095_v13  ;;  %v22810_v17 = vld [vmem:[#allocation64_spill] sm:$0xff] }
 0x5b6   : > { %v10092_v16 = vsel %vm22776_vm5, %v10089_v38, %v10091_v62  ;;  %vm22778_vm1 = vmmov %vm22765_vm0 }
 0x5b7   : > { %vm22790_vm5 = vmmov %vm22765_vm0 }
 0x5bb   : > { %15630 = vmatmul.mubr.msk.bf16.gmra.mrb[12].mxu1 %vm22739_vm4, %v22738_v32  ;;  %vm22766_vm4 = vmmov %vm22751_vm2  ;;  %v10103_v32 = vrot.slane %v20352_v37, 2 }
 0x5bc   : > { %15633 = vmatprep.mubr.msk.bf16.mxu1 %vm22741_vm13, %v22740_v5  ;;  %vm22767_vm13 = vmmov %vm22765_vm0 }
 0x5bd   : > { %v10082_v31 = vsel %vm22767_vm13, %v10079_v22, %v10081_v26  ;;  %vm22781_vm13 = vmmov %vm22765_vm0  ;;  %v22812_v22 = vld [vmem:[#allocation59_spill] sm:$0xff] }
 0x5be   : > { %v10098_v39 = vsel %vm22781_vm13, %v10095_v13, %v10097_v57 }
 0x5c3   : > { %15634 = vmatmul.mubr.msk.bf16.gmra.mrb[16].mxu1 %vm22743_vm3, %v22742_v20  ;;  %vm22768_vm3 = vmmov %vm22751_vm2  ;;  %v10107_v20 = vrot.slane %v20364_v8, 2  ;;  %v22796_v8 = vld [vmem:[#allocation53_spill] sm:$0xff] }
 0x5c4   : > { %15637 = vmatprep.mubr.msk.bf16.mxu1 %vm22745_vm8, %v22744_v1  ;;  %vm22769_vm8 = vmmov %vm22765_vm0 }
 0x5c5   : > { %v10084_v59 = vsel %vm22769_vm8, %v10081_v26, %v10083_v10  ;;  %vm22783_vm8 = vmmov %vm22765_vm0  ;;  %v10108_v11 = vsel %vm22790_vm5, %v10105_v43, %v10107_v20 }
 0x5c6   : > { %v10100_v54 = vsel %vm22783_vm8, %v10097_v57, %v10099_v30  ;;  %v16702_v57 = vld [vmem:[%s16915_s23 + $0x28] sm:$0xff] }
 0x5cb   : > { %15638 = vmatmul.mubr.msk.bf16.gmra.mrb[20].mxu1 %vm22747_vm9, %v22746_v9  ;;  %vm22770_vm9 = vmmov %vm22751_vm2  ;;  %v16664_v9 = vld [vmem:[#allocation3 + $0xa0] ss:$0 sps:$4 sm:$0x33]  }
 0x5cc   : > { %15641 = vmatprep.mubr.msk.bf16.mxu1 %vm22749_vm14, %v22748_v25  ;;  %vm22771_vm14 = vmmov %vm22765_vm0  ;;  %v10109_v37 = vrot.slane %v16664_v9, 2 }
 0x5cd   : > { %v10086_v63 = vsel %vm22771_vm14, %v10083_v10, %v10085_v42  ;;  %vm22785_vm14 = vmmov %vm22765_vm0 }
 0x5ce   : > { %v10102_v5 = vsel %vm22785_vm14, %v10099_v30, %v10101_v0  ;;  %v12188_v30 = vcombine.high %v16702_v57, %v16702_v57 }
 0x5d3   : > { %15642 = vmatmul.mubr.msk.bf16.gmra.mrb[24].mxu1 %vm22751_vm2, %v22750_v4  ;;  %v22794_v4 = vld [vmem:[#allocation55_spill] sm:$0xff] }
 0x5d4   : > { %15645 = vmatprep.mubr.msk.bf16.mxu1 %vm22753_vm7, %v22752_v34  ;;  %vm22772_vm7 = vmmov %vm22765_vm0  ;;  %v22798_v34 = vld [vmem:[#allocation54_spill] sm:$0xff] }
 0x5d5   : > { %v10088_v41 = vsel %vm22772_vm7, %v10085_v42, %v10087_v23  ;;  %vm22786_vm7 = vmmov %vm22765_vm0 }
 0x5d6   : > { %v10104_v33 = vsel %vm22786_vm7, %v10101_v0, %v10103_v32 }
 0x5db   : > { %15646 = vmatmul.mubr.msk.bf16.gmra.mrb[28].mxu1 %vm22755_vm10, %v22754_v24  ;;  %vm22773_vm10 = vmmov %vm22751_vm2  ;;  %v16667_v24 = vld [vmem:[%s21862_s2 + $0x110] sm:$0xff]  }
 0x5dc   : > { %15649 = vmatprep.mubr.msk.bf16.mxu1 %vm22757_vm11, %v22756_v53  ;;  %vm22774_vm11 = vmmov %vm22765_vm0  ;;  %v16668_v53 = vld [vmem:[%s21862_s2 + $0x118] sm:$0xff]  }
 0x5dd   : > { %v10090_v61 = vsel %vm22774_vm11, %v10087_v23, %v10089_v38  ;;  %vm22788_vm11 = vmmov %vm22765_vm0 }
 0x5de   : > { %v10106_v1 = vsel %vm22788_vm11, %v10103_v32, %v10105_v43 }
 0x5e3   : > { %15650 = vmatmul.mubr.msk.bf16.gmra.mrb[32].mxu1 %vm22760_vm15, %v22759_v52  ;;  %vm22775_vm15 = vmmov %vm22751_vm2  ;;  %v22806_v52 = vld [vmem:[#allocation58_spill] sm:$0xff] }
 0x5e4   : > { %15661 = vmatprep.mubr.msk.bf16.mxu1 %vm22762_vm6, %v10076_v27  ;;  %vm22777_vm6 = vmmov %vm22751_vm2  ;;  %v22808_v27 = vld [vmem:[#allocation67_spill] sm:$0xff] }
 0x5eb   : > { %15662 = vmatmul.mubr.msk.bf16.vlgmr.msra.gmra.mrb[0].mxu1 %vm22764_vm12, %v10078_v49  ;;  %vm22779_vm12 = vmmov %vm22751_vm2  ;;  %v22816_v49 = vld [vmem:[#allocation66_spill] sm:$0xff] }
 0x5ec   : > { %15698 = vmatpush3.bf16.msra.mxu1 %v16644_v28  ;;  %15665 = vmatprep.mubr.msk.bf16.mxu1 %vm22766_vm4, %v10080_v51  ;;  %v10094_v28 = vsel %vm22778_vm1, %v10091_v62, %v10093_v48  ;;  %vm22780_vm4 = vmmov %vm22751_vm2  ;;  %v10577_v51 = vshrl.u32 %v20449_v29, 16  ;;  %v16699_v62 = vld [vmem:[%s16915_s23] sm:$0xff] }
 0x5ed   : > { %15699 = vmatprep.subr.bf16.mxu1 %v16651_v7  ;;  %vm22792_vm1 = vmmov %vm22765_vm0 }
 0x5ee   : > { %v10110_v25 = vsel %vm22792_vm1, %v10107_v20, %v10109_v37  ;;  %vm22795_vm0 = vmmov %vm22751_vm2  ;;  %v10579_v26 = vrot.slane %v10577_v51, 2  ;;  %v16707_v51 = vld [vmem:[%s16915_s23 + $0x40] sm:$0xff] }
 0x5ef   : > { %vm22799_vm13 = vmmov %vm22795_vm0  ;;  %v21140_v20 = vld [vmem:[%s16915_s23 + $0xc0] sm:$0xff] }
 0x5f0   : > { %15700 = vmatpush3.bf16.msra.mxu1 %v16651_v7  ;;  %vm22803_vm8 = vmmov %vm22795_vm0  ;;  %v22814_v7 = vld [vmem:[#allocation68_spill] sm:$0xff] }
 0x5f1   : > { %15701 = vmatprep.subr.bf16.mxu1 %v16656_v47  ;;  %vm22807_vm14 = vmmov %vm22795_vm0 }
 0x5f2   : > { %vm22811_vm7 = vmmov %vm22795_vm0 }
 0x5f3   : > { %15666 = vmatmul.mubr.msk.bf16.gmra.mrb[4].mxu1 %vm22768_vm3, %v10082_v31  ;;  %vm22782_vm3 = vmmov %vm22751_vm2  ;;  %v22845_v31 = vld [vmem:[#allocation35_spill] sm:$0xff] }
 0x5f4   : > { %15669 = vmatprep.mubr.msk.bf16.mxu1 %vm22770_vm9, %v10084_v59  ;;  %15702 = vmatpush3.bf16.msra.mxu1 %v16656_v47  ;;  %vm22784_vm9 = vmmov %vm22751_vm2  ;;  %v10580_v47 = vshll.u32 %v20449_v29, 16  ;;  %v22843_v29 = vld [vmem:[#allocation9_spill] sm:$0xff] }
 0x5f5   : > { %15703 = vmatprep.subr.bf16.mxu1 %v16661_v55  ;;  %vm22815_vm11 = vmmov %vm22795_vm0  ;;  %v22850_v59 = vld [vmem:[#allocation73_spill] sm:$0xff] }
 0x5f6   : > { %vm22818_vm5 = vmmov %vm22795_vm0  ;;  %v10582_v10 = vrot.slane %v10580_v47, 3  ;;  %v12239_v47 = vcombine.high %v16707_v51, %v16707_v51 }
 0x5f7   : > { %vm22820_vm1 = vmmov %vm22795_vm0 }
 0x5f8   : > { %15704 = vmatpush3.bf16.msra.mxu1 %v16661_v55  ;;  %v10583_v55 = vor.u32 %v10582_v10, %v10579_v26 }
 0x5f9   : > { %15741 = vmatprep.subr.bf16.mxu1 %v16665_v45 }
 0x5fb   : > { %15670 = vmatmul.mubr.msk.bf16.gmra.mrb[8].mxu1 %vm22751_vm2, %v10086_v63  ;;  %v22852_v63 = vld [vmem:[#allocation8_spill] sm:$0xff] }
 0x5fc   : > { %15673 = vmatprep.mubr.msk.bf16.mxu1 %vm22773_vm10, %v10088_v41  ;;  %vm22787_vm10 = vmmov %vm22751_vm2 }
 0x603   : > { %15674 = vmatmul.mubr.msk.bf16.gmra.mrb[12].mxu1 %vm22775_vm15, %v10090_v61  ;;  %vm22789_vm15 = vmmov %vm22751_vm2  ;;  %v16700_v61 = vld [vmem:[%s16915_s23 + $0x18] sm:$0xff] }
 0x604   : > { %15677 = vmatprep.mubr.msk.bf16.mxu1 %vm22777_vm6, %v10092_v16  ;;  %vm22791_vm6 = vmmov %vm22751_vm2  ;;  %v16701_v16 = vld [vmem:[%s16915_s23 + $0x8] sm:$0xff] }
 0x60b   : > { %15678 = vmatmul.mubr.msk.bf16.gmra.mrb[16].mxu1 %vm22779_vm12, %v10094_v28  ;;  %vm22793_vm12 = vmmov %vm22751_vm2 }
 0x60c   : > { %15681 = vmatprep.mubr.msk.bf16.mxu1 %vm22780_vm4, %v10096_v35  ;;  %vm22797_vm4 = vmmov %vm22795_vm0 }
 0x613   : > { %15682 = vmatmul.mubr.msk.bf16.gmra.mrb[20].mxu1 %vm22782_vm3, %v10098_v39  ;;  %vm22801_vm3 = vmmov %vm22795_vm0 }
 0x614   : > { %15685 = vmatprep.mubr.msk.bf16.mxu1 %vm22784_vm9, %v10100_v54  ;;  %vm22805_vm9 = vmmov %vm22795_vm0 }
 0x61b   : > { %15686 = vmatmul.mubr.msk.bf16.gmra.mrb[24].mxu1 %vm22751_vm2, %v10102_v5  ;;  %vm22809_vm2 = vmmov %vm22795_vm0  ;;  %v16703_v5 = vld [vmem:[%s16915_s23 + $0x30] sm:$0xff] }
 0x61c   : > { %15689 = vmatprep.mubr.msk.bf16.mxu1 %vm22787_vm10, %v10104_v33  ;;  %vm22813_vm10 = vmmov %vm22795_vm0  ;;  %v12205_v33 = vcombine.high %v16703_v5, %v16703_v5 }
 0x623   : > { %15690 = vmatmul.mubr.msk.bf16.gmra.mrb[28].mxu1 %vm22789_vm15, %v10106_v1  ;;  %vm22817_vm15 = vmmov %vm22795_vm0  ;;  %v16704_v1 = vld [vmem:[%s16915_s23 + $0x20] sm:$0xff] }
 0x624   : > { %15693 = vmatprep.mubr.msk.bf16.mxu1 %vm22791_vm6, %v10108_v11  ;;  %vm22819_vm6 = vmmov %vm22795_vm0  ;;  %v12171_v11 = vcombine.high %v16704_v1, %v16704_v1 }
 0x62b   : > { %15694 = vmatmul.mubr.msk.bf16.gmra.mrb[32].mxu1 %vm22793_vm12, %v10110_v25  ;;  %vm22821_vm12 = vmmov %vm22795_vm0 }
 0x62c   : > { %15705 = vmatprep.mubr.msk.bf16.mxu1 %vm22795_vm0, %v22794_v4 }
 0x633   : > { %15706 = vmatmul.mubr.msk.bf16.vlgmr.msra.gmra.mrb[0].mxu1 %vm22797_vm4, %v22796_v8  ;;  %vm22822_vm4 = vsmask.f32 5376 }
 0x634   : > { %15742 = vmatpush3.bf16.msra.mxu1 %v16665_v45  ;;  %15709 = vmatprep.mubr.msk.bf16.mxu1 %vm22799_vm13, %v22798_v34  ;;  %vm22823_vm13 = vmmov %vm22795_vm0  ;;  %v16801_v45 = vmov 1983009808  }
 0x635   : > { %15743 = vmatprep.subr.bf16.mxu1 %v16666_v44  ;;  %v11341_v42 = vunpack.c.l.s4 %v16801_v45 }
 0x637   : > { %v11342_v23 = vunpack.c.0.s8 %v11341_v42  ;;  %v16720_v42 = vld [vmem:[%s16915_s23 + $0xa8] sm:$0xff] }
 0x638   : > { %15744 = vmatpush3.bf16.msra.mxu1 %v16666_v44  ;;  %v16705_v44 = vld [vmem:[%s16915_s23 + $0x48] sm:$0xff] }
 0x639   : > { %15745 = vmatprep.subr.bf16.mxu1 %v16667_v24  ;;  %v20863_v41 = vsub.s32 %v11342_v23, %v22852_v63  ;;  %v12256_v8 = vcombine.high %v16705_v44, %v16705_v44 }
 0x63b   : > { %15710 = vmatmul.mubr.msk.bf16.gmra.mrb[4].mxu1 %vm22801_vm3, %v22800_v36  ;;  %vm22824_vm3 = vmmov %vm22795_vm0  ;;  %v20873_v13 = vrot.slane %v16699_v62, %v20863_v41  ;;  %v20883_v39 = vrot.slane %v16700_v61, %v20863_v41  ;;  %v20886_v54 = vrot.slane %v16701_v16, %v20863_v41  ;;  %v20901_v9 = vrot.slane %v16704_v1, %v20863_v41  ;;  %v16706_v36 = vld [vmem:[%s16915_s23 + $0x38] sm:$0xff]  ;;  %v16712_v1 = vld [vmem:[%s16915_s23 + $0x80] sm:$0xff] }
 0x63c   : > { %15713 = vmatprep.mubr.msk.bf16.mxu1 %vm22803_vm8, %v22802_v14  ;;  %15746 = vmatpush3.bf16.msra.mxu1 %v16667_v24  ;;  %vm22825_vm8 = vmmov %vm22795_vm0  ;;  %v20908_v4 = vrot.slane %v12188_v30, %v20863_v41  ;;  %v12222_v14 = vcombine.high %v16706_v36, %v16706_v36  ;;  %v20941_v10 = vrot.slane %v16705_v44, %v20863_v41  ;;  %v16717_v44 = vld [vmem:[%s16915_s23 + $0x90] sm:$0xff] }
 0x63d   : > { %15747 = vmatprep.subr.bf16.mxu1 %v16668_v53  ;;  %v20967_v63 = vrot.slane %v16707_v51, %v20863_v41  ;;  %v12409_v30 = vcombine.high %v16717_v44, %v16717_v44 }
 0x640   : > { %15748 = vmatpush3.bf16.msra.mxu1 %v16668_v53  ;;  %v20916_v53 = vrot.slane %v16703_v5, %v20863_v41 }
 0x643   : > { %15714 = vmatmul.mubr.msk.bf16.gmra.mrb[8].mxu1 %vm22805_vm9, %v22804_v60  ;;  %vm22826_vm9 = vmmov %vm22795_vm0 }
 0x644   : > { %15717 = vmatprep.mubr.msk.bf16.mxu1 %vm22807_vm14, %v22806_v52  ;;  %vm22828_vm14 = vmmov %vm22795_vm0 }
 0x64b   : > { %15718 = vmatmul.mubr.msk.bf16.gmra.mrb[12].mxu1 %vm22809_vm2, %v22808_v27  ;;  %vm22830_vm2 = vmmov %vm22795_vm0  ;;  %v20924_v27 = vrot.slane %v12205_v33, %v20863_v41 }
 0x64c   : > { %15721 = vmatprep.mubr.msk.bf16.mxu1 %vm22811_vm7, %v22810_v17  ;;  %vm22832_vm7 = vmmov %vm22795_vm0  ;;  %v20927_v17 = vrot.slane %v16702_v57, %v20863_v41 }
 0x653   : > { %15722 = vmatmul.mubr.msk.bf16.gmra.mrb[16].mxu1 %vm22813_vm10, %v22812_v22  ;;  %vm22834_vm10 = vmmov %vm22795_vm0 }
 0x654   : > { %15725 = vmatprep.mubr.msk.bf16.mxu1 %vm22815_vm11, %v22814_v7  ;;  %vm22836_vm11 = vmmov %vm22795_vm0  ;;  %v20932_v7 = vrot.slane %v16706_v36, %v20863_v41  ;;  %v21007_v36 = vrot.slane %v16712_v1, %v20863_v41 }
 0x65b   : > { %15726 = vmatmul.mubr.msk.bf16.gmra.mrb[20].mxu1 %vm22817_vm15, %v22816_v49  ;;  %vm22838_vm15 = vmmov %vm22795_vm0  ;;  %v20935_v49 = vrot.slane %v12171_v11, %v20863_v41  ;;  %v12375_v11 = vcombine.high %v16712_v1, %v16712_v1 }
 0x65c   : > { %15729 = vmatprep.mubr.msk.bf16.mxu1 %vm22818_vm5, %v20388_v21  ;;  %v10584_v21 = vsel %vm22822_vm4, %v20415_v15, %v10583_v55  ;;  %v22833_v15 = vld [vmem:[#allocation61_spill] sm:$0xff]  ;;  %vm22840_vm5 = vmmov %vm22795_vm0  ;;  %v20944_v55 = vrot.slane %v12256_v8, %v20863_v41  ;;  %v16716_v8 = vld [vmem:[%s16915_s23 + $0x98] sm:$0xff] }
 0x65d   : > { %vm22847_vm4 = vmmov %vm22795_vm0 }
 0x663   : > { %15730 = vmatmul.mubr.msk.bf16.gmra.mrb[24].mxu1 %vm22819_vm6, %v20397_v18  ;;  %v22827_v18 = vld [vmem:[#allocation60_spill] sm:$0xff]  ;;  %vm22842_vm6 = vmmov %vm22795_vm0 }
 0x664   : > { %15733 = vmatprep.mubr.msk.bf16.mxu1 %vm22820_vm1, %v20408_v58  ;;  %v22829_v58 = vld [vmem:[#allocation70_spill] sm:$0xff]  ;;  %vm22844_vm1 = vmmov %vm22795_vm0 }
 0x66b   : > { %15734 = vmatmul.mubr.msk.bf16.gmra.mrb[28].mxu1 %vm22821_vm12, %v20413_v46  ;;  %v22831_v46 = vld [vmem:[#allocation69_spill] sm:$0xff]  ;;  %vm22846_vm12 = vmmov %vm22795_vm0 }
 0x66c   : > { %15737 = vmatprep.mubr.msk.bf16.mxu1 %vm22795_vm0, %v20433_v12  ;;  %v22835_v12 = vld [vmem:[#allocation72_spill] sm:$0xff] }
 0x673   : > { %15738 = vmatmul.mubr.msk.bf16.gmra.mrb[32].mxu1 %vm22823_vm13, %v10584_v21  ;;  %vm22848_vm13 = vmmov %vm22795_vm0  ;;  %v16708_v21 = vld [vmem:[%s16915_s23 + $0x50] sm:$0xff] }
 0x674   : > { %15749 = vmatprep.mubr.msk.bf16.mxu1 %vm22824_vm3, %v20418_v19  ;;  %v22837_v19 = vld [vmem:[#allocation71_spill] sm:$0xff]  ;;  %vm22849_vm3 = vmmov %vm22795_vm0 }
 0x67b   : > { %15750 = vmatmul.mubr.msk.bf16.vlgmr.msra.gmra.mrb[0].mxu1 %vm22825_vm8, %v20425_v3  ;;  %v22839_v3 = vld [vmem:[#allocation62_spill] sm:$0xff]  ;;  %vm22851_vm8 = vmmov %vm22795_vm0 }
 0x67c   : > { %15753 = vmatprep.mubr.msk.bf16.mxu1 %vm22826_vm9, %v20428_v56  ;;  %v22841_v56 = vld [vmem:[#allocation7_spill] sm:$0xff]  ;;  %vm22875_vm9 = vmmov %vm22795_vm0 }
 0x683   : > { %15754 = vmatmul.mubr.msk.bf16.gmra.mrb[4].mxu1 %vm22828_vm14, %v22827_v18  ;;  %v12273_v18 = vcombine.high %v16708_v21, %v16708_v21  ;;  %vm22876_vm14 = vmmov %vm22795_vm0 }
 0x684   : > { %15757 = vmatprep.mubr.msk.bf16.mxu1 %vm22830_vm2, %v22829_v58  ;;  %v21078_v58 = vrot.slane %v12409_v30, %v20863_v41  ;;  %vm22879_vm2 = vmmov %vm22795_vm0 }
 0x686   : > { %22860 = vst [vmem:[#allocation11_spill] sm:$0xff] %v21078_v58 }
 0x68b   : > { %15758 = vmatmul.mubr.msk.bf16.gmra.mrb[8].mxu1 %vm22832_vm7, %v22831_v46  ;;  %v20950_v46 = vrot.slane %v12222_v14, %v20863_v41  ;;  %v16713_v14 = vld [vmem:[%s16915_s23 + $0x70] sm:$0xff]  ;;  %vm22883_vm7 = vmmov %vm22795_vm0 }
 0x68c   : > { %15761 = vmatprep.mubr.msk.bf16.mxu1 %vm22834_vm10, %v22833_v15  ;;  %v16709_v15 = vld [vmem:[%s16915_s23 + $0x60] sm:$0xff]  ;;  %v12341_v51 = vcombine.high %v16713_v14, %v16713_v14  ;;  %vm22885_vm10 = vmmov %vm22795_vm0 }
 0x68d   : > { %v20999_v33 = vrot.slane %v16709_v15, %v20863_v41 }
 0x693   : > { %15762 = vmatmul.mubr.msk.bf16.gmra.mrb[12].mxu1 %vm22836_vm11, %v22835_v12  ;;  %v12307_v12 = vcombine.high %v16709_v15, %v16709_v15  ;;  %v16714_v15 = vld [vmem:[%s16915_s23 + $0x88] sm:$0xff]  ;;  %vm22891_vm11 = vmmov %vm22795_vm0 }
 0x694   : > { %15765 = vmatprep.mubr.msk.bf16.mxu1 %vm22838_vm15, %v22837_v19  ;;  %v16710_v19 = vld [vmem:[%s16915_s23 + $0x68] sm:$0xff]  ;;  %vm22893_vm15 = vmmov %vm22795_vm0 }
 0x69b   : > { %15766 = vmatmul.mubr.msk.bf16.gmra.mrb[16].mxu1 %vm22840_vm5, %v22839_v3  ;;  %v12324_v3 = vcombine.high %v16710_v19, %v16710_v19  ;;  %vm22895_vm5 = vmmov %vm22795_vm0 }
 0x69c   : > { %15769 = vmatprep.mubr.msk.bf16.mxu1 %vm22842_vm6, %v22841_v56  ;;  %v12460_v56 = vcombine.high %v16720_v42, %v16720_v42  ;;  %vm22896_vm6 = vmmov %vm22795_vm0 }
 0x69d   : > { %v20991_v57 = vrot.slane %v12324_v3, %v20863_v41 }
 0x69e   : > { %v21108_v22 = vrot.slane %v12460_v56, %v20863_v41 }
 0x6a0   : > { %22865 = vst [vmem:[#allocation23_spill] sm:$0xff] %v21108_v22 }
 0x6a3   : > { %15770 = vmatmul.mubr.msk.bf16.gmra.mrb[20].mxu1 %vm22844_vm1, %v22843_v29  ;;  %v16719_v29 = vld [vmem:[%s16915_s23 + $0xb8] sm:$0xff]  ;;  %vm22903_vm1 = vmmov %vm22795_vm0 }
 0x6a4   : > { %15773 = vmatprep.mubr.msk.bf16.mxu1 %vm22846_vm12, %v22845_v31  ;;  %v20959_v31 = vrot.slane %v16708_v21, %v20863_v41  ;;  %vm22905_vm12 = vmmov %vm22795_vm0 }
 0x6ab   : > { %15774 = vmatmul.mubr.msk.bf16.gmra.mrb[24].mxu1 %vm22795_vm0, %v20490_v40  ;;  %v16698_v40 = vld [vmem:[%s16915_s23 + $0x10] sm:$0xff] }
 0x6ac   : > { %15777 = vmatprep.mubr.msk.bf16.mxu1 %vm22847_vm4, %v20493_v50  ;;  %v12137_v38 = vcombine.high %v16698_v40, %v16698_v40  ;;  %v12103_v50 = vcombine.high %v16699_v62, %v16699_v62  ;;  %v20870_v48 = vrot.slane %v16698_v40, %v20863_v41  ;;  %v20970_v40 = vrot.slane %v12239_v47, %v20863_v41  ;;  %vm22911_vm4 = vmmov %vm22795_vm0 }
 0x6ad   : > { %v21030_v47 = vrot.slane %v12375_v11, %v20863_v41  ;;  %v21046_v11 = vrot.slane %v16714_v15, %v20863_v41 }
 0x6ae   : > { %v20876_v28 = vrot.slane %v12137_v38, %v20863_v41  ;;  %v20879_v35 = vrot.slane %v12103_v50, %v20863_v41  ;;  %v20977_v50 = vrot.slane %v12273_v18, %v20863_v41  ;;  %v21015_v18 = vrot.slane %v16713_v14, %v20863_v41 }
 0x6af   : > { %22853 = vst [vmem:[#allocation12_spill] sm:$0xff] %v21046_v11  ;;  %v12494_v38 = vcombine.high %v16719_v29, %v16719_v29 }
 0x6b3   : > { %15778 = vmatmul.mubr.msk.bf16.gmra.mrb[28].mxu1 %vm22848_vm13, %v20497_v2  ;;  %v12154_v2 = vcombine.high %v16700_v61, %v16700_v61  ;;  %v20980_v61 = vrot.slane %v16710_v19, %v20863_v41  ;;  %v12426_v19 = vcombine.high %v16716_v8, %v16716_v8  ;;  %vm22913_vm13 = vmmov %vm22795_vm0 }
 0x6b4   : > { %15781 = vmatprep.mubr.msk.bf16.mxu1 %vm22849_vm3, %v20500_v6  ;;  %v12120_v6 = vcombine.high %v16701_v16, %v16701_v16  ;;  %v20985_v16 = vrot.slane %v12307_v12, %v20863_v41  ;;  %v12392_v12 = vcombine.high %v16714_v15, %v16714_v15  ;;  %v21065_v15 = vrot.slane %v16717_v44, %v20863_v41  ;;  %vm22916_vm3 = vmmov %vm22795_vm0 }
 0x6b5   : > { %v20889_v0 = vrot.slane %v12154_v2, %v20863_v41  ;;  %v16718_v2 = vld [vmem:[%s16915_s23 + $0xa0] sm:$0xff]  ;;  %v21062_v14 = vrot.slane %v12426_v19, %v20863_v41  ;;  %v21084_v44 = vrot.slane %v16716_v8, %v20863_v41 }
 0x6b6   : > { %v20892_v32 = vrot.slane %v12120_v6, %v20863_v41  ;;  %v12443_v21 = vcombine.high %v16718_v2, %v16718_v2  ;;  %v21049_v62 = vrot.slane %v12392_v12, %v20863_v41  ;;  %22858 = vst [vmem:[#allocation16_spill] sm:$0xff] %v21065_v15  ;;  %v21068_v12 = vrot.slane %v16720_v42, %v20863_v41 }
 0x6b7   : > { %22857 = vst [vmem:[#allocation14_spill] sm:$0xff] %v21062_v14  ;;  %22862 = vst [vmem:[#allocation17_spill] sm:$0xff] %v21084_v44 }
 0x6b8   : > { %22854 = vst [vmem:[#allocation21_spill] sm:$0xff] %v21049_v62  ;;  %22859 = vst [vmem:[#allocation15_spill] sm:$0xff] %v21068_v12  ;;  %v21081_v19 = vrot.slane %v12443_v21, %v20863_v41  ;;  %v21098_v21 = vld [vmem:[%s21866_s6] ss:$0 sm:$0xff]  ;;  %v22868_v12 = vcombine.high %v20870_v48, %v20870_v48 }
 0x6ba   : > { %22861 = vst [vmem:[#allocation18_spill] sm:$0xff] %v21081_v19 }
 0x6bb   : > { %15782 = vmatmul.mubr.msk.bf16.gmra.mrb[32].mxu1 %vm22851_vm8, %v22850_v59  ;;  %v16711_v59 = vld [vmem:[%s16915_s23 + $0x58] sm:$0xff]  ;;  %vm22919_vm8 = vmmov %vm22795_vm0 }
 0x6bc   : > { %v12290_v45 = vcombine.high %v16711_v59, %v16711_v59  ;;  %v20988_v6 = vrot.slane %v16711_v59, %v20863_v41  ;;  %v21036_v59 = vrot.slane %v12341_v51, %v20863_v41  ;;  %v21055_v51 = vrot.slane %v16718_v2, %v20863_v41  ;;  %v21073_v2 = vld [vmem:[%s21865_s5] ss:$0 sm:$0xff] }
 0x6be   : > { %v20996_v5 = vrot.slane %v12290_v45, %v20863_v41  ;;  %v16715_v45 = vld [vmem:[%s16915_s23 + $0x78] sm:$0xff]  ;;  %22856 = vst [vmem:[#allocation20_spill] sm:$0xff] %v21055_v51 }
 0x6bf   : > { %v12358_v1 = vcombine.high %v16715_v45, %v16715_v45  ;;  %v21043_v23 = vrot.slane %v16715_v45, %v20863_v41  ;;  %v21105_v45 = vrot.slane %v12494_v38, %v20863_v41 }
 0x6c1   : > { %v21052_v3 = vrot.slane %v12358_v1, %v20863_v41  ;;  %v21093_v1 = vrot.slane %v16719_v29, %v20863_v41  ;;  %22864 = vst [vmem:[#allocation19_spill] sm:$0xff] %v21105_v45 }
 0x6c3   : > { %22855 = vst [vmem:[#allocation13_spill] sm:$0xff] %v21052_v3  ;;  %22863 = vst [vmem:[#allocation10_spill] sm:$0xff] %v21093_v1 }
 0x74e   : > { %v15751_v30 = vpop.f32.mrb[0].mxu1 }
 0x74f   : > { %v11226_v29 = vmul.f32 %v15751_v30, %v21073_v2  ;;  %v11038_v52 = vpop.f32.mrb[1].mxu1  ;;  %v21148_v30 = vrot.slane %v21140_v20, %v20863_v41 }
 0x750   : > { %v11224_v42 = vmul.f32 %v21073_v2, %v11038_v52  ;;  %v15752_v38 = vpop.f32.mrb[2].mxu1  ;;  %v21129_v52 = vld.sshfl [vmem:[%s16915_s23 + $0xb0] sm:$0xff pattern:$0x76325410] }
 0x751   : > { %v11269_v26 = vadd.f32 %v21098_v21, %v11226_v29  ;;  %v11227_v60 = vmul.f32 %v15752_v38, %v21073_v2  ;;  %v11041_v34 = vpop.f32.mrb[3].mxu1  ;;  %22866 = vst [vmem:[#allocation27_spill] sm:$0xff] %v21129_v52  ;;  %22867 = vst [vmem:[#allocation26_spill] sm:$0xff] %v21148_v30 }
 0x752   : > { %v11267_v25 = vadd.f32 %v21098_v21, %v11224_v42  ;;  %v11225_v56 = vmul.f32 %v21073_v2, %v11041_v34 }
 0x753   : > { %v11373_v37 = vcombine.high %v11269_v26, %v11269_v26  ;;  %v11380_v29 = vrot.slane %v11269_v26, %v20863_v41  ;;  %v11270_v38 = vadd.f32 %v21098_v21, %v11227_v60 }
 0x754   : > { %v11339_v43 = vcombine.high %v11267_v25, %v11267_v25  ;;  %v11346_v42 = vrot.slane %v11267_v25, %v20863_v41  ;;  %v11268_v34 = vadd.f32 %v21098_v21, %v11225_v56 }
 0x755   : > { %v11387_v24 = vrot.slane %v11373_v37, %v20863_v41  ;;  %v11388_v52 = vcombine.high %v11380_v29, %v11380_v29  ;;  %v11390_v26 = vcombine.high %v11270_v38, %v11270_v38  ;;  %v11397_v60 = vrot.slane %v11270_v38, %v20863_v41 }
 0x756   : > { %v11353_v22 = vrot.slane %v11339_v43, %v20863_v41  ;;  %v11354_v45 = vcombine.high %v11346_v42, %v11346_v42  ;;  %v12775_v8 = vadd.f32 %v20873_v13, %v11346_v42  ;;  %v11356_v1 = vcombine.high %v11268_v34, %v11268_v34  ;;  %v15755_v44 = vpop.f32.mrb[4].mxu1 }
 0x757   : > { %v11389_v25 = vcombine.high %v11387_v24, %v11387_v24  ;;  %v12783_v56 = vadd.f32 %v20870_v48, %v11388_v52  ;;  %v12784_v30 = vadd.f32 %v22868_v12, %v11387_v24  ;;  %v11404_v37 = vrot.slane %v11390_v26, %v20863_v41  ;;  %v11054_v29 = vpop.f32.mrb[5].mxu1 }
 0x758   : > { %v11355_v19 = vcombine.high %v11353_v22, %v11353_v22  ;;  %v22869_v43 = vcombine.high %v20873_v13, %v20873_v13  ;;  %v12777_v42 = vadd.f32 %v20879_v35, %v11353_v22  ;;  %v12903_v58 = vmax.f32 %v12775_v8, 0.0  ;;  %v15756_v15 = vpop.f32.mrb[6].mxu1 }
 0x759   : > { %v12785_v51 = vadd.f32 %v20876_v28, %v11389_v25  ;;  %v12911_v52 = vmax.f32 %v12783_v56, 0.0  ;;  %v12912_v14 = vmax.f32 %v12784_v30, 0.0  ;;  %v11405_v3 = vcombine.high %v11397_v60, %v11397_v60  ;;  %v21164_v48 = vpop.f32.mrb[7].mxu1 }
 0x75a   : > { %v12776_v38 = vadd.f32 %v22869_v43, %v11354_v45  ;;  %v22870_v24 = vcombine.high %v20879_v35, %v20879_v35  ;;  %v12905_v62 = vmax.f32 %v12777_v42, 0.0  ;;  %v11406_v13 = vcombine.high %v11404_v37, %v11404_v37 }
 0x75b   : > { %v13193_v45 = vcombine.low %v12911_v52, %v12912_v14  ;;  %v22871_v22 = vcombine.high %v20876_v28, %v20876_v28  ;;  %v12787_v25 = vadd.f32 %v20883_v39, %v11405_v3  ;;  %v22872_v30 = vcombine.high %v20883_v39, %v20883_v39 }
 0x75c   : > { %v12778_v12 = vadd.f32 %v22870_v24, %v11355_v19  ;;  %v12904_v26 = vmax.f32 %v12776_v38, 0.0  ;;  %v21178_v35 = vadd.f32 %v20889_v0, %v11406_v13  ;;  %v12913_v19 = vmax.f32 %v12785_v51, 0.0 }
 0x75d   : > { %v12786_v8 = vadd.f32 %v22871_v22, %v11397_v60  ;;  %v12788_v56 = vadd.f32 %v22872_v30, %v11404_v37  ;;  %v13201_v38 = vrot.slane %v13193_v45, %v20863_v41  ;;  %v12915_v42 = vmax.f32 %v12787_v25, 0.0 }
 0x75e   : > { %v12906_v43 = vmax.f32 %v12778_v12, 0.0  ;;  %v13159_v11 = vcombine.low %v12903_v58, %v12904_v26  ;;  %v11363_v60 = vrot.slane %v11268_v34, %v20863_v41  ;;  %v11370_v39 = vrot.slane %v11356_v1, %v20863_v41  ;;  %v21186_v37 = vpop.f32.mrb[8].mxu1 }
 0x75f   : > { %v12914_v14 = vmax.f32 %v12786_v8, 0.0  ;;  %v12916_v52 = vmax.f32 %v12788_v56, 0.0  ;;  %v11230_v51 = vmul.f32 %v15755_v44, %v21073_v2  ;;  %v11228_v12 = vmul.f32 %v21073_v2, %v11054_v29  ;;  %v21192_v26 = vpop.f32.mrb[9].mxu1 }
 0x760   : > { %v13160_v28 = vcombine.low %v12905_v62, %v12906_v43  ;;  %v13167_v3 = vrot.slane %v13159_v11, %v20863_v41  ;;  %v11371_v62 = vcombine.high %v11363_v60, %v11363_v60  ;;  %v11372_v45 = vcombine.high %v11370_v39, %v11370_v39  ;;  %v21196_v34 = vpop.f32.mrb[10].mxu1 }
 0x761   : > { %v13194_v58 = vcombine.low %v12913_v19, %v12914_v14  ;;  %v21188_v24 = vcombine.low %v12915_v42, %v12916_v52  ;;  %v12779_v11 = vadd.f32 %v20886_v54, %v11363_v60  ;;  %v12781_v8 = vadd.f32 %v20892_v32, %v11370_v39  ;;  %v21203_v29 = vpop.f32.mrb[11].mxu1 }
 0x762   : > { %v13174_v13 = vrot.slane %v13160_v28, %v20863_v41  ;;  %v11273_v44 = vadd.f32 %v21098_v21, %v11230_v51  ;;  %v22873_v30 = vcombine.high %v20886_v54, %v20886_v54  ;;  %v22874_v43 = vcombine.high %v20892_v32, %v20892_v32 }
 0x763   : > { %v13208_v1 = vrot.slane %v13194_v58, %v20863_v41  ;;  %v13218_v22 = vrot.slane %v21188_v24, %v20863_v41  ;;  %v12907_v14 = vmax.f32 %v12779_v11, 0.0  ;;  %v12909_v52 = vmax.f32 %v12781_v8, 0.0 }
 0x764   : > { %v13175_v25 = vcombine.low %v13167_v3, %v13174_v13  ;;  %v12780_v56 = vadd.f32 %v22873_v30, %v11371_v62  ;;  %v12782_v19 = vadd.f32 %v22874_v43, %v11372_v45  ;;  %v11440_v28 = vcombine.high %v11273_v44, %v11273_v44 }
 0x765   : > { %v13209_v42 = vcombine.low %v13201_v38, %v13208_v1  ;;  %v11447_v60 = vrot.slane %v11273_v44, %v20863_v41  ;;  %v11271_v54 = vadd.f32 %v21098_v21, %v11228_v12  ;;  %v12917_v58 = vmax.f32 %v21178_v35, 0.0 }
 0x766   : > { %13735 = vst.msk [vmem:[%s21212_s29] sm:$0xff] %vm22875_vm9, %v13175_v25  ;;  %v12908_v3 = vmax.f32 %v12780_v56, 0.0  ;;  %v12910_v39 = vmax.f32 %v12782_v19, 0.0  ;;  %v11454_v32 = vrot.slane %v11440_v28, %v20863_v41  ;;  %v11231_v13 = vmul.f32 %v15756_v15, %v21073_v2  ;;  %v21224_v8 = vpop.f32.mrb[12].mxu1  ;;  %vm22927_vm9 = vmmov %vm22795_vm0 }
 0x767   : > { %13737 = vst.msk [vmem:[%s21212_s29 + $0x10] sm:$0xff] %vm22876_vm14, %v13209_v42  ;;  %v11455_v38 = vcombine.high %v11447_v60, %v11447_v60  ;;  %v12797_v51 = vadd.f32 %v20908_v4, %v11447_v60  ;;  %v11407_v11 = vcombine.high %v11271_v54, %v11271_v54  ;;  %v11414_v1 = vrot.slane %v11271_v54, %v20863_v41  ;;  %v21230_v56 = vpop.f32.mrb[13].mxu1  ;;  %vm22934_vm14 = vmmov %vm22795_vm0 }
 0x768   : > { %v13176_v62 = vcombine.low %v12907_v14, %v12908_v3  ;;  %v13177_v45 = vcombine.low %v12909_v52, %v12910_v39  ;;  %v11456_v44 = vcombine.high %v11454_v32, %v11454_v32  ;;  %v22877_v35 = vcombine.high %v20908_v4, %v20908_v4  ;;  %v21238_v52 = vpop.f32.mrb[14].mxu1 }
 0x769   : > { %v12925_v25 = vmax.f32 %v12797_v51, 0.0  ;;  %v11274_v30 = vadd.f32 %v21098_v21, %v11231_v13  ;;  %v11421_v19 = vrot.slane %v11407_v11, %v20863_v41  ;;  %v22878_v14 = vcombine.high %v20889_v0, %v20889_v0  ;;  %v21242_v39 = vpop.f32.mrb[15].mxu1 }
 0x76a   : > { %v12798_v12 = vadd.f32 %v22877_v35, %v11455_v38  ;;  %v13184_v43 = vrot.slane %v13176_v62, %v20863_v41  ;;  %v13191_v15 = vrot.slane %v13177_v45, %v20863_v41  ;;  %v12799_v4 = vadd.f32 %v20916_v53, %v11456_v44 }
 0x76b   : > { %v12790_v42 = vadd.f32 %v22878_v14, %v11414_v1  ;;  %v11457_v60 = vcombine.high %v11274_v30, %v11274_v30  ;;  %v11464_v3 = vrot.slane %v11274_v30, %v20863_v41  ;;  %v11422_v32 = vcombine.high %v11421_v19, %v11421_v19 }
 0x76c   : > { %v12926_v28 = vmax.f32 %v12798_v12, 0.0  ;;  %v13192_v54 = vcombine.low %v13184_v43, %v13191_v15  ;;  %v12791_v38 = vadd.f32 %v20901_v9, %v11421_v19  ;;  %v12927_v13 = vmax.f32 %v12799_v4, 0.0 }
 0x76d   : > { %v12918_v51 = vmax.f32 %v12790_v42, 0.0  ;;  %v11471_v0 = vrot.slane %v11457_v60, %v20863_v41  ;;  %v11472_v45 = vcombine.high %v11464_v3, %v11464_v3  ;;  %v22880_v11 = vcombine.high %v20901_v9, %v20901_v9 }
 0x76e   : > { %v21245_v62 = vcombine.low %v12925_v25, %v12926_v28  ;;  %13736 = vst.msk [vmem:[%s21212_s29 + $0x8] sm:$0xff] %vm22879_vm2, %v13192_v54  ;;  %v12919_v44 = vmax.f32 %v12791_v38, 0.0  ;;  %v22881_v12 = vcombine.high %v20916_v53, %v20916_v53  ;;  %v22882_v19 = vcombine.high %v20924_v27, %v20924_v27  ;;  %v21265_v28 = vpop.f32.mrb[16].mxu1  ;;  %vm22940_vm2 = vmmov %vm22795_vm0 }
 0x76f   : > { %v12792_v1 = vadd.f32 %v22880_v11, %v11422_v32  ;;  %v13211_v35 = vcombine.low %v12917_v58, %v12918_v51  ;;  %v11473_v25 = vcombine.high %v11471_v0, %v11471_v0  ;;  %v12801_v15 = vadd.f32 %v20924_v27, %v11472_v45  ;;  %v21272_v27 = vpop.f32.mrb[17].mxu1 }
 0x770   : > { %v12800_v30 = vadd.f32 %v22881_v12, %v11464_v3  ;;  %v13259_v43 = vrot.slane %v21245_v62, %v20863_v41  ;;  %v12802_v14 = vadd.f32 %v22882_v19, %v11471_v0  ;;  %v11229_v58 = vmul.f32 %v21073_v2, %v21164_v48  ;;  %v21280_v0 = vpop.f32.mrb[18].mxu1 }
 0x771   : > { %v12920_v42 = vmax.f32 %v12792_v1, 0.0  ;;  %v13225_v9 = vrot.slane %v13211_v35, %v20863_v41  ;;  %v21268_v53 = vadd.f32 %v20932_v7, %v11473_v25  ;;  %v12929_v60 = vmax.f32 %v12801_v15, 0.0  ;;  %v21286_v35 = vpop.f32.mrb[19].mxu1 }
 0x772   : > { %v12928_v4 = vmax.f32 %v12800_v30, 0.0  ;;  %v12930_v3 = vmax.f32 %v12802_v14, 0.0  ;;  %v11234_v54 = vmul.f32 %v21186_v37, %v21073_v2  ;;  %v11272_v51 = vadd.f32 %v21098_v21, %v11229_v58 }
 0x773   : > { %v13226_v32 = vcombine.low %v13218_v22, %v13225_v9  ;;  %v21277_v38 = vcombine.low %v12919_v44, %v12920_v42  ;;  %v11232_v1 = vmul.f32 %v21073_v2, %v21192_v26  ;;  %v12931_v37 = vmax.f32 %v21268_v53, 0.0 }
 0x774   : > { %v13261_v48 = vcombine.low %v12927_v13, %v12928_v4  ;;  %v13262_v45 = vcombine.low %v12929_v60, %v12930_v3  ;;  %v11277_v11 = vadd.f32 %v21098_v21, %v11234_v54  ;;  %v11423_v13 = vcombine.high %v11272_v51, %v11272_v51 }
 0x775   : > { %v13235_v24 = vrot.slane %v21277_v38, %v20863_v41  ;;  %13738 = vst.msk [vmem:[%s21212_s29 + $0x18] sm:$0xff] %vm22883_vm7, %v13226_v32  ;;  %v11430_v44 = vrot.slane %v11272_v51, %v20863_v41  ;;  %v11275_v25 = vadd.f32 %v21098_v21, %v11232_v1  ;;  %v11235_v42 = vmul.f32 %v21196_v34, %v21073_v2  ;;  %vm22945_vm7 = vmmov %vm22795_vm0 }
 0x776   : > { %v13269_v22 = vrot.slane %v13261_v48, %v20863_v41  ;;  %v13276_v12 = vrot.slane %v13262_v45, %v20863_v41  ;;  %v11507_v30 = vcombine.high %v11277_v11, %v11277_v11  ;;  %v11514_v26 = vrot.slane %v11277_v11, %v20863_v41  ;;  %v21307_v51 = vpop.f32.mrb[20].mxu1 }
 0x777   : > { %v11437_v15 = vrot.slane %v11423_v13, %v20863_v41  ;;  %v11438_v19 = vcombine.high %v11430_v44, %v11430_v44  ;;  %v12793_v14 = vadd.f32 %v20935_v49, %v11430_v44  ;;  %v22884_v54 = vcombine.high %v20935_v49, %v20935_v49  ;;  %v21315_v13 = vpop.f32.mrb[21].mxu1 }
 0x778   : > { %v13277_v9 = vcombine.low %v13269_v22, %v13276_v12  ;;  %v11521_v4 = vrot.slane %v11507_v30, %v20863_v41  ;;  %v11522_v58 = vcombine.high %v11514_v26, %v11514_v26  ;;  %v12811_v60 = vadd.f32 %v20941_v10, %v11514_v26 }
 0x779   : > { %v11439_v3 = vcombine.high %v11437_v15, %v11437_v15  ;;  %v12794_v32 = vadd.f32 %v22884_v54, %v11438_v19  ;;  %v12795_v38 = vadd.f32 %v20927_v17, %v11437_v15  ;;  %v12921_v48 = vmax.f32 %v12793_v14, 0.0  ;;  %v21320_v15 = vpop.f32.mrb[22].mxu1 }
 0x77a   : > { %13741 = vst.msk [vmem:[%s21212_s29 + $0x30] sm:$0xff] %vm22885_vm10, %v13277_v9  ;;  %v11523_v45 = vcombine.high %v11521_v4, %v11521_v4  ;;  %v22886_v34 = vcombine.high %v20941_v10, %v20941_v10  ;;  %v12813_v1 = vadd.f32 %v20944_v55, %v11521_v4  ;;  %v12939_v22 = vmax.f32 %v12811_v60, 0.0  ;;  %vm22948_vm10 = vmmov %vm22795_vm0 }
 0x77b   : > { %v22887_v49 = vcombine.high %v20927_v17, %v20927_v17  ;;  %v12922_v12 = vmax.f32 %v12794_v32, 0.0  ;;  %v12923_v30 = vmax.f32 %v12795_v38, 0.0  ;;  %v11474_v26 = vcombine.high %v11275_v25, %v11275_v25 }
 0x77c   : > { %v12812_v11 = vadd.f32 %v22886_v34, %v11522_v58  ;;  %v22888_v19 = vcombine.high %v20944_v55, %v20944_v55  ;;  %v12941_v9 = vmax.f32 %v12813_v1, 0.0  ;;  %v11481_v4 = vrot.slane %v11275_v25, %v20863_v41  ;;  %v21326_v58 = vpop.f32.mrb[23].mxu1 }
 0x77d   : > { %v12796_v44 = vadd.f32 %v22887_v49, %v11439_v3  ;;  %v13228_v54 = vcombine.low %v12921_v48, %v12922_v12  ;;  %v11488_v17 = vrot.slane %v11474_v26, %v20863_v41  ;;  %v11278_v3 = vadd.f32 %v21098_v21, %v11235_v42 }
 0x77e   : > { %v12814_v14 = vadd.f32 %v22888_v19, %v11523_v45  ;;  %v12940_v10 = vmax.f32 %v12812_v11, 0.0  ;;  %v11489_v34 = vcombine.high %v11481_v4, %v11481_v4  ;;  %v22889_v49 = vcombine.high %v20932_v7, %v20932_v7 }
 0x77f   : > { %v12924_v60 = vmax.f32 %v12796_v44, 0.0  ;;  %v13242_v45 = vrot.slane %v13228_v54, %v20863_v41  ;;  %v22890_v25 = vcombine.high %v20950_v46, %v20950_v46  ;;  %v11524_v44 = vcombine.high %v11278_v3, %v11278_v3 }
 0x780   : > { %v12942_v32 = vmax.f32 %v12814_v14, 0.0  ;;  %v13312_v38 = vcombine.low %v12939_v22, %v12940_v10  ;;  %v12804_v55 = vadd.f32 %v22889_v49, %v11481_v4  ;;  %v12805_v42 = vadd.f32 %v20950_v46, %v11489_v34  ;;  %v21341_v10 = vpop.f32.mrb[24].mxu1 }
 0x781   : > { %v13244_v11 = vcombine.low %v12923_v30, %v12924_v60  ;;  %v12806_v1 = vadd.f32 %v22890_v25, %v11488_v17  ;;  %v13243_v26 = vcombine.low %v13235_v24, %v13242_v45  ;;  %v11531_v14 = vrot.slane %v11278_v3, %v20863_v41  ;;  %v21347_v54 = vpop.f32.mrb[25].mxu1 }
 0x782   : > { %v13313_v48 = vcombine.low %v12941_v9, %v12942_v32  ;;  %v13320_v12 = vrot.slane %v13312_v38, %v20863_v41  ;;  %v12932_v22 = vmax.f32 %v12804_v55, 0.0  ;;  %v12933_v4 = vmax.f32 %v12805_v42, 0.0  ;;  %v21358_v53 = vpop.f32.mrb[26].mxu1 }
 0x783   : > { %v13252_v19 = vrot.slane %v13244_v11, %v20863_v41  ;;  %v12934_v7 = vmax.f32 %v12806_v1, 0.0  ;;  %v11538_v60 = vrot.slane %v11524_v44, %v20863_v41  ;;  %13739 = vst.msk [vmem:[%s21212_s29 + $0x20] sm:$0xff] %vm22891_vm11, %v13243_v26  ;;  %v11539_v24 = vcombine.high %v11531_v14, %v11531_v14  ;;  %v21366_v34 = vpop.f32.mrb[27].mxu1  ;;  %vm22950_vm11 = vmmov %vm22795_vm0 }
 0x784   : > { %v13327_v30 = vrot.slane %v13313_v48, %v20863_v41  ;;  %v13278_v9 = vcombine.low %v12931_v37, %v12932_v22  ;;  %v11233_v17 = vmul.f32 %v21073_v2, %v21203_v29  ;;  %v11238_v3 = vmul.f32 %v21224_v8, %v21073_v2 }
 0x785   : > { %v13260_v46 = vcombine.low %v13252_v19, %v13259_v43  ;;  %v13279_v32 = vcombine.low %v12933_v4, %v12934_v7  ;;  %v11540_v38 = vcombine.high %v11538_v60, %v11538_v60  ;;  %v22892_v62 = vcombine.high %v21140_v20, %v21140_v20 }
 0x786   : > { %v13328_v37 = vcombine.low %v13320_v12, %v13327_v30  ;;  %v12815_v29 = vadd.f32 %v20959_v31, %v11539_v24  ;;  %v22894_v8 = vcombine.high %v20959_v31, %v20959_v31  ;;  %v11276_v55 = vadd.f32 %v21098_v21, %v11233_v17 }
 0x787   : > { %v21364_v43 = vrot.slane %v22892_v62, %v20863_v41  ;;  %13740 = vst.msk [vmem:[%s21212_s29 + $0x28] sm:$0xff] %vm22893_vm15, %v13260_v46  ;;  %v11281_v45 = vadd.f32 %v21098_v21, %v11238_v3  ;;  %v13286_v20 = vrot.slane %v13278_v9, %v20863_v41  ;;  %v13293_v11 = vrot.slane %v13279_v32, %v20863_v41  ;;  %v21392_v9 = vpop.f32.mrb[28].mxu1  ;;  %vm22951_vm15 = vmmov %vm22795_vm0 }
 0x788   : > { %v12816_v49 = vadd.f32 %v22894_v8, %v11538_v60  ;;  %13744 = vst.msk [vmem:[%s21212_s29 + $0x48] sm:$0xff] %vm22895_vm5, %v13328_v37  ;;  %v21381_v25 = vadd.f32 %v20977_v50, %v11540_v38  ;;  %v11236_v1 = vmul.f32 %v21073_v2, %v21230_v56  ;;  %v12943_v44 = vmax.f32 %v12815_v29, 0.0  ;;  %v21400_v17 = vpop.f32.mrb[29].mxu1  ;;  %vm22952_vm5 = vmmov %vm22795_vm0 }
 0x789   : > { %v11490_v48 = vcombine.high %v11276_v55, %v11276_v55  ;;  %v11497_v12 = vrot.slane %v11276_v55, %v20863_v41  ;;  %v13294_v42 = vcombine.low %v13286_v20, %v13293_v11  ;;  %v11574_v22 = vcombine.high %v11281_v45, %v11281_v45  ;;  %v21406_v29 = vpop.f32.mrb[30].mxu1 }
 0x78a   : > { %v12944_v31 = vmax.f32 %v12816_v49, 0.0  ;;  %v11581_v26 = vrot.slane %v11281_v45, %v20863_v41  ;;  %v11279_v19 = vadd.f32 %v21098_v21, %v11236_v1  ;;  %v11239_v24 = vmul.f32 %v21238_v52, %v21073_v2  ;;  %v21414_v20 = vpop.f32.mrb[31].mxu1 }
 0x78b   : > { %v11504_v14 = vrot.slane %v11490_v48, %v20863_v41  ;;  %v11505_v30 = vcombine.high %v11497_v12, %v11497_v12  ;;  %v12807_v4 = vadd.f32 %v20967_v63, %v11497_v12  ;;  %13742 = vst.msk [vmem:[%s21212_s29 + $0x38] sm:$0xff] %vm22896_vm6, %v13294_v42  ;;  %v11588_v56 = vrot.slane %v11574_v22, %v20863_v41  ;;  %vm22953_vm6 = vmmov %vm22795_vm0 }
 0x78c   : > { %v21388_v7 = vcombine.low %v12943_v44, %v12944_v31  ;;  %v11589_v60 = vcombine.high %v11581_v26, %v11581_v26  ;;  %v12825_v46 = vadd.f32 %v20985_v16, %v11581_v26  ;;  %v22897_v37 = vcombine.high %v20967_v63, %v20967_v63 }
 0x78d   : > { %v11506_v3 = vcombine.high %v11504_v14, %v11504_v14  ;;  %v12809_v38 = vadd.f32 %v20970_v40, %v11504_v14  ;;  %v11541_v62 = vcombine.high %v11279_v19, %v11279_v19  ;;  %v11590_v49 = vcombine.high %v11588_v56, %v11588_v56 }
 0x78e   : > { %v12808_v32 = vadd.f32 %v22897_v37, %v11505_v30  ;;  %v13337_v8 = vrot.slane %v21388_v7, %v20863_v41  ;;  %v22898_v55 = vcombine.high %v20985_v16, %v20985_v16  ;;  %v12827_v45 = vadd.f32 %v20980_v61, %v11588_v56 }
 0x78f   : > { %v22899_v63 = vcombine.high %v20970_v40, %v20970_v40  ;;  %v12935_v1 = vmax.f32 %v12807_v4, 0.0  ;;  %v12937_v31 = vmax.f32 %v12809_v38, 0.0  ;;  %v22900_v48 = vcombine.high %v20980_v61, %v20980_v61  ;;  %v21433_v38 = vpop.f32.mrb[32].mxu1 }
 0x790   : > { %v12826_v52 = vadd.f32 %v22898_v55, %v11589_v60  ;;  %v12936_v44 = vmax.f32 %v12808_v32, 0.0  ;;  %v12953_v42 = vmax.f32 %v12825_v46, 0.0  ;;  %v11548_v16 = vrot.slane %v11279_v19, %v20863_v41 }
 0x791   : > { %v12810_v11 = vadd.f32 %v22899_v63, %v11506_v3  ;;  %v12828_v12 = vadd.f32 %v22900_v48, %v11590_v49  ;;  %v12955_v14 = vmax.f32 %v12827_v45, 0.0  ;;  %v11555_v30 = vrot.slane %v11541_v62, %v20863_v41  ;;  %v21439_v45 = vpop.f32.mrb[33].mxu1 }
 0x792   : > { %v12954_v22 = vmax.f32 %v12826_v52, 0.0  ;;  %v13295_v7 = vcombine.low %v12935_v1, %v12936_v44  ;;  %v11556_v40 = vcombine.high %v11548_v16, %v11548_v16  ;;  %v22901_v4 = vcombine.high %v20977_v50, %v20977_v50  ;;  %v21445_v1 = vpop.f32.mrb[34].mxu1 }
 0x793   : > { %v12938_v26 = vmax.f32 %v12810_v11, 0.0  ;;  %v12956_v56 = vmax.f32 %v12828_v12, 0.0  ;;  %v11557_v61 = vcombine.high %v11555_v30, %v11555_v30  ;;  %v22902_v46 = vcombine.high %v20988_v6, %v20988_v6  ;;  %v21450_v12 = vpop.f32.mrb[35].mxu1 }
 0x794   : > { %v21424_v60 = vcombine.low %v12953_v42, %v12954_v22  ;;  %v12818_v3 = vadd.f32 %v22901_v4, %v11548_v16  ;;  %v12945_v19 = vmax.f32 %v21381_v25, 0.0  ;;  %v13303_v62 = vrot.slane %v13295_v7, %v20863_v41 }
 0x795   : > { %v13296_v37 = vcombine.low %v12937_v31, %v12938_v26  ;;  %v12820_v32 = vadd.f32 %v22902_v46, %v11555_v30  ;;  %v21436_v49 = vcombine.low %v12955_v14, %v12956_v56  ;;  %v12819_v55 = vadd.f32 %v20988_v6, %v11556_v40 }
 0x796   : > { %v12946_v52 = vmax.f32 %v12818_v3, 0.0  ;;  %v13378_v63 = vrot.slane %v21424_v60, %v20863_v41  ;;  %v11282_v25 = vadd.f32 %v21098_v21, %v11239_v24  ;;  %v12821_v44 = vadd.f32 %v20996_v5, %v11557_v61 }
 0x797   : > { %v13310_v50 = vrot.slane %v13296_v37, %v20863_v41  ;;  %v12948_v11 = vmax.f32 %v12820_v32, 0.0  ;;  %v12947_v31 = vmax.f32 %v12819_v55, 0.0  ;;  %v11237_v6 = vmul.f32 %v21073_v2, %v21242_v39 }
 0x798   : > { %v13330_v48 = vcombine.low %v12945_v19, %v12946_v52  ;;  %v13388_v22 = vrot.slane %v21436_v49, %v20863_v41  ;;  %v11591_v16 = vcombine.high %v11282_v25, %v11282_v25  ;;  %v11598_v26 = vrot.slane %v11282_v25, %v20863_v41 }
 0x799   : > { %v13311_v42 = vcombine.low %v13303_v62, %v13310_v50  ;;  %v13346_v7 = vcombine.low %v12947_v31, %v12948_v11  ;;  %v11280_v14 = vadd.f32 %v21098_v21, %v11237_v6  ;;  %v11242_v30 = vmul.f32 %v21265_v28, %v21073_v2 }
 0x79a   : > { %v13344_v24 = vrot.slane %v13330_v48, %v20863_v41  ;;  %v11605_v39 = vrot.slane %v11591_v16, %v20863_v41  ;;  %v11606_v56 = vcombine.high %v11598_v26, %v11598_v26  ;;  %v12829_v40 = vadd.f32 %v20991_v57, %v11598_v26 }
 0x79b   : > { %13743 = vst.msk [vmem:[%s21212_s29 + $0x40] sm:$0xff] %vm22903_vm1, %v13311_v42  ;;  %v11240_v4 = vmul.f32 %v21073_v2, %v21272_v27  ;;  %v11558_v37 = vcombine.high %v11280_v14, %v11280_v14  ;;  %v11565_v61 = vrot.slane %v11280_v14, %v20863_v41  ;;  %v12949_v46 = vmax.f32 %v12821_v44, 0.0  ;;  %vm22954_vm1 = vmmov %vm22795_vm0 }
 0x79c   : > { %v13345_v3 = vcombine.low %v13337_v8, %v13344_v24  ;;  %v13354_v32 = vrot.slane %v13346_v7, %v20863_v41  ;;  %v11607_v19 = vcombine.high %v11605_v39, %v11605_v39  ;;  %v22904_v28 = vcombine.high %v20991_v57, %v20991_v57 }
 0x79d   : > { %v11285_v49 = vadd.f32 %v21098_v21, %v11242_v30  ;;  %v12957_v55 = vmax.f32 %v12829_v40, 0.0  ;;  %v11572_v52 = vrot.slane %v11558_v37, %v20863_v41  ;;  %v22906_v27 = vcombine.high %v20996_v5, %v20996_v5 }
 0x79e   : > { %v12830_v62 = vadd.f32 %v22904_v28, %v11606_v56  ;;  %13745 = vst.msk [vmem:[%s21212_s29 + $0x50] sm:$0xff] %vm22905_vm12, %v13345_v3  ;;  %v11283_v50 = vadd.f32 %v21098_v21, %v11240_v4  ;;  %v11243_v57 = vmul.f32 %v21280_v0, %v21073_v2  ;;  %v12831_v31 = vadd.f32 %v21015_v18, %v11607_v19  ;;  %vm22955_vm12 = vmmov %vm22795_vm0 }
 0x79f   : > { %v12822_v8 = vadd.f32 %v22906_v27, %v11565_v61  ;;  %v11641_v25 = vcombine.high %v11285_v49, %v11285_v49  ;;  %v11648_v44 = vrot.slane %v11285_v49, %v20863_v41  ;;  %v11573_v48 = vcombine.high %v11572_v52, %v11572_v52 }
 0x7a0   : > { %v12958_v11 = vmax.f32 %v12830_v62, 0.0  ;;  %v12823_v6 = vadd.f32 %v20999_v33, %v11572_v52  ;;  %v11608_v24 = vcombine.high %v11283_v50, %v11283_v50  ;;  %v22907_v7 = vcombine.high %v20999_v33, %v20999_v33 }
 0x7a1   : > { %v12950_v42 = vmax.f32 %v12822_v8, 0.0  ;;  %v11655_v26 = vrot.slane %v11641_v25, %v20863_v41  ;;  %v11656_v5 = vcombine.high %v11648_v44, %v11648_v44  ;;  %v12839_v56 = vadd.f32 %v21007_v36, %v11648_v44 }
 0x7a2   : > { %v13381_v16 = vcombine.low %v12957_v55, %v12958_v11  ;;  %v12824_v14 = vadd.f32 %v22907_v7, %v11573_v48  ;;  %v12951_v30 = vmax.f32 %v12823_v6, 0.0  ;;  %v22908_v4 = vcombine.high %v21007_v36, %v21007_v36 }
 0x7a3   : > { %v13347_v39 = vcombine.low %v12949_v46, %v12950_v42  ;;  %v11657_v40 = vcombine.high %v11655_v26, %v11655_v26  ;;  %v12841_v37 = vadd.f32 %v21030_v47, %v11655_v26  ;;  %v12967_v28 = vmax.f32 %v12839_v56, 0.0 }
 0x7a4   : > { %v13395_v0 = vrot.slane %v13381_v16, %v20863_v41  ;;  %v12840_v3 = vadd.f32 %v22908_v4, %v11656_v5  ;;  %v12952_v61 = vmax.f32 %v12824_v14, 0.0  ;;  %v11615_v33 = vrot.slane %v11283_v50, %v20863_v41 }
 0x7a5   : > { %v13361_v19 = vrot.slane %v13347_v39, %v20863_v41  ;;  %v22909_v62 = vcombine.high %v21030_v47, %v21030_v47  ;;  %v12969_v52 = vmax.f32 %v12841_v37, 0.0  ;;  %v11622_v36 = vrot.slane %v11608_v24, %v20863_v41 }
 0x7a6   : > { %v13396_v46 = vcombine.low %v13388_v22, %v13395_v0  ;;  %v12968_v55 = vmax.f32 %v12840_v3, 0.0  ;;  %v13363_v8 = vcombine.low %v12951_v30, %v12952_v61  ;;  %v11623_v11 = vcombine.high %v11615_v33, %v11615_v33 }
 0x7a7   : > { %v12842_v49 = vadd.f32 %v22909_v62, %v11657_v40  ;;  %v13362_v27 = vcombine.low %v13354_v32, %v13361_v19  ;;  %v22910_v48 = vcombine.high %v21015_v18, %v21015_v18  ;;  %v11286_v22 = vadd.f32 %v21098_v21, %v11243_v57 }
 0x7a8   : > { %13748 = vst.msk [vmem:[%s21212_s29 + $0x68] sm:$0xff] %vm22795_vm0, %v13396_v46  ;;  %v13431_v44 = vcombine.low %v12967_v28, %v12968_v55  ;;  %v13371_v47 = vrot.slane %v13363_v8, %v20863_v41  ;;  %v11624_v32 = vcombine.high %v11622_v36, %v11622_v36  ;;  %v12833_v6 = vadd.f32 %v21036_v59, %v11623_v11  ;;  %v22914_v28 = vld [vmem:[#allocation12_spill] sm:$0xff]  ;;  %v22915_v46 = vld [vmem:[#allocation21_spill] sm:$0xff] }
 0x7a9   : > { %v12970_v25 = vmax.f32 %v12842_v49, 0.0  ;;  %v12832_v50 = vadd.f32 %v22910_v48, %v11615_v33  ;;  %13746 = vst.msk [vmem:[%s21212_s29 + $0x58] sm:$0xff] %vm22911_vm4, %v13362_v27  ;;  %v22912_v42 = vcombine.high %v21036_v59, %v21036_v59  ;;  %v12959_v26 = vmax.f32 %v12831_v31, 0.0  ;;  %vm22956_vm4 = vmmov %vm22795_vm0 }
 0x7aa   : > { %v11658_v7 = vcombine.high %v11286_v22, %v11286_v22  ;;  %v13379_v18 = vcombine.low %v13371_v47, %v13378_v63  ;;  %v13439_v57 = vrot.slane %v13431_v44, %v20863_v41  ;;  %v12961_v14 = vmax.f32 %v12833_v6, 0.0 }
 0x7ab   : > { %v12834_v16 = vadd.f32 %v22912_v42, %v11622_v36  ;;  %v13432_v5 = vcombine.low %v12969_v52, %v12970_v25  ;;  %v12960_v24 = vmax.f32 %v12832_v50, 0.0  ;;  %v11665_v0 = vrot.slane %v11286_v22, %v20863_v41 }
 0x7ac   : > { %v11672_v59 = vrot.slane %v11658_v7, %v20863_v41  ;;  %13747 = vst.msk [vmem:[%s21212_s29 + $0x60] sm:$0xff] %vm22913_vm13, %v13379_v18  ;;  %v12835_v31 = vadd.f32 %v21043_v23, %v11624_v32  ;;  %v11241_v60 = vmul.f32 %v21073_v2, %v21286_v35  ;;  %v11246_v63 = vmul.f32 %v21307_v51, %v21073_v2  ;;  %v22921_v18 = vld [vmem:[#allocation13_spill] sm:$0xff]  ;;  %vm22957_vm13 = vmmov %vm22795_vm0 }
 0x7ad   : > { %v12962_v30 = vmax.f32 %v12834_v16, 0.0  ;;  %v13446_v39 = vrot.slane %v13432_v5, %v20863_v41  ;;  %v13397_v56 = vcombine.low %v12959_v26, %v12960_v24  ;;  %v11673_v37 = vcombine.high %v11665_v0, %v11665_v0 }
 0x7ae   : > { %v11674_v61 = vcombine.high %v11672_v59, %v11672_v59  ;;  %v12843_v33 = vadd.f32 %v22914_v28, %v11665_v0  ;;  %v12845_v62 = vadd.f32 %v22915_v46, %v11672_v59  ;;  %v11284_v49 = vadd.f32 %v21098_v21, %v11241_v60 }
 0x7af   : > { %v13398_v40 = vcombine.low %v12961_v14, %v12962_v30  ;;  %v13447_v4 = vcombine.low %v13439_v57, %v13446_v39  ;;  %v13405_v3 = vrot.slane %v13397_v56, %v20863_v41  ;;  %v22917_v35 = vcombine.high %v22914_v28, %v22914_v28 }
 0x7b0   : > { %v22918_v55 = vcombine.high %v22915_v46, %v22915_v46  ;;  %v11289_v27 = vadd.f32 %v21098_v21, %v11246_v63  ;;  %v11244_v8 = vmul.f32 %v21073_v2, %v21315_v13  ;;  %v12971_v11 = vmax.f32 %v12843_v33, 0.0  ;;  %v22923_v63 = vld [vmem:[#allocation14_spill] sm:$0xff] }
 0x7b1   : > { %v13412_v19 = vrot.slane %v13398_v40, %v20863_v41  ;;  %13751 = vst.msk [vmem:[%s21212_s29 + $0x80] sm:$0xff] %vm22916_vm3, %v13447_v4  ;;  %v12844_v51 = vadd.f32 %v22917_v35, %v11673_v37  ;;  %v12973_v25 = vmax.f32 %v12845_v62, 0.0  ;;  %v11625_v44 = vcombine.high %v11284_v49, %v11284_v49  ;;  %v22925_v37 = vld [vmem:[#allocation20_spill] sm:$0xff]  ;;  %vm22958_vm3 = vmmov %vm22795_vm0 }
 0x7b2   : > { %v12846_v52 = vadd.f32 %v22918_v55, %v11674_v61  ;;  %v11632_v22 = vrot.slane %v11284_v49, %v20863_v41  ;;  %v11709_v47 = vcombine.high %v11289_v27, %v11289_v27  ;;  %v12963_v6 = vmax.f32 %v12835_v31, 0.0 }
 0x7b3   : > { %v13413_v36 = vcombine.low %v13405_v3, %v13412_v19  ;;  %v12972_v48 = vmax.f32 %v12844_v51, 0.0  ;;  %v11639_v32 = vrot.slane %v11625_v44, %v20863_v41  ;;  %v11716_v42 = vrot.slane %v11289_v27, %v20863_v41 }
 0x7b4   : > { %v12974_v50 = vmax.f32 %v12846_v52, 0.0  ;;  %v11287_v16 = vadd.f32 %v21098_v21, %v11244_v8  ;;  %v11640_v5 = vcombine.high %v11632_v22, %v11632_v22  ;;  %v22920_v24 = vcombine.high %v21043_v23, %v21043_v23 }
 0x7b5   : > { %13749 = vst.msk [vmem:[%s21212_s29 + $0x70] sm:$0xff] %vm22919_vm8, %v13413_v36  ;;  %v13448_v26 = vcombine.low %v12971_v11, %v12972_v48  ;;  %v22922_v57 = vcombine.high %v22921_v18, %v22921_v18  ;;  %v11723_v30 = vrot.slane %v11709_v47, %v20863_v41  ;;  %v11247_v56 = vmul.f32 %v21320_v15, %v21073_v2  ;;  %vm22959_vm8 = vmmov %vm22795_vm0 }
 0x7b6   : > { %v13449_v13 = vcombine.low %v12973_v25, %v12974_v50  ;;  %v12836_v7 = vadd.f32 %v22920_v24, %v11632_v22  ;;  %v11675_v39 = vcombine.high %v11287_v16, %v11287_v16  ;;  %v12837_v31 = vadd.f32 %v22921_v18, %v11640_v5  ;;  %v22928_v25 = vld [vmem:[#allocation16_spill] sm:$0xff]  ;;  %v22931_v18 = vld [vmem:[#allocation18_spill] sm:$0xff] }
 0x7b7   : > { %v12838_v14 = vadd.f32 %v22922_v57, %v11639_v32  ;;  %v13456_v0 = vrot.slane %v13448_v26, %v20863_v41  ;;  %v11724_v60 = vcombine.high %v11723_v30, %v11723_v30  ;;  %v22924_v4 = vcombine.high %v22923_v63, %v22923_v63 }
 0x7b8   : > { %v13463_v59 = vrot.slane %v13449_v13, %v20863_v41  ;;  %v12964_v40 = vmax.f32 %v12836_v7, 0.0  ;;  %v12855_v61 = vadd.f32 %v22925_v37, %v11723_v30  ;;  %v12965_v28 = vmax.f32 %v12837_v31, 0.0  ;;  %v22932_v30 = vld [vmem:[#allocation15_spill] sm:$0xff] }
 0x7b9   : > { %v12966_v23 = vmax.f32 %v12838_v14, 0.0  ;;  %v21563_v3 = vadd.f32 %v22924_v4, %v11716_v42  ;;  %v11682_v33 = vrot.slane %v11287_v16, %v20863_v41  ;;  %v22926_v46 = vcombine.high %v22925_v37, %v22925_v37  ;;  %v22930_v16 = vld [vmem:[#allocation11_spill] sm:$0xff] }
 0x7ba   : > { %v13464_v19 = vcombine.low %v13456_v0, %v13463_v59  ;;  %v13414_v15 = vcombine.low %v12963_v6, %v12964_v40  ;;  %v12983_v49 = vmax.f32 %v12855_v61, 0.0  ;;  %v11689_v35 = vrot.slane %v11675_v39, %v20863_v41  ;;  %v22933_v0 = vld [vmem:[#allocation26_spill] sm:$0xff] }
 0x7bb   : > { %v12856_v62 = vadd.f32 %v22926_v46, %v11724_v60  ;;  %v11290_v51 = vadd.f32 %v21098_v21, %v11247_v56  ;;  %v13415_v55 = vcombine.low %v12965_v28, %v12966_v23  ;;  %v11690_v27 = vcombine.high %v11682_v33, %v11682_v33 }
 0x7bc   : > { %13752 = vst.msk [vmem:[%s21212_s29 + $0x88] sm:$0xff] %vm22927_vm9, %v13464_v19  ;;  %v13422_v52 = vrot.slane %v13414_v15, %v20863_v41  ;;  %v11245_v8 = vmul.f32 %v21073_v2, %v21326_v58  ;;  %v11691_v11 = vcombine.high %v11689_v35, %v11689_v35  ;;  %v22929_v44 = vcombine.high %v22928_v25, %v22928_v25 }
 0x7bd   : > { %v12984_v36 = vmax.f32 %v12856_v62, 0.0  ;;  %v11725_v50 = vcombine.high %v11290_v51, %v11290_v51  ;;  %v13429_v22 = vrot.slane %v13415_v55, %v20863_v41  ;;  %v12847_v47 = vadd.f32 %v22928_v25, %v11690_v27  ;;  %v22938_v55 = vld [vmem:[#allocation17_spill] sm:$0xff] }
 0x7be   : > { %v12848_v48 = vadd.f32 %v22929_v44, %v11689_v35  ;;  %v11732_v32 = vrot.slane %v11290_v51, %v20863_v41  ;;  %v11288_v6 = vadd.f32 %v21098_v21, %v11245_v8  ;;  %v12849_v26 = vadd.f32 %v22930_v16, %v11691_v11 }
 0x7bf   : > { %v13499_v42 = vcombine.low %v12983_v49, %v12984_v36  ;;  %v11739_v13 = vrot.slane %v11725_v50, %v20863_v41  ;;  %v13430_v5 = vcombine.low %v13422_v52, %v13429_v22  ;;  %v12975_v24 = vmax.f32 %v12847_v47, 0.0 }
 0x7c0   : > { %v12976_v58 = vmax.f32 %v12848_v48, 0.0  ;;  %v11740_v7 = vcombine.high %v11732_v32, %v11732_v32  ;;  %v12857_v57 = vadd.f32 %v22931_v18, %v11732_v32  ;;  %v11692_v56 = vcombine.high %v11288_v6, %v11288_v6 }
 0x7c1   : > { %v11741_v14 = vcombine.high %v11739_v13, %v11739_v13  ;;  %v12859_v39 = vadd.f32 %v22932_v30, %v11739_v13  ;;  %v12526_v59 = vcombine.high %v22933_v0, %v22933_v0  ;;  %13750 = vst.msk [vmem:[%s21212_s29 + $0x78] sm:$0xff] %vm22934_vm14, %v13430_v5  ;;  %v12982_v31 = vmax.f32 %v21563_v3, 0.0 }
 0x7c2   : > { %v13507_v40 = vrot.slane %v13499_v42, %v20863_v41  ;;  %v22935_v23 = vcombine.high %v22931_v18, %v22931_v18  ;;  %v11699_v4 = vrot.slane %v11288_v6, %v20863_v41  ;;  %v13465_v37 = vcombine.low %v12975_v24, %v12976_v58 }
 0x7c3   : > { %v22936_v61 = vcombine.high %v22932_v30, %v22932_v30  ;;  %v12985_v28 = vmax.f32 %v12857_v57, 0.0  ;;  %v11706_v15 = vrot.slane %v11692_v56, %v20863_v41  ;;  %v22937_v3 = vcombine.high %v22930_v16, %v22930_v16 }
 0x7c4   : > { %v12858_v60 = vadd.f32 %v22935_v23, %v11740_v7  ;;  %v11707_v46 = vcombine.high %v11699_v4, %v11699_v4  ;;  %v12977_v49 = vmax.f32 %v12849_v26, 0.0  ;;  %v12987_v35 = vmax.f32 %v12859_v39, 0.0 }
 0x7c5   : > { %v12860_v19 = vadd.f32 %v22936_v61, %v11741_v14  ;;  %v12850_v62 = vadd.f32 %v22937_v3, %v11699_v4  ;;  %v11708_v51 = vcombine.high %v11706_v15, %v11706_v15  ;;  %v22939_v52 = vcombine.high %v22938_v55, %v22938_v55  ;;  %v22941_v14 = vld [vmem:[#allocation10_spill] sm:$0xff] }
 0x7c6   : > { %v12986_v33 = vmax.f32 %v12858_v60, 0.0  ;;  %v11250_v8 = vmul.f32 %v21341_v10, %v21073_v2  ;;  %v12851_v11 = vadd.f32 %v22938_v55, %v11707_v46  ;;  %v11248_v44 = vmul.f32 %v21073_v2, %v21347_v54 }
 0x7c7   : > { %v12852_v27 = vadd.f32 %v22939_v52, %v11706_v15  ;;  %v12978_v25 = vmax.f32 %v12850_v62, 0.0  ;;  %v12988_v48 = vmax.f32 %v12860_v19, 0.0  ;;  %v12853_v50 = vadd.f32 %v22923_v63, %v11708_v51 }
 0x7c8   : > { %v13500_v36 = vcombine.low %v12985_v28, %v12986_v33  ;;  %v11293_v47 = vadd.f32 %v21098_v21, %v11250_v8  ;;  %v12979_v6 = vmax.f32 %v12851_v11, 0.0  ;;  %v11291_v10 = vadd.f32 %v21098_v21, %v11248_v44  ;;  %v22946_v28 = vld [vmem:[#allocation23_spill] sm:$0xff]  ;;  %v21642_v33 = vld [vmem:[%s21865_s5] ss:$0 sm:$0xff] }
 0x7c9   : > { %v12980_v22 = vmax.f32 %v12852_v27, 0.0  ;;  %v13466_v42 = vcombine.low %v12977_v49, %v12978_v25  ;;  %v13473_v16 = vrot.slane %v13465_v37, %v20863_v41  ;;  %v12981_v26 = vmax.f32 %v12853_v50, 0.0 }
 0x7ca   : > { %v13514_v32 = vrot.slane %v13500_v36, %v20863_v41  ;;  %v11776_v58 = vcombine.high %v11293_v47, %v11293_v47  ;;  %v11783_v13 = vrot.slane %v11293_v47, %v20863_v41  ;;  %v11742_v5 = vcombine.high %v11291_v10, %v11291_v10 }
 0x7cb   : > { %v13480_v54 = vrot.slane %v13466_v42, %v20863_v41  ;;  %v13482_v63 = vcombine.low %v12979_v6, %v12980_v22  ;;  %v13516_v24 = vcombine.low %v12987_v35, %v12988_v48  ;;  %v13483_v7 = vcombine.low %v12981_v26, %v12982_v31  ;;  %v22943_v31 = vld [vmem:[#allocation19_spill] sm:$0xff] }
 0x7cc   : > { %v13515_v2 = vcombine.low %v13507_v40, %v13514_v32  ;;  %v11790_v18 = vrot.slane %v11776_v58, %v20863_v41  ;;  %v11791_v57 = vcombine.high %v11783_v13, %v11783_v13  ;;  %v22942_v30 = vcombine.high %v22941_v14, %v22941_v14  ;;  %v22949_v48 = vld [vmem:[#allocation27_spill] sm:$0xff] }
 0x7cd   : > { %v13481_v21 = vcombine.low %v13473_v16, %v13480_v54  ;;  %v11749_v56 = vrot.slane %v11291_v10, %v20863_v41  ;;  %v11756_v40 = vrot.slane %v11742_v5, %v20863_v41  ;;  %v13490_v23 = vrot.slane %v13482_v63, %v20863_v41 }
 0x7ce   : > { %13755 = vst.msk [vmem:[%s21212_s29 + $0xa0] sm:$0xff] %vm22940_vm2, %v13515_v2  ;;  %v21626_v39 = vadd.f32 %v22942_v30, %v11783_v13  ;;  %v13497_v60 = vrot.slane %v13483_v7, %v20863_v41  ;;  %v12869_v4 = vadd.f32 %v22943_v31, %v11791_v57  ;;  %v22944_v37 = vcombine.high %v22943_v31, %v22943_v31 }
 0x7cf   : > { %13753 = vst.msk [vmem:[%s21212_s29 + $0x90] sm:$0xff] %vm22945_vm7, %v13481_v21  ;;  %v11757_v19 = vcombine.high %v11749_v56, %v11749_v56  ;;  %v12861_v15 = vadd.f32 %v22946_v28, %v11749_v56  ;;  %v11251_v46 = vmul.f32 %v21642_v33, %v21358_v53  ;;  %v12527_v3 = vcombine.high %v21364_v43, %v21364_v43  ;;  %v21658_v53 = vld [vmem:[%s21866_s6] ss:$0 sm:$0xff] }
 0x7d0   : > { %v12870_v61 = vadd.f32 %v22944_v37, %v11790_v18  ;;  %v13524_v62 = vrot.slane %v13516_v24, %v20863_v41  ;;  %v13498_v49 = vcombine.low %v13490_v23, %v13497_v60  ;;  %v11758_v35 = vcombine.high %v11756_v40, %v11756_v40 }
 0x7d1   : > { %v11249_v51 = vmul.f32 %v21642_v33, %v21366_v34  ;;  %v12996_v55 = vmax.f32 %v21626_v39, 0.0  ;;  %v12997_v52 = vmax.f32 %v12869_v4, 0.0  ;;  %v22947_v27 = vcombine.high %v22946_v28, %v22946_v28  ;;  %v16725_v34 = vld [vmem:[%s16915_s23 + $0xb0] sm:$0xff] }
 0x7d2   : > { %v11294_v36 = vadd.f32 %v21658_v53, %v11251_v46  ;;  %13754 = vst.msk [vmem:[%s21212_s29 + $0x98] sm:$0xff] %vm22948_vm10, %v13498_v49  ;;  %v12998_v11 = vmax.f32 %v12870_v61, 0.0  ;;  %v12477_v44 = vcombine.high %v16725_v34, %v16725_v34  ;;  %v12492_v50 = vcombine.high %v22949_v48, %v22949_v48 }
 0x7d3   : > { %v12862_v8 = vadd.f32 %v22947_v27, %v11757_v19  ;;  %v11292_v25 = vadd.f32 %v21658_v53, %v11249_v51  ;;  %v12989_v22 = vmax.f32 %v12861_v15, 0.0  ;;  %v12863_v42 = vadd.f32 %v22949_v48, %v11758_v35 }
 0x7d4   : > { %v11792_v32 = vcombine.high %v11294_v36, %v11294_v36  ;;  %v11799_v6 = vrot.slane %v11294_v36, %v20863_v41  ;;  %v12491_v26 = vrot.slane %v12477_v44, %v20863_v41  ;;  %v11254_v46 = vmul.f32 %v21642_v33, %v21392_v9  ;;  %v16727_v36 = vld [vmem:[%s16915_s23 + $0xd8] sm:$0xff] }
 0x7d5   : > { %v12990_v47 = vmax.f32 %v12862_v8, 0.0  ;;  %v11759_v10 = vcombine.high %v11292_v25, %v11292_v25  ;;  %v11766_v16 = vrot.slane %v11292_v25, %v20863_v41  ;;  %v12991_v39 = vmax.f32 %v12863_v42, 0.0 }
 0x7d6   : > { %v11806_v13 = vrot.slane %v11792_v32, %v20863_v41  ;;  %v11807_v2 = vcombine.high %v11799_v6, %v11799_v6  ;;  %v12871_v54 = vadd.f32 %v22933_v0, %v11799_v6  ;;  %v12493_v24 = vcombine.high %v12491_v26, %v12491_v26 }
 0x7d7   : > { %v13517_v58 = vcombine.low %v12989_v22, %v12990_v47  ;;  %v11773_v63 = vrot.slane %v11759_v10, %v20863_v41  ;;  %v11774_v5 = vcombine.high %v11766_v16, %v11766_v16  ;;  %v12864_v7 = vadd.f32 %v12492_v50, %v11766_v16 }
 0x7d8   : > { %v11808_v57 = vcombine.high %v11806_v13, %v11806_v13  ;;  %v12872_v21 = vadd.f32 %v12526_v59, %v11807_v2  ;;  %v12873_v30 = vadd.f32 %v21364_v43, %v11806_v13  ;;  %v12999_v4 = vmax.f32 %v12871_v54, 0.0  ;;  %v16728_v2 = vld [vmem:[%s16915_s23 + $0xc8] sm:$0xff] }
 0x7d9   : > { %v13531_v18 = vrot.slane %v13517_v58, %v20863_v41  ;;  %v11775_v56 = vcombine.high %v11773_v63, %v11773_v63  ;;  %v12865_v40 = vadd.f32 %v12491_v26, %v11774_v5  ;;  %v12866_v23 = vadd.f32 %v12493_v24, %v11773_v63 }
 0x7da   : > { %v12874_v31 = vadd.f32 %v12527_v3, %v11808_v57  ;;  %v13000_v37 = vmax.f32 %v12872_v21, 0.0  ;;  %v12992_v19 = vmax.f32 %v12864_v7, 0.0  ;;  %v13001_v0 = vmax.f32 %v12873_v30, 0.0 }
 0x7db   : > { %v13532_v60 = vcombine.low %v13524_v62, %v13531_v18  ;;  %v12867_v61 = vadd.f32 %v22941_v14, %v11775_v56  ;;  %v12993_v28 = vmax.f32 %v12865_v40, 0.0  ;;  %v12994_v15 = vmax.f32 %v12866_v23, 0.0  ;;  %v21686_v14 = vld [vmem:[%s16915_s23 + $0xd0] sm:$0xff] }
 0x7dc   : > { %v13002_v59 = vmax.f32 %v12874_v31, 0.0  ;;  %v13567_v43 = vcombine.low %v12999_v4, %v13000_v37  ;;  %v13551_v49 = vcombine.low %v12997_v52, %v12998_v11  ;;  %v13533_v3 = vcombine.low %v12991_v39, %v12992_v19  ;;  %v21727_v19 = vld [vmem:[%s16915_s23 + $0xe0] sm:$0xff] }
 0x7dd   : > { %13756 = vst.msk [vmem:[%s21212_s29 + $0xa8] sm:$0xff] %vm22950_vm11, %v13532_v60  ;;  %v12995_v62 = vmax.f32 %v12867_v61, 0.0  ;;  %v13534_v35 = vcombine.low %v12993_v28, %v12994_v15  ;;  %v11297_v27 = vadd.f32 %v21658_v53, %v11254_v46  ;;  %v12545_v8 = vcombine.high %v21686_v14, %v21686_v14 }
 0x7de   : > { %v13568_v51 = vcombine.low %v13001_v0, %v13002_v59  ;;  %v12562_v25 = vcombine.high %v16727_v36, %v16727_v36  ;;  %v13541_v34 = vrot.slane %v13533_v3, %v20863_v41  ;;  %v12569_v52 = vrot.slane %v16727_v36, %v20863_v41 }
 0x7df   : > { %v13548_v44 = vrot.slane %v13534_v35, %v20863_v41  ;;  %v13550_v9 = vcombine.low %v12995_v62, %v12996_v55  ;;  %v13575_v11 = vrot.slane %v13567_v43, %v20863_v41  ;;  %v11843_v50 = vcombine.high %v11297_v27, %v11297_v27 }
 0x7e0   : > { %v13582_v48 = vrot.slane %v13568_v51, %v20863_v41  ;;  %v21697_v22 = vrot.slane %v11297_v27, %v20863_v41  ;;  %v13565_v47 = vrot.slane %v13551_v49, %v20863_v41  ;;  %v12577_v42 = vcombine.high %v12569_v52, %v12569_v52 }
 0x7e1   : > { %v13549_v32 = vcombine.low %v13541_v34, %v13548_v44  ;;  %v13558_v6 = vrot.slane %v13550_v9, %v20863_v41  ;;  %v11857_v10 = vrot.slane %v11843_v50, %v20863_v41  ;;  %v21705_v26 = vrot.slane %v12545_v8, %v20863_v41 }
 0x7e2   : > { %v13583_v55 = vcombine.low %v13575_v11, %v13582_v48  ;;  %v11858_v16 = vcombine.high %v21697_v22, %v21697_v22  ;;  %v11252_v13 = vmul.f32 %v21642_v33, %v21400_v17  ;;  %v12528_v54 = vcombine.high %v16728_v2, %v16728_v2 }
 0x7e3   : > { %v13566_v58 = vcombine.low %v13558_v6, %v13565_v47  ;;  %13757 = vst.msk [vmem:[%s21212_s29 + $0xb0] sm:$0xff] %vm22951_vm15, %v13549_v32  ;;  %v12535_v63 = vrot.slane %v16728_v2, %v20863_v41  ;;  %v11859_v5 = vcombine.high %v11857_v10, %v11857_v10  ;;  %v12576_v24 = vrot.slane %v12562_v25, %v20863_v41 }
 0x7e4   : > { %13759 = vst.msk [vmem:[%s21212_s29 + $0xc0] sm:$0xff] %vm22952_vm5, %v13583_v55  ;;  %v12883_v7 = vadd.f32 %v12569_v52, %v11858_v16  ;;  %v12884_v18 = vadd.f32 %v12577_v42, %v11857_v10  ;;  %v11295_v57 = vadd.f32 %v21658_v53, %v11252_v13  ;;  %v12542_v21 = vrot.slane %v12528_v54, %v20863_v41 }
 0x7e5   : > { %13758 = vst.msk [vmem:[%s21212_s29 + $0xb8] sm:$0xff] %vm22953_vm6, %v13566_v58  ;;  %v11255_v17 = vmul.f32 %v21642_v33, %v21406_v29  ;;  %v12561_v30 = vcombine.high %v21705_v26, %v21705_v26  ;;  %v12885_v39 = vadd.f32 %v12576_v24, %v11859_v5  ;;  %v12543_v31 = vcombine.high %v12535_v63, %v12535_v63 }
 0x7e6   : > { %v13011_v56 = vmax.f32 %v12883_v7, 0.0  ;;  %v13012_v40 = vmax.f32 %v12884_v18, 0.0  ;;  %v11809_v23 = vcombine.high %v11295_v57, %v11295_v57  ;;  %v11816_v60 = vrot.slane %v11295_v57, %v20863_v41 }
 0x7e7   : > { %v11298_v4 = vadd.f32 %v21658_v53, %v11255_v17  ;;  %v12544_v37 = vcombine.high %v12542_v21, %v12542_v21  ;;  %v12578_v61 = vcombine.high %v12576_v24, %v12576_v24  ;;  %v12586_v28 = vrot.slane %v21727_v19, %v20863_v41 }
 0x7e8   : > { %v11253_v29 = vmul.f32 %v21642_v33, %v21414_v20  ;;  %v11823_v15 = vrot.slane %v11809_v23, %v20863_v41  ;;  %v11824_v0 = vcombine.high %v11816_v60, %v11816_v60  ;;  %v12875_v59 = vadd.f32 %v12535_v63, %v11816_v60 }
 0x7e9   : > { %v11860_v43 = vcombine.high %v11298_v4, %v11298_v4  ;;  %v13618_v46 = vcombine.low %v13011_v56, %v13012_v40  ;;  %v11867_v49 = vrot.slane %v11298_v4, %v20863_v41  ;;  %v13013_v62 = vmax.f32 %v12885_v39, 0.0 }
 0x7ea   : > { %v11296_v3 = vadd.f32 %v21658_v53, %v11253_v29  ;;  %v11825_v35 = vcombine.high %v11823_v15, %v11823_v15  ;;  %v12876_v51 = vadd.f32 %v12543_v31, %v11824_v0  ;;  %v12877_v27 = vadd.f32 %v12542_v21, %v11823_v15 }
 0x7eb   : > { %v12594_v8 = vcombine.high %v12586_v28, %v12586_v28  ;;  %v11874_v36 = vrot.slane %v11860_v43, %v20863_v41  ;;  %v12886_v25 = vadd.f32 %v12578_v61, %v11867_v49  ;;  %v13003_v9 = vmax.f32 %v12875_v59, 0.0 }
 0x7ec   : > { %v11826_v34 = vcombine.high %v11296_v3, %v11296_v3  ;;  %v11833_v20 = vrot.slane %v11296_v3, %v20863_v41  ;;  %v12878_v44 = vadd.f32 %v12544_v37, %v11825_v35  ;;  %v13004_v52 = vmax.f32 %v12876_v51, 0.0  ;;  %v16730_v37 = vld [vmem:[%s16915_s23 + $0xf0] sm:$0xff]  ;;  %v16732_v51 = vld [vmem:[%s16915_s23 + $0xf8] sm:$0xff] }
 0x7ed   : > { %v12552_v11 = vrot.slane %v21686_v14, %v20863_v41  ;;  %v13005_v48 = vmax.f32 %v12877_v27, 0.0  ;;  %v11875_v50 = vcombine.high %v11874_v36, %v11874_v36  ;;  %v13014_v47 = vmax.f32 %v12886_v25, 0.0 }
 0x7ee   : > { %v11840_v32 = vrot.slane %v11826_v34, %v20863_v41  ;;  %v13006_v6 = vmax.f32 %v12878_v44, 0.0  ;;  %v13584_v42 = vcombine.low %v13003_v9, %v13004_v52  ;;  %v11841_v55 = vcombine.high %v11833_v20, %v11833_v20 }
 0x7ef   : > { %v12560_v10 = vcombine.high %v12552_v11, %v12552_v11  ;;  %v12882_v16 = vadd.f32 %v12561_v30, %v21697_v22  ;;  %v13619_v58 = vcombine.low %v13013_v62, %v13014_v47  ;;  %v13626_v2 = vrot.slane %v13618_v46, %v20863_v41  ;;  %v16731_v46 = vld [vmem:[%s16915_s23 + $0xe8] sm:$0xff]  ;;  %s14596_s23 = sshll.u32 %s16866_s28, 12  ;;  %s21819_s28 = scalar_lea.sflag [#allocation5], %s269_s21 }
 0x7f0   : > { %v11842_v13 = vcombine.high %v11840_v32, %v11840_v32  ;;  %v13585_v54 = vcombine.low %v13005_v48, %v13006_v6  ;;  %v12879_v63 = vadd.f32 %v12552_v11, %v11841_v55  ;;  %v12888_v14 = vadd.f32 %v12594_v8, %v11875_v50  ;;  %s21809_s18 = scalar_lea.hbm %s21867_s7, %s14596_s23 }
 0x7f1   : > { %v12880_v5 = vadd.f32 %v12560_v10, %v11840_v32  ;;  %v13633_v24 = vrot.slane %v13619_v58, %v20863_v41  ;;  %v11258_v18 = vmul.f32 %v21642_v33, %v21433_v38  ;;  %v13592_v57 = vrot.slane %v13584_v42, %v20863_v41 }
 0x7f2   : > { %v12881_v7 = vadd.f32 %v21705_v26, %v11842_v13  ;;  %v13599_v22 = vrot.slane %v13585_v54, %v20863_v41  ;;  %v13007_v21 = vmax.f32 %v12879_v63, 0.0  ;;  %v13010_v30 = vmax.f32 %v12882_v16, 0.0 }
 0x7f3   : > { %v13008_v17 = vmax.f32 %v12880_v5, 0.0  ;;  %v13634_v39 = vcombine.low %v13626_v2, %v13633_v24  ;;  %v11301_v40 = vadd.f32 %v21658_v53, %v11258_v18  ;;  %v12887_v60 = vadd.f32 %v12586_v28, %v11874_v36 }
 0x7f4   : > { %v13009_v56 = vmax.f32 %v12881_v7, 0.0  ;;  %v13600_v23 = vcombine.low %v13592_v57, %v13599_v22  ;;  %v13016_v4 = vmax.f32 %v12888_v14, 0.0  ;;  %v12613_v61 = vcombine.high %v16730_v37, %v16730_v37 }
 0x7f5   : > { %v13601_v26 = vcombine.low %v13007_v21, %v13008_v17  ;;  %13762 = vst.msk [vmem:[%s21212_s29 + $0xd8] sm:$0xff] %vm22954_vm1, %v13634_v39  ;;  %v11910_v38 = vcombine.high %v11301_v40, %v11301_v40  ;;  %v11256_v28 = vmul.f32 %v21642_v33, %v21439_v45  ;;  %v13015_v59 = vmax.f32 %v12887_v60, 0.0 }
 0x7f6   : > { %v13602_v31 = vcombine.low %v13009_v56, %v13010_v30  ;;  %13760 = vst.msk [vmem:[%s21212_s29 + $0xc8] sm:$0xff] %vm22955_vm12, %v13600_v23  ;;  %v12579_v43 = vcombine.high %v21727_v19, %v21727_v19  ;;  %v12603_v49 = vrot.slane %v16731_v46, %v20863_v41  ;;  %v11259_v62 = vmul.f32 %v21642_v33, %v21445_v1 }
 0x7f7   : > { %v13609_v29 = vrot.slane %v13601_v26, %v20863_v41  ;;  %v11924_v0 = vrot.slane %v11910_v38, %v20863_v41  ;;  %v12637_v27 = vrot.slane %v16732_v51, %v20863_v41  ;;  %v13635_v8 = vcombine.low %v13015_v59, %v13016_v4 }
 0x7f8   : > { %v13616_v15 = vrot.slane %v13602_v31, %v20863_v41  ;;  %v21769_v36 = vrot.slane %v16730_v37, %v20863_v41  ;;  %v11299_v45 = vadd.f32 %v21658_v53, %v11256_v28  ;;  %v12593_v25 = vrot.slane %v12579_v43, %v20863_v41 }
 0x7f9   : > { %v11926_v35 = vcombine.high %v11924_v0, %v11924_v0  ;;  %v11917_v19 = vrot.slane %v11301_v40, %v20863_v41  ;;  %v12627_v34 = vrot.slane %v12613_v61, %v20863_v41  ;;  %v12611_v1 = vcombine.high %v12603_v49, %v12603_v49 }
 0x7fa   : > { %v13617_v3 = vcombine.low %v13609_v29, %v13616_v15  ;;  %v11302_v20 = vadd.f32 %v21658_v53, %v11259_v62  ;;  %v11876_v44 = vcombine.high %v11299_v45, %v11299_v45  ;;  %v11883_v9 = vrot.slane %v11299_v45, %v20863_v41 }
 0x7fb   : > { %v12595_v52 = vcombine.high %v12593_v25, %v12593_v25  ;;  %v12630_v11 = vcombine.high %v16732_v51, %v16732_v51  ;;  %v12899_v48 = vadd.f32 %v12637_v27, %v11926_v35  ;;  %v12645_v32 = vcombine.high %v12637_v27, %v12637_v27 }
 0x7fc   : > { %13761 = vst.msk [vmem:[%s21212_s29 + $0xd0] sm:$0xff] %vm22795_vm0, %v13617_v3  ;;  %v11927_v50 = vcombine.high %v11302_v20, %v11302_v20  ;;  %v11934_v47 = vrot.slane %v11302_v20, %v20863_v41  ;;  %v11890_v6 = vrot.slane %v11876_v44, %v20863_v41  ;;  %v11891_v42 = vcombine.high %v11883_v9, %v11883_v9 }
 0x7fd   : > { %v12889_v55 = vadd.f32 %v12593_v25, %v11883_v9  ;;  %v12644_v10 = vrot.slane %v12630_v11, %v20863_v41  ;;  %v13643_v16 = vrot.slane %v13635_v8, %v20863_v41  ;;  %v11925_v54 = vcombine.high %v11917_v19, %v11917_v19 }
 0x7fe   : > { %v11941_v58 = vrot.slane %v11927_v50, %v20863_v41  ;;  %v11942_v13 = vcombine.high %v11934_v47, %v11934_v47  ;;  %v12900_v2 = vadd.f32 %v12645_v32, %v11934_v47  ;;  %v12629_v63 = vcombine.high %v12627_v34, %v12627_v34 }
 0x7ff   : > { %v11892_v5 = vcombine.high %v11890_v6, %v11890_v6  ;;  %v12890_v14 = vadd.f32 %v12595_v52, %v11891_v42  ;;  %v12646_v24 = vcombine.high %v12644_v10, %v12644_v10  ;;  %v13027_v18 = vmax.f32 %v12899_v48, 0.0 }
 0x800   : > { %v12901_v7 = vadd.f32 %v12644_v10, %v11942_v13  ;;  %v13028_v57 = vmax.f32 %v12900_v2, 0.0  ;;  %v13017_v21 = vmax.f32 %v12889_v55, 0.0  ;;  %v11257_v30 = vmul.f32 %v21642_v33, %v21450_v12 }
 0x801   : > { %v12892_v22 = vadd.f32 %v12611_v1, %v11892_v5  ;;  %v13018_v17 = vmax.f32 %v12890_v14, 0.0  ;;  %v12902_v39 = vadd.f32 %v12646_v24, %v11941_v58  ;;  %v12596_v23 = vcombine.high %v16731_v46, %v16731_v46 }
 0x802   : > { %v13029_v56 = vmax.f32 %v12901_v7, 0.0  ;;  %v13686_v40 = vcombine.low %v13027_v18, %v13028_v57  ;;  %v12628_v60 = vcombine.high %v21769_v36, %v21769_v36  ;;  %v12891_v26 = vadd.f32 %v12603_v49, %v11890_v6 }
 0x803   : > { %v13636_v31 = vcombine.low %v13017_v21, %v13018_v17  ;;  %v11300_v38 = vadd.f32 %v21658_v53, %v11257_v30  ;;  %v12897_v4 = vadd.f32 %v12627_v34, %v11925_v54  ;;  %v12898_v37 = vadd.f32 %v12629_v63, %v11924_v0 }
 0x804   : > { %v13030_v61 = vmax.f32 %v12902_v39, 0.0  ;;  %v12610_v29 = vrot.slane %v12596_v23, %v20863_v41  ;;  %v13020_v15 = vmax.f32 %v12892_v22, 0.0  ;;  %v13694_v43 = vrot.slane %v13686_v40, %v20863_v41 }
 0x805   : > { %v13650_v28 = vrot.slane %v13636_v31, %v20863_v41  ;;  %v11893_v12 = vcombine.high %v11300_v38, %v11300_v38  ;;  %v11900_v33 = vrot.slane %v11300_v38, %v20863_v41  ;;  %v13019_v49 = vmax.f32 %v12891_v26, 0.0 }
 0x806   : > { %v13687_v59 = vcombine.low %v13029_v56, %v13030_v61  ;;  %v12612_v46 = vcombine.high %v12610_v29, %v12610_v29  ;;  %v12896_v3 = vadd.f32 %v12628_v60, %v11917_v19  ;;  %v13025_v35 = vmax.f32 %v12897_v4, 0.0 }
 0x807   : > { %v13651_v62 = vcombine.low %v13643_v16, %v13650_v28  ;;  %v11907_v53 = vrot.slane %v11893_v12, %v20863_v41  ;;  %v11908_v0 = vcombine.high %v11900_v33, %v11900_v33  ;;  %v12893_v27 = vadd.f32 %v12610_v29, %v11900_v33 }
 0x808   : > { %v13701_v51 = vrot.slane %v13687_v59, %v20863_v41  ;;  %v13026_v8 = vmax.f32 %v12898_v37, 0.0  ;;  %v13652_v45 = vcombine.low %v13019_v49, %v13020_v15  ;;  %v13024_v52 = vmax.f32 %v12896_v3, 0.0 }
 0x809   : > { %13763 = vst.msk [vmem:[%s21212_s29 + $0xe0] sm:$0xff] %vm22956_vm4, %v13651_v62  ;;  %v11909_v25 = vcombine.high %v11907_v53, %v11907_v53  ;;  %v12894_v34 = vadd.f32 %v12612_v46, %v11908_v0  ;;  %v13021_v44 = vmax.f32 %v12893_v27, 0.0 }
 0x80a   : > { %v13702_v1 = vcombine.low %v13694_v43, %v13701_v51  ;;  %v13670_v19 = vcombine.low %v13025_v35, %v13026_v8  ;;  %v13660_v11 = vrot.slane %v13652_v45, %v20863_v41 }
 0x80b   : > { %v12895_v20 = vadd.f32 %v21769_v36, %v11909_v25  ;;  %v13022_v9 = vmax.f32 %v12894_v34, 0.0 }
 0x80c   : > { %13766 = vst.msk [vmem:[%s21212_s29 + $0xf8] sm:$0xff] %vm22957_vm13, %v13702_v1  ;;  %v13684_v36 = vrot.slane %v13670_v19, %v20863_v41 }
 0x80d   : > { %v13023_v48 = vmax.f32 %v12895_v20, 0.0  ;;  %v13653_v50 = vcombine.low %v13021_v44, %v13022_v9 }
 0x80f   : > { %v13667_v47 = vrot.slane %v13653_v50, %v20863_v41  ;;  %v13669_v32 = vcombine.low %v13023_v48, %v13024_v52 }
 0x811   : > { %v13668_v6 = vcombine.low %v13660_v11, %v13667_v47  ;;  %v13677_v42 = vrot.slane %v13669_v32, %v20863_v41 }
 0x813   : > { %v13685_v55 = vcombine.low %v13677_v42, %v13684_v36  ;;  %13764 = vst.msk [vmem:[%s21212_s29 + $0xe8] sm:$0xff] %vm22958_vm3, %v13668_v6 }
 0x815   : > { %13765 = vst.msk [vmem:[%s21212_s29 + $0xf0] sm:$0xff] %vm22959_vm8, %v13685_v55 }
 0x816   : > { %16747 = shalt.err (!%p16744_p3)
}
 0x817   : > { %s16748_s21 = scalar_lea.hbm %s21809_s18, 4096  ;;  %s16752_s13 = scalar_lea.hbm %s21867_s7, 8192 }
 0x818   : > { %p16749_p4 = scmp.ne.s32.totalorder %s21809_s18, %s16748_s21  ;;  %p16753_p9 = scmp.lt.u32.totalorder %s21809_s18, %s21867_s7 }
 0x819   : > { %p16754_p10 = scmp.lt.u32.totalorder %s16752_s13, %s16748_s21  ;;  %p16756_p12 = scmp.lt.u32.totalorder %s16748_s21, %s21809_s18 }
 0x81a   : > { %p16750_p7 = pnand %p16749_p4, %p16883_p5 }
 0x81b   : > { %p16755_p11 = por %p16754_p10, %p16753_p9 }
 0x81c   : > { %p16751_p8 = pneg %p16750_p7 }
 0x81d   : > { %p16757_p13 = por %p16756_p12, %p16755_p11 }
 0x81f   : > { %p16758_p0 = pnand %p16757_p13, %p16751_p8 }
 0x821   : > { %16761 = shalt.err (!%p16758_p0)
}
 0x822   : > { %s16803_s16 = smov 128   ;;  %s16804_s17 = smov 8  }
 0x823   : > { %16433 = dma.vmem_to_hbm [thread:$0]  (%p16883_p5), %s21811_s15, 4096, %s21809_s18, %s21819_s28, %s16803_s16, %s16803_s16, %s16804_s17  }
 0x824 PF: > { %p16439_p1 = scmp.ge.s32.totalorder %s16796_s27, 2  ;;  %s13796_s19 = sand.u32 1, %s16784_s24  }
 0x825   : > { %s13797_s20 = scalar_lea.sflag [#allocation5], %s13796_s19 }
 0x826   : > { %p16436_p2 = pnand %p16439_p1, %p16887_p6 }
 0x828   : > { %16779 = dma.done.wait (!%p16436_p2), %s13797_s20, 4096  }
 0x829   : > { %16781 = vsyncadd (!%p16436_p2), %s13797_s20, 4294963200  ;;  %p17_p3 = scmp.ge.s32.totalorder %s16870_s30, 4   ;;  %s22960_s24 = smov %s16788_s25 }
 0x82a   : > { %s22961_s25 = smov %s16792_s26  ;;  %s22962_s26 = smov %s16881_s10 }
 0x82b   : > { %s22963_s27 = smov %s16870_s30  ;;  %19 = sbr.rel (!%p17_p3) target bundleno = 3 (0x3), region = 99 }
 0x832   :  { %13802 = vsyncpa [#allocation5], 1 }
 0x833   :  { %13804 = vsyncpa [#allocation5 + $0x1], 1 }

</bundles_post_ra>
